<compile_context>
chip_gen: v7x
topology: tpu7x:2x2x1
jax: 0.10.0
libtpu: 0.0.40
codegen_flags: <defaults>
</compile_context>

<pallas_src>
import jax
import jax.numpy as jnp
import numpy as np
from jax.experimental import pallas as pl
from jax.experimental.pallas import tpu as pltpu


def _round_up(x, m):
    return (x + m - 1) // m * m


def _default_vmem_limit():
    try:
        kind = jax.devices()[0].device_kind.lower()
    except Exception:
        return 32 * 1024 * 1024
    if "v7" in kind:
        return 48 * 1024 * 1024    # 64 MiB physical -> leave headroom
    if "v6" in kind:
        return 64 * 1024 * 1024    # 128 MiB physical -> bigger bands OK
    return 32 * 1024 * 1024        # v5e default scoped is 16 MiB; keep explicit


def _pick_band_rows(H, W, Cp, vmem_budget, itemsize):
    """Largest divisor of H whose per-step working set fits comfortably."""
    Wp = _round_up(W + 2, 8)
    for th in sorted((d for d in range(1, H + 1) if H % d == 0), reverse=True):
        est = ((th + 4) * Wp * Cp * itemsize          # pad1 scratch
               + (th + 2) * Wp * Cp * itemsize        # pad2 scratch
               + 2 * th * W * Cp * 4                  # double-buffered f32 out block
               + 2 * 9 * Cp * Cp * itemsize           # conv weights
               + 2 * (th + 2) * W * Cp * (4 + itemsize))  # acc + tap temporaries
        if est <= vmem_budget // 2:
            return th
    return 1


def basic_block_kernel(x_hbm, w1_ref, w2_ref, b1_ref, b2_ref, o_ref,
                       pad1, pad2, sem):
    # x_hbm : (N, H+4, W+2, Cp) spatially pre-padded input in HBM (pl.ANY)
    # w*_ref: (9, Cp, Cp)  conv weights (BN scale folded), tap-major, compute dtype
    # b*_ref: (1, Cp)      folded BN biases (f32)
    # o_ref : (1, TH, W, Cp) output band
    # pad1  : (TH+4, Wp, Cp) VMEM scratch: x band + 2-row / 1-col halo
    # pad2  : (TH+2, Wp, Cp) VMEM scratch: out1 band + 1-row / 1-col halo
    TH = o_ref.shape[1]
    W = o_ref.shape[2]
    Cp = o_ref.shape[3]
    n = pl.program_id(0)
    b = pl.program_id(1)
    nb = pl.num_programs(1)

    # Fetch this band's input (with halo) straight into the compute-dtype scratch.
    copy_in = pltpu.make_async_copy(
        x_hbm.at[n, pl.ds(b * TH, TH + 4), :, :],
        pad1.at[:, :W + 2, :],
        sem)
    copy_in.start()
    copy_in.wait()

    def conv3x3(src, rows, w_ref):
        # 9 accumulating MXU matmuls (one per tap); f32 accumulation.
        acc = None
        for dy in range(3):
            for dx in range(3):
                tap = src[dy:dy + rows, dx:dx + W, :].reshape(rows * W, Cp)
                part = jnp.dot(tap, w_ref[dy * 3 + dx],
                               preferred_element_type=jnp.float32)
                acc = part if acc is None else acc + part
        return acc

    # conv1 (+ folded bn1) + bias + relu over the band plus a 1-row halo on each
    # side (the out1 halo rows are needed by conv2; recomputed per band).
    out1 = jnp.maximum(conv3x3(pad1, TH + 2, w1_ref) + b1_ref[...], 0.0)

    # Stage out1 (compute dtype) with conv2's SAME-padding column halo.
    pad2[:, 1:W + 1, :] = out1.reshape(TH + 2, W, Cp).astype(pad2.dtype)
    pad2[:, 0:1, :] = jnp.zeros((TH + 2, 1, Cp), pad2.dtype)
    pad2[:, W + 1:W + 2, :] = jnp.zeros((TH + 2, 1, Cp), pad2.dtype)

    @pl.when(b == 0)
    def _():   # out1 row above the image -> SAME padding for conv2
        pad2[0:1, :, :] = jnp.zeros((1, pad2.shape[1], Cp), pad2.dtype)

    @pl.when(b == nb - 1)
    def _():   # out1 row below the image
        pad2[TH + 1:TH + 2, :, :] = jnp.zeros((1, pad2.shape[1], Cp), pad2.dtype)

    # conv2 (+ folded bn2) + bias + residual + relu.  The residual is re-read
    # from the already-resident input scratch right before the add.
    out2 = conv3x3(pad2, TH, w2_ref) + b2_ref[...]
    res = pad1[2:TH + 2, 1:W + 1, :].astype(jnp.float32).reshape(TH * W, Cp)
    o_ref[...] = jnp.maximum(out2 + res, 0.0).reshape(1, TH, W, Cp).astype(o_ref.dtype)


def basic_block(x_nhwc, w1, w2, s1, b1, s2, b2, *, band_rows=None,
                compute_dtype=jnp.bfloat16, vmem_limit_bytes=None):
    """Fused BasicBlock forward (stride=1, no downsample, eval-mode BN).

    x_nhwc: (N,H,W,C); w*: (3,3,C,C) HWIO; s*/b*: (C,) folded BN scale/bias.
    """
    N, H, W, C = x_nhwc.shape
    Cp = _round_up(C, 128)          # lane-dense channels
    pc = Cp - C
    Wp = _round_up(W + 2, 8)        # sublane-aligned scratch rows

    if vmem_limit_bytes is None:
        vmem_limit_bytes = _default_vmem_limit()
    itemsize = np.dtype(compute_dtype).itemsize
    if band_rows is None:
        band_rows = _pick_band_rows(H, W, Cp, vmem_limit_bytes, itemsize)
    if H % band_rows != 0:
        raise ValueError(f"band_rows={band_rows} must divide H={H}")
    TH = band_rows
    nbands = H // TH

    # Fold BN scale into the conv weights; channel-pad; tap-major (9, Cp, Cp).
    w1p = jnp.pad(w1 * s1.reshape(1, 1, 1, -1), ((0, 0), (0, 0), (0, pc), (0, pc)))
    w2p = jnp.pad(w2 * s2.reshape(1, 1, 1, -1), ((0, 0), (0, 0), (0, pc), (0, pc)))
    w1p = w1p.reshape(9, Cp, Cp).astype(compute_dtype)
    w2p = w2p.reshape(9, Cp, Cp).astype(compute_dtype)
    b1p = jnp.pad(b1.reshape(1, -1), ((0, 0), (0, pc))).astype(jnp.float32)
    b2p = jnp.pad(b2.reshape(1, -1), ((0, 0), (0, pc))).astype(jnp.float32)

    # One fused pad+cast pass: 2-row / 1-col spatial halo + channel pad.
    xh = jnp.pad(x_nhwc, ((0, 0), (2, 2), (1, 1), (0, pc))).astype(compute_dtype)

    def _call(single_buffer_consts):
        const = {}
        if single_buffer_consts:
            const["pipeline_mode"] = pl.Buffered(1)   # grid-invariant operands
        w_spec = pl.BlockSpec((9, Cp, Cp), lambda n, b: (0, 0, 0), **const)
        s_spec = pl.BlockSpec((1, Cp), lambda n, b: (0, 0), **const)
        return pl.pallas_call(
            basic_block_kernel,
            out_shape=jax.ShapeDtypeStruct((N, H, W, Cp), x_nhwc.dtype),
            grid_spec=pltpu.PrefetchScalarGridSpec(
                num_scalar_prefetch=0,
                grid=(N, nbands),
                in_specs=[
                    pl.BlockSpec(memory_space=pl.ANY),   # raw HBM input, manual DMA
                    w_spec, w_spec, s_spec, s_spec,
                ],
                out_specs=pl.BlockSpec((1, TH, W, Cp), lambda n, b: (n, b, 0, 0)),
                scratch_shapes=[
                    pltpu.VMEM((TH + 4, Wp, Cp), compute_dtype),
                    pltpu.VMEM((TH + 2, Wp, Cp), compute_dtype),
                    pltpu.SemaphoreType.DMA,
                ]),
            compiler_params=pltpu.CompilerParams(
                dimension_semantics=("parallel", "parallel"),
                vmem_limit_bytes=vmem_limit_bytes),
        )(xh, w1p, w2p, b1p, b2p)

    try:
        out = _call(True)          # single-buffer the grid-invariant weights/biases
    except Exception:              # pl.Buffered(1) unsupported -> default buffering
        out = _call(False)

    return out[..., :C] if pc else out


def fold_bn(gamma, beta, mean, var, eps=1e-5):
    scale = gamma / jnp.sqrt(var + eps)
    return scale, beta - mean * scale


def reference(x_nhwc, w1, w2, g1, bb1, m1, v1, g2, bb2, m2, v2, eps=1e-5):
    """True eval-mode BasicBlock forward in plain JAX (NHWC / HWIO)."""
    dn = ('NHWC', 'HWIO', 'NHWC')
    y = jax.lax.conv_general_dilated(x_nhwc, w1, (1, 1), 'SAME', dimension_numbers=dn)
    y = (y - m1) / jnp.sqrt(v1 + eps) * g1 + bb1
    y = jnp.maximum(y, 0.0)
    y = jax.lax.conv_general_dilated(y, w2, (1, 1), 'SAME', dimension_numbers=dn)
    y = (y - m2) / jnp.sqrt(v2 + eps) * g2 + bb2
    return jnp.maximum(y + x_nhwc, 0.0)


if __name__ == "__main__":
    N, C, H, W = 2, 4, 16, 16          # inplanes = planes = 4, stride = 1
    key = jax.random.PRNGKey(0)
    kx, k1, k2, kg1, kb1, kg2, kb2, km1, kv1, km2, kv2 = jax.random.split(key, 11)

    # Input in PyTorch NCHW convention, then transpose to NHWC for the kernel.
    x_nchw = jax.random.normal(kx, (N, C, H, W), jnp.float32)
    x_nhwc = jnp.transpose(x_nchw, (0, 2, 3, 1))

    # Conv weights in PyTorch layout (Cout, Cin, kh, kw) -> (kh, kw, Cin, Cout).
    w1_pt = jax.random.normal(k1, (C, C, 3, 3), jnp.float32) * 0.1
    w2_pt = jax.random.normal(k2, (C, C, 3, 3), jnp.float32) * 0.1
    w1 = jnp.transpose(w1_pt, (2, 3, 1, 0))
    w2 = jnp.transpose(w2_pt, (2, 3, 1, 0))

    # Deterministic eval-mode BatchNorm parameters.
    g1 = 1.0 + 0.1 * jax.random.normal(kg1, (C,), jnp.float32)
    b1 = 0.1 * jax.random.normal(kb1, (C,), jnp.float32)
    m1 = 0.1 * jax.random.normal(km1, (C,), jnp.float32)
    v1 = 1.0 + 0.1 * jnp.abs(jax.random.normal(kv1, (C,), jnp.float32))
    g2 = 1.0 + 0.1 * jax.random.normal(kg2, (C,), jnp.float32)
    b2 = 0.1 * jax.random.normal(kb2, (C,), jnp.float32)
    m2 = 0.1 * jax.random.normal(km2, (C,), jnp.float32)
    v2 = 1.0 + 0.1 * jnp.abs(jax.random.normal(kv2, (C,), jnp.float32))

    s1, bb1 = fold_bn(g1, b1, m1, v1)
    s2, bb2 = fold_bn(g2, b2, m2, v2)

    ref = reference(x_nhwc, w1, w2, g1, b1, m1, v1, g2, b2, m2, v2)

    # 1) f32 compute, 2 bands: higher-precision check of banding/halo/residual.
    out = basic_block(x_nhwc, w1, w2, s1, bb1, s2, bb2,
                      band_rows=8, compute_dtype=jnp.float32)
    out = jax.block_until_ready(out)
    np.testing.assert_allclose(np.asarray(out), np.asarray(ref), rtol=1e-2, atol=1e-2)

    # 2) bf16 compute, 4 bands (boundary + interior bands exercised).
    out = basic_block(x_nhwc, w1, w2, s1, bb1, s2, bb2,
                      band_rows=4, compute_dtype=jnp.bfloat16)
    out = jax.block_until_ready(out)
    np.testing.assert_allclose(np.asarray(out), np.asarray(ref), rtol=2e-2, atol=2e-2)

    # 3) bf16 compute, default band picker (degenerates to a single band here).
    out = basic_block(x_nhwc, w1, w2, s1, bb1, s2, bb2)
    out = jax.block_until_ready(out)
    np.testing.assert_allclose(np.asarray(out), np.asarray(ref), rtol=2e-2, atol=2e-2)

    print("KERNEL_OK")
</pallas_src>

<mosaic_0001>
module attributes {stable_mosaic.version = 11 : i64} {
  func.func @basic_block_kernel(%arg0: i32, %arg1: i32, %arg2: memref<2x20x18x128xf32, #tpu.memory_space<any>>, %arg3: memref<9x128x128xf32, #tpu.memory_space<vmem>>, %arg4: memref<9x128x128xf32, #tpu.memory_space<vmem>>, %arg5: memref<1x128xf32, #tpu.memory_space<vmem>>, %arg6: memref<1x128xf32, #tpu.memory_space<vmem>>, %arg7: memref<1x8x16x128xf32, #tpu.memory_space<vmem>>, %arg8: memref<12x24x128xf32, #tpu.memory_space<vmem>>, %arg9: memref<10x24x128xf32, #tpu.memory_space<vmem>>, %arg10: memref<!tpu.dma_semaphore, #tpu.memory_space<semaphore_mem>>) attributes {dimension_semantics = [#tpu.dimension_semantics<parallel>, #tpu.dimension_semantics<parallel>], iteration_bounds = array<i64: 2, 2>, scalar_prefetch = 0 : i64, scratch_operands = 3 : i64, tpu.core_type = #tpu.core_type<tc>, window_params = [{}, {pipeline_mode = #tpu.pipeline_mode<synchronous>, transform_indices = @transform_1, window_bounds = array<i64: 9, 128, 128>}, {pipeline_mode = #tpu.pipeline_mode<synchronous>, transform_indices = @transform_2, window_bounds = array<i64: 9, 128, 128>}, {pipeline_mode = #tpu.pipeline_mode<synchronous>, transform_indices = @transform_3, window_bounds = array<i64: 1, 128>}, {pipeline_mode = #tpu.pipeline_mode<synchronous>, transform_indices = @transform_4, window_bounds = array<i64: 1, 128>}, {transform_indices = @transform_5, window_bounds = array<i64: 1, 8, 16, 128>}]} {
    %c8_i32 = arith.constant 8 : i32
    %0 = arith.muli %arg1, %c8_i32 : i32
    %c0_i32 = arith.constant 0 : i32
    %c0_i32_0 = arith.constant 0 : i32
    %1 = tpu.memref_slice %arg2[%arg0, %0, %c0_i32, %c0_i32_0] : memref<2x20x18x128xf32, #tpu.memory_space<any>> -> memref<1x12x18x128xf32, #tpu.memory_space<any>>
    %2 = tpu.memref_squeeze %1 : memref<1x12x18x128xf32, #tpu.memory_space<any>> -> memref<12x18x128xf32, #tpu.memory_space<any>>
    %c0_i32_1 = arith.constant 0 : i32
    %c0_i32_2 = arith.constant 0 : i32
    %c0_i32_3 = arith.constant 0 : i32
    %3 = tpu.memref_slice %arg8[%c0_i32_1, %c0_i32_2, %c0_i32_3] : memref<12x24x128xf32, #tpu.memory_space<vmem>> -> memref<12x18x128xf32, #tpu.memory_space<vmem>>
    tpu.enqueue_dma source(%2 : memref<12x18x128xf32, #tpu.memory_space<any>>) target(%3 : memref<12x18x128xf32, #tpu.memory_space<vmem>>) target_semaphore(%arg10 : memref<!tpu.dma_semaphore, #tpu.memory_space<semaphore_mem>>)
    %c0_i32_4 = arith.constant 0 : i32
    %c0_i32_5 = arith.constant 0 : i32
    %4 = tpu.memref_slice %arg2[%arg0, %0, %c0_i32_4, %c0_i32_5] : memref<2x20x18x128xf32, #tpu.memory_space<any>> -> memref<1x12x18x128xf32, #tpu.memory_space<any>>
    %5 = tpu.memref_squeeze %4 : memref<1x12x18x128xf32, #tpu.memory_space<any>> -> memref<12x18x128xf32, #tpu.memory_space<any>>
    %c0_i32_6 = arith.constant 0 : i32
    %c0_i32_7 = arith.constant 0 : i32
    %c0_i32_8 = arith.constant 0 : i32
    %6 = tpu.memref_slice %arg8[%c0_i32_6, %c0_i32_7, %c0_i32_8] : memref<12x24x128xf32, #tpu.memory_space<vmem>> -> memref<12x18x128xf32, #tpu.memory_space<vmem>>
    tpu.wait_dma2 semaphore(%arg10 : memref<!tpu.dma_semaphore, #tpu.memory_space<semaphore_mem>>) src(%5 : memref<12x18x128xf32, #tpu.memory_space<any>>) dst(%6 : memref<12x18x128xf32, #tpu.memory_space<vmem>>)
    %c0 = arith.constant 0 : index
    %c0_9 = arith.constant 0 : index
    %c0_10 = arith.constant 0 : index
    %7 = vector.load %arg8[%c0, %c0_9, %c0_10] : memref<12x24x128xf32, #tpu.memory_space<vmem>>, vector<10x16x128xf32>
    %8 = vector.shape_cast %7 : vector<10x16x128xf32> to vector<160x128xf32>
    %c0_11 = arith.constant 0 : index
    %c0_12 = arith.constant 0 : index
    %c0_13 = arith.constant 0 : index
    %9 = vector.load %arg3[%c0_11, %c0_12, %c0_13] : memref<9x128x128xf32, #tpu.memory_space<vmem>>, vector<1x128x128xf32>
    %10 = vector.shape_cast %9 : vector<1x128x128xf32> to vector<128x128xf32>
    %cst = arith.constant dense<0.000000e+00> : vector<160x128xf32>
    %11 = tpu.matmul %8, %10, %cst {dimension_numbers = #tpu.dot_dimension_numbers<[1], [0], [0], [1], [0, 0, 1, 1], [], []>} : vector<160x128xf32>, vector<128x128xf32>, vector<160x128xf32> -> vector<160x128xf32>
    %c0_14 = arith.constant 0 : index
    %c1 = arith.constant 1 : index
    %c0_15 = arith.constant 0 : index
    %12 = vector.load %arg8[%c0_14, %c1, %c0_15] : memref<12x24x128xf32, #tpu.memory_space<vmem>>, vector<10x16x128xf32>
    %13 = vector.shape_cast %12 : vector<10x16x128xf32> to vector<160x128xf32>
    %c1_16 = arith.constant 1 : index
    %c0_17 = arith.constant 0 : index
    %c0_18 = arith.constant 0 : index
    %14 = vector.load %arg3[%c1_16, %c0_17, %c0_18] : memref<9x128x128xf32, #tpu.memory_space<vmem>>, vector<1x128x128xf32>
    %15 = vector.shape_cast %14 : vector<1x128x128xf32> to vector<128x128xf32>
    %cst_19 = arith.constant dense<0.000000e+00> : vector<160x128xf32>
    %16 = tpu.matmul %13, %15, %cst_19 {dimension_numbers = #tpu.dot_dimension_numbers<[1], [0], [0], [1], [0, 0, 1, 1], [], []>} : vector<160x128xf32>, vector<128x128xf32>, vector<160x128xf32> -> vector<160x128xf32>
    %17 = arith.addf %11, %16 : vector<160x128xf32>
    %c0_20 = arith.constant 0 : index
    %c2 = arith.constant 2 : index
    %c0_21 = arith.constant 0 : index
    %18 = vector.load %arg8[%c0_20, %c2, %c0_21] : memref<12x24x128xf32, #tpu.memory_space<vmem>>, vector<10x16x128xf32>
    %19 = vector.shape_cast %18 : vector<10x16x128xf32> to vector<160x128xf32>
    %c2_22 = arith.constant 2 : index
    %c0_23 = arith.constant 0 : index
    %c0_24 = arith.constant 0 : index
    %20 = vector.load %arg3[%c2_22, %c0_23, %c0_24] : memref<9x128x128xf32, #tpu.memory_space<vmem>>, vector<1x128x128xf32>
    %21 = vector.shape_cast %20 : vector<1x128x128xf32> to vector<128x128xf32>
    %cst_25 = arith.constant dense<0.000000e+00> : vector<160x128xf32>
    %22 = tpu.matmul %19, %21, %cst_25 {dimension_numbers = #tpu.dot_dimension_numbers<[1], [0], [0], [1], [0, 0, 1, 1], [], []>} : vector<160x128xf32>, vector<128x128xf32>, vector<160x128xf32> -> vector<160x128xf32>
    %23 = arith.addf %17, %22 : vector<160x128xf32>
    %c1_26 = arith.constant 1 : index
    %c0_27 = arith.constant 0 : index
    %c0_28 = arith.constant 0 : index
    %24 = vector.load %arg8[%c1_26, %c0_27, %c0_28] : memref<12x24x128xf32, #tpu.memory_space<vmem>>, vector<10x16x128xf32>
    %25 = vector.shape_cast %24 : vector<10x16x128xf32> to vector<160x128xf32>
    %c3 = arith.constant 3 : index
    %c0_29 = arith.constant 0 : index
    %c0_30 = arith.constant 0 : index
    %26 = vector.load %arg3[%c3, %c0_29, %c0_30] : memref<9x128x128xf32, #tpu.memory_space<vmem>>, vector<1x128x128xf32>
    %27 = vector.shape_cast %26 : vector<1x128x128xf32> to vector<128x128xf32>
    %cst_31 = arith.constant dense<0.000000e+00> : vector<160x128xf32>
    %28 = tpu.matmul %25, %27, %cst_31 {dimension_numbers = #tpu.dot_dimension_numbers<[1], [0], [0], [1], [0, 0, 1, 1], [], []>} : vector<160x128xf32>, vector<128x128xf32>, vector<160x128xf32> -> vector<160x128xf32>
    %29 = arith.addf %23, %28 : vector<160x128xf32>
    %c1_32 = arith.constant 1 : index
    %c1_33 = arith.constant 1 : index
    %c0_34 = arith.constant 0 : index
    %30 = vector.load %arg8[%c1_32, %c1_33, %c0_34] : memref<12x24x128xf32, #tpu.memory_space<vmem>>, vector<10x16x128xf32>
    %31 = vector.shape_cast %30 : vector<10x16x128xf32> to vector<160x128xf32>
    %c4 = arith.constant 4 : index
    %c0_35 = arith.constant 0 : index
    %c0_36 = arith.constant 0 : index
    %32 = vector.load %arg3[%c4, %c0_35, %c0_36] : memref<9x128x128xf32, #tpu.memory_space<vmem>>, vector<1x128x128xf32>
    %33 = vector.shape_cast %32 : vector<1x128x128xf32> to vector<128x128xf32>
    %cst_37 = arith.constant dense<0.000000e+00> : vector<160x128xf32>
    %34 = tpu.matmul %31, %33, %cst_37 {dimension_numbers = #tpu.dot_dimension_numbers<[1], [0], [0], [1], [0, 0, 1, 1], [], []>} : vector<160x128xf32>, vector<128x128xf32>, vector<160x128xf32> -> vector<160x128xf32>
    %35 = arith.addf %29, %34 : vector<160x128xf32>
    %c1_38 = arith.constant 1 : index
    %c2_39 = arith.constant 2 : index
    %c0_40 = arith.constant 0 : index
    %36 = vector.load %arg8[%c1_38, %c2_39, %c0_40] : memref<12x24x128xf32, #tpu.memory_space<vmem>>, vector<10x16x128xf32>
    %37 = vector.shape_cast %36 : vector<10x16x128xf32> to vector<160x128xf32>
    %c5 = arith.constant 5 : index
    %c0_41 = arith.constant 0 : index
    %c0_42 = arith.constant 0 : index
    %38 = vector.load %arg3[%c5, %c0_41, %c0_42] : memref<9x128x128xf32, #tpu.memory_space<vmem>>, vector<1x128x128xf32>
    %39 = vector.shape_cast %38 : vector<1x128x128xf32> to vector<128x128xf32>
    %cst_43 = arith.constant dense<0.000000e+00> : vector<160x128xf32>
    %40 = tpu.matmul %37, %39, %cst_43 {dimension_numbers = #tpu.dot_dimension_numbers<[1], [0], [0], [1], [0, 0, 1, 1], [], []>} : vector<160x128xf32>, vector<128x128xf32>, vector<160x128xf32> -> vector<160x128xf32>
    %41 = arith.addf %35, %40 : vector<160x128xf32>
    %c2_44 = arith.constant 2 : index
    %c0_45 = arith.constant 0 : index
    %c0_46 = arith.constant 0 : index
    %42 = vector.load %arg8[%c2_44, %c0_45, %c0_46] : memref<12x24x128xf32, #tpu.memory_space<vmem>>, vector<10x16x128xf32>
    %43 = vector.shape_cast %42 : vector<10x16x128xf32> to vector<160x128xf32>
    %c6 = arith.constant 6 : index
    %c0_47 = arith.constant 0 : index
    %c0_48 = arith.constant 0 : index
    %44 = vector.load %arg3[%c6, %c0_47, %c0_48] : memref<9x128x128xf32, #tpu.memory_space<vmem>>, vector<1x128x128xf32>
    %45 = vector.shape_cast %44 : vector<1x128x128xf32> to vector<128x128xf32>
    %cst_49 = arith.constant dense<0.000000e+00> : vector<160x128xf32>
    %46 = tpu.matmul %43, %45, %cst_49 {dimension_numbers = #tpu.dot_dimension_numbers<[1], [0], [0], [1], [0, 0, 1, 1], [], []>} : vector<160x128xf32>, vector<128x128xf32>, vector<160x128xf32> -> vector<160x128xf32>
    %47 = arith.addf %41, %46 : vector<160x128xf32>
    %c2_50 = arith.constant 2 : index
    %c1_51 = arith.constant 1 : index
    %c0_52 = arith.constant 0 : index
    %48 = vector.load %arg8[%c2_50, %c1_51, %c0_52] : memref<12x24x128xf32, #tpu.memory_space<vmem>>, vector<10x16x128xf32>
    %49 = vector.shape_cast %48 : vector<10x16x128xf32> to vector<160x128xf32>
    %c7 = arith.constant 7 : index
    %c0_53 = arith.constant 0 : index
    %c0_54 = arith.constant 0 : index
    %50 = vector.load %arg3[%c7, %c0_53, %c0_54] : memref<9x128x128xf32, #tpu.memory_space<vmem>>, vector<1x128x128xf32>
    %51 = vector.shape_cast %50 : vector<1x128x128xf32> to vector<128x128xf32>
    %cst_55 = arith.constant dense<0.000000e+00> : vector<160x128xf32>
    %52 = tpu.matmul %49, %51, %cst_55 {dimension_numbers = #tpu.dot_dimension_numbers<[1], [0], [0], [1], [0, 0, 1, 1], [], []>} : vector<160x128xf32>, vector<128x128xf32>, vector<160x128xf32> -> vector<160x128xf32>
    %53 = arith.addf %47, %52 : vector<160x128xf32>
    %c2_56 = arith.constant 2 : index
    %c2_57 = arith.constant 2 : index
    %c0_58 = arith.constant 0 : index
    %54 = vector.load %arg8[%c2_56, %c2_57, %c0_58] : memref<12x24x128xf32, #tpu.memory_space<vmem>>, vector<10x16x128xf32>
    %55 = vector.shape_cast %54 : vector<10x16x128xf32> to vector<160x128xf32>
    %c8 = arith.constant 8 : index
    %c0_59 = arith.constant 0 : index
    %c0_60 = arith.constant 0 : index
    %56 = vector.load %arg3[%c8, %c0_59, %c0_60] : memref<9x128x128xf32, #tpu.memory_space<vmem>>, vector<1x128x128xf32>
    %57 = vector.shape_cast %56 : vector<1x128x128xf32> to vector<128x128xf32>
    %cst_61 = arith.constant dense<0.000000e+00> : vector<160x128xf32>
    %58 = tpu.matmul %55, %57, %cst_61 {dimension_numbers = #tpu.dot_dimension_numbers<[1], [0], [0], [1], [0, 0, 1, 1], [], []>} : vector<160x128xf32>, vector<128x128xf32>, vector<160x128xf32> -> vector<160x128xf32>
    %59 = arith.addf %53, %58 : vector<160x128xf32>
    %c0_62 = arith.constant 0 : index
    %c0_63 = arith.constant 0 : index
    %60 = vector.load %arg5[%c0_62, %c0_63] : memref<1x128xf32, #tpu.memory_space<vmem>>, vector<1x128xf32>
    %61 = vector.broadcast %60 : vector<1x128xf32> to vector<160x128xf32>
    %62 = arith.addf %59, %61 : vector<160x128xf32>
    %cst_64 = arith.constant 0.000000e+00 : f32
    %63 = vector.broadcast %cst_64 : f32 to vector<160x128xf32>
    %64 = arith.maximumf %62, %63 : vector<160x128xf32>
    %65 = vector.shape_cast %64 : vector<160x128xf32> to vector<10x16x128xf32>
    %c0_65 = arith.constant 0 : index
    %c1_66 = arith.constant 1 : index
    %c0_67 = arith.constant 0 : index
    %66 = vector.load %arg9[%c0_65, %c1_66, %c0_67] : memref<10x24x128xf32, #tpu.memory_space<vmem>>, vector<10x16x128xf32>
    tpu.vector_store %arg9[%c0_65, %c1_66, %c0_67], %65 {strides = array<i32>} : memref<10x24x128xf32, #tpu.memory_space<vmem>>, vector<10x16x128xf32>,
    %cst_68 = arith.constant 0.000000e+00 : f32
    %67 = vector.broadcast %cst_68 : f32 to vector<10x1x128xf32>
    %c0_69 = arith.constant 0 : index
    %c0_70 = arith.constant 0 : index
    %c0_71 = arith.constant 0 : index
    %68 = vector.load %arg9[%c0_69, %c0_70, %c0_71] : memref<10x24x128xf32, #tpu.memory_space<vmem>>, vector<10x1x128xf32>
    tpu.vector_store %arg9[%c0_69, %c0_70, %c0_71], %67 {strides = array<i32>} : memref<10x24x128xf32, #tpu.memory_space<vmem>>, vector<10x1x128xf32>,
    %cst_72 = arith.constant 0.000000e+00 : f32
    %69 = vector.broadcast %cst_72 : f32 to vector<10x1x128xf32>
    %c0_73 = arith.constant 0 : index
    %c17 = arith.constant 17 : index
    %c0_74 = arith.constant 0 : index
    %70 = vector.load %arg9[%c0_73, %c17, %c0_74] : memref<10x24x128xf32, #tpu.memory_space<vmem>>, vector<10x1x128xf32>
    tpu.vector_store %arg9[%c0_73, %c17, %c0_74], %69 {strides = array<i32>} : memref<10x24x128xf32, #tpu.memory_space<vmem>>, vector<10x1x128xf32>,
    %c0_i32_75 = arith.constant 0 : i32
    %71 = arith.cmpi eq, %arg1, %c0_i32_75 : i32
    %72 = arith.extui %71 : i1 to i32
    %c0_i32_76 = arith.constant 0 : i32
    %73 = arith.cmpi ne, %72, %c0_i32_76 : i32
    scf.if %73 {
      %cst_151 = arith.constant 0.000000e+00 : f32
      %140 = vector.broadcast %cst_151 : f32 to vector<1x24x128xf32>
      %c0_152 = arith.constant 0 : index
      %c0_153 = arith.constant 0 : index
      %c0_154 = arith.constant 0 : index
      %141 = vector.load %arg9[%c0_152, %c0_153, %c0_154] : memref<10x24x128xf32, #tpu.memory_space<vmem>>, vector<1x24x128xf32>
      tpu.vector_store %arg9[%c0_152, %c0_153, %c0_154], %140 {strides = array<i32>} : memref<10x24x128xf32, #tpu.memory_space<vmem>>, vector<1x24x128xf32>,
    } else {
    }
    %c1_i32 = arith.constant 1 : i32
    %74 = arith.cmpi eq, %arg1, %c1_i32 : i32
    %75 = arith.extui %74 : i1 to i32
    %c0_i32_77 = arith.constant 0 : i32
    %76 = arith.cmpi ne, %75, %c0_i32_77 : i32
    scf.if %76 {
      %cst_151 = arith.constant 0.000000e+00 : f32
      %140 = vector.broadcast %cst_151 : f32 to vector<1x24x128xf32>
      %c9 = arith.constant 9 : index
      %c0_152 = arith.constant 0 : index
      %c0_153 = arith.constant 0 : index
      %141 = vector.load %arg9[%c9, %c0_152, %c0_153] : memref<10x24x128xf32, #tpu.memory_space<vmem>>, vector<1x24x128xf32>
      tpu.vector_store %arg9[%c9, %c0_152, %c0_153], %140 {strides = array<i32>} : memref<10x24x128xf32, #tpu.memory_space<vmem>>, vector<1x24x128xf32>,
    } else {
    }
    %c0_78 = arith.constant 0 : index
    %c0_79 = arith.constant 0 : index
    %c0_80 = arith.constant 0 : index
    %77 = vector.load %arg9[%c0_78, %c0_79, %c0_80] : memref<10x24x128xf32, #tpu.memory_space<vmem>>, vector<8x16x128xf32>
    %78 = vector.shape_cast %77 : vector<8x16x128xf32> to vector<128x128xf32>
    %c0_81 = arith.constant 0 : index
    %c0_82 = arith.constant 0 : index
    %c0_83 = arith.constant 0 : index
    %79 = vector.load %arg4[%c0_81, %c0_82, %c0_83] : memref<9x128x128xf32, #tpu.memory_space<vmem>>, vector<1x128x128xf32>
    %80 = vector.shape_cast %79 : vector<1x128x128xf32> to vector<128x128xf32>
    %cst_84 = arith.constant dense<0.000000e+00> : vector<128x128xf32>
    %81 = tpu.matmul %78, %80, %cst_84 {dimension_numbers = #tpu.dot_dimension_numbers<[1], [0], [0], [1], [0, 0, 1, 1], [], []>} : vector<128x128xf32>, vector<128x128xf32>, vector<128x128xf32> -> vector<128x128xf32>
    %c0_85 = arith.constant 0 : index
    %c1_86 = arith.constant 1 : index
    %c0_87 = arith.constant 0 : index
    %82 = vector.load %arg9[%c0_85, %c1_86, %c0_87] : memref<10x24x128xf32, #tpu.memory_space<vmem>>, vector<8x16x128xf32>
    %83 = vector.shape_cast %82 : vector<8x16x128xf32> to vector<128x128xf32>
    %c1_88 = arith.constant 1 : index
    %c0_89 = arith.constant 0 : index
    %c0_90 = arith.constant 0 : index
    %84 = vector.load %arg4[%c1_88, %c0_89, %c0_90] : memref<9x128x128xf32, #tpu.memory_space<vmem>>, vector<1x128x128xf32>
    %85 = vector.shape_cast %84 : vector<1x128x128xf32> to vector<128x128xf32>
    %cst_91 = arith.constant dense<0.000000e+00> : vector<128x128xf32>
    %86 = tpu.matmul %83, %85, %cst_91 {dimension_numbers = #tpu.dot_dimension_numbers<[1], [0], [0], [1], [0, 0, 1, 1], [], []>} : vector<128x128xf32>, vector<128x128xf32>, vector<128x128xf32> -> vector<128x128xf32>
    %87 = arith.addf %81, %86 : vector<128x128xf32>
    %c0_92 = arith.constant 0 : index
    %c2_93 = arith.constant 2 : index
    %c0_94 = arith.constant 0 : index
    %88 = vector.load %arg9[%c0_92, %c2_93, %c0_94] : memref<10x24x128xf32, #tpu.memory_space<vmem>>, vector<8x16x128xf32>
    %89 = vector.shape_cast %88 : vector<8x16x128xf32> to vector<128x128xf32>
    %c2_95 = arith.constant 2 : index
    %c0_96 = arith.constant 0 : index
    %c0_97 = arith.constant 0 : index
    %90 = vector.load %arg4[%c2_95, %c0_96, %c0_97] : memref<9x128x128xf32, #tpu.memory_space<vmem>>, vector<1x128x128xf32>
    %91 = vector.shape_cast %90 : vector<1x128x128xf32> to vector<128x128xf32>
    %cst_98 = arith.constant dense<0.000000e+00> : vector<128x128xf32>
    %92 = tpu.matmul %89, %91, %cst_98 {dimension_numbers = #tpu.dot_dimension_numbers<[1], [0], [0], [1], [0, 0, 1, 1], [], []>} : vector<128x128xf32>, vector<128x128xf32>, vector<128x128xf32> -> vector<128x128xf32>
    %93 = arith.addf %87, %92 : vector<128x128xf32>
    %c1_99 = arith.constant 1 : index
    %c0_100 = arith.constant 0 : index
    %c0_101 = arith.constant 0 : index
    %94 = vector.load %arg9[%c1_99, %c0_100, %c0_101] : memref<10x24x128xf32, #tpu.memory_space<vmem>>, vector<8x16x128xf32>
    %95 = vector.shape_cast %94 : vector<8x16x128xf32> to vector<128x128xf32>
    %c3_102 = arith.constant 3 : index
    %c0_103 = arith.constant 0 : index
    %c0_104 = arith.constant 0 : index
    %96 = vector.load %arg4[%c3_102, %c0_103, %c0_104] : memref<9x128x128xf32, #tpu.memory_space<vmem>>, vector<1x128x128xf32>
    %97 = vector.shape_cast %96 : vector<1x128x128xf32> to vector<128x128xf32>
    %cst_105 = arith.constant dense<0.000000e+00> : vector<128x128xf32>
    %98 = tpu.matmul %95, %97, %cst_105 {dimension_numbers = #tpu.dot_dimension_numbers<[1], [0], [0], [1], [0, 0, 1, 1], [], []>} : vector<128x128xf32>, vector<128x128xf32>, vector<128x128xf32> -> vector<128x128xf32>
    %99 = arith.addf %93, %98 : vector<128x128xf32>
    %c1_106 = arith.constant 1 : index
    %c1_107 = arith.constant 1 : index
    %c0_108 = arith.constant 0 : index
    %100 = vector.load %arg9[%c1_106, %c1_107, %c0_108] : memref<10x24x128xf32, #tpu.memory_space<vmem>>, vector<8x16x128xf32>
    %101 = vector.shape_cast %100 : vector<8x16x128xf32> to vector<128x128xf32>
    %c4_109 = arith.constant 4 : index
    %c0_110 = arith.constant 0 : index
    %c0_111 = arith.constant 0 : index
    %102 = vector.load %arg4[%c4_109, %c0_110, %c0_111] : memref<9x128x128xf32, #tpu.memory_space<vmem>>, vector<1x128x128xf32>
    %103 = vector.shape_cast %102 : vector<1x128x128xf32> to vector<128x128xf32>
    %cst_112 = arith.constant dense<0.000000e+00> : vector<128x128xf32>
    %104 = tpu.matmul %101, %103, %cst_112 {dimension_numbers = #tpu.dot_dimension_numbers<[1], [0], [0], [1], [0, 0, 1, 1], [], []>} : vector<128x128xf32>, vector<128x128xf32>, vector<128x128xf32> -> vector<128x128xf32>
    %105 = arith.addf %99, %104 : vector<128x128xf32>
    %c1_113 = arith.constant 1 : index
    %c2_114 = arith.constant 2 : index
    %c0_115 = arith.constant 0 : index
    %106 = vector.load %arg9[%c1_113, %c2_114, %c0_115] : memref<10x24x128xf32, #tpu.memory_space<vmem>>, vector<8x16x128xf32>
    %107 = vector.shape_cast %106 : vector<8x16x128xf32> to vector<128x128xf32>
    %c5_116 = arith.constant 5 : index
    %c0_117 = arith.constant 0 : index
    %c0_118 = arith.constant 0 : index
    %108 = vector.load %arg4[%c5_116, %c0_117, %c0_118] : memref<9x128x128xf32, #tpu.memory_space<vmem>>, vector<1x128x128xf32>
    %109 = vector.shape_cast %108 : vector<1x128x128xf32> to vector<128x128xf32>
    %cst_119 = arith.constant dense<0.000000e+00> : vector<128x128xf32>
    %110 = tpu.matmul %107, %109, %cst_119 {dimension_numbers = #tpu.dot_dimension_numbers<[1], [0], [0], [1], [0, 0, 1, 1], [], []>} : vector<128x128xf32>, vector<128x128xf32>, vector<128x128xf32> -> vector<128x128xf32>
    %111 = arith.addf %105, %110 : vector<128x128xf32>
    %c2_120 = arith.constant 2 : index
    %c0_121 = arith.constant 0 : index
    %c0_122 = arith.constant 0 : index
    %112 = vector.load %arg9[%c2_120, %c0_121, %c0_122] : memref<10x24x128xf32, #tpu.memory_space<vmem>>, vector<8x16x128xf32>
    %113 = vector.shape_cast %112 : vector<8x16x128xf32> to vector<128x128xf32>
    %c6_123 = arith.constant 6 : index
    %c0_124 = arith.constant 0 : index
    %c0_125 = arith.constant 0 : index
    %114 = vector.load %arg4[%c6_123, %c0_124, %c0_125] : memref<9x128x128xf32, #tpu.memory_space<vmem>>, vector<1x128x128xf32>
    %115 = vector.shape_cast %114 : vector<1x128x128xf32> to vector<128x128xf32>
    %cst_126 = arith.constant dense<0.000000e+00> : vector<128x128xf32>
    %116 = tpu.matmul %113, %115, %cst_126 {dimension_numbers = #tpu.dot_dimension_numbers<[1], [0], [0], [1], [0, 0, 1, 1], [], []>} : vector<128x128xf32>, vector<128x128xf32>, vector<128x128xf32> -> vector<128x128xf32>
    %117 = arith.addf %111, %116 : vector<128x128xf32>
    %c2_127 = arith.constant 2 : index
    %c1_128 = arith.constant 1 : index
    %c0_129 = arith.constant 0 : index
    %118 = vector.load %arg9[%c2_127, %c1_128, %c0_129] : memref<10x24x128xf32, #tpu.memory_space<vmem>>, vector<8x16x128xf32>
    %119 = vector.shape_cast %118 : vector<8x16x128xf32> to vector<128x128xf32>
    %c7_130 = arith.constant 7 : index
    %c0_131 = arith.constant 0 : index
    %c0_132 = arith.constant 0 : index
    %120 = vector.load %arg4[%c7_130, %c0_131, %c0_132] : memref<9x128x128xf32, #tpu.memory_space<vmem>>, vector<1x128x128xf32>
    %121 = vector.shape_cast %120 : vector<1x128x128xf32> to vector<128x128xf32>
    %cst_133 = arith.constant dense<0.000000e+00> : vector<128x128xf32>
    %122 = tpu.matmul %119, %121, %cst_133 {dimension_numbers = #tpu.dot_dimension_numbers<[1], [0], [0], [1], [0, 0, 1, 1], [], []>} : vector<128x128xf32>, vector<128x128xf32>, vector<128x128xf32> -> vector<128x128xf32>
    %123 = arith.addf %117, %122 : vector<128x128xf32>
    %c2_134 = arith.constant 2 : index
    %c2_135 = arith.constant 2 : index
    %c0_136 = arith.constant 0 : index
    %124 = vector.load %arg9[%c2_134, %c2_135, %c0_136] : memref<10x24x128xf32, #tpu.memory_space<vmem>>, vector<8x16x128xf32>
    %125 = vector.shape_cast %124 : vector<8x16x128xf32> to vector<128x128xf32>
    %c8_137 = arith.constant 8 : index
    %c0_138 = arith.constant 0 : index
    %c0_139 = arith.constant 0 : index
    %126 = vector.load %arg4[%c8_137, %c0_138, %c0_139] : memref<9x128x128xf32, #tpu.memory_space<vmem>>, vector<1x128x128xf32>
    %127 = vector.shape_cast %126 : vector<1x128x128xf32> to vector<128x128xf32>
    %cst_140 = arith.constant dense<0.000000e+00> : vector<128x128xf32>
    %128 = tpu.matmul %125, %127, %cst_140 {dimension_numbers = #tpu.dot_dimension_numbers<[1], [0], [0], [1], [0, 0, 1, 1], [], []>} : vector<128x128xf32>, vector<128x128xf32>, vector<128x128xf32> -> vector<128x128xf32>
    %129 = arith.addf %123, %128 : vector<128x128xf32>
    %c0_141 = arith.constant 0 : index
    %c0_142 = arith.constant 0 : index
    %130 = vector.load %arg6[%c0_141, %c0_142] : memref<1x128xf32, #tpu.memory_space<vmem>>, vector<1x128xf32>
    %131 = vector.broadcast %130 : vector<1x128xf32> to vector<128x128xf32>
    %132 = arith.addf %129, %131 : vector<128x128xf32>
    %c2_143 = arith.constant 2 : index
    %c1_144 = arith.constant 1 : index
    %c0_145 = arith.constant 0 : index
    %133 = vector.load %arg8[%c2_143, %c1_144, %c0_145] : memref<12x24x128xf32, #tpu.memory_space<vmem>>, vector<8x16x128xf32>
    %134 = vector.shape_cast %133 : vector<8x16x128xf32> to vector<128x128xf32>
    %135 = arith.addf %132, %134 : vector<128x128xf32>
    %cst_146 = arith.constant 0.000000e+00 : f32
    %136 = vector.broadcast %cst_146 : f32 to vector<128x128xf32>
    %137 = arith.maximumf %135, %136 : vector<128x128xf32>
    %138 = vector.shape_cast %137 : vector<128x128xf32> to vector<1x8x16x128xf32>
    %c0_147 = arith.constant 0 : index
    %c0_148 = arith.constant 0 : index
    %c0_149 = arith.constant 0 : index
    %c0_150 = arith.constant 0 : index
    %139 = vector.load %arg7[%c0_147, %c0_148, %c0_149, %c0_150] : memref<1x8x16x128xf32, #tpu.memory_space<vmem>>, vector<1x8x16x128xf32>
    tpu.vector_store %arg7[%c0_147, %c0_148, %c0_149, %c0_150], %138 {strides = array<i32>} : memref<1x8x16x128xf32, #tpu.memory_space<vmem>>, vector<1x8x16x128xf32>,
    return
  }
  func.func @transform_1(%arg0: i32, %arg1: i32) -> (i32, i32, i32) {
    %c0_i32 = arith.constant 0 : i32
    %c0_i32_0 = arith.constant 0 : i32
    %c0_i32_1 = arith.constant 0 : i32
    %c0_i32_2 = arith.constant 0 : i32
    return %c0_i32, %c0_i32_0, %c0_i32_1 : i32, i32, i32
  }
  func.func @transform_2(%arg0: i32, %arg1: i32) -> (i32, i32, i32) {
    %c0_i32 = arith.constant 0 : i32
    %c0_i32_0 = arith.constant 0 : i32
    %c0_i32_1 = arith.constant 0 : i32
    %c0_i32_2 = arith.constant 0 : i32
    return %c0_i32, %c0_i32_0, %c0_i32_1 : i32, i32, i32
  }
  func.func @transform_3(%arg0: i32, %arg1: i32) -> (i32, i32) {
    %c0_i32 = arith.constant 0 : i32
    %c0_i32_0 = arith.constant 0 : i32
    %c0_i32_1 = arith.constant 0 : i32
    return %c0_i32, %c0_i32_0 : i32, i32
  }
  func.func @transform_4(%arg0: i32, %arg1: i32) -> (i32, i32) {
    %c0_i32 = arith.constant 0 : i32
    %c0_i32_0 = arith.constant 0 : i32
    %c0_i32_1 = arith.constant 0 : i32
    return %c0_i32, %c0_i32_0 : i32, i32
  }
  func.func @transform_5(%arg0: i32, %arg1: i32) -> (i32, i32, i32, i32) {
    %c0_i32 = arith.constant 0 : i32
    %c0_i32_0 = arith.constant 0 : i32
    %c0_i32_1 = arith.constant 0 : i32
    return %arg0, %arg1, %c0_i32, %c0_i32_0 : i32, i32, i32, i32
  }
}

module attributes {stable_mosaic.version = 11 : i64} {
  func.func @basic_block_kernel(%arg0: i32, %arg1: i32, %arg2: memref<2x20x18x128xf32, #tpu.memory_space<any>>, %arg3: memref<9x128x128xf32, #tpu.memory_space<vmem>>, %arg4: memref<9x128x128xf32, #tpu.memory_space<vmem>>, %arg5: memref<1x128xf32, #tpu.memory_space<vmem>>, %arg6: memref<1x128xf32, #tpu.memory_space<vmem>>, %arg7: memref<1x8x16x128xf32, #tpu.memory_space<vmem>>, %arg8: memref<12x24x128xf32, #tpu.memory_space<vmem>>, %arg9: memref<10x24x128xf32, #tpu.memory_space<vmem>>, %arg10: memref<!tpu.dma_semaphore, #tpu.memory_space<semaphore_mem>>) attributes {dimension_semantics = [#tpu.dimension_semantics<parallel>, #tpu.dimension_semantics<parallel>], iteration_bounds = array<i64: 2, 2>, scalar_prefetch = 0 : i64, scratch_operands = 3 : i64, tpu.core_type = #tpu.core_type<tc>, window_params = [{}, {pipeline_mode = #tpu.pipeline_mode<synchronous>, transform_indices = @transform_1, window_bounds = array<i64: 9, 128, 128>}, {pipeline_mode = #tpu.pipeline_mode<synchronous>, transform_indices = @transform_2, window_bounds = array<i64: 9, 128, 128>}, {pipeline_mode = #tpu.pipeline_mode<synchronous>, transform_indices = @transform_3, window_bounds = array<i64: 1, 128>}, {pipeline_mode = #tpu.pipeline_mode<synchronous>, transform_indices = @transform_4, window_bounds = array<i64: 1, 128>}, {transform_indices = @transform_5, window_bounds = array<i64: 1, 8, 16, 128>}]} {
    %c8_i32 = arith.constant 8 : i32
    %0 = arith.muli %arg1, %c8_i32 : i32
    %c0_i32 = arith.constant 0 : i32
    %c0_i32_0 = arith.constant 0 : i32
    %1 = tpu.memref_slice %arg2[%arg0, %0, %c0_i32, %c0_i32_0] : memref<2x20x18x128xf32, #tpu.memory_space<any>> -> memref<1x12x18x128xf32, #tpu.memory_space<any>>
    %2 = tpu.memref_squeeze %1 : memref<1x12x18x128xf32, #tpu.memory_space<any>> -> memref<12x18x128xf32, #tpu.memory_space<any>>
    %c0_i32_1 = arith.constant 0 : i32
    %c0_i32_2 = arith.constant 0 : i32
    %c0_i32_3 = arith.constant 0 : i32
    %3 = tpu.memref_slice %arg8[%c0_i32_1, %c0_i32_2, %c0_i32_3] : memref<12x24x128xf32, #tpu.memory_space<vmem>> -> memref<12x18x128xf32, #tpu.memory_space<vmem>>
    tpu.enqueue_dma source(%2 : memref<12x18x128xf32, #tpu.memory_space<any>>) target(%3 : memref<12x18x128xf32, #tpu.memory_space<vmem>>) target_semaphore(%arg10 : memref<!tpu.dma_semaphore, #tpu.memory_space<semaphore_mem>>)
    %c0_i32_4 = arith.constant 0 : i32
    %c0_i32_5 = arith.constant 0 : i32
    %4 = tpu.memref_slice %arg2[%arg0, %0, %c0_i32_4, %c0_i32_5] : memref<2x20x18x128xf32, #tpu.memory_space<any>> -> memref<1x12x18x128xf32, #tpu.memory_space<any>>
    %5 = tpu.memref_squeeze %4 : memref<1x12x18x128xf32, #tpu.memory_space<any>> -> memref<12x18x128xf32, #tpu.memory_space<any>>
    %c0_i32_6 = arith.constant 0 : i32
    %c0_i32_7 = arith.constant 0 : i32
    %c0_i32_8 = arith.constant 0 : i32
    %6 = tpu.memref_slice %arg8[%c0_i32_6, %c0_i32_7, %c0_i32_8] : memref<12x24x128xf32, #tpu.memory_space<vmem>> -> memref<12x18x128xf32, #tpu.memory_space<vmem>>
    tpu.wait_dma2 semaphore(%arg10 : memref<!tpu.dma_semaphore, #tpu.memory_space<semaphore_mem>>) src(%5 : memref<12x18x128xf32, #tpu.memory_space<any>>) dst(%6 : memref<12x18x128xf32, #tpu.memory_space<vmem>>)
    %c0 = arith.constant 0 : index
    %c0_9 = arith.constant 0 : index
    %c0_10 = arith.constant 0 : index
    %7 = vector.load %arg8[%c0, %c0_9, %c0_10] : memref<12x24x128xf32, #tpu.memory_space<vmem>>, vector<10x16x128xf32>
    %8 = vector.shape_cast %7 : vector<10x16x128xf32> to vector<160x128xf32>
    %c0_11 = arith.constant 0 : index
    %c0_12 = arith.constant 0 : index
    %c0_13 = arith.constant 0 : index
    %9 = vector.load %arg3[%c0_11, %c0_12, %c0_13] : memref<9x128x128xf32, #tpu.memory_space<vmem>>, vector<1x128x128xf32>
    %10 = vector.shape_cast %9 : vector<1x128x128xf32> to vector<128x128xf32>
    %cst = arith.constant dense<0.000000e+00> : vector<160x128xf32>
    %11 = tpu.matmul %8, %10, %cst {dimension_numbers = #tpu.dot_dimension_numbers<[1], [0], [0], [1], [0, 0, 1, 1], [], []>} : vector<160x128xf32>, vector<128x128xf32>, vector<160x128xf32> -> vector<160x128xf32>
    %c0_14 = arith.constant 0 : index
    %c1 = arith.constant 1 : index
    %c0_15 = arith.constant 0 : index
    %12 = vector.load %arg8[%c0_14, %c1, %c0_15] : memref<12x24x128xf32, #tpu.memory_space<vmem>>, vector<10x16x128xf32>
    %13 = vector.shape_cast %12 : vector<10x16x128xf32> to vector<160x128xf32>
    %c1_16 = arith.constant 1 : index
    %c0_17 = arith.constant 0 : index
    %c0_18 = arith.constant 0 : index
    %14 = vector.load %arg3[%c1_16, %c0_17, %c0_18] : memref<9x128x128xf32, #tpu.memory_space<vmem>>, vector<1x128x128xf32>
    %15 = vector.shape_cast %14 : vector<1x128x128xf32> to vector<128x128xf32>
    %cst_19 = arith.constant dense<0.000000e+00> : vector<160x128xf32>
    %16 = tpu.matmul %13, %15, %cst_19 {dimension_numbers = #tpu.dot_dimension_numbers<[1], [0], [0], [1], [0, 0, 1, 1], [], []>} : vector<160x128xf32>, vector<128x128xf32>, vector<160x128xf32> -> vector<160x128xf32>
    %17 = arith.addf %11, %16 : vector<160x128xf32>
    %c0_20 = arith.constant 0 : index
    %c2 = arith.constant 2 : index
    %c0_21 = arith.constant 0 : index
    %18 = vector.load %arg8[%c0_20, %c2, %c0_21] : memref<12x24x128xf32, #tpu.memory_space<vmem>>, vector<10x16x128xf32>
    %19 = vector.shape_cast %18 : vector<10x16x128xf32> to vector<160x128xf32>
    %c2_22 = arith.constant 2 : index
    %c0_23 = arith.constant 0 : index
    %c0_24 = arith.constant 0 : index
    %20 = vector.load %arg3[%c2_22, %c0_23, %c0_24] : memref<9x128x128xf32, #tpu.memory_space<vmem>>, vector<1x128x128xf32>
    %21 = vector.shape_cast %20 : vector<1x128x128xf32> to vector<128x128xf32>
    %cst_25 = arith.constant dense<0.000000e+00> : vector<160x128xf32>
    %22 = tpu.matmul %19, %21, %cst_25 {dimension_numbers = #tpu.dot_dimension_numbers<[1], [0], [0], [1], [0, 0, 1, 1], [], []>} : vector<160x128xf32>, vector<128x128xf32>, vector<160x128xf32> -> vector<160x128xf32>
    %23 = arith.addf %17, %22 : vector<160x128xf32>
    %c1_26 = arith.constant 1 : index
    %c0_27 = arith.constant 0 : index
    %c0_28 = arith.constant 0 : index
    %24 = vector.load %arg8[%c1_26, %c0_27, %c0_28] : memref<12x24x128xf32, #tpu.memory_space<vmem>>, vector<10x16x128xf32>
    %25 = vector.shape_cast %24 : vector<10x16x128xf32> to vector<160x128xf32>
    %c3 = arith.constant 3 : index
    %c0_29 = arith.constant 0 : index
    %c0_30 = arith.constant 0 : index
    %26 = vector.load %arg3[%c3, %c0_29, %c0_30] : memref<9x128x128xf32, #tpu.memory_space<vmem>>, vector<1x128x128xf32>
    %27 = vector.shape_cast %26 : vector<1x128x128xf32> to vector<128x128xf32>
    %cst_31 = arith.constant dense<0.000000e+00> : vector<160x128xf32>
    %28 = tpu.matmul %25, %27, %cst_31 {dimension_numbers = #tpu.dot_dimension_numbers<[1], [0], [0], [1], [0, 0, 1, 1], [], []>} : vector<160x128xf32>, vector<128x128xf32>, vector<160x128xf32> -> vector<160x128xf32>
    %29 = arith.addf %23, %28 : vector<160x128xf32>
    %c1_32 = arith.constant 1 : index
    %c1_33 = arith.constant 1 : index
    %c0_34 = arith.constant 0 : index
    %30 = vector.load %arg8[%c1_32, %c1_33, %c0_34] : memref<12x24x128xf32, #tpu.memory_space<vmem>>, vector<10x16x128xf32>
    %31 = vector.shape_cast %30 : vector<10x16x128xf32> to vector<160x128xf32>
    %c4 = arith.constant 4 : index
    %c0_35 = arith.constant 0 : index
    %c0_36 = arith.constant 0 : index
    %32 = vector.load %arg3[%c4, %c0_35, %c0_36] : memref<9x128x128xf32, #tpu.memory_space<vmem>>, vector<1x128x128xf32>
    %33 = vector.shape_cast %32 : vector<1x128x128xf32> to vector<128x128xf32>
    %cst_37 = arith.constant dense<0.000000e+00> : vector<160x128xf32>
    %34 = tpu.matmul %31, %33, %cst_37 {dimension_numbers = #tpu.dot_dimension_numbers<[1], [0], [0], [1], [0, 0, 1, 1], [], []>} : vector<160x128xf32>, vector<128x128xf32>, vector<160x128xf32> -> vector<160x128xf32>
    %35 = arith.addf %29, %34 : vector<160x128xf32>
    %c1_38 = arith.constant 1 : index
    %c2_39 = arith.constant 2 : index
    %c0_40 = arith.constant 0 : index
    %36 = vector.load %arg8[%c1_38, %c2_39, %c0_40] : memref<12x24x128xf32, #tpu.memory_space<vmem>>, vector<10x16x128xf32>
    %37 = vector.shape_cast %36 : vector<10x16x128xf32> to vector<160x128xf32>
    %c5 = arith.constant 5 : index
    %c0_41 = arith.constant 0 : index
    %c0_42 = arith.constant 0 : index
    %38 = vector.load %arg3[%c5, %c0_41, %c0_42] : memref<9x128x128xf32, #tpu.memory_space<vmem>>, vector<1x128x128xf32>
    %39 = vector.shape_cast %38 : vector<1x128x128xf32> to vector<128x128xf32>
    %cst_43 = arith.constant dense<0.000000e+00> : vector<160x128xf32>
    %40 = tpu.matmul %37, %39, %cst_43 {dimension_numbers = #tpu.dot_dimension_numbers<[1], [0], [0], [1], [0, 0, 1, 1], [], []>} : vector<160x128xf32>, vector<128x128xf32>, vector<160x128xf32> -> vector<160x128xf32>
    %41 = arith.addf %35, %40 : vector<160x128xf32>
    %c2_44 = arith.constant 2 : index
    %c0_45 = arith.constant 0 : index
    %c0_46 = arith.constant 0 : index
    %42 = vector.load %arg8[%c2_44, %c0_45, %c0_46] : memref<12x24x128xf32, #tpu.memory_space<vmem>>, vector<10x16x128xf32>
    %43 = vector.shape_cast %42 : vector<10x16x128xf32> to vector<160x128xf32>
    %c6 = arith.constant 6 : index
    %c0_47 = arith.constant 0 : index
    %c0_48 = arith.constant 0 : index
    %44 = vector.load %arg3[%c6, %c0_47, %c0_48] : memref<9x128x128xf32, #tpu.memory_space<vmem>>, vector<1x128x128xf32>
    %45 = vector.shape_cast %44 : vector<1x128x128xf32> to vector<128x128xf32>
    %cst_49 = arith.constant dense<0.000000e+00> : vector<160x128xf32>
    %46 = tpu.matmul %43, %45, %cst_49 {dimension_numbers = #tpu.dot_dimension_numbers<[1], [0], [0], [1], [0, 0, 1, 1], [], []>} : vector<160x128xf32>, vector<128x128xf32>, vector<160x128xf32> -> vector<160x128xf32>
    %47 = arith.addf %41, %46 : vector<160x128xf32>
    %c2_50 = arith.constant 2 : index
    %c1_51 = arith.constant 1 : index
    %c0_52 = arith.constant 0 : index
    %48 = vector.load %arg8[%c2_50, %c1_51, %c0_52] : memref<12x24x128xf32, #tpu.memory_space<vmem>>, vector<10x16x128xf32>
    %49 = vector.shape_cast %48 : vector<10x16x128xf32> to vector<160x128xf32>
    %c7 = arith.constant 7 : index
    %c0_53 = arith.constant 0 : index
    %c0_54 = arith.constant 0 : index
    %50 = vector.load %arg3[%c7, %c0_53, %c0_54] : memref<9x128x128xf32, #tpu.memory_space<vmem>>, vector<1x128x128xf32>
    %51 = vector.shape_cast %50 : vector<1x128x128xf32> to vector<128x128xf32>
    %cst_55 = arith.constant dense<0.000000e+00> : vector<160x128xf32>
    %52 = tpu.matmul %49, %51, %cst_55 {dimension_numbers = #tpu.dot_dimension_numbers<[1], [0], [0], [1], [0, 0, 1, 1], [], []>} : vector<160x128xf32>, vector<128x128xf32>, vector<160x128xf32> -> vector<160x128xf32>
    %53 = arith.addf %47, %52 : vector<160x128xf32>
    %c2_56 = arith.constant 2 : index
    %c2_57 = arith.constant 2 : index
    %c0_58 = arith.constant 0 : index
    %54 = vector.load %arg8[%c2_56, %c2_57, %c0_58] : memref<12x24x128xf32, #tpu.memory_space<vmem>>, vector<10x16x128xf32>
    %55 = vector.shape_cast %54 : vector<10x16x128xf32> to vector<160x128xf32>
    %c8 = arith.constant 8 : index
    %c0_59 = arith.constant 0 : index
    %c0_60 = arith.constant 0 : index
    %56 = vector.load %arg3[%c8, %c0_59, %c0_60] : memref<9x128x128xf32, #tpu.memory_space<vmem>>, vector<1x128x128xf32>
    %57 = vector.shape_cast %56 : vector<1x128x128xf32> to vector<128x128xf32>
    %cst_61 = arith.constant dense<0.000000e+00> : vector<160x128xf32>
    %58 = tpu.matmul %55, %57, %cst_61 {dimension_numbers = #tpu.dot_dimension_numbers<[1], [0], [0], [1], [0, 0, 1, 1], [], []>} : vector<160x128xf32>, vector<128x128xf32>, vector<160x128xf32> -> vector<160x128xf32>
    %59 = arith.addf %53, %58 : vector<160x128xf32>
    %c0_62 = arith.constant 0 : index
    %c0_63 = arith.constant 0 : index
    %60 = vector.load %arg5[%c0_62, %c0_63] : memref<1x128xf32, #tpu.memory_space<vmem>>, vector<1x128xf32>
    %61 = vector.broadcast %60 : vector<1x128xf32> to vector<160x128xf32>
    %62 = arith.addf %59, %61 : vector<160x128xf32>
    %cst_64 = arith.constant 0.000000e+00 : f32
    %63 = vector.broadcast %cst_64 : f32 to vector<160x128xf32>
    %64 = arith.maximumf %62, %63 : vector<160x128xf32>
    %65 = vector.shape_cast %64 : vector<160x128xf32> to vector<10x16x128xf32>
    %c0_65 = arith.constant 0 : index
    %c1_66 = arith.constant 1 : index
    %c0_67 = arith.constant 0 : index
    %66 = vector.load %arg9[%c0_65, %c1_66, %c0_67] : memref<10x24x128xf32, #tpu.memory_space<vmem>>, vector<10x16x128xf32>
    tpu.vector_store %arg9[%c0_65, %c1_66, %c0_67], %65 {strides = array<i32>} : memref<10x24x128xf32, #tpu.memory_space<vmem>>, vector<10x16x128xf32>,
    %cst_68 = arith.constant 0.000000e+00 : f32
    %67 = vector.broadcast %cst_68 : f32 to vector<10x1x128xf32>
    %c0_69 = arith.constant 0 : index
    %c0_70 = arith.constant 0 : index
    %c0_71 = arith.constant 0 : index
    %68 = vector.load %arg9[%c0_69, %c0_70, %c0_71] : memref<10x24x128xf32, #tpu.memory_space<vmem>>, vector<10x1x128xf32>
    tpu.vector_store %arg9[%c0_69, %c0_70, %c0_71], %67 {strides = array<i32>} : memref<10x24x128xf32, #tpu.memory_space<vmem>>, vector<10x1x128xf32>,
    %cst_72 = arith.constant 0.000000e+00 : f32
    %69 = vector.broadcast %cst_72 : f32 to vector<10x1x128xf32>
    %c0_73 = arith.constant 0 : index
    %c17 = arith.constant 17 : index
    %c0_74 = arith.constant 0 : index
    %70 = vector.load %arg9[%c0_73, %c17, %c0_74] : memref<10x24x128xf32, #tpu.memory_space<vmem>>, vector<10x1x128xf32>
    tpu.vector_store %arg9[%c0_73, %c17, %c0_74], %69 {strides = array<i32>} : memref<10x24x128xf32, #tpu.memory_space<vmem>>, vector<10x1x128xf32>,
    %c0_i32_75 = arith.constant 0 : i32
    %71 = arith.cmpi eq, %arg1, %c0_i32_75 : i32
    %72 = arith.extui %71 : i1 to i32
    %c0_i32_76 = arith.constant 0 : i32
    %73 = arith.cmpi ne, %72, %c0_i32_76 : i32
    scf.if %73 {
      %cst_151 = arith.constant 0.000000e+00 : f32
      %140 = vector.broadcast %cst_151 : f32 to vector<1x24x128xf32>
      %c0_152 = arith.constant 0 : index
      %c0_153 = arith.constant 0 : index
      %c0_154 = arith.constant 0 : index
      %141 = vector.load %arg9[%c0_152, %c0_153, %c0_154] : memref<10x24x128xf32, #tpu.memory_space<vmem>>, vector<1x24x128xf32>
      tpu.vector_store %arg9[%c0_152, %c0_153, %c0_154], %140 {strides = array<i32>} : memref<10x24x128xf32, #tpu.memory_space<vmem>>, vector<1x24x128xf32>,
    } else {
    }
    %c1_i32 = arith.constant 1 : i32
    %74 = arith.cmpi eq, %arg1, %c1_i32 : i32
    %75 = arith.extui %74 : i1 to i32
    %c0_i32_77 = arith.constant 0 : i32
    %76 = arith.cmpi ne, %75, %c0_i32_77 : i32
    scf.if %76 {
      %cst_151 = arith.constant 0.000000e+00 : f32
      %140 = vector.broadcast %cst_151 : f32 to vector<1x24x128xf32>
      %c9 = arith.constant 9 : index
      %c0_152 = arith.constant 0 : index
      %c0_153 = arith.constant 0 : index
      %141 = vector.load %arg9[%c9, %c0_152, %c0_153] : memref<10x24x128xf32, #tpu.memory_space<vmem>>, vector<1x24x128xf32>
      tpu.vector_store %arg9[%c9, %c0_152, %c0_153], %140 {strides = array<i32>} : memref<10x24x128xf32, #tpu.memory_space<vmem>>, vector<1x24x128xf32>,
    } else {
    }
    %c0_78 = arith.constant 0 : index
    %c0_79 = arith.constant 0 : index
    %c0_80 = arith.constant 0 : index
    %77 = vector.load %arg9[%c0_78, %c0_79, %c0_80] : memref<10x24x128xf32, #tpu.memory_space<vmem>>, vector<8x16x128xf32>
    %78 = vector.shape_cast %77 : vector<8x16x128xf32> to vector<128x128xf32>
    %c0_81 = arith.constant 0 : index
    %c0_82 = arith.constant 0 : index
    %c0_83 = arith.constant 0 : index
    %79 = vector.load %arg4[%c0_81, %c0_82, %c0_83] : memref<9x128x128xf32, #tpu.memory_space<vmem>>, vector<1x128x128xf32>
    %80 = vector.shape_cast %79 : vector<1x128x128xf32> to vector<128x128xf32>
    %cst_84 = arith.constant dense<0.000000e+00> : vector<128x128xf32>
    %81 = tpu.matmul %78, %80, %cst_84 {dimension_numbers = #tpu.dot_dimension_numbers<[1], [0], [0], [1], [0, 0, 1, 1], [], []>} : vector<128x128xf32>, vector<128x128xf32>, vector<128x128xf32> -> vector<128x128xf32>
    %c0_85 = arith.constant 0 : index
    %c1_86 = arith.constant 1 : index
    %c0_87 = arith.constant 0 : index
    %82 = vector.load %arg9[%c0_85, %c1_86, %c0_87] : memref<10x24x128xf32, #tpu.memory_space<vmem>>, vector<8x16x128xf32>
    %83 = vector.shape_cast %82 : vector<8x16x128xf32> to vector<128x128xf32>
    %c1_88 = arith.constant 1 : index
    %c0_89 = arith.constant 0 : index
    %c0_90 = arith.constant 0 : index
    %84 = vector.load %arg4[%c1_88, %c0_89, %c0_90] : memref<9x128x128xf32, #tpu.memory_space<vmem>>, vector<1x128x128xf32>
    %85 = vector.shape_cast %84 : vector<1x128x128xf32> to vector<128x128xf32>
    %cst_91 = arith.constant dense<0.000000e+00> : vector<128x128xf32>
    %86 = tpu.matmul %83, %85, %cst_91 {dimension_numbers = #tpu.dot_dimension_numbers<[1], [0], [0], [1], [0, 0, 1, 1], [], []>} : vector<128x128xf32>, vector<128x128xf32>, vector<128x128xf32> -> vector<128x128xf32>
    %87 = arith.addf %81, %86 : vector<128x128xf32>
    %c0_92 = arith.constant 0 : index
    %c2_93 = arith.constant 2 : index
    %c0_94 = arith.constant 0 : index
    %88 = vector.load %arg9[%c0_92, %c2_93, %c0_94] : memref<10x24x128xf32, #tpu.memory_space<vmem>>, vector<8x16x128xf32>
    %89 = vector.shape_cast %88 : vector<8x16x128xf32> to vector<128x128xf32>
    %c2_95 = arith.constant 2 : index
    %c0_96 = arith.constant 0 : index
    %c0_97 = arith.constant 0 : index
    %90 = vector.load %arg4[%c2_95, %c0_96, %c0_97] : memref<9x128x128xf32, #tpu.memory_space<vmem>>, vector<1x128x128xf32>
    %91 = vector.shape_cast %90 : vector<1x128x128xf32> to vector<128x128xf32>
    %cst_98 = arith.constant dense<0.000000e+00> : vector<128x128xf32>
    %92 = tpu.matmul %89, %91, %cst_98 {dimension_numbers = #tpu.dot_dimension_numbers<[1], [0], [0], [1], [0, 0, 1, 1], [], []>} : vector<128x128xf32>, vector<128x128xf32>, vector<128x128xf32> -> vector<128x128xf32>
    %93 = arith.addf %87, %92 : vector<128x128xf32>
    %c1_99 = arith.constant 1 : index
    %c0_100 = arith.constant 0 : index
    %c0_101 = arith.constant 0 : index
    %94 = vector.load %arg9[%c1_99, %c0_100, %c0_101] : memref<10x24x128xf32, #tpu.memory_space<vmem>>, vector<8x16x128xf32>
    %95 = vector.shape_cast %94 : vector<8x16x128xf32> to vector<128x128xf32>
    %c3_102 = arith.constant 3 : index
    %c0_103 = arith.constant 0 : index
    %c0_104 = arith.constant 0 : index
    %96 = vector.load %arg4[%c3_102, %c0_103, %c0_104] : memref<9x128x128xf32, #tpu.memory_space<vmem>>, vector<1x128x128xf32>
    %97 = vector.shape_cast %96 : vector<1x128x128xf32> to vector<128x128xf32>
    %cst_105 = arith.constant dense<0.000000e+00> : vector<128x128xf32>
    %98 = tpu.matmul %95, %97, %cst_105 {dimension_numbers = #tpu.dot_dimension_numbers<[1], [0], [0], [1], [0, 0, 1, 1], [], []>} : vector<128x128xf32>, vector<128x128xf32>, vector<128x128xf32> -> vector<128x128xf32>
    %99 = arith.addf %93, %98 : vector<128x128xf32>
    %c1_106 = arith.constant 1 : index
    %c1_107 = arith.constant 1 : index
    %c0_108 = arith.constant 0 : index
    %100 = vector.load %arg9[%c1_106, %c1_107, %c0_108] : memref<10x24x128xf32, #tpu.memory_space<vmem>>, vector<8x16x128xf32>
    %101 = vector.shape_cast %100 : vector<8x16x128xf32> to vector<128x128xf32>
    %c4_109 = arith.constant 4 : index
    %c0_110 = arith.constant 0 : index
    %c0_111 = arith.constant 0 : index
    %102 = vector.load %arg4[%c4_109, %c0_110, %c0_111] : memref<9x128x128xf32, #tpu.memory_space<vmem>>, vector<1x128x128xf32>
    %103 = vector.shape_cast %102 : vector<1x128x128xf32> to vector<128x128xf32>
    %cst_112 = arith.constant dense<0.000000e+00> : vector<128x128xf32>
    %104 = tpu.matmul %101, %103, %cst_112 {dimension_numbers = #tpu.dot_dimension_numbers<[1], [0], [0], [1], [0, 0, 1, 1], [], []>} : vector<128x128xf32>, vector<128x128xf32>, vector<128x128xf32> -> vector<128x128xf32>
    %105 = arith.addf %99, %104 : vector<128x128xf32>
    %c1_113 = arith.constant 1 : index
    %c2_114 = arith.constant 2 : index
    %c0_115 = arith.constant 0 : index
    %106 = vector.load %arg9[%c1_113, %c2_114, %c0_115] : memref<10x24x128xf32, #tpu.memory_space<vmem>>, vector<8x16x128xf32>
    %107 = vector.shape_cast %106 : vector<8x16x128xf32> to vector<128x128xf32>
    %c5_116 = arith.constant 5 : index
    %c0_117 = arith.constant 0 : index
    %c0_118 = arith.constant 0 : index
    %108 = vector.load %arg4[%c5_116, %c0_117, %c0_118] : memref<9x128x128xf32, #tpu.memory_space<vmem>>, vector<1x128x128xf32>
    %109 = vector.shape_cast %108 : vector<1x128x128xf32> to vector<128x128xf32>
    %cst_119 = arith.constant dense<0.000000e+00> : vector<128x128xf32>
    %110 = tpu.matmul %107, %109, %cst_119 {dimension_numbers = #tpu.dot_dimension_numbers<[1], [0], [0], [1], [0, 0, 1, 1], [], []>} : vector<128x128xf32>, vector<128x128xf32>, vector<128x128xf32> -> vector<128x128xf32>
    %111 = arith.addf %105, %110 : vector<128x128xf32>
    %c2_120 = arith.constant 2 : index
    %c0_121 = arith.constant 0 : index
    %c0_122 = arith.constant 0 : index
    %112 = vector.load %arg9[%c2_120, %c0_121, %c0_122] : memref<10x24x128xf32, #tpu.memory_space<vmem>>, vector<8x16x128xf32>
    %113 = vector.shape_cast %112 : vector<8x16x128xf32> to vector<128x128xf32>
    %c6_123 = arith.constant 6 : index
    %c0_124 = arith.constant 0 : index
    %c0_125 = arith.constant 0 : index
    %114 = vector.load %arg4[%c6_123, %c0_124, %c0_125] : memref<9x128x128xf32, #tpu.memory_space<vmem>>, vector<1x128x128xf32>
    %115 = vector.shape_cast %114 : vector<1x128x128xf32> to vector<128x128xf32>
    %cst_126 = arith.constant dense<0.000000e+00> : vector<128x128xf32>
    %116 = tpu.matmul %113, %115, %cst_126 {dimension_numbers = #tpu.dot_dimension_numbers<[1], [0], [0], [1], [0, 0, 1, 1], [], []>} : vector<128x128xf32>, vector<128x128xf32>, vector<128x128xf32> -> vector<128x128xf32>
    %117 = arith.addf %111, %116 : vector<128x128xf32>
    %c2_127 = arith.constant 2 : index
    %c1_128 = arith.constant 1 : index
    %c0_129 = arith.constant 0 : index
    %118 = vector.load %arg9[%c2_127, %c1_128, %c0_129] : memref<10x24x128xf32, #tpu.memory_space<vmem>>, vector<8x16x128xf32>
    %119 = vector.shape_cast %118 : vector<8x16x128xf32> to vector<128x128xf32>
    %c7_130 = arith.constant 7 : index
    %c0_131 = arith.constant 0 : index
    %c0_132 = arith.constant 0 : index
    %120 = vector.load %arg4[%c7_130, %c0_131, %c0_132] : memref<9x128x128xf32, #tpu.memory_space<vmem>>, vector<1x128x128xf32>
    %121 = vector.shape_cast %120 : vector<1x128x128xf32> to vector<128x128xf32>
    %cst_133 = arith.constant dense<0.000000e+00> : vector<128x128xf32>
    %122 = tpu.matmul %119, %121, %cst_133 {dimension_numbers = #tpu.dot_dimension_numbers<[1], [0], [0], [1], [0, 0, 1, 1], [], []>} : vector<128x128xf32>, vector<128x128xf32>, vector<128x128xf32> -> vector<128x128xf32>
    %123 = arith.addf %117, %122 : vector<128x128xf32>
    %c2_134 = arith.constant 2 : index
    %c2_135 = arith.constant 2 : index
    %c0_136 = arith.constant 0 : index
    %124 = vector.load %arg9[%c2_134, %c2_135, %c0_136] : memref<10x24x128xf32, #tpu.memory_space<vmem>>, vector<8x16x128xf32>
    %125 = vector.shape_cast %124 : vector<8x16x128xf32> to vector<128x128xf32>
    %c8_137 = arith.constant 8 : index
    %c0_138 = arith.constant 0 : index
    %c0_139 = arith.constant 0 : index
    %126 = vector.load %arg4[%c8_137, %c0_138, %c0_139] : memref<9x128x128xf32, #tpu.memory_space<vmem>>, vector<1x128x128xf32>
    %127 = vector.shape_cast %126 : vector<1x128x128xf32> to vector<128x128xf32>
    %cst_140 = arith.constant dense<0.000000e+00> : vector<128x128xf32>
    %128 = tpu.matmul %125, %127, %cst_140 {dimension_numbers = #tpu.dot_dimension_numbers<[1], [0], [0], [1], [0, 0, 1, 1], [], []>} : vector<128x128xf32>, vector<128x128xf32>, vector<128x128xf32> -> vector<128x128xf32>
    %129 = arith.addf %123, %128 : vector<128x128xf32>
    %c0_141 = arith.constant 0 : index
    %c0_142 = arith.constant 0 : index
    %130 = vector.load %arg6[%c0_141, %c0_142] : memref<1x128xf32, #tpu.memory_space<vmem>>, vector<1x128xf32>
    %131 = vector.broadcast %130 : vector<1x128xf32> to vector<128x128xf32>
    %132 = arith.addf %129, %131 : vector<128x128xf32>
    %c2_143 = arith.constant 2 : index
    %c1_144 = arith.constant 1 : index
    %c0_145 = arith.constant 0 : index
    %133 = vector.load %arg8[%c2_143, %c1_144, %c0_145] : memref<12x24x128xf32, #tpu.memory_space<vmem>>, vector<8x16x128xf32>
    %134 = vector.shape_cast %133 : vector<8x16x128xf32> to vector<128x128xf32>
    %135 = arith.addf %132, %134 : vector<128x128xf32>
    %cst_146 = arith.constant 0.000000e+00 : f32
    %136 = vector.broadcast %cst_146 : f32 to vector<128x128xf32>
    %137 = arith.maximumf %135, %136 : vector<128x128xf32>
    %138 = vector.shape_cast %137 : vector<128x128xf32> to vector<1x8x16x128xf32>
    %c0_147 = arith.constant 0 : index
    %c0_148 = arith.constant 0 : index
    %c0_149 = arith.constant 0 : index
    %c0_150 = arith.constant 0 : index
    %139 = vector.load %arg7[%c0_147, %c0_148, %c0_149, %c0_150] : memref<1x8x16x128xf32, #tpu.memory_space<vmem>>, vector<1x8x16x128xf32>
    tpu.vector_store %arg7[%c0_147, %c0_148, %c0_149, %c0_150], %138 {strides = array<i32>} : memref<1x8x16x128xf32, #tpu.memory_space<vmem>>, vector<1x8x16x128xf32>,
    return
  }
  func.func @transform_1(%arg0: i32, %arg1: i32) -> (i32, i32, i32) {
    %c0_i32 = arith.constant 0 : i32
    %c0_i32_0 = arith.constant 0 : i32
    %c0_i32_1 = arith.constant 0 : i32
    %c0_i32_2 = arith.constant 0 : i32
    return %c0_i32, %c0_i32_0, %c0_i32_1 : i32, i32, i32
  }
  func.func @transform_2(%arg0: i32, %arg1: i32) -> (i32, i32, i32) {
    %c0_i32 = arith.constant 0 : i32
    %c0_i32_0 = arith.constant 0 : i32
    %c0_i32_1 = arith.constant 0 : i32
    %c0_i32_2 = arith.constant 0 : i32
    return %c0_i32, %c0_i32_0, %c0_i32_1 : i32, i32, i32
  }
  func.func @transform_3(%arg0: i32, %arg1: i32) -> (i32, i32) {
    %c0_i32 = arith.constant 0 : i32
    %c0_i32_0 = arith.constant 0 : i32
    %c0_i32_1 = arith.constant 0 : i32
    return %c0_i32, %c0_i32_0 : i32, i32
  }
  func.func @transform_4(%arg0: i32, %arg1: i32) -> (i32, i32) {
    %c0_i32 = arith.constant 0 : i32
    %c0_i32_0 = arith.constant 0 : i32
    %c0_i32_1 = arith.constant 0 : i32
    return %c0_i32, %c0_i32_0 : i32, i32
  }
  func.func @transform_5(%arg0: i32, %arg1: i32) -> (i32, i32, i32, i32) {
    %c0_i32 = arith.constant 0 : i32
    %c0_i32_0 = arith.constant 0 : i32
    %c0_i32_1 = arith.constant 0 : i32
    return %arg0, %arg1, %c0_i32, %c0_i32_0 : i32, i32, i32, i32
  }
}

</mosaic_0001>

<bundles_post_ra>
// kernel: tpu_custom_call.1
= control target key start
LH: loop header
LB: loop body
LE: loop exit
PB: predicated region body
PF: predicated region fallthrough
CT: control target
= control target key end

     0   :  { %10 = vsyncpa [#allocation6], 0  ;;  %s8598_s0 = inlined_call_operand.vmem [shape: f32[2,20,18,128], index: 0, kind: input, shape index: {}]   ;;  %s8599_s1 = inlined_call_operand.vmem [shape: f32[9,128,128], index: 1, kind: input, shape index: {}]   ;;  %s8600_s2 = inlined_call_operand.hbm [shape: f32[9,128,128], index: 2, kind: input, shape index: {}]   ;;  %s8601_s3 = inlined_call_operand.vmem [shape: f32[1,128], index: 3, kind: input, shape index: {}]   ;;  %s8602_s4 = inlined_call_operand.vmem [shape: f32[1,128], index: 4, kind: input, shape index: {}]   ;;  %s8603_s5 = inlined_call_operand.hbm [shape: f32[2,16,16,128], index: 5, kind: output, shape index: {}]  }
   0x1   :  { %11 = vsyncpa [#allocation7], 0 }
   0x2   :  { %13 = vsyncpa [#allocation7 + $0x1], 0  ;;  %s7314_s18 = smov 0   ;;  %s7316_s19 = smov 0  }
   0x3   :  { %s7318_s20 = smov 0   ;;  %s7320_s21 = smov 0  }
   0x4   :  { %s7322_s22 = smov 0   ;;  %s7324_s23 = smov 0  }
   0x5   :  { %s7326_s24 = smov 0   ;;  %s7328_s25 = smov 0  }
   0x6 LB: > { %s4340_s26 = sadd.s32 4294967295, %s7273_s25   ;;  %s4341_s27 = sadd.s32 4294967294, %s7273_s25   ;;  %s7273_s25 = sphi %s7328_s25, %s19_s25   ;;  %s7269_s24 = sphi %s7326_s24, %s8639_s24   ;;  %s7265_s23 = sphi %s7324_s23, %s8638_s23   ;;  %s7261_s22 = sphi %s7322_s22, %s8637_s22   ;;  %s7257_s21 = sphi %s7320_s21, %s8636_s21   ;;  %s7253_s20 = sphi %s7318_s20, %s8635_s20   ;;  %s7249_s19 = sphi %s7316_s19, %s8634_s19   ;;  %s7245_s18 = sphi %s7314_s18, %s8633_s18  }
   0x7   : > { %s28_s28 = sadd.s32 1, %s7265_s23  ;;  %s31_s29 = sadd.s32 1, %s7269_s24 }
   0x8   : > { %p29_p0 = scmp.ge.s32.totalorder %s28_s28, 2  ;;  %s124_s30 = sadd.s32 1, %s7253_s20 }
   0x9   : > { %p134_p1 = scmp.ne.s32.totalorder %s7253_s20, %s7249_s19  ;;  %p135_p2 = scmp.eq.s32.totalorder %s4340_s26, 3 }
   0xa   : > { %s8641_s28 = smov (%p29_p0, %s28_s28), 0  ;;  %s8643_s29 = smov (!%p29_p0, %s31_s29), %s7269_s24 }
   0xb   : > { %s120_s6 = ssub.s32 %s7265_s23, %s8641_s28  ;;  %p7366_p3 = por %p135_p2, %p134_p1 }
   0xc   : > { %p33_p4 = scmp.ge.s32.totalorder %s8643_s29, 2  ;;  %p140_p5 = scmp.ne.s32.totalorder %s7249_s19, %s7245_s18 }
   0xd   : > { %s8616_s7 = scalar_select %p7366_p3, 1, 0 }
   0xe   : > { %p141_p6 = scmp.eq.s32.totalorder %s4341_s27, 3  ;;  %p4342_p7 = scmp.ge.s32.totalorder %s7273_s25, 1 }
   0xf   : > { %s8645_s29 = smov (%p33_p4, %s8643_s29), 0  ;;  %p148_p9 = scmp.lt.s32.totalorder %s7273_s25, 5 }
  0x10   : > { %p7375_p8 = por %p141_p6, %p140_p5  ;;  %s119_s9 = ssub.s32 %s7269_s24, %s8645_s29 }
  0x11   : > { %s121_s10 = sor.u32 %s120_s6, %s119_s9  ;;  %p7382_p10 = pnand %p4342_p7, %p148_p9 }
  0x12   : > { %s8617_s8 = scalar_select %p7375_p8, 1, 0 }
  0x13   : > { %s8618_s11 = scalar_select %p7382_p10, 1, 0 }
  0x14   : > { %p122_p11 = scmp.eq.s32.totalorder %s121_s10, 0  ;;  %p7386_p12 = scmp.eq.s32.totalorder %s4340_s26, 0 }
  0x15   : > { %p7062_p13 = pneg %p7382_p10  ;;  %s7275_s14 = smov [#allocation5]  }
  0x16   : > { %s8619_s12 = scalar_select %p7386_p12, 1, 0 }
  0x17   : > { %s7393_s13 = scalar_select %p122_p11, %s7253_s20, %s124_s30  }
  0x18   : > { %s163_s15 = sshll.u32 %s7275_s14, 4  ;;  %p7397_p0 = pnand %p7386_p12, %p7062_p13  ;;  %s164_s15 = int_to_ptr.vmem [resolvable:$true] %s163_s15 }
  0x19   : > { %s7145_s26 = scalar_lea.hbm %s8600_s2, 18432 }
  0x1a   : > { %p7146_p1 = scmp.ne.s32.totalorder %s8600_s2, %s7145_s26  ;;  %p7147_p2 = pneg %p7397_p0 }
  0x1b   : > { %p7152_p6 = scmp.lt.u32.totalorder %s7145_s26, %s8600_s2 }
  0x1c   : > { %p7148_p4 = pnand %p7147_p2, %p7146_p1 }
  0x1e   : > { %p7149_p5 = pneg %p7148_p4 }
  0x20   : > { %p7154_p7 = pnand %p7152_p6, %p7149_p5 }
  0x22   : > { %7157 = shalt.err (!%p7154_p7)
}
  0x23   : > { %s7158_s14 = scalar_lea.vmem %s164_s15, 18432  ;;  %p7166_p8 = scmp.lt.s32.totalorder %s164_s15, %s164_s15 }
  0x24   : > { %p7159_p9 = scmp.ne.s32.totalorder %s164_s15, %s7158_s14  ;;  %p7167_p3 = scmp.lt.s32.totalorder %s7158_s14, %s7158_s14 }
  0x26   : > { %p7161_p11 = pnand %p7159_p9, %p7147_p2  ;;  %p7168_p12 = por %p7167_p3, %p7166_p8 }
  0x28   : > { %p7162_p13 = pneg %p7161_p11 }
  0x2a   : > { %p7169_p10 = pnand %p7168_p12, %p7162_p13 }
  0x2c   : > { %7172 = shalt.err (!%p7169_p10)
}
  0x2d   : > { %s7276_s17 = smov 128   ;;  %s7277_s27 = smov 8  }
  0x2e   : > { %7065 = dma.hbm_to_vmem [thread:$0]  (!%p7397_p0), %s8600_s2, 18432, %s164_s15, [#allocation6], %s7276_s17, %s7276_s17, %s7277_s27  }
  0x2f   : > { %p8621_p1 = scmp.ne.s32.totalorder %s8618_s11, 0 }
  0x31   : > { %185 = sbr.rel (%p8621_p1) target bundleno = 1223 (0x4c7), region = 36 }
  0x38   : > { %p8622_p4 = scmp.ne.s32.totalorder %s8619_s12, 0 }
  0x3a   : > { %7234 = dma.done.wait (%p8622_p4), [#allocation6], 18432  }
  0x3b   : > { %7236 = vsyncadd (%p8622_p4), [#allocation6], 4294948864  ;;  %s203_s26 = sand.u32 1, %s7249_s19   ;;  %s4348_s30 = smul.u32 192, %s7257_s21 }
  0x3c   : > { %s7427_s16 = sshll.u32 %s203_s26, 7  ;;  %s209_s10 = smul.u32 480, %s7261_s22 }
  0x3d   : > { %s7472_s12 = scalar_lea.vmem [#allocation8], %s7427_s16 }
  0x3e   : > { %s210_s15 = sadd.s32 %s4348_s30, %s209_s10 }
  0x3f   : > { %s7433_s17 = scalar_lea.vmem %s8598_s0, %s210_s15 }
  0x40   : > { %v271_v0 = vld [vmem:[%s7433_s17] sm:$0xff]  ;;  %v273_v1 = vld [vmem:[%s7433_s17 + $0x8] sm:$0xff]  ;;  %v275_v2 = vld [vmem:[%s7433_s17 + $0x18] sm:$0xff] }
  0x41   : > { %272 = vst [vmem:[#allocation2] sm:$0xff] %v271_v0  ;;  %274 = vst [vmem:[#allocation2 + $0x8] sm:$0xff] %v273_v1  ;;  %v277_v3 = vld [vmem:[%s7433_s17 + $0x20] sm:$0xff]  ;;  %v279_v4 = vld [vmem:[%s7433_s17 + $0x30] sm:$0xff] }
  0x42   : > { %276 = vst [vmem:[#allocation2 + $0x18] sm:$0xff] %v275_v2  ;;  %v281_v5 = vld [vmem:[%s7433_s17 + $0x38] sm:$0xff]  ;;  %278 = vst [vmem:[#allocation2 + $0x20] sm:$0xff] %v277_v3  ;;  %v283_v6 = vld [vmem:[%s7433_s17 + $0x48] sm:$0xff] }
  0x43   : > { %280 = vst [vmem:[#allocation2 + $0x30] sm:$0xff] %v279_v4  ;;  %282 = vst [vmem:[#allocation2 + $0x38] sm:$0xff] %v281_v5  ;;  %v285_v7 = vld [vmem:[%s7433_s17 + $0x50] sm:$0xff]  ;;  %v287_v8 = vld [vmem:[%s7433_s17 + $0x60] sm:$0xff] }
  0x44   : > { %284 = vst [vmem:[#allocation2 + $0x48] sm:$0xff] %v283_v6  ;;  %286 = vst [vmem:[#allocation2 + $0x50] sm:$0xff] %v285_v7  ;;  %v289_v9 = vld [vmem:[%s7433_s17 + $0x68] sm:$0xff]  ;;  %v291_v10 = vld [vmem:[%s7433_s17 + $0x78] sm:$0xff] }
  0x45   : > { %288 = vst [vmem:[#allocation2 + $0x60] sm:$0xff] %v287_v8  ;;  %v293_v11 = vld [vmem:[%s7433_s17 + $0x80] sm:$0xff]  ;;  %290 = vst [vmem:[#allocation2 + $0x68] sm:$0xff] %v289_v9  ;;  %v295_v12 = vld [vmem:[%s7433_s17 + $0x90] sm:$0xff] }
  0x46   : > { %292 = vst [vmem:[#allocation2 + $0x78] sm:$0xff] %v291_v10  ;;  %294 = vst [vmem:[#allocation2 + $0x80] sm:$0xff] %v293_v11  ;;  %v297_v13 = vld [vmem:[%s7433_s17 + $0x98] sm:$0xff]  ;;  %v299_v14 = vld [vmem:[%s7433_s17 + $0xa8] sm:$0xff] }
  0x47   : > { %296 = vst [vmem:[#allocation2 + $0x90] sm:$0xff] %v295_v12  ;;  %298 = vst [vmem:[#allocation2 + $0x98] sm:$0xff] %v297_v13  ;;  %v301_v15 = vld [vmem:[%s7433_s17 + $0xb0] sm:$0xff]  ;;  %v303_v16 = vld [vmem:[%s7433_s17 + $0xc0] sm:$0xff] }
  0x48   : > { %300 = vst [vmem:[#allocation2 + $0xa8] sm:$0xff] %v299_v14  ;;  %v305_v17 = vld [vmem:[%s7433_s17 + $0xc8] sm:$0xff]  ;;  %302 = vst [vmem:[#allocation2 + $0xb0] sm:$0xff] %v301_v15  ;;  %v307_v18 = vld [vmem:[%s7433_s17 + $0xd8] sm:$0xff] }
  0x49   : > { %304 = vst [vmem:[#allocation2 + $0xc0] sm:$0xff] %v303_v16  ;;  %306 = vst [vmem:[#allocation2 + $0xc8] sm:$0xff] %v305_v17  ;;  %v309_v19 = vld [vmem:[%s7433_s17 + $0xe0] sm:$0xff]  ;;  %v311_v20 = vld [vmem:[%s7433_s17 + $0xf0] sm:$0xff] }
  0x4a   : > { %308 = vst [vmem:[#allocation2 + $0xd8] sm:$0xff] %v307_v18  ;;  %310 = vst [vmem:[#allocation2 + $0xe0] sm:$0xff] %v309_v19  ;;  %v313_v21 = vld [vmem:[%s7433_s17 + $0xf8] sm:$0xff]  ;;  %v315_v22 = vld [vmem:[%s7433_s17 + $0x108] sm:$0xff] }
  0x4b   : > { %312 = vst [vmem:[#allocation2 + $0xf0] sm:$0xff] %v311_v20  ;;  %v317_v23 = vld [vmem:[%s7433_s17 + $0x110] sm:$0xff]  ;;  %314 = vst [vmem:[#allocation2 + $0xf8] sm:$0xff] %v313_v21  ;;  %v4350_v25 = vld [vmem:[%s7433_s17 + $0x28] sm:$0x3] }
  0x4c   : > { %316 = vst [vmem:[#allocation2 + $0x108] sm:$0xff] %v315_v22  ;;  %318 = vst [vmem:[#allocation2 + $0x110] sm:$0xff] %v317_v23  ;;  %v4349_v24 = vld [vmem:[%s7433_s17 + $0x10] sm:$0x3]  ;;  %v4351_v26 = vld [vmem:[%s7433_s17 + $0x40] sm:$0x3] }
  0x4d   : > { %329 = vst [vmem:[#allocation2 + $0x10] sm:$0x3] %v4349_v24  ;;  %331 = vst [vmem:[#allocation2 + $0x28] sm:$0x3] %v4350_v25  ;;  %v4352_v27 = vld [vmem:[%s7433_s17 + $0x58] sm:$0x3] }
  0x4e   : > { %333 = vst [vmem:[#allocation2 + $0x40] sm:$0x3] %v4351_v26  ;;  %v4353_v28 = vld [vmem:[%s7433_s17 + $0x70] sm:$0x3]  ;;  %v4354_v29 = vld [vmem:[%s7433_s17 + $0x88] sm:$0x3] }
  0x4f   : > { %335 = vst [vmem:[#allocation2 + $0x58] sm:$0x3] %v4352_v27  ;;  %337 = vst [vmem:[#allocation2 + $0x70] sm:$0x3] %v4353_v28  ;;  %v4355_v30 = vld [vmem:[%s7433_s17 + $0xa0] sm:$0x3] }
  0x50   : > { %339 = vst [vmem:[#allocation2 + $0x88] sm:$0x3] %v4354_v29  ;;  %v4356_v31 = vld [vmem:[%s7433_s17 + $0xb8] sm:$0x3]  ;;  %v4357_v32 = vld [vmem:[%s7433_s17 + $0xd0] sm:$0x3] }
  0x51   : > { %341 = vst [vmem:[#allocation2 + $0xa0] sm:$0x3] %v4355_v30  ;;  %343 = vst [vmem:[#allocation2 + $0xb8] sm:$0x3] %v4356_v31  ;;  %v4358_v33 = vld [vmem:[%s7433_s17 + $0xe8] sm:$0x3] }
  0x52   : > { %345 = vst [vmem:[#allocation2 + $0xd0] sm:$0x3] %v4357_v32  ;;  %v4359_v34 = vld [vmem:[%s7433_s17 + $0x100] sm:$0x3]  ;;  %v4360_v35 = vld [vmem:[%s7433_s17 + $0x118] sm:$0x3] }
  0x53   : > { %347 = vst [vmem:[#allocation2 + $0xe8] sm:$0x3] %v4358_v33  ;;  %349 = vst [vmem:[#allocation2 + $0x100] sm:$0x3] %v4359_v34 }
  0x54   : > { %351 = vst [vmem:[#allocation2 + $0x118] sm:$0x3] %v4360_v35 }
  0x55   : > { %355 = vsyncadd [#allocation4], 3456 }
  0x56   : > { %7237 = dma.done.wait [#allocation4], 3456 }
  0x57   : > { %7238 = vsyncadd [#allocation4], 4294963840  ;;  %v7278_v36 = vmov 0.0   ;;  %v4361_v37 = vld [vmem:[%s8599_s1 + $0x80] sm:$0xff]  ;;  %v4362_v38 = vld [vmem:[%s8599_s1 + $0x88] sm:$0xff]  ;;  %p4490_p3 = scmp.ne.s32.totalorder %s7257_s21, 0 }
  0x58   : > { %2386 = vst [vmem:[#allocation3] sm:$0x1] %v7278_v36  ;;  %2387 = vst [vmem:[#allocation3 + $0x18] sm:$0x1] %v7278_v36  ;;  %v4363_v39 = vld [vmem:[%s8599_s1 + $0x90] sm:$0xff]  ;;  %v6176_v40 = vpack.c.bf16 %v4362_v38, %v4361_v37  ;;  %v4364_v41 = vld [vmem:[%s8599_s1 + $0x98] sm:$0xff] }
  0x59   : > { %2388 = vst [vmem:[#allocation3 + $0x30] sm:$0x1] %v7278_v36  ;;  %2389 = vst [vmem:[#allocation3 + $0x48] sm:$0x1] %v7278_v36  ;;  %v6180_v42 = vpack.c.bf16 %v4364_v41, %v4363_v39  ;;  %v4365_v43 = vld [vmem:[%s8599_s1 + $0xa0] sm:$0xff]  ;;  %v4366_v44 = vld [vmem:[%s8599_s1 + $0xa8] sm:$0xff] }
  0x5a   : > { %2390 = vst [vmem:[#allocation3 + $0x60] sm:$0x1] %v7278_v36  ;;  %2391 = vst [vmem:[#allocation3 + $0x78] sm:$0x1] %v7278_v36  ;;  %6177 = vmatprep.subr.bf16.mxu0 %v6176_v40  ;;  %v6184_v45 = vpack.c.bf16 %v4366_v44, %v4365_v43  ;;  %v396_v46 = vld [vmem:[#allocation2 + $0x1] sm:$0xff]  ;;  %v4367_v47 = vld [vmem:[%s8599_s1 + $0xb0] sm:$0xff] }
  0x5b   : > { %2392 = vst [vmem:[#allocation3 + $0x90] sm:$0x1] %v7278_v36  ;;  %2393 = vst [vmem:[#allocation3 + $0xa8] sm:$0x1] %v7278_v36  ;;  %6179 = vmatpush3.bf16.msra.mxu0 %v6176_v40  ;;  %v4368_v48 = vld [vmem:[%s8599_s1 + $0xb8] sm:$0xff]  ;;  %5146 = vmatprep.mubr.f32.mxu0 %v396_v46  ;;  %v4369_v50 = vld [vmem:[%s8599_s1 + $0xc0] sm:$0xff] }
  0x5c   : > { %2394 = vst [vmem:[#allocation3 + $0xc0] sm:$0x1] %v7278_v36  ;;  %2395 = vst [vmem:[#allocation3 + $0xd8] sm:$0x1] %v7278_v36  ;;  %6181 = vmatprep.subr.bf16.mxu0 %v6180_v42  ;;  %v6188_v49 = vpack.c.bf16 %v4368_v48, %v4367_v47  ;;  %v4370_v51 = vld [vmem:[%s8599_s1 + $0xc8] sm:$0xff]  ;;  %v4371_v53 = vld [vmem:[%s8599_s1 + $0xd0] sm:$0xff] }
  0x5d   : > { %2396 = vst [vmem:[#allocation3 + $0x11] sm:$0x1] %v7278_v36  ;;  %2397 = vst [vmem:[#allocation3 + $0x29] sm:$0x1] %v7278_v36  ;;  %v6192_v52 = vpack.c.bf16 %v4370_v51, %v4369_v50  ;;  %v4372_v54 = vld [vmem:[%s8599_s1 + $0xd8] sm:$0xff]  ;;  %v4373_v56 = vld [vmem:[%s8599_s1 + $0xe0] sm:$0xff] }
  0x5e   : > { %2398 = vst [vmem:[#allocation3 + $0x41] sm:$0x1] %v7278_v36  ;;  %2399 = vst [vmem:[#allocation3 + $0x59] sm:$0x1] %v7278_v36  ;;  %v6196_v55 = vpack.c.bf16 %v4372_v54, %v4371_v53  ;;  %v4374_v57 = vld [vmem:[%s8599_s1 + $0xe8] sm:$0xff]  ;;  %v4375_v59 = vld [vmem:[%s8599_s1 + $0xf0] sm:$0xff] }
  0x5f   : > { %2400 = vst [vmem:[#allocation3 + $0x71] sm:$0x1] %v7278_v36  ;;  %2401 = vst [vmem:[#allocation3 + $0x89] sm:$0x1] %v7278_v36  ;;  %6183 = vmatpush3.bf16.msra.mxu0 %v6180_v42  ;;  %v6200_v58 = vpack.c.bf16 %v4374_v57, %v4373_v56  ;;  %v4376_v60 = vld [vmem:[%s8599_s1 + $0xf8] sm:$0xff]  ;;  %v380_v62 = vld [vmem:[%s8599_s1] sm:$0xff] }
  0x60   : > { %2402 = vst [vmem:[#allocation3 + $0xa1] sm:$0x1] %v7278_v36  ;;  %2403 = vst [vmem:[#allocation3 + $0xb9] sm:$0x1] %v7278_v36  ;;  %6185 = vmatprep.subr.bf16.mxu0 %v6184_v45  ;;  %v6204_v61 = vpack.c.bf16 %v4376_v60, %v4375_v59  ;;  %v381_v63 = vld [vmem:[%s8599_s1 + $0x8] sm:$0xff]  ;;  %v382_v1 = vld [vmem:[%s8599_s1 + $0x10] sm:$0xff] }
  0x61   : > { %2404 = vst [vmem:[#allocation3 + $0xd1] sm:$0x1] %v7278_v36  ;;  %2405 = vst [vmem:[#allocation3 + $0xe9] sm:$0x1] %v7278_v36  ;;  %v6208_v0 = vpack.c.bf16 %v381_v63, %v380_v62  ;;  %v383_v2 = vld [vmem:[%s8599_s1 + $0x18] sm:$0xff]  ;;  %v397_v3 = vld [vmem:[#allocation2 + $0x9] sm:$0xff] }
  0x62   : > { %v7534_v4 = vld [vmem:[#allocation2 + $0x19] sm:$0xff]  ;;  %v6212_v5 = vpack.c.bf16 %v383_v2, %v382_v1  ;;  %v7536_v6 = vld [vmem:[#allocation2 + $0x4a] sm:$0xff]  ;;  %v7546_v9 = vld [vmem:[#allocation2 + $0x21] sm:$0xff] }
  0x63   : > { %6187 = vmatpush3.bf16.msra.mxu0 %v6184_v45  ;;  %v384_v7 = vld [vmem:[%s8599_s1 + $0x20] sm:$0xff]  ;;  %v385_v8 = vld [vmem:[%s8599_s1 + $0x28] sm:$0xff]  ;;  %5645 = vmatprep.mubr.f32.mxu1 %v7536_v6  ;;  %v7548_v10 = vld [vmem:[#allocation2 + $0x31] sm:$0xff] }
  0x64   : > { %6189 = vmatprep.subr.bf16.mxu0 %v6188_v49  ;;  %v6216_v11 = vpack.c.bf16 %v385_v8, %v384_v7  ;;  %v386_v12 = vld [vmem:[%s8599_s1 + $0x30] sm:$0xff]  ;;  %v387_v13 = vld [vmem:[%s8599_s1 + $0x38] sm:$0xff]  ;;  %v388_v17 = vld [vmem:[%s8599_s1 + $0x40] sm:$0xff] }
  0x65   : > { %v7558_v14 = vld [vmem:[#allocation2 + $0x39] sm:$0xff]  ;;  %v7560_v15 = vld [vmem:[#allocation2 + $0x49] sm:$0xff]  ;;  %v6220_v16 = vpack.c.bf16 %v387_v13, %v386_v12  ;;  %v7570_v19 = vld [vmem:[#allocation2 + $0x51] sm:$0xff] }
  0x66   : > { %v389_v18 = vld [vmem:[%s8599_s1 + $0x48] sm:$0xff]  ;;  %v390_v22 = vld [vmem:[%s8599_s1 + $0x50] sm:$0xff]  ;;  %v391_v23 = vld [vmem:[%s8599_s1 + $0x58] sm:$0xff] }
  0x67   : > { %6191 = vmatpush3.bf16.msra.mxu0 %v6188_v49  ;;  %v7572_v20 = vld [vmem:[#allocation2 + $0x61] sm:$0xff]  ;;  %v6224_v21 = vpack.c.bf16 %v389_v18, %v388_v17  ;;  %v7582_v24 = vld [vmem:[#allocation2 + $0x69] sm:$0xff]  ;;  %v7584_v25 = vld [vmem:[#allocation2 + $0x79] sm:$0xff]  ;;  %v6228_v26 = vpack.c.bf16 %v391_v23, %v390_v22 }
  0x68   : > { %6193 = vmatprep.subr.bf16.mxu0 %v6192_v52  ;;  %v392_v27 = vld [vmem:[%s8599_s1 + $0x60] sm:$0xff]  ;;  %v393_v28 = vld [vmem:[%s8599_s1 + $0x68] sm:$0xff]  ;;  %v7596_v30 = vld [vmem:[#allocation2 + $0x91] sm:$0xff] }
  0x69   : > { %v7594_v29 = vld [vmem:[#allocation2 + $0x81] sm:$0xff]  ;;  %v6232_v31 = vpack.c.bf16 %v393_v28, %v392_v27  ;;  %v394_v32 = vld [vmem:[%s8599_s1 + $0x70] sm:$0xff]  ;;  %v395_v33 = vld [vmem:[%s8599_s1 + $0x78] sm:$0xff] }
  0x6a   : > { %v7606_v34 = vld [vmem:[#allocation2 + $0x99] sm:$0xff]  ;;  %v7608_v35 = vld [vmem:[#allocation2 + $0xa9] sm:$0xff]  ;;  %v6236_v36 = vpack.c.bf16 %v395_v33, %v394_v32  ;;  %v7618_v39 = vld [vmem:[#allocation2 + $0xb1] sm:$0xff] }
  0x6b   : > { %6195 = vmatpush3.bf16.msra.mxu0 %v6192_v52  ;;  %v4377_v37 = vld [vmem:[%s8599_s1 + $0x100] sm:$0xff]  ;;  %v4378_v38 = vld [vmem:[%s8599_s1 + $0x108] sm:$0xff]  ;;  %v4379_v46 = vld [vmem:[%s8599_s1 + $0x110] sm:$0xff] }
  0x6c   : > { %6197 = vmatprep.subr.bf16.mxu0 %v6196_v55  ;;  %v7620_v40 = vld [vmem:[#allocation2 + $0xc1] sm:$0xff]  ;;  %v6240_v41 = vpack.c.bf16 %v4378_v38, %v4377_v37  ;;  %v7624_v42 = vld [vmem:[#allocation2 + $0xc9] sm:$0xff]  ;;  %v7626_v43 = vld [vmem:[#allocation2 + $0xd9] sm:$0xff] }
  0x6d   : > { %v7630_v44 = vld [vmem:[#allocation2 + $0xe1] sm:$0xff]  ;;  %v4380_v47 = vld [vmem:[%s8599_s1 + $0x118] sm:$0xff]  ;;  %v7650_v54 = vld [vmem:[#allocation2 + $0x30] sm:$0xff] }
  0x6e   : > { %v360_v45 = vld [vmem:[#allocation2] sm:$0xff]  ;;  %v361_v48 = vld [vmem:[#allocation2 + $0x8] sm:$0xff]  ;;  %v7639_v49 = vld [vmem:[#allocation2 + $0x18] sm:$0xff]  ;;  %v6244_v50 = vpack.c.bf16 %v4380_v47, %v4379_v46 }
  0x6f   : > { %6199 = vmatpush3.bf16.msra.mxu0 %v6196_v55  ;;  %v4381_v51 = vld [vmem:[%s8599_s1 + $0x120] sm:$0xff]  ;;  %v4382_v52 = vld [vmem:[%s8599_s1 + $0x128] sm:$0xff]  ;;  %v4383_v56 = vld [vmem:[%s8599_s1 + $0x130] sm:$0xff] }
  0x70   : > { %6201 = vmatprep.subr.bf16.mxu0 %v6200_v58  ;;  %v7648_v53 = vld [vmem:[#allocation2 + $0x20] sm:$0xff]  ;;  %v6248_v55 = vpack.c.bf16 %v4382_v52, %v4381_v51  ;;  %v4384_v57 = vld [vmem:[%s8599_s1 + $0x138] sm:$0xff]  ;;  %v7662_v59 = vld [vmem:[#allocation2 + $0x48] sm:$0xff] }
  0x71   : > { %v6252_v60 = vpack.c.bf16 %v4384_v57, %v4383_v56  ;;  %v4386_v62 = vld [vmem:[%s8599_s1 + $0x148] sm:$0xff]  ;;  %v7672_v63 = vld [vmem:[#allocation2 + $0x50] sm:$0xff]  ;;  %v7686_v7 = vld [vmem:[#allocation2 + $0x78] sm:$0xff] }
  0x72   : > { %v4387_v2 = vld [vmem:[%s8599_s1 + $0x150] sm:$0xff]  ;;  %v4390_v12 = vld [vmem:[%s8599_s1 + $0x168] sm:$0xff]  ;;  %v7696_v13 = vld [vmem:[#allocation2 + $0x80] sm:$0xff] }
  0x73   : > { %6203 = vmatpush3.bf16.msra.mxu0 %v6200_v58  ;;  %v7660_v58 = vld [vmem:[#allocation2 + $0x38] sm:$0xff]  ;;  %v4391_v18 = vld [vmem:[%s8599_s1 + $0x170] sm:$0xff]  ;;  %v7710_v23 = vld [vmem:[#allocation2 + $0xa8] sm:$0xff] }
  0x74   : > { %6205 = vmatprep.subr.bf16.mxu0 %v6204_v61  ;;  %v7708_v22 = vld [vmem:[#allocation2 + $0x98] sm:$0xff]  ;;  %v4393_v27 = vld [vmem:[%s8599_s1 + $0x180] sm:$0xff]  ;;  %v4394_v28 = vld [vmem:[%s8599_s1 + $0x188] sm:$0xff] }
  0x75   : > { %v7722_v32 = vld [vmem:[#allocation2 + $0xc0] sm:$0xff]  ;;  %v6272_v33 = vpack.c.bf16 %v4394_v28, %v4393_v27  ;;  %v7728_v37 = vld [vmem:[#allocation2 + $0xd8] sm:$0xff]  ;;  %v764_v47 = vld [vmem:[#allocation2 + $0xa] sm:$0xff] }
  0x76   : > { %v7732_v38 = vld [vmem:[#allocation2 + $0xe0] sm:$0xff]  ;;  %v4396_v46 = vld [vmem:[%s8599_s1 + $0x198] sm:$0xff]  ;;  %v4398_v52 = vld [vmem:[%s8599_s1 + $0x1a8] sm:$0xff] }
  0x77   : > { %6207 = vmatpush3.bf16.msra.mxu0 %v6204_v61  ;;  %v4385_v61 = vld [vmem:[%s8599_s1 + $0x140] sm:$0xff]  ;;  %v7752_v56 = vld [vmem:[#allocation2 + $0x32] sm:$0xff] }
  0x78   : > { %6209 = vmatprep.subr.bf16.mxu0 %v6208_v0  ;;  %v6256_v1 = vpack.c.bf16 %v4386_v62, %v4385_v61  ;;  %v4397_v51 = vld [vmem:[%s8599_s1 + $0x1a0] sm:$0xff]  ;;  %v4400_v61 = vld [vmem:[%s8599_s1 + $0x1b8] sm:$0xff] }
  0x79   : > { %v6280_v57 = vpack.c.bf16 %v4398_v52, %v4397_v51  ;;  %v7762_v62 = vld [vmem:[#allocation2 + $0x3a] sm:$0xff]  ;;  %v7810_v52 = vld [vmem:[#allocation2 + $0xaa] sm:$0xff] }
  0x7a   : > { %5147 = vmatmul.mubr.f32.vlgmr.msra.gmra.mrb[0].mxu0 %v397_v3  ;;  %v4388_v3 = vld [vmem:[%s8599_s1 + $0x158] sm:$0xff]  ;;  %v4405_v28 = vld [vmem:[%s8599_s1 + $0x1e0] sm:$0xff] }
  0x7b   : > { %6211 = vmatpush3.bf16.msra.mxu0 %v6208_v0  ;;  %5149 = vmatprep.mubr.f32.mxu0 %v7534_v4  ;;  %v7674_v0 = vld [vmem:[#allocation2 + $0x60] sm:$0xff]  ;;  %v6260_v8 = vpack.c.bf16 %v4388_v3, %v4387_v2  ;;  %v4402_v3 = vld [vmem:[%s8599_s1 + $0x1c8] sm:$0xff] }
  0x7c   : > { %6213 = vmatprep.subr.bf16.mxu0 %v6212_v5  ;;  %v4401_v2 = vld [vmem:[%s8599_s1 + $0x1c0] sm:$0xff] }
  0x7d   : > { %v7808_v51 = vld [vmem:[#allocation2 + $0x9a] sm:$0xff] }
  0x7e   : > { %5150 = vmatmul.mubr.f32.gmra.mrb[2].mxu0 %v7546_v9 }
  0x7f   : > { %6215 = vmatpush3.bf16.msra.mxu0 %v6212_v5  ;;  %5152 = vmatprep.mubr.f32.mxu0 %v7548_v10  ;;  %v7684_v5 = vld [vmem:[#allocation2 + $0x68] sm:$0xff] }
  0x80   : > { %6217 = vmatprep.subr.bf16.mxu0 %v6216_v11 }
  0x82   : > { %5153 = vmatmul.mubr.f32.gmra.mrb[4].mxu0 %v7558_v14 }
  0x83   : > { %5155 = vmatprep.mubr.f32.mxu0 %v7560_v15  ;;  %6219 = vmatpush3.bf16.msra.mxu0 %v6216_v11  ;;  %v4389_v11 = vld [vmem:[%s8599_s1 + $0x160] sm:$0xff] }
  0x84   : > { %6221 = vmatprep.subr.bf16.mxu0 %v6220_v16  ;;  %v6264_v17 = vpack.c.bf16 %v4390_v12, %v4389_v11  ;;  %v7774_v11 = vld [vmem:[#allocation2 + $0x62] sm:$0xff]  ;;  %v6288_v12 = vpack.c.bf16 %v4402_v3, %v4401_v2 }
  0x85   : > { %v7822_v2 = vld [vmem:[#allocation2 + $0xc2] sm:$0xff] }
  0x86   : > { %5156 = vmatmul.mubr.f32.gmra.mrb[6].mxu0 %v7570_v19 }
  0x87   : > { %5158 = vmatprep.mubr.f32.mxu0 %v7572_v20  ;;  %6223 = vmatpush3.bf16.msra.mxu0 %v6220_v16  ;;  %v7698_v16 = vld [vmem:[#allocation2 + $0x90] sm:$0xff] }
  0x88   : > { %6225 = vmatprep.subr.bf16.mxu0 %v6224_v21 }
  0x8a   : > { %5159 = vmatmul.mubr.f32.gmra.mrb[8].mxu0 %v7582_v24 }
  0x8b   : > { %5161 = vmatprep.mubr.f32.mxu0 %v7584_v25  ;;  %6227 = vmatpush3.bf16.msra.mxu0 %v6224_v21  ;;  %v4392_v21 = vld [vmem:[%s8599_s1 + $0x178] sm:$0xff] }
  0x8c   : > { %6229 = vmatprep.subr.bf16.mxu0 %v6228_v26 }
  0x8e   : > { %5162 = vmatmul.mubr.f32.gmra.mrb[10].mxu0 %v7594_v29 }
  0x8f   : > { %5164 = vmatprep.mubr.f32.mxu0 %v7596_v30  ;;  %6231 = vmatpush3.bf16.msra.mxu0 %v6228_v26  ;;  %v6268_v26 = vpack.c.bf16 %v4392_v21, %v4391_v18  ;;  %v4404_v18 = vld [vmem:[%s8599_s1 + $0x1d8] sm:$0xff]  ;;  %v7784_v21 = vld [vmem:[#allocation2 + $0x6a] sm:$0xff] }
  0x90   : > { %6233 = vmatprep.subr.bf16.mxu0 %v6232_v31 }
  0x92   : > { %5165 = vmatmul.mubr.f32.gmra.mrb[12].mxu0 %v7606_v34 }
  0x93   : > { %5167 = vmatprep.mubr.f32.mxu0 %v7608_v35  ;;  %6235 = vmatpush3.bf16.msra.mxu0 %v6232_v31  ;;  %v7720_v31 = vld [vmem:[#allocation2 + $0xb0] sm:$0xff] }
  0x94   : > { %6237 = vmatprep.subr.bf16.mxu0 %v6236_v36 }
  0x96   : > { %5168 = vmatmul.mubr.f32.gmra.mrb[14].mxu0 %v7618_v39 }
  0x97   : > { %5170 = vmatprep.mubr.f32.mxu0 %v7620_v40  ;;  %6239 = vmatpush3.bf16.msra.mxu0 %v6236_v36  ;;  %v7726_v36 = vld [vmem:[#allocation2 + $0xc8] sm:$0xff] }
  0x98   : > { %6241 = vmatprep.subr.bf16.mxu0 %v6240_v41 }
  0x9a   : > { %5171 = vmatmul.mubr.f32.gmra.mrb[16].mxu0 %v7624_v42 }
  0x9b   : > { %5173 = vmatprep.mubr.f32.mxu0 %v7626_v43 }
  0x9e   : > { %5174 = vmatmul.mubr.f32.gmra.mrb[18].mxu0 %v7630_v44 }
  0x9f   : > { %5208 = vmatprep.mubr.f32.mxu0 %v360_v45  ;;  %v4395_v45 = vld [vmem:[%s8599_s1 + $0x190] sm:$0xff] }
  0xa2   : > { %5209 = vmatmul.mubr.f32.vlgmr.msra.gmra.mrb[0].mxu0 %v361_v48  ;;  %v7741_v48 = vld [vmem:[#allocation2 + $0x1a] sm:$0xff] }
  0xa3   : > { %6243 = vmatpush3.bf16.msra.mxu0 %v6240_v41  ;;  %5211 = vmatprep.mubr.f32.mxu0 %v7639_v49  ;;  %v763_v41 = vld [vmem:[#allocation2 + $0x2] sm:$0xff] }
  0xa4   : > { %6245 = vmatprep.subr.bf16.mxu0 %v6244_v50 }
  0xa6   : > { %5212 = vmatmul.mubr.f32.gmra.mrb[2].mxu0 %v7648_v53 }
  0xa7   : > { %6247 = vmatpush3.bf16.msra.mxu0 %v6244_v50  ;;  %5214 = vmatprep.mubr.f32.mxu0 %v7650_v54  ;;  %v6276_v50 = vpack.c.bf16 %v4396_v46, %v4395_v45  ;;  %v7798_v45 = vld [vmem:[#allocation2 + $0x92] sm:$0xff] }
  0xa8   : > { %6249 = vmatprep.subr.bf16.mxu0 %v6248_v55 }
  0xaa   : > { %5215 = vmatmul.mubr.f32.gmra.mrb[4].mxu0 %v7660_v58 }
  0xab   : > { %5217 = vmatprep.mubr.f32.mxu0 %v7662_v59  ;;  %6251 = vmatpush3.bf16.msra.mxu0 %v6248_v55  ;;  %v7750_v55 = vld [vmem:[#allocation2 + $0x22] sm:$0xff] }
  0xac   : > { %6253 = vmatprep.subr.bf16.mxu0 %v6252_v60 }
  0xae   : > { %5218 = vmatmul.mubr.f32.gmra.mrb[6].mxu0 %v7672_v63 }
  0xaf   : > { %5220 = vmatprep.mubr.f32.mxu0 %v7674_v0  ;;  %6255 = vmatpush3.bf16.msra.mxu0 %v6252_v60  ;;  %v4399_v60 = vld [vmem:[%s8599_s1 + $0x1b0] sm:$0xff] }
  0xb0   : > { %6257 = vmatprep.subr.bf16.mxu0 %v6256_v1 }
  0xb2   : > { %5221 = vmatmul.mubr.f32.gmra.mrb[8].mxu0 %v7684_v5 }
  0xb3   : > { %5223 = vmatprep.mubr.f32.mxu0 %v7686_v7  ;;  %6259 = vmatpush3.bf16.msra.mxu0 %v6256_v1  ;;  %v6284_v1 = vpack.c.bf16 %v4400_v61, %v4399_v60  ;;  %v4409_v60 = vld [vmem:[%s8599_s1 + $0x200] sm:$0xff]  ;;  %v4410_v61 = vld [vmem:[%s8599_s1 + $0x208] sm:$0xff] }
  0xb4   : > { %6261 = vmatprep.subr.bf16.mxu0 %v6260_v8  ;;  %v6304_v3 = vpack.c.bf16 %v4410_v61, %v4409_v60  ;;  %v4415_v61 = vld [vmem:[%s8599_s1 + $0x230] sm:$0xff] }
  0xb6   : > { %5224 = vmatmul.mubr.f32.gmra.mrb[10].mxu0 %v7696_v13 }
  0xb7   : > { %5226 = vmatprep.mubr.f32.mxu0 %v7698_v16  ;;  %6263 = vmatpush3.bf16.msra.mxu0 %v6260_v8  ;;  %v7772_v8 = vld [vmem:[#allocation2 + $0x52] sm:$0xff] }
  0xb8   : > { %6265 = vmatprep.subr.bf16.mxu0 %v6264_v17 }
  0xba   : > { %5227 = vmatmul.mubr.f32.gmra.mrb[12].mxu0 %v7708_v22 }
  0xbb   : > { %5229 = vmatprep.mubr.f32.mxu0 %v7710_v23  ;;  %6267 = vmatpush3.bf16.msra.mxu0 %v6264_v17  ;;  %v4403_v17 = vld [vmem:[%s8599_s1 + $0x1d0] sm:$0xff] }
  0xbc   : > { %6269 = vmatprep.subr.bf16.mxu0 %v6268_v26  ;;  %v6292_v27 = vpack.c.bf16 %v4404_v18, %v4403_v17  ;;  %v7828_v17 = vld [vmem:[#allocation2 + $0xda] sm:$0xff]  ;;  %v7832_v18 = vld [vmem:[#allocation2 + $0xe2] sm:$0xff] }
  0xbe   : > { %5230 = vmatmul.mubr.f32.gmra.mrb[14].mxu0 %v7720_v31 }
  0xbf   : > { %5232 = vmatprep.mubr.f32.mxu0 %v7722_v32  ;;  %6271 = vmatpush3.bf16.msra.mxu0 %v6268_v26  ;;  %v7786_v26 = vld [vmem:[#allocation2 + $0x7a] sm:$0xff] }
  0xc0   : > { %6273 = vmatprep.subr.bf16.mxu0 %v6272_v33 }
  0xc2   : > { %5233 = vmatmul.mubr.f32.gmra.mrb[16].mxu0 %v7726_v36 }
  0xc3   : > { %5235 = vmatprep.mubr.f32.mxu0 %v7728_v37 }
  0xc6   : > { %5236 = vmatmul.mubr.f32.gmra.mrb[18].mxu0 %v7732_v38 }
  0xc7   : > { %5270 = vmatprep.mubr.f32.mxu0 %v763_v41  ;;  %v7796_v41 = vld [vmem:[#allocation2 + $0x82] sm:$0xff] }
  0xca   : > { %5271 = vmatmul.mubr.f32.vlgmr.msra.gmra.mrb[0].mxu0 %v764_v47  ;;  %v4407_v47 = vld [vmem:[%s8599_s1 + $0x1f0] sm:$0xff] }
  0xcb   : > { %6275 = vmatpush3.bf16.msra.mxu0 %v6272_v33  ;;  %5273 = vmatprep.mubr.f32.mxu0 %v7741_v48  ;;  %v4406_v33 = vld [vmem:[%s8599_s1 + $0x1e8] sm:$0xff] }
  0xcc   : > { %6277 = vmatprep.subr.bf16.mxu0 %v6276_v50  ;;  %v6296_v46 = vpack.c.bf16 %v4406_v33, %v4405_v28  ;;  %v4412_v28 = vld [vmem:[%s8599_s1 + $0x218] sm:$0xff] }
  0xce   : > { %5274 = vmatmul.mubr.f32.gmra.mrb[2].mxu0 %v7750_v55 }
  0xcf   : > { %6279 = vmatpush3.bf16.msra.mxu0 %v6276_v50  ;;  %5276 = vmatprep.mubr.f32.mxu0 %v7752_v56  ;;  %v4408_v50 = vld [vmem:[%s8599_s1 + $0x1f8] sm:$0xff] }
  0xd0   : > { %6281 = vmatprep.subr.bf16.mxu0 %v6280_v57 }
  0xd2   : > { %5277 = vmatmul.mubr.f32.gmra.mrb[4].mxu0 %v7762_v62 }
  0xd3   : > { %5279 = vmatprep.mubr.f32.mxu0 %v7536_v6  ;;  %6283 = vmatpush3.bf16.msra.mxu0 %v6280_v57  ;;  %v6300_v57 = vpack.c.bf16 %v4408_v50, %v4407_v47  ;;  %v4414_v47 = vld [vmem:[%s8599_s1 + $0x228] sm:$0xff]  ;;  %v4473_v50 = vld [vmem:[%s8599_s1 + $0x400] sm:$0xff] }
  0xd4   : > { %6285 = vmatprep.subr.bf16.mxu0 %v6284_v1 }
  0xd6   : > { %5280 = vmatmul.mubr.f32.gmra.mrb[6].mxu0 %v7772_v8 }
  0xd7   : > { %5282 = vmatprep.mubr.f32.mxu0 %v7774_v11  ;;  %6287 = vmatpush3.bf16.msra.mxu0 %v6284_v1  ;;  %v7820_v1 = vld [vmem:[#allocation2 + $0xb2] sm:$0xff] }
  0xd8   : > { %6289 = vmatprep.subr.bf16.mxu0 %v6288_v12 }
  0xda   : > { %5283 = vmatmul.mubr.f32.gmra.mrb[8].mxu0 %v7784_v21 }
  0xdb   : > { %5285 = vmatprep.mubr.f32.mxu0 %v7786_v26  ;;  %6291 = vmatpush3.bf16.msra.mxu0 %v6288_v12  ;;  %v7826_v12 = vld [vmem:[#allocation2 + $0xca] sm:$0xff] }
  0xdc   : > { %6293 = vmatprep.subr.bf16.mxu0 %v6292_v27 }
  0xde   : > { %5286 = vmatmul.mubr.f32.gmra.mrb[10].mxu0 %v7796_v41 }
  0xdf   : > { %5288 = vmatprep.mubr.f32.mxu0 %v7798_v45  ;;  %6295 = vmatpush3.bf16.msra.mxu0 %v6292_v27  ;;  %v4411_v27 = vld [vmem:[%s8599_s1 + $0x210] sm:$0xff] }
  0xe0   : > { %6297 = vmatprep.subr.bf16.mxu0 %v6296_v46  ;;  %v6308_v33 = vpack.c.bf16 %v4412_v28, %v4411_v27  ;;  %v4476_v28 = vld [vmem:[%s8599_s1 + $0x418] sm:$0xff] }
  0xe2   : > { %5289 = vmatmul.mubr.f32.gmra.mrb[12].mxu0 %v7808_v51 }
  0xe3   : > { %5291 = vmatprep.mubr.f32.mxu0 %v7810_v52  ;;  %6299 = vmatpush3.bf16.msra.mxu0 %v6296_v46  ;;  %v4413_v46 = vld [vmem:[%s8599_s1 + $0x220] sm:$0xff] }
  0xe4   : > { %6301 = vmatprep.subr.bf16.mxu0 %v6300_v57 }
  0xe6   : > { %5292 = vmatmul.mubr.f32.gmra.mrb[14].mxu0 %v7820_v1 }
  0xe7   : > { %5294 = vmatprep.mubr.f32.mxu0 %v7822_v2  ;;  %6303 = vmatpush3.bf16.msra.mxu0 %v6300_v57  ;;  %v6312_v57 = vpack.c.bf16 %v4414_v47, %v4413_v46  ;;  %v4417_v46 = vld [vmem:[%s8599_s1 + $0x240] sm:$0xff] }
  0xe8   : > { %6305 = vmatprep.subr.bf16.mxu0 %v6304_v3 }
  0xea   : > { %5295 = vmatmul.mubr.f32.gmra.mrb[16].mxu0 %v7826_v12 }
  0xeb   : > { %5297 = vmatprep.mubr.f32.mxu0 %v7828_v17 }
  0xee   : > { %5298 = vmatmul.mubr.f32.gmra.mrb[18].mxu0 %v7832_v18 }
  0xef   : > { %5332 = vmatprep.mubr.f32.mxu0 %v7639_v49  ;;  %v4474_v49 = vld [vmem:[%s8599_s1 + $0x408] sm:$0xff] }
  0xf0   : > { %v7856_v60 = vpack.c.bf16 %v4474_v49, %v4473_v50  ;;  %v4477_v50 = vld [vmem:[%s8599_s1 + $0x420] sm:$0xff]  ;;  %v4478_v49 = vld [vmem:[%s8599_s1 + $0x428] sm:$0xff] }
  0xf2   : > { %5333 = vmatmul.mubr.f32.vlgmr.msra.gmra.mrb[0].mxu0 %v7648_v53  ;;  %v4416_v53 = vld [vmem:[%s8599_s1 + $0x238] sm:$0xff]  ;;  %6752 = vmatprep.subr.bf16.mxu1 %v7856_v60 }
  0xf3   : > { %6307 = vmatpush3.bf16.msra.mxu0 %v6304_v3  ;;  %5335 = vmatprep.mubr.f32.mxu0 %v7650_v54  ;;  %v4475_v3 = vld [vmem:[%s8599_s1 + $0x410] sm:$0xff]  ;;  %v6316_v27 = vpack.c.bf16 %v4416_v53, %v4415_v61  ;;  %v7891_v53 = vpack.c.bf16 %v4478_v49, %v4477_v50  ;;  %v4421_v49 = vld [vmem:[%s8599_s1 + $0x260] sm:$0xff] }
  0xf4   : > { %6309 = vmatprep.subr.bf16.mxu0 %v6308_v33  ;;  %6760 = vmatpush3.bf16.msra.mxu1 %v7856_v60  ;;  %v7880_v47 = vpack.c.bf16 %v4476_v28, %v4475_v3  ;;  %v4419_v3 = vld [vmem:[%s8599_s1 + $0x250] sm:$0xff] }
  0xf5   : > { %8623 = vst [vmem:[#allocation13_spill] sm:$0xff] %v7891_v53  ;;  %v4479_v28 = vld [vmem:[%s8599_s1 + $0x430] sm:$0xff] }
  0xf6   : > { %5336 = vmatmul.mubr.f32.gmra.mrb[2].mxu0 %v7660_v58  ;;  %6753 = vmatprep.subr.bf16.mxu1 %v7880_v47 }
  0xf7   : > { %6311 = vmatpush3.bf16.msra.mxu0 %v6308_v33  ;;  %5338 = vmatprep.mubr.f32.mxu0 %v7662_v59  ;;  %v4418_v33 = vld [vmem:[%s8599_s1 + $0x248] sm:$0xff] }
  0xf8   : > { %6313 = vmatprep.subr.bf16.mxu0 %v6312_v57  ;;  %v6320_v61 = vpack.c.bf16 %v4418_v33, %v4417_v46  ;;  %6761 = vmatpush3.bf16.msra.mxu1 %v7880_v47  ;;  %v4480_v46 = vld [vmem:[%s8599_s1 + $0x438] sm:$0xff] }
  0xf9   : > { %6754 = vmatprep.subr.bf16.mxu1 %v7891_v53  ;;  %v7909_v50 = vpack.c.bf16 %v4480_v46, %v4479_v28 }
  0xfa   : > { %5339 = vmatmul.mubr.f32.gmra.mrb[4].mxu0 %v7672_v63 }
  0xfb   : > { %5341 = vmatprep.mubr.f32.mxu0 %v7674_v0  ;;  %6315 = vmatpush3.bf16.msra.mxu0 %v6312_v57  ;;  %v4420_v57 = vld [vmem:[%s8599_s1 + $0x258] sm:$0xff]  ;;  %8624 = vst [vmem:[#allocation14_spill] sm:$0xff] %v7909_v50 }
  0xfc   : > { %6317 = vmatprep.subr.bf16.mxu0 %v6316_v27  ;;  %v6324_v33 = vpack.c.bf16 %v4420_v57, %v4419_v3  ;;  %6762 = vmatpush3.bf16.msra.mxu1 %v7891_v53  ;;  %v4481_v3 = vld [vmem:[%s8599_s1 + $0x440] sm:$0xff]  ;;  %v4482_v57 = vld [vmem:[%s8599_s1 + $0x448] sm:$0xff]  ;;  %v4423_v53 = vld [vmem:[%s8599_s1 + $0x270] sm:$0xff] }
  0xfd   : > { %6755 = vmatprep.subr.bf16.mxu1 %v7909_v50  ;;  %v7927_v46 = vpack.c.bf16 %v4482_v57, %v4481_v3 }
  0xfe   : > { %5342 = vmatmul.mubr.f32.gmra.mrb[6].mxu0 %v7684_v5 }
  0xff   : > { %5344 = vmatprep.mubr.f32.mxu0 %v7686_v7  ;;  %6319 = vmatpush3.bf16.msra.mxu0 %v6316_v27  ;;  %v4422_v27 = vld [vmem:[%s8599_s1 + $0x268] sm:$0xff] }
 0x100   : > { %6321 = vmatprep.subr.bf16.mxu0 %v6320_v61  ;;  %v6328_v28 = vpack.c.bf16 %v4422_v27, %v4421_v49  ;;  %6763 = vmatpush3.bf16.msra.mxu1 %v7909_v50  ;;  %v4483_v49 = vld [vmem:[%s8599_s1 + $0x450] sm:$0xff]  ;;  %v4484_v27 = vld [vmem:[%s8599_s1 + $0x458] sm:$0xff]  ;;  %v4425_v50 = vld [vmem:[%s8599_s1 + $0x280] sm:$0xff] }
 0x101   : > { %6756 = vmatprep.subr.bf16.mxu1 %v7927_v46  ;;  %v7945_v57 = vpack.c.bf16 %v4484_v27, %v4483_v49  ;;  %v4486_v49 = vld [vmem:[%s8599_s1 + $0x468] sm:$0xff] }
 0x102   : > { %5345 = vmatmul.mubr.f32.gmra.mrb[8].mxu0 %v7696_v13 }
 0x103   : > { %5347 = vmatprep.mubr.f32.mxu0 %v7698_v16  ;;  %6323 = vmatpush3.bf16.msra.mxu0 %v6320_v61  ;;  %v4424_v61 = vld [vmem:[%s8599_s1 + $0x278] sm:$0xff]  ;;  %8625 = vst [vmem:[#allocation15_spill] sm:$0xff] %v7945_v57 }
 0x104   : > { %6325 = vmatprep.subr.bf16.mxu0 %v6324_v33  ;;  %v6332_v3 = vpack.c.bf16 %v4424_v61, %v4423_v53  ;;  %6764 = vmatpush3.bf16.msra.mxu1 %v7927_v46  ;;  %v4485_v61 = vld [vmem:[%s8599_s1 + $0x460] sm:$0xff] }
 0x105   : > { %6757 = vmatprep.subr.bf16.mxu1 %v7945_v57  ;;  %v7964_v27 = vpack.c.bf16 %v4486_v49, %v4485_v61  ;;  %v4427_v49 = vld [vmem:[%s8599_s1 + $0x290] sm:$0xff] }
 0x106   : > { %5348 = vmatmul.mubr.f32.gmra.mrb[10].mxu0 %v7708_v22 }
 0x107   : > { %5350 = vmatprep.mubr.f32.mxu0 %v7710_v23  ;;  %6327 = vmatpush3.bf16.msra.mxu0 %v6324_v33  ;;  %v4426_v33 = vld [vmem:[%s8599_s1 + $0x288] sm:$0xff]  ;;  %8626 = vst [vmem:[#allocation16_spill] sm:$0xff] %v7964_v27 }
 0x108   : > { %6329 = vmatprep.subr.bf16.mxu0 %v6328_v28  ;;  %v6336_v53 = vpack.c.bf16 %v4426_v33, %v4425_v50  ;;  %6765 = vmatpush3.bf16.msra.mxu1 %v7945_v57  ;;  %v4487_v50 = vld [vmem:[%s8599_s1 + $0x470] sm:$0xff]  ;;  %v4428_v57 = vld [vmem:[%s8599_s1 + $0x298] sm:$0xff] }
 0x109   : > { %v7974_v33 = vld [vmem:[#allocation2 + $0xf0] sm:$0xff]  ;;  %6758 = vmatprep.subr.bf16.mxu1 %v7964_v27 }
 0x10a   : > { %5351 = vmatmul.mubr.f32.gmra.mrb[12].mxu0 %v7720_v31 }
 0x10b   : > { %5353 = vmatprep.mubr.f32.mxu0 %v7722_v32  ;;  %6331 = vmatpush3.bf16.msra.mxu0 %v6328_v28  ;;  %v4488_v28 = vld [vmem:[%s8599_s1 + $0x478] sm:$0xff] }
 0x10c   : > { %6333 = vmatprep.subr.bf16.mxu0 %v6332_v3  ;;  %v7977_v61 = vpack.c.bf16 %v4488_v28, %v4487_v50  ;;  %6766 = vmatpush3.bf16.msra.mxu1 %v7964_v27  ;;  %v6340_v50 = vpack.c.bf16 %v4428_v57, %v4427_v49  ;;  %v4429_v28 = vld [vmem:[%s8599_s1 + $0x2a0] sm:$0xff]  ;;  %v4430_v27 = vld [vmem:[%s8599_s1 + $0x2a8] sm:$0xff]  ;;  %v4431_v57 = vld [vmem:[%s8599_s1 + $0x2b0] sm:$0xff] }
 0x10d   : > { %v4432_v49 = vld [vmem:[%s8599_s1 + $0x2b8] sm:$0xff] }
 0x10e   : > { %5354 = vmatmul.mubr.f32.gmra.mrb[14].mxu0 %v7726_v36  ;;  %6759 = vmatprep.subr.bf16.mxu1 %v7977_v61 }
 0x10f   : > { %5356 = vmatprep.mubr.f32.mxu0 %v7728_v37  ;;  %6335 = vmatpush3.bf16.msra.mxu0 %v6332_v3  ;;  %v7983_v3 = vld [vmem:[#allocation2 + $0xf8] sm:$0xff] }
 0x110   : > { %6337 = vmatprep.subr.bf16.mxu0 %v6336_v53  ;;  %6767 = vmatpush3.bf16.msra.mxu1 %v7977_v61 }
 0x112   : > { %5357 = vmatmul.mubr.f32.gmra.mrb[16].mxu0 %v7732_v38 }
 0x113   : > { %5359 = vmatprep.mubr.f32.mxu0 %v7974_v33  ;;  %5646 = vmatmul.mubr.f32.vlgmr.msra.gmra.mrb[0].mxu1 %v7772_v8 }
 0x114   : > { %5648 = vmatprep.mubr.f32.mxu1 %v7774_v11 }
 0x116   : > { %5360 = vmatmul.mubr.f32.gmra.mrb[18].mxu0 %v7983_v3 }
 0x117   : > { %5394 = vmatprep.mubr.f32.mxu0 %v7534_v4  ;;  %v6344_v4 = vpack.c.bf16 %v4430_v27, %v4429_v28  ;;  %5649 = vmatmul.mubr.f32.gmra.mrb[2].mxu1 %v7784_v21  ;;  %v4436_v27 = vld [vmem:[%s8599_s1 + $0x2d8] sm:$0xff] }
 0x118   : > { %5651 = vmatprep.mubr.f32.mxu1 %v7786_v26  ;;  %v4440_v28 = vld [vmem:[%s8599_s1 + $0x2f8] sm:$0xff] }
 0x11a   : > { %5395 = vmatmul.mubr.f32.vlgmr.msra.gmra.mrb[0].mxu0 %v7546_v9  ;;  %v6348_v9 = vpack.c.bf16 %v4432_v49, %v4431_v57  ;;  %v4442_v57 = vld [vmem:[%s8599_s1 + $0x308] sm:$0xff] }
 0x11b   : > { %6339 = vmatpush3.bf16.msra.mxu0 %v6336_v53  ;;  %5397 = vmatprep.mubr.f32.mxu0 %v7548_v10  ;;  %v4433_v10 = vld [vmem:[%s8599_s1 + $0x2c0] sm:$0xff]  ;;  %v4434_v53 = vld [vmem:[%s8599_s1 + $0x2c8] sm:$0xff] }
 0x11c   : > { %6341 = vmatprep.subr.bf16.mxu0 %v6340_v50  ;;  %5652 = vmatmul.mubr.f32.gmra.mrb[4].mxu1 %v7796_v41 }
 0x11d   : > { %5654 = vmatprep.mubr.f32.mxu1 %v7798_v45 }
 0x11e   : > { %5398 = vmatmul.mubr.f32.gmra.mrb[2].mxu0 %v7558_v14  ;;  %v6352_v14 = vpack.c.bf16 %v4434_v53, %v4433_v10  ;;  %v8071_v10 = vld [vmem:[#allocation2 + $0xf1] sm:$0xff]  ;;  %v4446_v53 = vld [vmem:[%s8599_s1 + $0x328] sm:$0xff] }
 0x11f   : > { %6343 = vmatpush3.bf16.msra.mxu0 %v6340_v50  ;;  %5400 = vmatprep.mubr.f32.mxu0 %v7560_v15  ;;  %v4435_v15 = vld [vmem:[%s8599_s1 + $0x2d0] sm:$0xff]  ;;  %v4438_v50 = vld [vmem:[%s8599_s1 + $0x2e8] sm:$0xff] }
 0x120   : > { %6345 = vmatprep.subr.bf16.mxu0 %v6344_v4  ;;  %5655 = vmatmul.mubr.f32.gmra.mrb[6].mxu1 %v7808_v51 }
 0x121   : > { %5657 = vmatprep.mubr.f32.mxu1 %v7810_v52 }
 0x122   : > { %5401 = vmatmul.mubr.f32.gmra.mrb[4].mxu0 %v7570_v19  ;;  %v6356_v19 = vpack.c.bf16 %v4436_v27, %v4435_v15  ;;  %v4448_v15 = vld [vmem:[%s8599_s1 + $0x338] sm:$0xff]  ;;  %v4450_v27 = vld [vmem:[%s8599_s1 + $0x348] sm:$0xff] }
 0x123   : > { %5403 = vmatprep.mubr.f32.mxu0 %v7572_v20  ;;  %6347 = vmatpush3.bf16.msra.mxu0 %v6344_v4  ;;  %v4437_v20 = vld [vmem:[%s8599_s1 + $0x2e0] sm:$0xff] }
 0x124   : > { %6349 = vmatprep.subr.bf16.mxu0 %v6348_v9  ;;  %5658 = vmatmul.mubr.f32.gmra.mrb[8].mxu1 %v7820_v1  ;;  %v4441_v4 = vld [vmem:[%s8599_s1 + $0x300] sm:$0xff] }
 0x125   : > { %5660 = vmatprep.mubr.f32.mxu1 %v7822_v2  ;;  %v6368_v49 = vpack.c.bf16 %v4442_v57, %v4441_v4  ;;  %v4472_v4 = vld [vmem:[%s8599_s1 + $0x3f8] sm:$0xff]  ;;  %v1877_v57 = vld [vmem:[#allocation2 + $0x49] sm:$0xff] }
 0x126   : > { %5404 = vmatmul.mubr.f32.gmra.mrb[6].mxu0 %v7582_v24  ;;  %v6360_v24 = vpack.c.bf16 %v4438_v50, %v4437_v20  ;;  %v4454_v20 = vld [vmem:[%s8599_s1 + $0x368] sm:$0xff]  ;;  %v4456_v50 = vld [vmem:[%s8599_s1 + $0x378] sm:$0xff] }
 0x127   : > { %5406 = vmatprep.mubr.f32.mxu0 %v7584_v25  ;;  %6351 = vmatpush3.bf16.msra.mxu0 %v6348_v9  ;;  %v4439_v25 = vld [vmem:[%s8599_s1 + $0x2f0] sm:$0xff] }
 0x128   : > { %6353 = vmatprep.subr.bf16.mxu0 %v6352_v14  ;;  %5661 = vmatmul.mubr.f32.gmra.mrb[10].mxu1 %v7826_v12  ;;  %v2116_v9 = vld [vmem:[#allocation2 + $0x112] sm:$0xff] }
 0x129   : > { %5663 = vmatprep.mubr.f32.mxu1 %v7828_v17 }
 0x12a   : > { %5407 = vmatmul.mubr.f32.gmra.mrb[8].mxu0 %v7594_v29  ;;  %v6364_v29 = vpack.c.bf16 %v4440_v28, %v4439_v25  ;;  %v4464_v25 = vld [vmem:[%s8599_s1 + $0x3b8] sm:$0xff]  ;;  %v4466_v28 = vld [vmem:[%s8599_s1 + $0x3c8] sm:$0xff] }
 0x12b   : > { %5409 = vmatprep.mubr.f32.mxu0 %v7596_v30  ;;  %6355 = vmatpush3.bf16.msra.mxu0 %v6352_v14  ;;  %v8054_v30 = vld [vmem:[#allocation2 + $0xf2] sm:$0xff] }
 0x12c   : > { %6357 = vmatprep.subr.bf16.mxu0 %v6356_v19  ;;  %5664 = vmatmul.mubr.f32.gmra.mrb[12].mxu1 %v7832_v18 }
 0x12d   : > { %5666 = vmatprep.mubr.f32.mxu1 %v8054_v30 }
 0x12e   : > { %5410 = vmatmul.mubr.f32.gmra.mrb[10].mxu0 %v7606_v34  ;;  %v8066_v34 = vld [vmem:[#allocation2 + $0xfa] sm:$0xff] }
 0x12f   : > { %5412 = vmatprep.mubr.f32.mxu0 %v7608_v35  ;;  %6359 = vmatpush3.bf16.msra.mxu0 %v6356_v19  ;;  %v2115_v35 = vld [vmem:[#allocation2 + $0x10a] sm:$0xff]  ;;  %v4452_v19 = vld [vmem:[%s8599_s1 + $0x358] sm:$0xff] }
 0x130   : > { %6361 = vmatprep.subr.bf16.mxu0 %v6360_v24  ;;  %5667 = vmatmul.mubr.f32.gmra.mrb[14].mxu1 %v8066_v34 }
 0x131   : > { %5669 = vmatprep.mubr.f32.mxu1 %v2115_v35  ;;  %v1882_v35 = vld [vmem:[#allocation2 + $0x81] sm:$0xff] }
 0x132   : > { %5413 = vmatmul.mubr.f32.gmra.mrb[12].mxu0 %v7618_v39  ;;  %v8075_v39 = vld [vmem:[#allocation2 + $0xf9] sm:$0xff] }
 0x133   : > { %5415 = vmatprep.mubr.f32.mxu0 %v7620_v40  ;;  %6363 = vmatpush3.bf16.msra.mxu0 %v6360_v24  ;;  %v4443_v40 = vld [vmem:[%s8599_s1 + $0x310] sm:$0xff]  ;;  %v4458_v24 = vld [vmem:[%s8599_s1 + $0x388] sm:$0xff] }
 0x134   : > { %6365 = vmatprep.subr.bf16.mxu0 %v6364_v29  ;;  %5670 = vmatmul.mubr.f32.gmra.mrb[16].mxu1 %v2116_v9  ;;  %v1884_v9 = vld [vmem:[#allocation2 + $0x99] sm:$0xff] }
 0x136   : > { %5416 = vmatmul.mubr.f32.gmra.mrb[14].mxu0 %v7624_v42  ;;  %v4444_v42 = vld [vmem:[%s8599_s1 + $0x318] sm:$0xff] }
 0x137   : > { %5418 = vmatprep.mubr.f32.mxu0 %v7626_v43  ;;  %6367 = vmatpush3.bf16.msra.mxu0 %v6364_v29  ;;  %v6372_v43 = vpack.c.bf16 %v4444_v42, %v4443_v40  ;;  %v4468_v29 = vld [vmem:[%s8599_s1 + $0x3d8] sm:$0xff]  ;;  %v1885_v40 = vld [vmem:[#allocation2 + $0xa9] sm:$0xff]  ;;  %v1887_v42 = vld [vmem:[#allocation2 + $0xc1] sm:$0xff] }
 0x138   : > { %6369 = vmatprep.subr.bf16.mxu0 %v6368_v49 }
 0x13a   : > { %5419 = vmatmul.mubr.f32.gmra.mrb[16].mxu0 %v7630_v44  ;;  %v4445_v44 = vld [vmem:[%s8599_s1 + $0x320] sm:$0xff] }
 0x13b   : > { %5421 = vmatprep.mubr.f32.mxu0 %v8071_v10  ;;  %v6376_v14 = vpack.c.bf16 %v4446_v53, %v4445_v44  ;;  %v1888_v44 = vld [vmem:[#allocation2 + $0xc9] sm:$0xff]  ;;  %v1889_v53 = vld [vmem:[#allocation2 + $0xd9] sm:$0xff] }
 0x13e   : > { %5422 = vmatmul.mubr.f32.gmra.mrb[18].mxu0 %v8075_v39 }
 0x13f   : > { %5456 = vmatprep.mubr.f32.mxu0 %v7741_v48  ;;  %v4447_v48 = vld [vmem:[%s8599_s1 + $0x330] sm:$0xff] }
 0x142   : > { %5457 = vmatmul.mubr.f32.vlgmr.msra.gmra.mrb[0].mxu0 %v7750_v55  ;;  %v6380_v55 = vpack.c.bf16 %v4448_v15, %v4447_v48  ;;  %v1890_v48 = vld [vmem:[#allocation2 + $0xe1] sm:$0xff]  ;;  %v1894_v15 = vld [vmem:[#allocation2 + $0x111] sm:$0xff] }
 0x143   : > { %6371 = vmatpush3.bf16.msra.mxu0 %v6368_v49  ;;  %5459 = vmatprep.mubr.f32.mxu0 %v7752_v56  ;;  %v4449_v56 = vld [vmem:[%s8599_s1 + $0x340] sm:$0xff]  ;;  %v1883_v49 = vld [vmem:[#allocation2 + $0x91] sm:$0xff] }
 0x144   : > { %6373 = vmatprep.subr.bf16.mxu0 %v6372_v43 }
 0x146   : > { %5460 = vmatmul.mubr.f32.gmra.mrb[2].mxu0 %v7762_v62  ;;  %v6384_v62 = vpack.c.bf16 %v4450_v27, %v4449_v56  ;;  %v2098_v56 = vld [vmem:[#allocation2 + $0x3a] sm:$0xff] }
 0x147   : > { %6375 = vmatpush3.bf16.msra.mxu0 %v6372_v43  ;;  %5462 = vmatprep.mubr.f32.mxu0 %v7536_v6  ;;  %v4451_v6 = vld [vmem:[%s8599_s1 + $0x350] sm:$0xff]  ;;  %v8629_v43 = vld [vmem:[#allocation15_spill] sm:$0xff] }
 0x148   : > { %6377 = vmatprep.subr.bf16.mxu0 %v6376_v14 }
 0x14a   : > { %5463 = vmatmul.mubr.f32.gmra.mrb[4].mxu0 %v7772_v8  ;;  %v6388_v8 = vpack.c.bf16 %v4452_v19, %v4451_v6 }
 0x14b   : > { %5465 = vmatprep.mubr.f32.mxu0 %v7774_v11  ;;  %6379 = vmatpush3.bf16.msra.mxu0 %v6376_v14  ;;  %v4453_v11 = vld [vmem:[%s8599_s1 + $0x360] sm:$0xff]  ;;  %v8630_v14 = vld [vmem:[#allocation16_spill] sm:$0xff] }
 0x14c   : > { %6381 = vmatprep.subr.bf16.mxu0 %v6380_v55 }
 0x14e   : > { %5466 = vmatmul.mubr.f32.gmra.mrb[6].mxu0 %v7784_v21  ;;  %v6392_v21 = vpack.c.bf16 %v4454_v20, %v4453_v11 }
 0x14f   : > { %5468 = vmatprep.mubr.f32.mxu0 %v7786_v26  ;;  %6383 = vmatpush3.bf16.msra.mxu0 %v6380_v55  ;;  %v4455_v26 = vld [vmem:[%s8599_s1 + $0x370] sm:$0xff] }
 0x150   : > { %6385 = vmatprep.subr.bf16.mxu0 %v6384_v62  ;;  %v2097_v55 = vld [vmem:[#allocation2 + $0x32] sm:$0xff] }
 0x152   : > { %5469 = vmatmul.mubr.f32.gmra.mrb[8].mxu0 %v7796_v41  ;;  %v6396_v41 = vpack.c.bf16 %v4456_v50, %v4455_v26 }
 0x153   : > { %5471 = vmatprep.mubr.f32.mxu0 %v7798_v45  ;;  %6387 = vmatpush3.bf16.msra.mxu0 %v6384_v62  ;;  %v4457_v45 = vld [vmem:[%s8599_s1 + $0x380] sm:$0xff] }
 0x154   : > { %6389 = vmatprep.subr.bf16.mxu0 %v6388_v8 }
 0x156   : > { %5472 = vmatmul.mubr.f32.gmra.mrb[10].mxu0 %v7808_v51  ;;  %v6400_v51 = vpack.c.bf16 %v4458_v24, %v4457_v45 }
 0x157   : > { %5474 = vmatprep.mubr.f32.mxu0 %v7810_v52  ;;  %6391 = vmatpush3.bf16.msra.mxu0 %v6388_v8  ;;  %v4459_v52 = vld [vmem:[%s8599_s1 + $0x390] sm:$0xff] }
 0x158   : > { %6393 = vmatprep.subr.bf16.mxu0 %v6392_v21 }
 0x15a   : > { %5475 = vmatmul.mubr.f32.gmra.mrb[12].mxu0 %v7820_v1  ;;  %v4460_v1 = vld [vmem:[%s8599_s1 + $0x398] sm:$0xff] }
 0x15b   : > { %5477 = vmatprep.mubr.f32.mxu0 %v7822_v2  ;;  %6395 = vmatpush3.bf16.msra.mxu0 %v6392_v21  ;;  %v6404_v2 = vpack.c.bf16 %v4460_v1, %v4459_v52 }
 0x15c   : > { %6397 = vmatprep.subr.bf16.mxu0 %v6396_v41 }
 0x15e   : > { %5478 = vmatmul.mubr.f32.gmra.mrb[14].mxu0 %v7826_v12  ;;  %v4461_v12 = vld [vmem:[%s8599_s1 + $0x3a0] sm:$0xff] }
 0x15f   : > { %5480 = vmatprep.mubr.f32.mxu0 %v7828_v17  ;;  %6399 = vmatpush3.bf16.msra.mxu0 %v6396_v41  ;;  %v4462_v17 = vld [vmem:[%s8599_s1 + $0x3a8] sm:$0xff] }
 0x160   : > { %6401 = vmatprep.subr.bf16.mxu0 %v6400_v51 }
 0x162   : > { %5481 = vmatmul.mubr.f32.gmra.mrb[16].mxu0 %v7832_v18  ;;  %v6408_v18 = vpack.c.bf16 %v4462_v17, %v4461_v12 }
 0x163   : > { %5483 = vmatprep.mubr.f32.mxu0 %v8054_v30  ;;  %v4470_v30 = vld [vmem:[%s8599_s1 + $0x3e8] sm:$0xff] }
 0x166   : > { %5484 = vmatmul.mubr.f32.gmra.mrb[18].mxu0 %v8066_v34  ;;  %v1881_v34 = vld [vmem:[#allocation2 + $0x79] sm:$0xff] }
 0x167   : > { %5518 = vmatprep.mubr.f32.mxu0 %v7650_v54  ;;  %v4463_v54 = vld [vmem:[%s8599_s1 + $0x3b0] sm:$0xff] }
 0x16a   : > { %5519 = vmatmul.mubr.f32.vlgmr.msra.gmra.mrb[0].mxu0 %v7660_v58  ;;  %v6412_v58 = vpack.c.bf16 %v4464_v25, %v4463_v54 }
 0x16b   : > { %6403 = vmatpush3.bf16.msra.mxu0 %v6400_v51  ;;  %5521 = vmatprep.mubr.f32.mxu0 %v7662_v59  ;;  %v4465_v59 = vld [vmem:[%s8599_s1 + $0x3c0] sm:$0xff] }
 0x16c   : > { %6405 = vmatprep.subr.bf16.mxu0 %v6404_v2 }
 0x16e   : > { %5522 = vmatmul.mubr.f32.gmra.mrb[2].mxu0 %v7672_v63  ;;  %v6416_v63 = vpack.c.bf16 %v4466_v28, %v4465_v59 }
 0x16f   : > { %6407 = vmatpush3.bf16.msra.mxu0 %v6404_v2  ;;  %5524 = vmatprep.mubr.f32.mxu0 %v7674_v0  ;;  %v4467_v0 = vld [vmem:[%s8599_s1 + $0x3d0] sm:$0xff]  ;;  %v8239_v2 = vld [vmem:[%s8601_s3] ss:$0 sm:$0xff] }
 0x170   : > { %6409 = vmatprep.subr.bf16.mxu0 %v6408_v18 }
 0x172   : > { %5525 = vmatmul.mubr.f32.gmra.mrb[4].mxu0 %v7684_v5  ;;  %v6420_v5 = vpack.c.bf16 %v4468_v29, %v4467_v0 }
 0x173   : > { %5527 = vmatprep.mubr.f32.mxu0 %v7686_v7  ;;  %6411 = vmatpush3.bf16.msra.mxu0 %v6408_v18  ;;  %v4469_v7 = vld [vmem:[%s8599_s1 + $0x3e0] sm:$0xff] }
 0x174   : > { %6413 = vmatprep.subr.bf16.mxu0 %v6412_v58 }
 0x176   : > { %5528 = vmatmul.mubr.f32.gmra.mrb[6].mxu0 %v7696_v13  ;;  %v6424_v13 = vpack.c.bf16 %v4470_v30, %v4469_v7 }
 0x177   : > { %5530 = vmatprep.mubr.f32.mxu0 %v7698_v16  ;;  %6415 = vmatpush3.bf16.msra.mxu0 %v6412_v58  ;;  %v4471_v16 = vld [vmem:[%s8599_s1 + $0x3f0] sm:$0xff] }
 0x178   : > { %6417 = vmatprep.subr.bf16.mxu0 %v6416_v63 }
 0x17a   : > { %5531 = vmatmul.mubr.f32.gmra.mrb[8].mxu0 %v7708_v22  ;;  %v6428_v22 = vpack.c.bf16 %v4472_v4, %v4471_v16 }
 0x17b   : > { %5533 = vmatprep.mubr.f32.mxu0 %v7710_v23  ;;  %6419 = vmatpush3.bf16.msra.mxu0 %v6416_v63  ;;  %v1671_v23 = vld [vmem:[#allocation2 + $0x108] sm:$0xff] }
 0x17c   : > { %6421 = vmatprep.subr.bf16.mxu0 %v6420_v5 }
 0x17e   : > { %5534 = vmatmul.mubr.f32.gmra.mrb[10].mxu0 %v7720_v31  ;;  %v1672_v31 = vld [vmem:[#allocation2 + $0x110] sm:$0xff] }
 0x17f   : > { %5536 = vmatprep.mubr.f32.mxu0 %v7722_v32  ;;  %6423 = vmatpush3.bf16.msra.mxu0 %v6420_v5  ;;  %v1875_v32 = vld [vmem:[#allocation2 + $0x31] sm:$0xff] }
 0x180   : > { %6425 = vmatprep.subr.bf16.mxu0 %v6424_v13 }
 0x182   : > { %5537 = vmatmul.mubr.f32.gmra.mrb[12].mxu0 %v7726_v36  ;;  %v1876_v36 = vld [vmem:[#allocation2 + $0x39] sm:$0xff] }
 0x183   : > { %5539 = vmatprep.mubr.f32.mxu0 %v7728_v37  ;;  %6427 = vmatpush3.bf16.msra.mxu0 %v6424_v13  ;;  %v1878_v37 = vld [vmem:[#allocation2 + $0x51] sm:$0xff] }
 0x184   : > { %6429 = vmatprep.subr.bf16.mxu0 %v6428_v22 }
 0x186   : > { %5540 = vmatmul.mubr.f32.gmra.mrb[14].mxu0 %v7732_v38  ;;  %v1879_v38 = vld [vmem:[#allocation2 + $0x61] sm:$0xff] }
 0x187   : > { %5542 = vmatprep.mubr.f32.mxu0 %v7974_v33  ;;  %6431 = vmatpush3.bf16.msra.mxu0 %v6428_v22  ;;  %v1880_v33 = vld [vmem:[#allocation2 + $0x69] sm:$0xff] }
 0x188   : > { %6433 = vmatprep.subr.bf16.mxu0 %v7856_v60 }
 0x18a   : > { %5543 = vmatmul.mubr.f32.gmra.mrb[16].mxu0 %v7983_v3  ;;  %v8627_v3 = vld [vmem:[#allocation13_spill] sm:$0xff] }
 0x18b   : > { %5545 = vmatprep.mubr.f32.mxu0 %v1671_v23 }
 0x18e   : > { %5546 = vmatmul.mubr.f32.gmra.mrb[18].mxu0 %v1672_v31 }
 0x18f   : > { %5580 = vmatprep.mubr.f32.mxu0 %v1875_v32 }
 0x192   : > { %5581 = vmatmul.mubr.f32.vlgmr.msra.gmra.mrb[0].mxu0 %v1876_v36 }
 0x193   : > { %6435 = vmatpush3.bf16.msra.mxu0 %v7856_v60  ;;  %5583 = vmatprep.mubr.f32.mxu0 %v1877_v57  ;;  %v8628_v60 = vld [vmem:[#allocation14_spill] sm:$0xff] }
 0x194   : > { %6437 = vmatprep.subr.bf16.mxu0 %v7880_v47 }
 0x196   : > { %5584 = vmatmul.mubr.f32.gmra.mrb[2].mxu0 %v1878_v37 }
 0x197   : > { %6439 = vmatpush3.bf16.msra.mxu0 %v7880_v47  ;;  %5586 = vmatprep.mubr.f32.mxu0 %v1879_v38  ;;  %v1886_v47 = vld [vmem:[#allocation2 + $0xb1] sm:$0xff] }
 0x198   : > { %6441 = vmatprep.subr.bf16.mxu0 %v8627_v3 }
 0x19a   : > { %5587 = vmatmul.mubr.f32.gmra.mrb[4].mxu0 %v1880_v33 }
 0x19b   : > { %5589 = vmatprep.mubr.f32.mxu0 %v1881_v34  ;;  %6443 = vmatpush3.bf16.msra.mxu0 %v8627_v3 }
 0x19c   : > { %6445 = vmatprep.subr.bf16.mxu0 %v8628_v60 }
 0x19e   : > { %5590 = vmatmul.mubr.f32.gmra.mrb[6].mxu0 %v1882_v35 }
 0x19f   : > { %5592 = vmatprep.mubr.f32.mxu0 %v1883_v49  ;;  %6447 = vmatpush3.bf16.msra.mxu0 %v8628_v60 }
 0x1a0   : > { %6449 = vmatprep.subr.bf16.mxu0 %v7927_v46 }
 0x1a2   : > { %5593 = vmatmul.mubr.f32.gmra.mrb[8].mxu0 %v1884_v9 }
 0x1a3   : > { %5595 = vmatprep.mubr.f32.mxu0 %v1885_v40  ;;  %6451 = vmatpush3.bf16.msra.mxu0 %v7927_v46  ;;  %v1893_v46 = vld [vmem:[#allocation2 + $0x109] sm:$0xff] }
 0x1a4   : > { %6453 = vmatprep.subr.bf16.mxu0 %v8629_v43 }
 0x1a6   : > { %5596 = vmatmul.mubr.f32.gmra.mrb[10].mxu0 %v1886_v47 }
 0x1a7   : > { %5598 = vmatprep.mubr.f32.mxu0 %v1887_v42  ;;  %6455 = vmatpush3.bf16.msra.mxu0 %v8629_v43 }
 0x1a8   : > { %6457 = vmatprep.subr.bf16.mxu0 %v8630_v14 }
 0x1aa   : > { %5599 = vmatmul.mubr.f32.gmra.mrb[12].mxu0 %v1888_v44 }
 0x1ab   : > { %5601 = vmatprep.mubr.f32.mxu0 %v1889_v53  ;;  %6459 = vmatpush3.bf16.msra.mxu0 %v8630_v14 }
 0x1ac   : > { %6461 = vmatprep.subr.bf16.mxu0 %v7977_v61 }
 0x1ae   : > { %5602 = vmatmul.mubr.f32.gmra.mrb[14].mxu0 %v1890_v48 }
 0x1af   : > { %5604 = vmatprep.mubr.f32.mxu0 %v8071_v10  ;;  %6463 = vmatpush3.bf16.msra.mxu0 %v7977_v61 }
 0x1b2   : > { %5605 = vmatmul.mubr.f32.gmra.mrb[16].mxu0 %v8075_v39 }
 0x1b3   : > { %5607 = vmatprep.mubr.f32.mxu0 %v1893_v46 }
 0x1b6   : > { %5608 = vmatmul.mubr.f32.gmra.mrb[18].mxu0 %v1894_v15 }
 0x1b7   : > { %5642 = vmatprep.mubr.f32.mxu0 %v2097_v55 }
 0x1ba   : > { %5643 = vmatmul.mubr.f32.vlgmr.msra.gmra.mrb[0].mxu0 %v2098_v56 }
 0x1e6   : > { %v5647_v27 = vpop.f32.mrb[0].mxu1 }
 0x1e7   : > { %v2210_v62 = vpop.f32.mrb[1].mxu1 }
 0x1ea   : > { %v5650_v6 = vpop.f32.mrb[2].mxu1 }
 0x1eb   : > { %v2220_v19 = vpop.f32.mrb[3].mxu1 }
 0x1ef   : > { %v5653_v8 = vpop.f32.mrb[4].mxu1 }
 0x1f0   : > { %v2230_v11 = vpop.f32.mrb[5].mxu1 }
 0x1f3   : > { %v5656_v20 = vpop.f32.mrb[6].mxu1 }
 0x1f4   : > { %v2240_v10 = vpop.f32.mrb[7].mxu1 }
 0x1f7   : > { %v5659_v21 = vpop.f32.mrb[8].mxu1 }
 0x1f8   : > { %v2250_v61 = vpop.f32.mrb[9].mxu1 }
 0x1fb   : > { %v5662_v26 = vpop.f32.mrb[10].mxu1 }
 0x1fc   : > { %v2260_v50 = vpop.f32.mrb[11].mxu1 }
 0x1ff   : > { %v8224_v39 = vpop.f32.mrb[12].mxu1 }
 0x200   : > { %v8226_v41 = vpop.f32.mrb[13].mxu1 }
 0x203   : > { %v8228_v45 = vpop.f32.mrb[14].mxu1 }
 0x204   : > { %v8230_v24 = vpop.f32.mrb[15].mxu1 }
 0x207   : > { %v8232_v51 = vpop.f32.mrb[16].mxu1 }
 0x208   : > { %v8234_v52 = vpop.f32.mrb[17].mxu1 }
 0x269   : > { %v5585_v1 = vpop.f32.mrb[2].mxu0 }
 0x26a   : > { %v6768_v12 = vadd.f32 %v5647_v27, %v5585_v1  ;;  %v1988_v17 = vpop.f32.mrb[3].mxu0 }
 0x26b   : > { %v6769_v18 = vadd.f32 %v2210_v62, %v1988_v17 }
 0x26c   : > { %v2329_v54 = vadd.f32 %v6768_v12, %v8239_v2 }
 0x26d   : > { %v2328_v25 = vadd.f32 %v6769_v18, %v8239_v2  ;;  %v5588_v58 = vpop.f32.mrb[4].mxu0 }
 0x26e   : > { %v2349_v59 = vmax.f32 %v2329_v54, 0.0  ;;  %v6770_v28 = vadd.f32 %v5650_v6, %v5588_v58  ;;  %v1998_v63 = vpop.f32.mrb[5].mxu0 }
 0x26f   : > { %v2348_v0 = vmax.f32 %v2328_v25, 0.0  ;;  %v6771_v29 = vadd.f32 %v2220_v19, %v1998_v63 }
 0x270   : > { %2369 = vst [vmem:[#allocation3 + $0x21] sm:$0xff] %v2349_v59  ;;  %v2331_v5 = vadd.f32 %v6770_v28, %v8239_v2 }
 0x271   : > { %2368 = vst [vmem:[#allocation3 + $0x19] sm:$0xff] %v2348_v0  ;;  %v2330_v7 = vadd.f32 %v6771_v29, %v8239_v2  ;;  %v5591_v30 = vpop.f32.mrb[6].mxu0 }
 0x272   : > { %v2351_v13 = vmax.f32 %v2331_v5, 0.0  ;;  %v6772_v16 = vadd.f32 %v5653_v8, %v5591_v30  ;;  %v2008_v4 = vpop.f32.mrb[7].mxu0 }
 0x273   : > { %v2350_v22 = vmax.f32 %v2330_v7, 0.0  ;;  %v6773_v23 = vadd.f32 %v2230_v11, %v2008_v4 }
 0x274   : > { %2371 = vst [vmem:[#allocation3 + $0x39] sm:$0xff] %v2351_v13  ;;  %v2333_v31 = vadd.f32 %v6772_v16, %v8239_v2 }
 0x275   : > { %2370 = vst [vmem:[#allocation3 + $0x31] sm:$0xff] %v2350_v22  ;;  %v2332_v32 = vadd.f32 %v6773_v23, %v8239_v2  ;;  %v5594_v36 = vpop.f32.mrb[8].mxu0 }
 0x276   : > { %v2353_v57 = vmax.f32 %v2333_v31, 0.0  ;;  %v6774_v37 = vadd.f32 %v5656_v20, %v5594_v36  ;;  %v2018_v38 = vpop.f32.mrb[9].mxu0 }
 0x277   : > { %v2352_v33 = vmax.f32 %v2332_v32, 0.0  ;;  %v6775_v3 = vadd.f32 %v2240_v10, %v2018_v38 }
 0x278   : > { %2373 = vst [vmem:[#allocation3 + $0x51] sm:$0xff] %v2353_v57  ;;  %v2335_v34 = vadd.f32 %v6774_v37, %v8239_v2 }
 0x279   : > { %2372 = vst [vmem:[#allocation3 + $0x49] sm:$0xff] %v2352_v33  ;;  %v2334_v35 = vadd.f32 %v6775_v3, %v8239_v2  ;;  %v5597_v49 = vpop.f32.mrb[10].mxu0 }
 0x27a   : > { %v2355_v60 = vmax.f32 %v2335_v34, 0.0  ;;  %v6776_v9 = vadd.f32 %v5659_v21, %v5597_v49  ;;  %v2028_v40 = vpop.f32.mrb[11].mxu0 }
 0x27b   : > { %v2354_v47 = vmax.f32 %v2334_v35, 0.0  ;;  %v6777_v42 = vadd.f32 %v2250_v61, %v2028_v40 }
 0x27c   : > { %2375 = vst [vmem:[#allocation3 + $0x69] sm:$0xff] %v2355_v60  ;;  %v2337_v43 = vadd.f32 %v6776_v9, %v8239_v2 }
 0x27d   : > { %2374 = vst [vmem:[#allocation3 + $0x61] sm:$0xff] %v2354_v47  ;;  %v2336_v44 = vadd.f32 %v6777_v42, %v8239_v2  ;;  %v5600_v53 = vpop.f32.mrb[12].mxu0 }
 0x27e   : > { %v2357_v14 = vmax.f32 %v2337_v43, 0.0  ;;  %v6778_v48 = vadd.f32 %v5662_v26, %v5600_v53  ;;  %v2038_v46 = vpop.f32.mrb[13].mxu0 }
 0x27f   : > { %v2356_v15 = vmax.f32 %v2336_v44, 0.0  ;;  %v6779_v55 = vadd.f32 %v2260_v50, %v2038_v46 }
 0x280   : > { %2377 = vst [vmem:[#allocation3 + $0x81] sm:$0xff] %v2357_v14  ;;  %v2339_v56 = vadd.f32 %v6778_v48, %v8239_v2 }
 0x281   : > { %2376 = vst [vmem:[#allocation3 + $0x79] sm:$0xff] %v2356_v15  ;;  %v2338_v27 = vadd.f32 %v6779_v55, %v8239_v2  ;;  %v5603_v62 = vpop.f32.mrb[14].mxu0 }
 0x282   : > { %v2359_v6 = vmax.f32 %v2339_v56, 0.0  ;;  %v6780_v19 = vadd.f32 %v8224_v39, %v5603_v62  ;;  %v2048_v8 = vpop.f32.mrb[15].mxu0 }
 0x283   : > { %v2358_v11 = vmax.f32 %v2338_v27, 0.0  ;;  %v6781_v20 = vadd.f32 %v8226_v41, %v2048_v8 }
 0x284   : > { %2379 = vst [vmem:[#allocation3 + $0x99] sm:$0xff] %v2359_v6  ;;  %v2341_v10 = vadd.f32 %v6780_v19, %v8239_v2 }
 0x285   : > { %2378 = vst [vmem:[#allocation3 + $0x91] sm:$0xff] %v2358_v11  ;;  %v2340_v21 = vadd.f32 %v6781_v20, %v8239_v2  ;;  %v5606_v61 = vpop.f32.mrb[16].mxu0 }
 0x286   : > { %v2361_v26 = vmax.f32 %v2341_v10, 0.0  ;;  %v6782_v50 = vadd.f32 %v8228_v45, %v5606_v61  ;;  %v2058_v1 = vpop.f32.mrb[17].mxu0 }
 0x287   : > { %v2360_v12 = vmax.f32 %v2340_v21, 0.0  ;;  %v6783_v17 = vadd.f32 %v8230_v24, %v2058_v1 }
 0x288   : > { %2381 = vst [vmem:[#allocation3 + $0xb1] sm:$0xff] %v2361_v26  ;;  %v2343_v39 = vadd.f32 %v6782_v50, %v8239_v2 }
 0x289   : > { %2380 = vst [vmem:[#allocation3 + $0xa9] sm:$0xff] %v2360_v12  ;;  %v2342_v41 = vadd.f32 %v6783_v17, %v8239_v2  ;;  %v5609_v18 = vpop.f32.mrb[18].mxu0 }
 0x28a   : > { %v2363_v54 = vmax.f32 %v2343_v39, 0.0  ;;  %v6784_v25 = vadd.f32 %v8232_v51, %v5609_v18  ;;  %v2068_v58 = vpop.f32.mrb[19].mxu0 }
 0x28b   : > { %v2362_v59 = vmax.f32 %v2342_v41, 0.0  ;;  %v6785_v28 = vadd.f32 %v8234_v52, %v2068_v58  ;;  %v7279_v52 = vmov (!%p4490_p3), 0.0  }
 0x28c   : > { %2383 = vst [vmem:[#allocation3 + $0xc9] sm:$0xff] %v2363_v54  ;;  %v2345_v45 = vadd.f32 %v6784_v25, %v8239_v2 }
 0x28d   : > { %2382 = vst [vmem:[#allocation3 + $0xc1] sm:$0xff] %v2362_v59  ;;  %v2344_v24 = vadd.f32 %v6785_v28, %v8239_v2  ;;  %v5644_v63 = vpop.f32.mrb[0].mxu0  ;;  %2409 = sbr.rel (%p4490_p3) target bundleno = 661 (0x295), region = 81 }
 0x28e   : > { %v2365_v0 = vmax.f32 %v2345_v45, 0.0  ;;  %v2327_v29 = vadd.f32 %v5644_v63, %v8239_v2  ;;  %v2200_v5 = vpop.f32.mrb[1].mxu0 }
 0x28f   : > { %v2364_v7 = vmax.f32 %v2344_v24, 0.0  ;;  %v2326_v30 = vadd.f32 %v8239_v2, %v2200_v5 }
 0x290   : > { %2385 = vst [vmem:[#allocation3 + $0xe1] sm:$0xff] %v2365_v0  ;;  %v2347_v51 = vmax.f32 %v2327_v29, 0.0 }
 0x291   : > { %2384 = vst [vmem:[#allocation3 + $0xd9] sm:$0xff] %v2364_v7  ;;  %v2346_v13 = vmax.f32 %v2326_v30, 0.0 }
 0x292   : > { %2367 = vst [vmem:[#allocation3 + $0x9] sm:$0xff] %v2347_v51 }
 0x293   : > { %2366 = vst [vmem:[#allocation3 + $0x1] sm:$0xff] %v2346_v13  ;;  %2412 = vst [vmem:[#allocation3 + $0x10] sm:$0xff] (!%p4490_p3), %v7279_v52 }
 0x294   : > { %2410 = vst [vmem:[#allocation3] sm:$0xff] %v7279_v52  ;;  %2411 = vst [vmem:[#allocation3 + $0x8] sm:$0xff] %v7279_v52 }
 0x295 PF: > { %p4491_p8 = scmp.ne.s32.totalorder %s7257_s21, 1 }
 0x296   : > { %v7280_v16 = vmov (!%p4491_p8), 0.0  }
 0x297   : > { %2416 = sbr.rel (%p4491_p8) target bundleno = 670 (0x29e), region = 85  ;;  %2418 = vst [vmem:[#allocation3 + $0xd8] sm:$0xff] (!%p4491_p8), %v7280_v16  ;;  %2419 = vst [vmem:[#allocation3 + $0xe0] sm:$0xff] (!%p4491_p8), %v7280_v16 }
 0x298   : > { %2420 = vst [vmem:[#allocation3 + $0xe8] sm:$0xff] (!%p4491_p8), %v7280_v16 }
 0x29e PF: > { %v2470_v2 = vld [vmem:[#allocation5 + $0x80] sm:$0xff]  ;;  %v2471_v4 = vld [vmem:[#allocation5 + $0x88] sm:$0xff]  ;;  %v2472_v22 = vld [vmem:[#allocation5 + $0x90] sm:$0xff]  ;;  %s4501_s9 = sshll.u32 %s7257_s21, 4  ;;  %s4496_s30 = sshll.u32 %s7261_s22, 5 }
 0x29f   : > { %v6464_v23 = vpack.c.bf16 %v2471_v4, %v2470_v2  ;;  %v2473_v31 = vld [vmem:[#allocation5 + $0x98] sm:$0xff]  ;;  %v2474_v36 = vld [vmem:[#allocation5 + $0xa0] sm:$0xff]  ;;  %v2475_v57 = vld [vmem:[#allocation5 + $0xa8] sm:$0xff]  ;;  %s4237_s16 = sadd.s32 %s4501_s9, %s4496_s30  ;;  %s4240_s22 = sshll.u32 %s7472_s12, 4  ;;  %s8540_s22 = int_to_ptr.vmem [resolvable:$true] %s4240_s22 }
 0x2a0   : > { %v6468_v32 = vpack.c.bf16 %v2473_v31, %v2472_v22  ;;  %v6472_v37 = vpack.c.bf16 %v2475_v57, %v2474_v36  ;;  %v2453_v38 = vld [vmem:[#allocation3 + $0x1] sm:$0xff]  ;;  %v2478_v35 = vld [vmem:[#allocation5 + $0xc0] sm:$0xff]  ;;  %v2479_v49 = vld [vmem:[#allocation5 + $0xc8] sm:$0xff]  ;;  %s4497_s21 = sshll.u32 %s4237_s16, 7  ;;  %s8546_s11 = scalar_lea.sflag [#allocation7], %s203_s26 }
 0x2a1   : > { %6465 = vmatprep.subr.bf16.mxu1 %v6464_v23  ;;  %v2476_v33 = vld [vmem:[#allocation5 + $0xb0] sm:$0xff]  ;;  %v2477_v3 = vld [vmem:[#allocation5 + $0xb8] sm:$0xff]  ;;  %5704 = vmatprep.mubr.f32.mxu1 %v2453_v38  ;;  %v6480_v60 = vpack.c.bf16 %v2479_v49, %v2478_v35  ;;  %v2482_v42 = vld [vmem:[#allocation5 + $0xe0] sm:$0xff]  ;;  %s8538_s14 = scalar_lea.hbm %s8603_s5, %s4497_s21  ;;  %s7173_s17 = scalar_lea.vmem %s8540_s22, 2048 }
 0x2a2   : > { %6467 = vmatpush3.bf16.msra.mxu1 %v6464_v23  ;;  %v6476_v34 = vpack.c.bf16 %v2477_v3, %v2476_v33  ;;  %v2480_v9 = vld [vmem:[#allocation5 + $0xd0] sm:$0xff]  ;;  %v2481_v40 = vld [vmem:[#allocation5 + $0xd8] sm:$0xff]  ;;  %v2483_v43 = vld [vmem:[#allocation5 + $0xe8] sm:$0xff]  ;;  %p7174_p10 = scmp.ne.s32.totalorder %s8540_s22, %s7173_s17  ;;  %p8631_p12 = scmp.ne.s32.totalorder %s8616_s7, 0 }
 0x2a3   : > { %6469 = vmatprep.subr.bf16.mxu1 %v6468_v32  ;;  %v6484_v47 = vpack.c.bf16 %v2481_v40, %v2480_v9  ;;  %v6488_v44 = vpack.c.bf16 %v2483_v43, %v2482_v42  ;;  %v2484_v53 = vld [vmem:[#allocation5 + $0xf0] sm:$0xff]  ;;  %v2485_v14 = vld [vmem:[#allocation5 + $0xf8] sm:$0xff]  ;;  %v2437_v46 = vld [vmem:[#allocation5] sm:$0xff]  ;;  %s7281_s27 = smov [#allocation8]  }
 0x2a4   : > { %v6492_v48 = vpack.c.bf16 %v2485_v14, %v2484_v53  ;;  %v2438_v15 = vld [vmem:[#allocation5 + $0x8] sm:$0xff]  ;;  %v2439_v56 = vld [vmem:[#allocation5 + $0x10] sm:$0xff]  ;;  %v2440_v27 = vld [vmem:[#allocation5 + $0x18] sm:$0xff]  ;;  %p7175_p0 = pnand %p7174_p10, %p8631_p12  ;;  %s7177_s6 = sshll.u32 %s7281_s27, 4  ;;  %s7178_s6 = int_to_ptr.vmem [resolvable:$false] %s7177_s6 }
 0x2a5   : > { %v6496_v55 = vpack.c.bf16 %v2438_v15, %v2437_v46  ;;  %v2454_v62 = vld [vmem:[#allocation3 + $0x9] sm:$0xff]  ;;  %v8269_v6 = vld [vmem:[#allocation3 + $0x19] sm:$0xff]  ;;  %v6500_v19 = vpack.c.bf16 %v2440_v27, %v2439_v56  ;;  %v8272_v20 = vld [vmem:[#allocation3 + $0x21] sm:$0xff]  ;;  %s7179_s9 = scalar_lea.vmem %s7178_s6, 4096  ;;  %p7180_p5 = scmp.lt.s32.totalorder %s8540_s22, %s7178_s6 }
 0x2a6   : > { %6471 = vmatpush3.bf16.msra.mxu1 %v6468_v32  ;;  %v2441_v8 = vld [vmem:[#allocation5 + $0x20] sm:$0xff]  ;;  %v2442_v11 = vld [vmem:[#allocation5 + $0x28] sm:$0xff]  ;;  %v2443_v61 = vld [vmem:[#allocation5 + $0x30] sm:$0xff]  ;;  %p7176_p2 = pneg %p7175_p0  ;;  %p7181_p6 = scmp.lt.s32.totalorder %s7179_s9, %s7173_s17 }
 0x2a7   : > { %6473 = vmatprep.subr.bf16.mxu1 %v6472_v37  ;;  %v8274_v10 = vld [vmem:[#allocation3 + $0x31] sm:$0xff]  ;;  %v6504_v21 = vpack.c.bf16 %v2442_v11, %v2441_v8  ;;  %v2444_v26 = vld [vmem:[#allocation5 + $0x38] sm:$0xff]  ;;  %v8278_v50 = vld [vmem:[#allocation3 + $0x39] sm:$0xff] }
 0x2a8   : > { %v8280_v1 = vld [vmem:[#allocation3 + $0x49] sm:$0xff]  ;;  %v6508_v12 = vpack.c.bf16 %v2444_v26, %v2443_v61  ;;  %v2446_v39 = vld [vmem:[#allocation5 + $0x48] sm:$0xff]  ;;  %v8286_v18 = vld [vmem:[#allocation3 + $0x61] sm:$0xff]  ;;  %p7182_p7 = por %p7181_p6, %p7180_p5 }
 0x2a9   : > { %v2445_v17 = vld [vmem:[#allocation5 + $0x40] sm:$0xff]  ;;  %v2447_v25 = vld [vmem:[#allocation5 + $0x50] sm:$0xff]  ;;  %v2448_v58 = vld [vmem:[#allocation5 + $0x58] sm:$0xff] }
 0x2aa   : > { %6475 = vmatpush3.bf16.msra.mxu1 %v6472_v37  ;;  %v8284_v41 = vld [vmem:[#allocation3 + $0x51] sm:$0xff]  ;;  %v6512_v54 = vpack.c.bf16 %v2446_v39, %v2445_v17  ;;  %v8290_v59 = vld [vmem:[#allocation3 + $0x69] sm:$0xff]  ;;  %v8292_v28 = vld [vmem:[#allocation3 + $0x79] sm:$0xff]  ;;  %v6516_v45 = vpack.c.bf16 %v2448_v58, %v2447_v25  ;;  %p7183_p9 = pnand %p7182_p7, %p7176_p2 }
 0x2ab   : > { %6477 = vmatprep.subr.bf16.mxu1 %v6476_v34  ;;  %v2449_v24 = vld [vmem:[#allocation5 + $0x60] sm:$0xff]  ;;  %v2450_v63 = vld [vmem:[#allocation5 + $0x68] sm:$0xff]  ;;  %v8296_v0 = vld [vmem:[#allocation3 + $0x81] sm:$0xff] }
 0x2ac   : > { %v8298_v29 = vld [vmem:[#allocation3 + $0x91] sm:$0xff]  ;;  %v6520_v5 = vpack.c.bf16 %v2450_v63, %v2449_v24  ;;  %v2451_v7 = vld [vmem:[#allocation5 + $0x70] sm:$0xff]  ;;  %v2452_v30 = vld [vmem:[#allocation5 + $0x78] sm:$0xff] }
 0x2ad   : > { %v8302_v51 = vld [vmem:[#allocation3 + $0x99] sm:$0xff]  ;;  %v8304_v13 = vld [vmem:[#allocation3 + $0xa9] sm:$0xff]  ;;  %v6524_v52 = vpack.c.bf16 %v2452_v30, %v2451_v7  ;;  %v8308_v4 = vld [vmem:[#allocation3 + $0xb1] sm:$0xff] }
 0x2ae   : > { %6479 = vmatpush3.bf16.msra.mxu1 %v6476_v34  ;;  %v2793_v16 = vld [vmem:[#allocation5 + $0x100] sm:$0xff]  ;;  %v2794_v2 = vld [vmem:[#allocation5 + $0x108] sm:$0xff]  ;;  %v2421_v22 = vld [vmem:[#allocation3] sm:$0xff] }
 0x2af   : > { %6481 = vmatprep.subr.bf16.mxu1 %v6480_v60  ;;  %v6528_v23 = vpack.c.bf16 %v2794_v2, %v2793_v16  ;;  %v2795_v31 = vld [vmem:[#allocation5 + $0x110] sm:$0xff]  ;;  %v2796_v32 = vld [vmem:[#allocation5 + $0x118] sm:$0xff]  ;;  %v8311_v57 = vld [vmem:[#allocation3 + $0x18] sm:$0xff] }
 0x2b0   : > { %v2422_v36 = vld [vmem:[#allocation3 + $0x8] sm:$0xff]  ;;  %v6532_v37 = vpack.c.bf16 %v2796_v32, %v2795_v31  ;;  %v2797_v38 = vld [vmem:[#allocation5 + $0x120] sm:$0xff]  ;;  %v2798_v33 = vld [vmem:[#allocation5 + $0x128] sm:$0xff] }
 0x2b1   : > { %v8314_v3 = vld [vmem:[#allocation3 + $0x20] sm:$0xff]  ;;  %v8316_v34 = vld [vmem:[#allocation3 + $0x30] sm:$0xff]  ;;  %v6536_v35 = vpack.c.bf16 %v2798_v33, %v2797_v38  ;;  %v8320_v9 = vld [vmem:[#allocation3 + $0x38] sm:$0xff] }
 0x2b2   : > { %6483 = vmatpush3.bf16.msra.mxu1 %v6480_v60  ;;  %v2799_v49 = vld [vmem:[#allocation5 + $0x130] sm:$0xff]  ;;  %v2800_v60 = vld [vmem:[#allocation5 + $0x138] sm:$0xff]  ;;  %v2801_v42 = vld [vmem:[#allocation5 + $0x140] sm:$0xff] }
 0x2b3   : > { %6485 = vmatprep.subr.bf16.mxu1 %v6484_v47  ;;  %v8322_v40 = vld [vmem:[#allocation3 + $0x48] sm:$0xff]  ;;  %v2802_v43 = vld [vmem:[#allocation5 + $0x148] sm:$0xff]  ;;  %v8328_v53 = vld [vmem:[#allocation3 + $0x60] sm:$0xff] }
 0x2b4   : > { %v6544_v14 = vpack.c.bf16 %v2802_v43, %v2801_v42  ;;  %v2804_v46 = vld [vmem:[#allocation5 + $0x158] sm:$0xff]  ;;  %v2805_v27 = vld [vmem:[#allocation5 + $0x160] sm:$0xff]  ;;  %v8344_v26 = vld [vmem:[#allocation3 + $0x98] sm:$0xff] }
 0x2b5   : > { %v8332_v15 = vld [vmem:[#allocation3 + $0x68] sm:$0xff]  ;;  %v8340_v8 = vld [vmem:[#allocation3 + $0x90] sm:$0xff]  ;;  %v2990_v24 = vld [vmem:[#allocation5 + $0x190] sm:$0xff] }
 0x2b6   : > { %6487 = vmatpush3.bf16.msra.mxu1 %v6484_v47  ;;  %v6540_v47 = vpack.c.bf16 %v2800_v60, %v2799_v49  ;;  %v2808_v61 = vld [vmem:[#allocation5 + $0x178] sm:$0xff]  ;;  %v2988_v39 = vld [vmem:[#allocation5 + $0x180] sm:$0xff]  ;;  %v8353_v7 = vld [vmem:[#allocation3 + $0x1a] sm:$0xff] }
 0x2b7   : > { %6489 = vmatprep.subr.bf16.mxu1 %v6488_v44  ;;  %v8350_v25 = vld [vmem:[#allocation3 + $0xb0] sm:$0xff]  ;;  %v2776_v58 = vld [vmem:[#allocation3 + $0x2] sm:$0xff]  ;;  %v2993_v16 = vld [vmem:[#allocation5 + $0x1a8] sm:$0xff] }
 0x2b8   : > { %v2991_v63 = vld [vmem:[#allocation5 + $0x198] sm:$0xff]  ;;  %v2994_v31 = vld [vmem:[#allocation5 + $0x1b0] sm:$0xff]  ;;  %v2996_v33 = vld [vmem:[#allocation5 + $0x1c0] sm:$0xff] }
 0x2b9   : > { %v6564_v30 = vpack.c.bf16 %v2991_v63, %v2990_v24  ;;  %v8356_v2 = vld [vmem:[#allocation3 + $0x22] sm:$0xff]  ;;  %v8368_v49 = vld [vmem:[#allocation3 + $0x52] sm:$0xff] }
 0x2ba   : > { %6491 = vmatpush3.bf16.msra.mxu1 %v6488_v44  ;;  %v8326_v44 = vld [vmem:[#allocation3 + $0x50] sm:$0xff]  ;;  %v2995_v32 = vld [vmem:[#allocation5 + $0x1b8] sm:$0xff]  ;;  %v2998_v42 = vld [vmem:[#allocation5 + $0x1d0] sm:$0xff] }
 0x2bb   : > { %6493 = vmatprep.subr.bf16.mxu1 %v6492_v48  ;;  %v6572_v38 = vpack.c.bf16 %v2995_v32, %v2994_v31  ;;  %v8370_v60 = vld [vmem:[#allocation3 + $0x62] sm:$0xff]  ;;  %v3183_v24 = vld [vmem:[#allocation5 + $0x208] sm:$0xff] }
 0x2bc   : > { %v2999_v43 = vld [vmem:[#allocation5 + $0x1d8] sm:$0xff]  ;;  %v8392_v63 = vld [vmem:[#allocation3 + $0xb2] sm:$0xff] }
 0x2bd   : > { %v3187_v31 = vld [vmem:[#allocation5 + $0x228] sm:$0xff] }
 0x2be   : > { %6495 = vmatpush3.bf16.msra.mxu1 %v6492_v48  ;;  %v2803_v48 = vld [vmem:[#allocation5 + $0x150] sm:$0xff] }
 0x2bf   : > { %6497 = vmatprep.subr.bf16.mxu1 %v6496_v55  ;;  %v6548_v56 = vpack.c.bf16 %v2804_v46, %v2803_v48  ;;  %v8376_v48 = vld [vmem:[#allocation3 + $0x7a] sm:$0xff]  ;;  %v6580_v46 = vpack.c.bf16 %v2999_v43, %v2998_v42  ;;  %v3193_v43 = vld [vmem:[#allocation5 + $0x258] sm:$0xff] }
 0x2c0   : > { %v3192_v42 = vld [vmem:[#allocation5 + $0x250] sm:$0xff] }
 0x2c1   : > { %5705 = vmatmul.mubr.f32.vlgmr.msra.gmra.mrb[18].mxu1 %v2454_v62  ;;  %v2806_v62 = vld [vmem:[#allocation5 + $0x168] sm:$0xff] }
 0x2c2   : > { %6499 = vmatpush3.bf16.msra.mxu1 %v6496_v55  ;;  %5707 = vmatprep.mubr.f32.mxu1 %v8269_v6  ;;  %v8334_v55 = vld [vmem:[#allocation3 + $0x78] sm:$0xff]  ;;  %v6552_v11 = vpack.c.bf16 %v2806_v62, %v2805_v27  ;;  %v8380_v62 = vld [vmem:[#allocation3 + $0x82] sm:$0xff] }
 0x2c3   : > { %6501 = vmatprep.subr.bf16.mxu1 %v6500_v19  ;;  %v3001_v27 = vld [vmem:[#allocation5 + $0x1e8] sm:$0xff] }
 0x2c5   : > { %5708 = vmatmul.mubr.f32.gmra.mrb[20].mxu1 %v8272_v20 }
 0x2c6   : > { %6503 = vmatpush3.bf16.msra.mxu1 %v6500_v19  ;;  %5710 = vmatprep.mubr.f32.mxu1 %v8274_v10  ;;  %v8338_v19 = vld [vmem:[#allocation3 + $0x80] sm:$0xff] }
 0x2c7   : > { %6505 = vmatprep.subr.bf16.mxu1 %v6504_v21 }
 0x2c9   : > { %5711 = vmatmul.mubr.f32.gmra.mrb[22].mxu1 %v8278_v50 }
 0x2ca   : > { %6507 = vmatpush3.bf16.msra.mxu1 %v6504_v21  ;;  %5713 = vmatprep.mubr.f32.mxu1 %v8280_v1  ;;  %v2807_v21 = vld [vmem:[#allocation5 + $0x170] sm:$0xff] }
 0x2cb   : > { %6509 = vmatprep.subr.bf16.mxu1 %v6508_v12  ;;  %v6556_v17 = vpack.c.bf16 %v2808_v61, %v2807_v21  ;;  %v3002_v61 = vld [vmem:[#allocation5 + $0x1f0] sm:$0xff] }
 0x2cd   : > { %5714 = vmatmul.mubr.f32.gmra.mrb[24].mxu1 %v8284_v41 }
 0x2ce   : > { %6511 = vmatpush3.bf16.msra.mxu1 %v6508_v12  ;;  %5716 = vmatprep.mubr.f32.mxu1 %v8286_v18  ;;  %v8346_v12 = vld [vmem:[#allocation3 + $0xa8] sm:$0xff] }
 0x2cf   : > { %6513 = vmatprep.subr.bf16.mxu1 %v6512_v54 }
 0x2d1   : > { %5717 = vmatmul.mubr.f32.gmra.mrb[26].mxu1 %v8290_v59 }
 0x2d2   : > { %6515 = vmatpush3.bf16.msra.mxu1 %v6512_v54  ;;  %5719 = vmatprep.mubr.f32.mxu1 %v8292_v28  ;;  %v2989_v54 = vld [vmem:[#allocation5 + $0x188] sm:$0xff] }
 0x2d3   : > { %6517 = vmatprep.subr.bf16.mxu1 %v6516_v45 }
 0x2d5   : > { %5720 = vmatmul.mubr.f32.gmra.mrb[28].mxu1 %v8296_v0 }
 0x2d6   : > { %6519 = vmatpush3.bf16.msra.mxu1 %v6516_v45  ;;  %5722 = vmatprep.mubr.f32.mxu1 %v8298_v29  ;;  %v6560_v45 = vpack.c.bf16 %v2989_v54, %v2988_v39  ;;  %v8386_v39 = vld [vmem:[#allocation3 + $0x9a] sm:$0xff]  ;;  %v8388_v54 = vld [vmem:[#allocation3 + $0xaa] sm:$0xff] }
 0x2d7   : > { %6521 = vmatprep.subr.bf16.mxu1 %v6520_v5 }
 0x2d9   : > { %5723 = vmatmul.mubr.f32.gmra.mrb[30].mxu1 %v8302_v51 }
 0x2da   : > { %6523 = vmatpush3.bf16.msra.mxu1 %v6520_v5  ;;  %5725 = vmatprep.mubr.f32.mxu1 %v8304_v13  ;;  %v2777_v5 = vld [vmem:[#allocation3 + $0xa] sm:$0xff] }
 0x2db   : > { %6525 = vmatprep.subr.bf16.mxu1 %v6524_v52 }
 0x2dd   : > { %5726 = vmatmul.mubr.f32.gmra.mrb[32].mxu1 %v8308_v4 }
 0x2de   : > { %6527 = vmatpush3.bf16.msra.mxu1 %v6524_v52  ;;  %5760 = vmatprep.mubr.f32.mxu1 %v2421_v22  ;;  %v2992_v52 = vld [vmem:[#allocation5 + $0x1a0] sm:$0xff] }
 0x2df   : > { %6529 = vmatprep.subr.bf16.mxu1 %v6528_v23  ;;  %v8358_v22 = vld [vmem:[#allocation3 + $0x32] sm:$0xff] }
 0x2e1   : > { %5761 = vmatmul.mubr.f32.vlgmr.msra.gmra.mrb[18].mxu1 %v2422_v36  ;;  %v8362_v36 = vld [vmem:[#allocation3 + $0x3a] sm:$0xff] }
 0x2e2   : > { %6531 = vmatpush3.bf16.msra.mxu1 %v6528_v23  ;;  %5763 = vmatprep.mubr.f32.mxu1 %v8311_v57  ;;  %v6568_v23 = vpack.c.bf16 %v2993_v16, %v2992_v52  ;;  %v3185_v52 = vld [vmem:[#allocation5 + $0x218] sm:$0xff] }
 0x2e3   : > { %6533 = vmatprep.subr.bf16.mxu1 %v6532_v37 }
 0x2e5   : > { %5764 = vmatmul.mubr.f32.gmra.mrb[20].mxu1 %v8314_v3 }
 0x2e6   : > { %6535 = vmatpush3.bf16.msra.mxu1 %v6532_v37  ;;  %5766 = vmatprep.mubr.f32.mxu1 %v8316_v34  ;;  %v8364_v37 = vld [vmem:[#allocation3 + $0x4a] sm:$0xff] }
 0x2e7   : > { %6537 = vmatprep.subr.bf16.mxu1 %v6536_v35 }
 0x2e9   : > { %5767 = vmatmul.mubr.f32.gmra.mrb[22].mxu1 %v8320_v9 }
 0x2ea   : > { %6539 = vmatpush3.bf16.msra.mxu1 %v6536_v35  ;;  %5769 = vmatprep.mubr.f32.mxu1 %v8322_v40  ;;  %v2997_v35 = vld [vmem:[#allocation5 + $0x1c8] sm:$0xff] }
 0x2eb   : > { %6541 = vmatprep.subr.bf16.mxu1 %v6540_v47 }
 0x2ed   : > { %5770 = vmatmul.mubr.f32.gmra.mrb[24].mxu1 %v8326_v44 }
 0x2ee   : > { %6543 = vmatpush3.bf16.msra.mxu1 %v6540_v47  ;;  %5772 = vmatprep.mubr.f32.mxu1 %v8328_v53  ;;  %v6576_v47 = vpack.c.bf16 %v2997_v35, %v2996_v33  ;;  %v3189_v33 = vld [vmem:[#allocation5 + $0x238] sm:$0xff]  ;;  %v3190_v35 = vld [vmem:[#allocation5 + $0x240] sm:$0xff] }
 0x2ef   : > { %6545 = vmatprep.subr.bf16.mxu1 %v6544_v14 }
 0x2f1   : > { %5773 = vmatmul.mubr.f32.gmra.mrb[26].mxu1 %v8332_v15 }
 0x2f2   : > { %6547 = vmatpush3.bf16.msra.mxu1 %v6544_v14  ;;  %5775 = vmatprep.mubr.f32.mxu1 %v8334_v55  ;;  %v8374_v14 = vld [vmem:[#allocation3 + $0x6a] sm:$0xff] }
 0x2f3   : > { %6549 = vmatprep.subr.bf16.mxu1 %v6548_v56 }
 0x2f5   : > { %5776 = vmatmul.mubr.f32.gmra.mrb[28].mxu1 %v8338_v19 }
 0x2f6   : > { %6551 = vmatpush3.bf16.msra.mxu1 %v6548_v56  ;;  %5778 = vmatprep.mubr.f32.mxu1 %v8340_v8  ;;  %v3000_v56 = vld [vmem:[#allocation5 + $0x1e0] sm:$0xff] }
 0x2f7   : > { %6553 = vmatprep.subr.bf16.mxu1 %v6552_v11  ;;  %v6584_v21 = vpack.c.bf16 %v3001_v27, %v3000_v56  ;;  %v3194_v56 = vld [vmem:[#allocation5 + $0x260] sm:$0xff]  ;;  %v3195_v27 = vld [vmem:[#allocation5 + $0x268] sm:$0xff] }
 0x2f9   : > { %5779 = vmatmul.mubr.f32.gmra.mrb[30].mxu1 %v8344_v26 }
 0x2fa   : > { %6555 = vmatpush3.bf16.msra.mxu1 %v6552_v11  ;;  %5781 = vmatprep.mubr.f32.mxu1 %v8346_v12  ;;  %v8382_v11 = vld [vmem:[#allocation3 + $0x92] sm:$0xff] }
 0x2fb   : > { %6557 = vmatprep.subr.bf16.mxu1 %v6556_v17 }
 0x2fd   : > { %5782 = vmatmul.mubr.f32.gmra.mrb[32].mxu1 %v8350_v25 }
 0x2fe   : > { %6559 = vmatpush3.bf16.msra.mxu1 %v6556_v17  ;;  %5816 = vmatprep.mubr.f32.mxu1 %v2776_v58  ;;  %v3003_v17 = vld [vmem:[#allocation5 + $0x1f8] sm:$0xff] }
 0x2ff   : > { %6561 = vmatprep.subr.bf16.mxu1 %v6560_v45  ;;  %v6588_v58 = vpack.c.bf16 %v3003_v17, %v3002_v61  ;;  %v3196_v61 = vld [vmem:[#allocation5 + $0x270] sm:$0xff]  ;;  %v3197_v17 = vld [vmem:[#allocation5 + $0x278] sm:$0xff] }
 0x301   : > { %5817 = vmatmul.mubr.f32.vlgmr.msra.gmra.mrb[18].mxu1 %v2777_v5 }
 0x302   : > { %6563 = vmatpush3.bf16.msra.mxu1 %v6560_v45  ;;  %5819 = vmatprep.mubr.f32.mxu1 %v8353_v7  ;;  %v3182_v45 = vld [vmem:[#allocation5 + $0x200] sm:$0xff] }
 0x303   : > { %6565 = vmatprep.subr.bf16.mxu1 %v6564_v30  ;;  %v6592_v5 = vpack.c.bf16 %v3183_v24, %v3182_v45  ;;  %v6620_v45 = vpack.c.bf16 %v3197_v17, %v3196_v61  ;;  %v3376_v24 = vld [vmem:[#allocation5 + $0x280] sm:$0xff]  ;;  %v3390_v61 = vld [vmem:[#allocation5 + $0x2f0] sm:$0xff]  ;;  %v3391_v17 = vld [vmem:[#allocation5 + $0x2f8] sm:$0xff] }
 0x305   : > { %5820 = vmatmul.mubr.f32.gmra.mrb[20].mxu1 %v8356_v2 }
 0x306   : > { %6567 = vmatpush3.bf16.msra.mxu1 %v6564_v30  ;;  %5822 = vmatprep.mubr.f32.mxu1 %v8358_v22  ;;  %v3184_v30 = vld [vmem:[#allocation5 + $0x210] sm:$0xff] }
 0x307   : > { %6569 = vmatprep.subr.bf16.mxu1 %v6568_v23  ;;  %v6596_v16 = vpack.c.bf16 %v3185_v52, %v3184_v30  ;;  %v8412_v30 = vld [vmem:[#allocation3 + $0xc8] sm:$0xff] }
 0x309   : > { %5823 = vmatmul.mubr.f32.gmra.mrb[22].mxu1 %v8362_v36 }
 0x30a   : > { %6571 = vmatpush3.bf16.msra.mxu1 %v6568_v23  ;;  %5825 = vmatprep.mubr.f32.mxu1 %v8364_v37  ;;  %v3186_v23 = vld [vmem:[#allocation5 + $0x220] sm:$0xff] }
 0x30b   : > { %6573 = vmatprep.subr.bf16.mxu1 %v6572_v38  ;;  %v6600_v32 = vpack.c.bf16 %v3187_v31, %v3186_v23  ;;  %v3379_v23 = vld [vmem:[#allocation5 + $0x298] sm:$0xff] }
 0x30d   : > { %5826 = vmatmul.mubr.f32.gmra.mrb[24].mxu1 %v8368_v49 }
 0x30e   : > { %6575 = vmatpush3.bf16.msra.mxu1 %v6572_v38  ;;  %5828 = vmatprep.mubr.f32.mxu1 %v8370_v60  ;;  %v3188_v38 = vld [vmem:[#allocation5 + $0x230] sm:$0xff] }
 0x30f   : > { %6577 = vmatprep.subr.bf16.mxu1 %v6576_v47 }
 0x311   : > { %5829 = vmatmul.mubr.f32.gmra.mrb[26].mxu1 %v8374_v14 }
 0x312   : > { %6579 = vmatpush3.bf16.msra.mxu1 %v6576_v47  ;;  %5831 = vmatprep.mubr.f32.mxu1 %v8376_v48  ;;  %v3191_v47 = vld [vmem:[#allocation5 + $0x248] sm:$0xff] }
 0x313   : > { %6581 = vmatprep.subr.bf16.mxu1 %v6580_v46 }
 0x315   : > { %5832 = vmatmul.mubr.f32.gmra.mrb[28].mxu1 %v8380_v62 }
 0x316   : > { %6583 = vmatpush3.bf16.msra.mxu1 %v6580_v46  ;;  %5834 = vmatprep.mubr.f32.mxu1 %v8382_v11  ;;  %v6612_v46 = vpack.c.bf16 %v3193_v43, %v3192_v42  ;;  %v3386_v42 = vld [vmem:[#allocation5 + $0x2d0] sm:$0xff]  ;;  %v3387_v43 = vld [vmem:[#allocation5 + $0x2d8] sm:$0xff] }
 0x317   : > { %6585 = vmatprep.subr.bf16.mxu1 %v6584_v21 }
 0x319   : > { %5835 = vmatmul.mubr.f32.gmra.mrb[30].mxu1 %v8386_v39 }
 0x31a   : > { %6587 = vmatpush3.bf16.msra.mxu1 %v6584_v21  ;;  %5837 = vmatprep.mubr.f32.mxu1 %v8388_v54  ;;  %v6616_v21 = vpack.c.bf16 %v3195_v27, %v3194_v56  ;;  %v3388_v56 = vld [vmem:[#allocation5 + $0x2e0] sm:$0xff]  ;;  %v3389_v27 = vld [vmem:[#allocation5 + $0x2e8] sm:$0xff] }
 0x31b   : > { %6589 = vmatprep.subr.bf16.mxu1 %v6588_v58 }
 0x31d   : > { %5838 = vmatmul.mubr.f32.gmra.mrb[32].mxu1 %v8392_v63 }
 0x31e   : > { %6591 = vmatpush3.bf16.msra.mxu1 %v6588_v58  ;;  %5872 = vmatprep.mubr.f32.mxu1 %v8311_v57  ;;  %v6604_v57 = vpack.c.bf16 %v3189_v33, %v3188_v38  ;;  %v8408_v58 = vld [vmem:[#allocation3 + $0xc0] sm:$0xff]  ;;  %v3381_v38 = vld [vmem:[#allocation5 + $0x2a8] sm:$0xff] }
 0x31f   : > { %6593 = vmatprep.subr.bf16.mxu1 %v6592_v5 }
 0x321   : > { %5873 = vmatmul.mubr.f32.vlgmr.msra.gmra.mrb[18].mxu1 %v8314_v3  ;;  %v6608_v3 = vpack.c.bf16 %v3191_v47, %v3190_v35  ;;  %v3383_v35 = vld [vmem:[#allocation5 + $0x2b8] sm:$0xff]  ;;  %v3384_v47 = vld [vmem:[#allocation5 + $0x2c0] sm:$0xff] }
 0x322   : > { %6595 = vmatpush3.bf16.msra.mxu1 %v6592_v5  ;;  %5875 = vmatprep.mubr.f32.mxu1 %v8316_v34  ;;  %v3377_v5 = vld [vmem:[#allocation5 + $0x288] sm:$0xff] }
 0x323   : > { %6597 = vmatprep.subr.bf16.mxu1 %v6596_v16  ;;  %v6624_v52 = vpack.c.bf16 %v3377_v5, %v3376_v24  ;;  %v6652_v24 = vpack.c.bf16 %v3391_v17, %v3390_v61  ;;  %v3571_v5 = vld [vmem:[#allocation5 + $0x300] sm:$0xff]  ;;  %v3585_v61 = vld [vmem:[#allocation5 + $0x370] sm:$0xff]  ;;  %v3586_v17 = vld [vmem:[#allocation5 + $0x378] sm:$0xff] }
 0x325   : > { %5876 = vmatmul.mubr.f32.gmra.mrb[20].mxu1 %v8320_v9 }
 0x326   : > { %6599 = vmatpush3.bf16.msra.mxu1 %v6596_v16  ;;  %5878 = vmatprep.mubr.f32.mxu1 %v8322_v40  ;;  %v3378_v16 = vld [vmem:[#allocation5 + $0x290] sm:$0xff] }
 0x327   : > { %6601 = vmatprep.subr.bf16.mxu1 %v6600_v32  ;;  %v6628_v31 = vpack.c.bf16 %v3379_v23, %v3378_v16  ;;  %v8432_v16 = vld [vmem:[#allocation3 + $0xc9] sm:$0xff] }
 0x329   : > { %5879 = vmatmul.mubr.f32.gmra.mrb[22].mxu1 %v8326_v44 }
 0x32a   : > { %6603 = vmatpush3.bf16.msra.mxu1 %v6600_v32  ;;  %5881 = vmatprep.mubr.f32.mxu1 %v8328_v53  ;;  %v3380_v32 = vld [vmem:[#allocation5 + $0x2a0] sm:$0xff] }
 0x32b   : > { %6605 = vmatprep.subr.bf16.mxu1 %v6604_v57  ;;  %v6632_v33 = vpack.c.bf16 %v3381_v38, %v3380_v32  ;;  %v3574_v32 = vld [vmem:[#allocation5 + $0x318] sm:$0xff] }
 0x32d   : > { %5882 = vmatmul.mubr.f32.gmra.mrb[24].mxu1 %v8332_v15 }
 0x32e   : > { %6607 = vmatpush3.bf16.msra.mxu1 %v6604_v57  ;;  %5884 = vmatprep.mubr.f32.mxu1 %v8334_v55  ;;  %v3382_v57 = vld [vmem:[#allocation5 + $0x2b0] sm:$0xff] }
 0x32f   : > { %6609 = vmatprep.subr.bf16.mxu1 %v6608_v3 }
 0x331   : > { %5885 = vmatmul.mubr.f32.gmra.mrb[26].mxu1 %v8338_v19 }
 0x332   : > { %6611 = vmatpush3.bf16.msra.mxu1 %v6608_v3  ;;  %5887 = vmatprep.mubr.f32.mxu1 %v8340_v8  ;;  %v3385_v3 = vld [vmem:[#allocation5 + $0x2c8] sm:$0xff] }
 0x333   : > { %6613 = vmatprep.subr.bf16.mxu1 %v6612_v46 }
 0x335   : > { %5888 = vmatmul.mubr.f32.gmra.mrb[28].mxu1 %v8344_v26 }
 0x336   : > { %6615 = vmatpush3.bf16.msra.mxu1 %v6612_v46  ;;  %5890 = vmatprep.mubr.f32.mxu1 %v8346_v12  ;;  %v6644_v46 = vpack.c.bf16 %v3387_v43, %v3386_v42  ;;  %v3581_v42 = vld [vmem:[#allocation5 + $0x350] sm:$0xff]  ;;  %v3582_v43 = vld [vmem:[#allocation5 + $0x358] sm:$0xff] }
 0x337   : > { %6617 = vmatprep.subr.bf16.mxu1 %v6616_v21 }
 0x339   : > { %5891 = vmatmul.mubr.f32.gmra.mrb[30].mxu1 %v8350_v25 }
 0x33a   : > { %6619 = vmatpush3.bf16.msra.mxu1 %v6616_v21  ;;  %5893 = vmatprep.mubr.f32.mxu1 %v8408_v58  ;;  %v6648_v21 = vpack.c.bf16 %v3389_v27, %v3388_v56  ;;  %v3583_v56 = vld [vmem:[#allocation5 + $0x360] sm:$0xff]  ;;  %v3584_v27 = vld [vmem:[#allocation5 + $0x368] sm:$0xff] }
 0x33b   : > { %6621 = vmatprep.subr.bf16.mxu1 %v6620_v45 }
 0x33d   : > { %5894 = vmatmul.mubr.f32.gmra.mrb[32].mxu1 %v8412_v30 }
 0x33e   : > { %6623 = vmatpush3.bf16.msra.mxu1 %v6620_v45  ;;  %5928 = vmatprep.mubr.f32.mxu1 %v8269_v6  ;;  %v6636_v6 = vpack.c.bf16 %v3383_v35, %v3382_v57  ;;  %v8428_v45 = vld [vmem:[#allocation3 + $0xc1] sm:$0xff]  ;;  %v3576_v57 = vld [vmem:[#allocation5 + $0x328] sm:$0xff] }
 0x33f   : > { %6625 = vmatprep.subr.bf16.mxu1 %v6624_v52 }
 0x341   : > { %5929 = vmatmul.mubr.f32.vlgmr.msra.gmra.mrb[18].mxu1 %v8272_v20  ;;  %v6640_v20 = vpack.c.bf16 %v3385_v3, %v3384_v47  ;;  %v3578_v47 = vld [vmem:[#allocation5 + $0x338] sm:$0xff]  ;;  %v3579_v3 = vld [vmem:[#allocation5 + $0x340] sm:$0xff] }
 0x342   : > { %6627 = vmatpush3.bf16.msra.mxu1 %v6624_v52  ;;  %5931 = vmatprep.mubr.f32.mxu1 %v8274_v10  ;;  %v3572_v52 = vld [vmem:[#allocation5 + $0x308] sm:$0xff] }
 0x343   : > { %6629 = vmatprep.subr.bf16.mxu1 %v6628_v31  ;;  %v6656_v23 = vpack.c.bf16 %v3572_v52, %v3571_v5  ;;  %v6684_v5 = vpack.c.bf16 %v3586_v17, %v3585_v61  ;;  %v3765_v52 = vld [vmem:[#allocation5 + $0x380] sm:$0xff]  ;;  %v3962_v61 = vld [vmem:[#allocation5 + $0x418] sm:$0xff]  ;;  %v3964_v17 = vld [vmem:[#allocation5 + $0x428] sm:$0xff] }
 0x345   : > { %5932 = vmatmul.mubr.f32.gmra.mrb[20].mxu1 %v8278_v50 }
 0x346   : > { %6631 = vmatpush3.bf16.msra.mxu1 %v6628_v31  ;;  %5934 = vmatprep.mubr.f32.mxu1 %v8280_v1  ;;  %v3573_v31 = vld [vmem:[#allocation5 + $0x310] sm:$0xff] }
 0x347   : > { %6633 = vmatprep.subr.bf16.mxu1 %v6632_v33  ;;  %v6660_v38 = vpack.c.bf16 %v3574_v32, %v3573_v31  ;;  %v8452_v31 = vld [vmem:[#allocation3 + $0xca] sm:$0xff] }
 0x349   : > { %5935 = vmatmul.mubr.f32.gmra.mrb[22].mxu1 %v8284_v41 }
 0x34a   : > { %6635 = vmatpush3.bf16.msra.mxu1 %v6632_v33  ;;  %5937 = vmatprep.mubr.f32.mxu1 %v8286_v18  ;;  %v3575_v33 = vld [vmem:[#allocation5 + $0x320] sm:$0xff] }
 0x34b   : > { %6637 = vmatprep.subr.bf16.mxu1 %v6636_v6  ;;  %v6664_v35 = vpack.c.bf16 %v3576_v57, %v3575_v33  ;;  %v3768_v33 = vld [vmem:[#allocation5 + $0x398] sm:$0xff] }
 0x34d   : > { %5938 = vmatmul.mubr.f32.gmra.mrb[24].mxu1 %v8290_v59 }
 0x34e   : > { %6639 = vmatpush3.bf16.msra.mxu1 %v6636_v6  ;;  %5940 = vmatprep.mubr.f32.mxu1 %v8292_v28  ;;  %v3577_v6 = vld [vmem:[#allocation5 + $0x330] sm:$0xff] }
 0x34f   : > { %6641 = vmatprep.subr.bf16.mxu1 %v6640_v20 }
 0x351   : > { %5941 = vmatmul.mubr.f32.gmra.mrb[26].mxu1 %v8296_v0 }
 0x352   : > { %6643 = vmatpush3.bf16.msra.mxu1 %v6640_v20  ;;  %5943 = vmatprep.mubr.f32.mxu1 %v8298_v29  ;;  %v3580_v20 = vld [vmem:[#allocation5 + $0x348] sm:$0xff] }
 0x353   : > { %6645 = vmatprep.subr.bf16.mxu1 %v6644_v46 }
 0x355   : > { %5944 = vmatmul.mubr.f32.gmra.mrb[28].mxu1 %v8302_v51 }
 0x356   : > { %6647 = vmatpush3.bf16.msra.mxu1 %v6644_v46  ;;  %5946 = vmatprep.mubr.f32.mxu1 %v8304_v13  ;;  %v6676_v46 = vpack.c.bf16 %v3582_v43, %v3581_v42  ;;  %v3776_v42 = vld [vmem:[#allocation5 + $0x3d8] sm:$0xff]  ;;  %v3778_v43 = vld [vmem:[#allocation5 + $0x3e8] sm:$0xff] }
 0x357   : > { %6649 = vmatprep.subr.bf16.mxu1 %v6648_v21 }
 0x359   : > { %5947 = vmatmul.mubr.f32.gmra.mrb[30].mxu1 %v8308_v4 }
 0x35a   : > { %6651 = vmatpush3.bf16.msra.mxu1 %v6648_v21  ;;  %5949 = vmatprep.mubr.f32.mxu1 %v8428_v45  ;;  %v6680_v21 = vpack.c.bf16 %v3584_v27, %v3583_v56  ;;  %v3959_v56 = vld [vmem:[#allocation5 + $0x400] sm:$0xff]  ;;  %v3960_v27 = vld [vmem:[#allocation5 + $0x408] sm:$0xff] }
 0x35b   : > { %6653 = vmatprep.subr.bf16.mxu1 %v6652_v24 }
 0x35d   : > { %5950 = vmatmul.mubr.f32.gmra.mrb[32].mxu1 %v8432_v16 }
 0x35e   : > { %6655 = vmatpush3.bf16.msra.mxu1 %v6652_v24  ;;  %5984 = vmatprep.mubr.f32.mxu1 %v8353_v7  ;;  %v6668_v7 = vpack.c.bf16 %v3578_v47, %v3577_v6  ;;  %v8448_v24 = vld [vmem:[#allocation3 + $0xc2] sm:$0xff]  ;;  %v3770_v6 = vld [vmem:[#allocation5 + $0x3a8] sm:$0xff] }
 0x35f   : > { %6657 = vmatprep.subr.bf16.mxu1 %v6656_v23 }
 0x361   : > { %5985 = vmatmul.mubr.f32.vlgmr.msra.gmra.mrb[18].mxu1 %v8356_v2  ;;  %v6672_v2 = vpack.c.bf16 %v3580_v20, %v3579_v3  ;;  %v3772_v3 = vld [vmem:[#allocation5 + $0x3b8] sm:$0xff]  ;;  %v3773_v20 = vld [vmem:[#allocation5 + $0x3c0] sm:$0xff] }
 0x362   : > { %6659 = vmatpush3.bf16.msra.mxu1 %v6656_v23  ;;  %5987 = vmatprep.mubr.f32.mxu1 %v8358_v22  ;;  %v3766_v23 = vld [vmem:[#allocation5 + $0x388] sm:$0xff] }
 0x363   : > { %6661 = vmatprep.subr.bf16.mxu1 %v6660_v38  ;;  %v6688_v32 = vpack.c.bf16 %v3766_v23, %v3765_v52  ;;  %v3966_v52 = vld [vmem:[#allocation5 + $0x438] sm:$0xff]  ;;  %v3967_v23 = vld [vmem:[#allocation5 + $0x440] sm:$0xff] }
 0x365   : > { %5988 = vmatmul.mubr.f32.gmra.mrb[20].mxu1 %v8362_v36 }
 0x366   : > { %6663 = vmatpush3.bf16.msra.mxu1 %v6660_v38  ;;  %5990 = vmatprep.mubr.f32.mxu1 %v8364_v37  ;;  %v3767_v38 = vld [vmem:[#allocation5 + $0x390] sm:$0xff] }
 0x367   : > { %6665 = vmatprep.subr.bf16.mxu1 %v6664_v35  ;;  %v6692_v57 = vpack.c.bf16 %v3768_v33, %v3767_v38  ;;  %v3970_v38 = vld [vmem:[#allocation5 + $0x458] sm:$0xff]  ;;  %v3972_v33 = vld [vmem:[#allocation5 + $0x468] sm:$0xff] }
 0x369   : > { %5991 = vmatmul.mubr.f32.gmra.mrb[22].mxu1 %v8368_v49 }
 0x36a   : > { %6667 = vmatpush3.bf16.msra.mxu1 %v6664_v35  ;;  %5993 = vmatprep.mubr.f32.mxu1 %v8370_v60  ;;  %v3769_v35 = vld [vmem:[#allocation5 + $0x3a0] sm:$0xff] }
 0x36b   : > { %6669 = vmatprep.subr.bf16.mxu1 %v6668_v7  ;;  %v6696_v47 = vpack.c.bf16 %v3770_v6, %v3769_v35 }
 0x36d   : > { %5994 = vmatmul.mubr.f32.gmra.mrb[24].mxu1 %v8374_v14 }
 0x36e   : > { %6671 = vmatpush3.bf16.msra.mxu1 %v6668_v7  ;;  %5996 = vmatprep.mubr.f32.mxu1 %v8376_v48  ;;  %v3771_v7 = vld [vmem:[#allocation5 + $0x3b0] sm:$0xff] }
 0x36f   : > { %6673 = vmatprep.subr.bf16.mxu1 %v6672_v2 }
 0x371   : > { %5997 = vmatmul.mubr.f32.gmra.mrb[26].mxu1 %v8380_v62 }
 0x372   : > { %6675 = vmatpush3.bf16.msra.mxu1 %v6672_v2  ;;  %5999 = vmatprep.mubr.f32.mxu1 %v8382_v11  ;;  %v3774_v2 = vld [vmem:[#allocation5 + $0x3c8] sm:$0xff] }
 0x373   : > { %6677 = vmatprep.subr.bf16.mxu1 %v6676_v46 }
 0x375   : > { %6000 = vmatmul.mubr.f32.gmra.mrb[28].mxu1 %v8386_v39 }
 0x376   : > { %6679 = vmatpush3.bf16.msra.mxu1 %v6676_v46  ;;  %6002 = vmatprep.mubr.f32.mxu1 %v8388_v54  ;;  %v3780_v46 = vld [vmem:[#allocation5 + $0x3f8] sm:$0xff] }
 0x377   : > { %6681 = vmatprep.subr.bf16.mxu1 %v6680_v21 }
 0x379   : > { %6003 = vmatmul.mubr.f32.gmra.mrb[30].mxu1 %v8392_v63 }
 0x37a   : > { %6683 = vmatpush3.bf16.msra.mxu1 %v6680_v21  ;;  %6005 = vmatprep.mubr.f32.mxu1 %v8448_v24  ;;  %v3961_v21 = vld [vmem:[#allocation5 + $0x410] sm:$0xff] }
 0x37b   : > { %6685 = vmatprep.subr.bf16.mxu1 %v6684_v5 }
 0x37d   : > { %6006 = vmatmul.mubr.f32.gmra.mrb[32].mxu1 %v8452_v31 }
 0x37e   : > { %6687 = vmatpush3.bf16.msra.mxu1 %v6684_v5  ;;  %6040 = vmatprep.mubr.f32.mxu1 %v8316_v34  ;;  %v6700_v34 = vpack.c.bf16 %v3772_v3, %v3771_v7  ;;  %v3965_v5 = vld [vmem:[#allocation5 + $0x430] sm:$0xff]  ;;  %v4164_v3 = vld [vmem:[#allocation2 + $0x69] sm:$0xff] }
 0x37f   : > { %6689 = vmatprep.subr.bf16.mxu1 %v6688_v32 }
 0x381   : > { %6041 = vmatmul.mubr.f32.vlgmr.msra.gmra.mrb[18].mxu1 %v8320_v9  ;;  %v6704_v9 = vpack.c.bf16 %v3774_v2, %v3773_v20 }
 0x382   : > { %6691 = vmatpush3.bf16.msra.mxu1 %v6688_v32  ;;  %6043 = vmatprep.mubr.f32.mxu1 %v8322_v40  ;;  %v3775_v40 = vld [vmem:[#allocation5 + $0x3d0] sm:$0xff]  ;;  %v3968_v32 = vld [vmem:[#allocation5 + $0x448] sm:$0xff] }
 0x383   : > { %6693 = vmatprep.subr.bf16.mxu1 %v6692_v57 }
 0x385   : > { %6044 = vmatmul.mubr.f32.gmra.mrb[20].mxu1 %v8326_v44  ;;  %v6708_v44 = vpack.c.bf16 %v3776_v42, %v3775_v40 }
 0x386   : > { %6695 = vmatpush3.bf16.msra.mxu1 %v6692_v57  ;;  %6046 = vmatprep.mubr.f32.mxu1 %v8328_v53  ;;  %v3777_v53 = vld [vmem:[#allocation5 + $0x3e0] sm:$0xff]  ;;  %v3974_v57 = vld [vmem:[#allocation5 + $0x478] sm:$0xff] }
 0x387   : > { %6697 = vmatprep.subr.bf16.mxu1 %v6696_v47 }
 0x389   : > { %6047 = vmatmul.mubr.f32.gmra.mrb[22].mxu1 %v8332_v15  ;;  %v6712_v15 = vpack.c.bf16 %v3778_v43, %v3777_v53 }
 0x38a   : > { %6699 = vmatpush3.bf16.msra.mxu1 %v6696_v47  ;;  %6049 = vmatprep.mubr.f32.mxu1 %v8334_v55  ;;  %v3779_v55 = vld [vmem:[#allocation5 + $0x3f0] sm:$0xff] }
 0x38b   : > { %6701 = vmatprep.subr.bf16.mxu1 %v6700_v34 }
 0x38d   : > { %6050 = vmatmul.mubr.f32.gmra.mrb[24].mxu1 %v8338_v19  ;;  %v3568_v19 = vld [vmem:[#allocation3 + $0xd8] sm:$0xff] }
 0x38e   : > { %6703 = vmatpush3.bf16.msra.mxu1 %v6700_v34  ;;  %6052 = vmatprep.mubr.f32.mxu1 %v8340_v8  ;;  %v6716_v8 = vpack.c.bf16 %v3780_v46, %v3779_v55 }
 0x38f   : > { %6705 = vmatprep.subr.bf16.mxu1 %v6704_v9 }
 0x391   : > { %6053 = vmatmul.mubr.f32.gmra.mrb[26].mxu1 %v8344_v26  ;;  %v3569_v26 = vld [vmem:[#allocation3 + $0xe0] sm:$0xff] }
 0x392   : > { %6707 = vmatpush3.bf16.msra.mxu1 %v6704_v9  ;;  %6055 = vmatprep.mubr.f32.mxu1 %v8346_v12  ;;  %v6720_v12 = vpack.c.bf16 %v3960_v27, %v3959_v56  ;;  %v4163_v9 = vld [vmem:[#allocation2 + $0x61] sm:$0xff] }
 0x393   : > { %6709 = vmatprep.subr.bf16.mxu1 %v6708_v44 }
 0x395   : > { %6056 = vmatmul.mubr.f32.gmra.mrb[28].mxu1 %v8350_v25  ;;  %v6724_v25 = vpack.c.bf16 %v3962_v61, %v3961_v21  ;;  %v4168_v61 = vld [vmem:[#allocation2 + $0x99] sm:$0xff] }
 0x396   : > { %6711 = vmatpush3.bf16.msra.mxu1 %v6708_v44  ;;  %6058 = vmatprep.mubr.f32.mxu1 %v8408_v58  ;;  %v3963_v58 = vld [vmem:[#allocation5 + $0x420] sm:$0xff] }
 0x397   : > { %6713 = vmatprep.subr.bf16.mxu1 %v6712_v15 }
 0x399   : > { %6059 = vmatmul.mubr.f32.gmra.mrb[30].mxu1 %v8412_v30  ;;  %v6728_v30 = vpack.c.bf16 %v3964_v17, %v3963_v58 }
 0x39a   : > { %6715 = vmatpush3.bf16.msra.mxu1 %v6712_v15  ;;  %6061 = vmatprep.mubr.f32.mxu1 %v3568_v19  ;;  %v4166_v15 = vld [vmem:[#allocation2 + $0x81] sm:$0xff] }
 0x39b   : > { %6717 = vmatprep.subr.bf16.mxu1 %v6716_v8 }
 0x39d   : > { %6062 = vmatmul.mubr.f32.gmra.mrb[32].mxu1 %v3569_v26 }
 0x39e   : > { %6719 = vmatpush3.bf16.msra.mxu1 %v6716_v8  ;;  %6096 = vmatprep.mubr.f32.mxu1 %v8274_v10  ;;  %v6732_v10 = vpack.c.bf16 %v3966_v52, %v3965_v5  ;;  %v4165_v8 = vld [vmem:[#allocation2 + $0x79] sm:$0xff] }
 0x39f   : > { %6721 = vmatprep.subr.bf16.mxu1 %v6720_v12 }
 0x3a1   : > { %6097 = vmatmul.mubr.f32.vlgmr.msra.gmra.mrb[18].mxu1 %v8278_v50  ;;  %v6736_v50 = vpack.c.bf16 %v3968_v32, %v3967_v23 }
 0x3a2   : > { %6723 = vmatpush3.bf16.msra.mxu1 %v6720_v12  ;;  %6099 = vmatprep.mubr.f32.mxu1 %v8280_v1  ;;  %v3969_v1 = vld [vmem:[#allocation5 + $0x450] sm:$0xff] }
 0x3a3   : > { %6725 = vmatprep.subr.bf16.mxu1 %v6724_v25 }
 0x3a5   : > { %6100 = vmatmul.mubr.f32.gmra.mrb[20].mxu1 %v8284_v41  ;;  %v6740_v41 = vpack.c.bf16 %v3970_v38, %v3969_v1 }
 0x3a6   : > { %6727 = vmatpush3.bf16.msra.mxu1 %v6724_v25  ;;  %6102 = vmatprep.mubr.f32.mxu1 %v8286_v18  ;;  %v3971_v18 = vld [vmem:[#allocation5 + $0x460] sm:$0xff] }
 0x3a7   : > { %6729 = vmatprep.subr.bf16.mxu1 %v6728_v30 }
 0x3a9   : > { %6103 = vmatmul.mubr.f32.gmra.mrb[22].mxu1 %v8290_v59  ;;  %v6744_v59 = vpack.c.bf16 %v3972_v33, %v3971_v18  ;;  %v4169_v18 = vld [vmem:[#allocation2 + $0xa9] sm:$0xff] }
 0x3aa   : > { %6731 = vmatpush3.bf16.msra.mxu1 %v6728_v30  ;;  %6105 = vmatprep.mubr.f32.mxu1 %v8292_v28  ;;  %v3973_v28 = vld [vmem:[#allocation5 + $0x470] sm:$0xff]  ;;  %v4167_v30 = vld [vmem:[#allocation2 + $0x91] sm:$0xff] }
 0x3ab   : > { %6733 = vmatprep.subr.bf16.mxu1 %v6732_v10 }
 0x3ad   : > { %6106 = vmatmul.mubr.f32.gmra.mrb[24].mxu1 %v8296_v0  ;;  %v3762_v0 = vld [vmem:[#allocation3 + $0xd9] sm:$0xff] }
 0x3ae   : > { %6735 = vmatpush3.bf16.msra.mxu1 %v6732_v10  ;;  %6108 = vmatprep.mubr.f32.mxu1 %v8298_v29  ;;  %v6748_v29 = vpack.c.bf16 %v3974_v57, %v3973_v28 }
 0x3af   : > { %6737 = vmatprep.subr.bf16.mxu1 %v6736_v50 }
 0x3b1   : > { %6109 = vmatmul.mubr.f32.gmra.mrb[26].mxu1 %v8302_v51  ;;  %v3763_v51 = vld [vmem:[#allocation3 + $0xe1] sm:$0xff] }
 0x3b2   : > { %6739 = vmatpush3.bf16.msra.mxu1 %v6736_v50  ;;  %6111 = vmatprep.mubr.f32.mxu1 %v8304_v13  ;;  %v3956_v13 = vld [vmem:[#allocation3 + $0xda] sm:$0xff]  ;;  %v4170_v50 = vld [vmem:[#allocation2 + $0xb1] sm:$0xff] }
 0x3b3   : > { %6741 = vmatprep.subr.bf16.mxu1 %v6740_v41 }
 0x3b5   : > { %6112 = vmatmul.mubr.f32.gmra.mrb[28].mxu1 %v8308_v4  ;;  %v3957_v4 = vld [vmem:[#allocation3 + $0xe2] sm:$0xff] }
 0x3b6   : > { %6743 = vmatpush3.bf16.msra.mxu1 %v6740_v41  ;;  %6114 = vmatprep.mubr.f32.mxu1 %v8428_v45 }
 0x3b7   : > { %6745 = vmatprep.subr.bf16.mxu1 %v6744_v59 }
 0x3b9   : > { %6115 = vmatmul.mubr.f32.gmra.mrb[30].mxu1 %v8432_v16 }
 0x3ba   : > { %6747 = vmatpush3.bf16.msra.mxu1 %v6744_v59  ;;  %6117 = vmatprep.mubr.f32.mxu1 %v3762_v0 }
 0x3bb   : > { %6749 = vmatprep.subr.bf16.mxu1 %v6748_v29 }
 0x3bd   : > { %6118 = vmatmul.mubr.f32.gmra.mrb[32].mxu1 %v3763_v51 }
 0x3be   : > { %6751 = vmatpush3.bf16.msra.mxu1 %v6748_v29  ;;  %6152 = vmatprep.mubr.f32.mxu1 %v8358_v22  ;;  %v8500_v22 = vld [vmem:[%s8602_s4] ss:$0 sm:$0xff]  ;;  %v4172_v29 = vld [vmem:[#allocation2 + $0xc9] sm:$0xff] }
 0x3c1   : > { %6153 = vmatmul.mubr.f32.vlgmr.msra.gmra.mrb[18].mxu1 %v8362_v36 }
 0x3c2   : > { %6155 = vmatprep.mubr.f32.mxu1 %v8364_v37  ;;  %v4160_v37 = vld [vmem:[#allocation2 + $0x39] sm:$0xff] }
 0x3c5   : > { %6156 = vmatmul.mubr.f32.gmra.mrb[20].mxu1 %v8368_v49 }
 0x3c6   : > { %6158 = vmatprep.mubr.f32.mxu1 %v8370_v60 }
 0x3c9   : > { %6159 = vmatmul.mubr.f32.gmra.mrb[22].mxu1 %v8374_v14  ;;  %v4159_v14 = vld [vmem:[#allocation2 + $0x31] sm:$0xff] }
 0x3ca   : > { %6161 = vmatprep.mubr.f32.mxu1 %v8376_v48 }
 0x3cd   : > { %6162 = vmatmul.mubr.f32.gmra.mrb[24].mxu1 %v8380_v62 }
 0x3ce   : > { %6164 = vmatprep.mubr.f32.mxu1 %v8382_v11 }
 0x3d1   : > { %6165 = vmatmul.mubr.f32.gmra.mrb[26].mxu1 %v8386_v39 }
 0x3d2   : > { %6167 = vmatprep.mubr.f32.mxu1 %v8388_v54  ;;  %v4162_v54 = vld [vmem:[#allocation2 + $0x51] sm:$0xff] }
 0x3d5   : > { %6168 = vmatmul.mubr.f32.gmra.mrb[28].mxu1 %v8392_v63 }
 0x3d6   : > { %6170 = vmatprep.mubr.f32.mxu1 %v8448_v24  ;;  %v4161_v24 = vld [vmem:[#allocation2 + $0x49] sm:$0xff] }
 0x3d9   : > { %6171 = vmatmul.mubr.f32.gmra.mrb[30].mxu1 %v8452_v31 }
 0x3da   : > { %6173 = vmatprep.mubr.f32.mxu1 %v3956_v13 }
 0x3dd   : > { %6174 = vmatmul.mubr.f32.gmra.mrb[32].mxu1 %v3957_v4 }
 0x494   : > { %v6154_v36 = vpop.f32.mrb[18].mxu1 }
 0x495   : > { %v4144_v49 = vadd.f32 %v6154_v36, %v8500_v22  ;;  %v4041_v60 = vpop.f32.mrb[19].mxu1  ;;  %v4171_v36 = vld [vmem:[#allocation2 + $0xc1] sm:$0xff] }
 0x496   : > { %v4143_v48 = vadd.f32 %v8500_v22, %v4041_v60 }
 0x497   : > { %v4176_v62 = vadd.f32 %v4160_v37, %v4144_v49 }
 0x498   : > { %v4175_v11 = vadd.f32 %v4159_v14, %v4143_v48  ;;  %v6157_v39 = vpop.f32.mrb[20].mxu1 }
 0x499   : > { %v4192_v63 = vmax.f32 %v4176_v62, 0.0  ;;  %v4146_v45 = vadd.f32 %v6157_v39, %v8500_v22  ;;  %v4051_v16 = vpop.f32.mrb[21].mxu1  ;;  %v4174_v62 = vld [vmem:[#allocation2 + $0xe1] sm:$0xff] }
 0x49a   : > { %v4191_v31 = vmax.f32 %v4175_v11, 0.0  ;;  %v4145_v35 = vadd.f32 %v8500_v22, %v4051_v16 }
 0x49b   : > { %4208 = vst [vmem:[%s7472_s12 + $0x8] sm:$0xff] %v4192_v63  ;;  %v4178_v6 = vadd.f32 %v4162_v54, %v4146_v45  ;;  %v4173_v63 = vld [vmem:[#allocation2 + $0xd9] sm:$0xff] }
 0x49c   : > { %4207 = vst [vmem:[%s7472_s12] sm:$0xff] %v4191_v31  ;;  %v4177_v47 = vadd.f32 %v4161_v24, %v4145_v35  ;;  %v6160_v7 = vpop.f32.mrb[22].mxu1 }
 0x49d   : > { %v4194_v34 = vmax.f32 %v4178_v6, 0.0  ;;  %v4148_v20 = vadd.f32 %v6160_v7, %v8500_v22  ;;  %v4061_v2 = vpop.f32.mrb[23].mxu1 }
 0x49e   : > { %v4193_v40 = vmax.f32 %v4177_v47, 0.0  ;;  %v4147_v42 = vadd.f32 %v8500_v22, %v4061_v2 }
 0x49f   : > { %4210 = vst [vmem:[%s7472_s12 + $0x18] sm:$0xff] %v4194_v34  ;;  %v4180_v44 = vadd.f32 %v4164_v3, %v4148_v20 }
 0x4a0   : > { %4209 = vst [vmem:[%s7472_s12 + $0x10] sm:$0xff] %v4193_v40  ;;  %v4179_v53 = vadd.f32 %v4163_v9, %v4147_v42  ;;  %v6163_v43 = vpop.f32.mrb[24].mxu1 }
 0x4a1   : > { %v4196_v55 = vmax.f32 %v4180_v44, 0.0  ;;  %v4150_v46 = vadd.f32 %v6163_v43, %v8500_v22  ;;  %v4071_v19 = vpop.f32.mrb[25].mxu1 }
 0x4a2   : > { %v4195_v56 = vmax.f32 %v4179_v53, 0.0  ;;  %v4149_v27 = vadd.f32 %v8500_v22, %v4071_v19 }
 0x4a3   : > { %4212 = vst [vmem:[%s7472_s12 + $0x28] sm:$0xff] %v4196_v55  ;;  %v4182_v26 = vadd.f32 %v4166_v15, %v4150_v46 }
 0x4a4   : > { %4211 = vst [vmem:[%s7472_s12 + $0x20] sm:$0xff] %v4195_v56  ;;  %v4181_v12 = vadd.f32 %v4165_v8, %v4149_v27  ;;  %v6166_v21 = vpop.f32.mrb[26].mxu1 }
 0x4a5   : > { %v4198_v25 = vmax.f32 %v4182_v26, 0.0  ;;  %v4152_v58 = vadd.f32 %v6166_v21, %v8500_v22  ;;  %v4081_v17 = vpop.f32.mrb[27].mxu1 }
 0x4a6   : > { %v4197_v5 = vmax.f32 %v4181_v12, 0.0  ;;  %v4151_v52 = vadd.f32 %v8500_v22, %v4081_v17 }
 0x4a7   : > { %4214 = vst [vmem:[%s7472_s12 + $0x38] sm:$0xff] %v4198_v25  ;;  %v4184_v10 = vadd.f32 %v4168_v61, %v4152_v58 }
 0x4a8   : > { %4213 = vst [vmem:[%s7472_s12 + $0x30] sm:$0xff] %v4197_v5  ;;  %v4183_v23 = vadd.f32 %v4167_v30, %v4151_v52  ;;  %v6169_v32 = vpop.f32.mrb[28].mxu1 }
 0x4a9   : > { %v4200_v1 = vmax.f32 %v4184_v10, 0.0  ;;  %v4154_v38 = vadd.f32 %v6169_v32, %v8500_v22  ;;  %v4091_v41 = vpop.f32.mrb[29].mxu1 }
 0x4aa   : > { %v4199_v33 = vmax.f32 %v4183_v23, 0.0  ;;  %v4153_v59 = vadd.f32 %v8500_v22, %v4091_v41 }
 0x4ab   : > { %4216 = vst [vmem:[%s7472_s12 + $0x48] sm:$0xff] %v4200_v1  ;;  %v4186_v28 = vadd.f32 %v4170_v50, %v4154_v38 }
 0x4ac   : > { %4215 = vst [vmem:[%s7472_s12 + $0x40] sm:$0xff] %v4199_v33  ;;  %v4185_v57 = vadd.f32 %v4169_v18, %v4153_v59  ;;  %v6172_v0 = vpop.f32.mrb[30].mxu1 }
 0x4ad   : > { %v4202_v51 = vmax.f32 %v4186_v28, 0.0  ;;  %v4156_v13 = vadd.f32 %v6172_v0, %v8500_v22  ;;  %v4101_v4 = vpop.f32.mrb[31].mxu1 }
 0x4ae   : > { %v4201_v37 = vmax.f32 %v4185_v57, 0.0  ;;  %v4155_v49 = vadd.f32 %v8500_v22, %v4101_v4 }
 0x4af   : > { %4218 = vst [vmem:[%s7472_s12 + $0x58] sm:$0xff] %v4202_v51  ;;  %v4188_v60 = vadd.f32 %v4172_v29, %v4156_v13 }
 0x4b0   : > { %4217 = vst [vmem:[%s7472_s12 + $0x50] sm:$0xff] %v4201_v37  ;;  %v4187_v14 = vadd.f32 %v4171_v36, %v4155_v49  ;;  %v6175_v48 = vpop.f32.mrb[32].mxu1 }
 0x4b1   : > { %v4204_v11 = vmax.f32 %v4188_v60, 0.0  ;;  %v4158_v39 = vadd.f32 %v6175_v48, %v8500_v22  ;;  %v4111_v54 = vpop.f32.mrb[33].mxu1 }
 0x4b2   : > { %v4203_v45 = vmax.f32 %v4187_v14, 0.0  ;;  %v4157_v16 = vadd.f32 %v8500_v22, %v4111_v54 }
 0x4b3   : > { %4220 = vst [vmem:[%s7472_s12 + $0x68] sm:$0xff] %v4204_v11  ;;  %v4190_v24 = vadd.f32 %v4174_v62, %v4158_v39 }
 0x4b4   : > { %4219 = vst [vmem:[%s7472_s12 + $0x60] sm:$0xff] %v4203_v45  ;;  %v4189_v31 = vadd.f32 %v4173_v63, %v4157_v16 }
 0x4b5   : > { %v4206_v35 = vmax.f32 %v4190_v24, 0.0 }
 0x4b6   : > { %v4205_v6 = vmax.f32 %v4189_v31, 0.0 }
 0x4b7   : > { %4222 = vst [vmem:[%s7472_s12 + $0x78] sm:$0xff] %v4206_v35 }
 0x4b8   : > { %4221 = vst [vmem:[%s7472_s12 + $0x70] sm:$0xff] %v4205_v6 }
 0x4b9   : > { %7186 = shalt.err (!%p7183_p9)
}
 0x4ba   : > { %s7187_s26 = scalar_lea.hbm %s8538_s14, 2048  ;;  %s7191_s16 = scalar_lea.hbm %s8603_s5, 8192 }
 0x4bb   : > { %p7188_p11 = scmp.ne.s32.totalorder %s8538_s14, %s7187_s26  ;;  %p7192_p4 = scmp.lt.u32.totalorder %s8538_s14, %s8603_s5 }
 0x4bc   : > { %p7193_p3 = scmp.lt.u32.totalorder %s7191_s16, %s7187_s26  ;;  %p7195_p10 = scmp.lt.u32.totalorder %s7187_s26, %s8538_s14 }
 0x4bd   : > { %p7189_p13 = pnand %p7188_p11, %p8631_p12 }
 0x4be   : > { %p7194_p8 = por %p7193_p3, %p7192_p4 }
 0x4bf   : > { %p7190_p1 = pneg %p7189_p13 }
 0x4c0   : > { %p7196_p0 = por %p7195_p10, %p7194_p8 }
 0x4c2   : > { %p7197_p2 = pnand %p7196_p0, %p7190_p1 }
 0x4c4   : > { %7200 = shalt.err (!%p7197_p2)
}
 0x4c5   : > { %s7282_s15 = smov 128   ;;  %s7283_s17 = smov 8  }
 0x4c6   : > { %7060 = dma.vmem_to_hbm [thread:$0]  (%p8631_p12), %s8540_s22, 2048, %s8538_s14, %s8546_s11, %s7282_s15, %s7282_s15, %s7283_s17  }
 0x4c7 PF: > { %p7072_p5 = scmp.ge.s32.totalorder %s7273_s25, 2  ;;  %s4255_s27 = sand.u32 1, %s7245_s18  }
 0x4c8   : > { %p8632_p6 = scmp.ne.s32.totalorder %s8617_s8, 0  ;;  %s4256_s6 = scalar_lea.sflag [#allocation7], %s4255_s27 }
 0x4ca   : > { %p7067_p7 = pnand %p7072_p5, %p8632_p6 }
 0x4cc   : > { %7240 = dma.done.wait (!%p7067_p7), %s4256_s6, 2048  }
 0x4cd   : > { %7242 = vsyncadd (!%p7067_p7), %s4256_s6, 4294965248  ;;  %s19_s25 = sadd.s32 1, %s7273_s25   ;;  %s8633_s18 = smov %s7249_s19 }
 0x4ce   : > { %p16_p9 = scmp.ge.s32.totalorder %s19_s25, 6   ;;  %s8634_s19 = smov %s7253_s20 }
 0x4cf   : > { %s8635_s20 = smov %s7393_s13  ;;  %s8636_s21 = smov %s7265_s23 }
 0x4d0   : > { %s8637_s22 = smov %s7269_s24  ;;  %s8638_s23 = smov %s8641_s28 }
 0x4d1   : > { %s8639_s24 = smov %s8645_s29  ;;  %18 = sbr.rel (!%p16_p9) target bundleno = 6 (0x6), region = 154 }
 0x4d8   :  { %4261 = vsyncpa [#allocation6], 1 }
 0x4d9   :  { %4263 = vsyncpa [#allocation6 + $0x1], 1 }
 0x4da   :  { %4264 = vsyncpa [#allocation7], 1 }
 0x4db   :  { %4266 = vsyncpa [#allocation7 + $0x1], 1 }
 0x4dc   :  { %4267 = vsyncmov [#allocation4] }
 0x4df   :  { %s4268_s7 = vpop.sfrf %4267 }
 0x4e0   :  { %p4500_p12 = scmp.ne.s32.totalorder %s4268_s7, 0 }
 0x4e2   :  { %4272 = shalt.err (%p4500_p12)  }

// kernel: tpu_custom_call.1
= control target key start
LH: loop header
LB: loop body
LE: loop exit
PB: predicated region body
PF: predicated region fallthrough
CT: control target
= control target key end

     0   :  { %10 = vsyncpa [#allocation6], 0  ;;  %s8598_s0 = inlined_call_operand.vmem [shape: f32[2,20,18,128], index: 0, kind: input, shape index: {}]   ;;  %s8599_s1 = inlined_call_operand.vmem [shape: f32[9,128,128], index: 1, kind: input, shape index: {}]   ;;  %s8600_s2 = inlined_call_operand.hbm [shape: f32[9,128,128], index: 2, kind: input, shape index: {}]   ;;  %s8601_s3 = inlined_call_operand.vmem [shape: f32[1,128], index: 3, kind: input, shape index: {}]   ;;  %s8602_s4 = inlined_call_operand.vmem [shape: f32[1,128], index: 4, kind: input, shape index: {}]   ;;  %s8603_s5 = inlined_call_operand.hbm [shape: f32[2,16,16,128], index: 5, kind: output, shape index: {}]  }
   0x1   :  { %11 = vsyncpa [#allocation7], 0 }
   0x2   :  { %13 = vsyncpa [#allocation7 + $0x1], 0  ;;  %s7314_s18 = smov 0   ;;  %s7316_s19 = smov 0  }
   0x3   :  { %s7318_s20 = smov 0   ;;  %s7320_s21 = smov 0  }
   0x4   :  { %s7322_s22 = smov 0   ;;  %s7324_s23 = smov 0  }
   0x5   :  { %s7326_s24 = smov 0   ;;  %s7328_s25 = smov 0  }
   0x6 LB: > { %s4340_s26 = sadd.s32 4294967295, %s7273_s25   ;;  %s4341_s27 = sadd.s32 4294967294, %s7273_s25   ;;  %s7273_s25 = sphi %s7328_s25, %s19_s25   ;;  %s7269_s24 = sphi %s7326_s24, %s8639_s24   ;;  %s7265_s23 = sphi %s7324_s23, %s8638_s23   ;;  %s7261_s22 = sphi %s7322_s22, %s8637_s22   ;;  %s7257_s21 = sphi %s7320_s21, %s8636_s21   ;;  %s7253_s20 = sphi %s7318_s20, %s8635_s20   ;;  %s7249_s19 = sphi %s7316_s19, %s8634_s19   ;;  %s7245_s18 = sphi %s7314_s18, %s8633_s18  }
   0x7   : > { %s28_s28 = sadd.s32 1, %s7265_s23  ;;  %s31_s29 = sadd.s32 1, %s7269_s24 }
   0x8   : > { %p29_p0 = scmp.ge.s32.totalorder %s28_s28, 2  ;;  %s124_s30 = sadd.s32 1, %s7253_s20 }
   0x9   : > { %p134_p1 = scmp.ne.s32.totalorder %s7253_s20, %s7249_s19  ;;  %p135_p2 = scmp.eq.s32.totalorder %s4340_s26, 3 }
   0xa   : > { %s8641_s28 = smov (%p29_p0, %s28_s28), 0  ;;  %s8643_s29 = smov (!%p29_p0, %s31_s29), %s7269_s24 }
   0xb   : > { %s120_s6 = ssub.s32 %s7265_s23, %s8641_s28  ;;  %p7366_p3 = por %p135_p2, %p134_p1 }
   0xc   : > { %p33_p4 = scmp.ge.s32.totalorder %s8643_s29, 2  ;;  %p140_p5 = scmp.ne.s32.totalorder %s7249_s19, %s7245_s18 }
   0xd   : > { %s8616_s7 = scalar_select %p7366_p3, 1, 0 }
   0xe   : > { %p141_p6 = scmp.eq.s32.totalorder %s4341_s27, 3  ;;  %p4342_p7 = scmp.ge.s32.totalorder %s7273_s25, 1 }
   0xf   : > { %s8645_s29 = smov (%p33_p4, %s8643_s29), 0  ;;  %p148_p9 = scmp.lt.s32.totalorder %s7273_s25, 5 }
  0x10   : > { %p7375_p8 = por %p141_p6, %p140_p5  ;;  %s119_s9 = ssub.s32 %s7269_s24, %s8645_s29 }
  0x11   : > { %s121_s10 = sor.u32 %s120_s6, %s119_s9  ;;  %p7382_p10 = pnand %p4342_p7, %p148_p9 }
  0x12   : > { %s8617_s8 = scalar_select %p7375_p8, 1, 0 }
  0x13   : > { %s8618_s11 = scalar_select %p7382_p10, 1, 0 }
  0x14   : > { %p122_p11 = scmp.eq.s32.totalorder %s121_s10, 0  ;;  %p7386_p12 = scmp.eq.s32.totalorder %s4340_s26, 0 }
  0x15   : > { %p7062_p13 = pneg %p7382_p10  ;;  %s7275_s14 = smov [#allocation5]  }
  0x16   : > { %s8619_s12 = scalar_select %p7386_p12, 1, 0 }
  0x17   : > { %s7393_s13 = scalar_select %p122_p11, %s7253_s20, %s124_s30  }
  0x18   : > { %s163_s15 = sshll.u32 %s7275_s14, 4  ;;  %p7397_p0 = pnand %p7386_p12, %p7062_p13  ;;  %s164_s15 = int_to_ptr.vmem [resolvable:$true] %s163_s15 }
  0x19   : > { %s7145_s26 = scalar_lea.hbm %s8600_s2, 18432 }
  0x1a   : > { %p7146_p1 = scmp.ne.s32.totalorder %s8600_s2, %s7145_s26  ;;  %p7147_p2 = pneg %p7397_p0 }
  0x1b   : > { %p7152_p6 = scmp.lt.u32.totalorder %s7145_s26, %s8600_s2 }
  0x1c   : > { %p7148_p4 = pnand %p7147_p2, %p7146_p1 }
  0x1e   : > { %p7149_p5 = pneg %p7148_p4 }
  0x20   : > { %p7154_p7 = pnand %p7152_p6, %p7149_p5 }
  0x22   : > { %7157 = shalt.err (!%p7154_p7)
}
  0x23   : > { %s7158_s14 = scalar_lea.vmem %s164_s15, 18432  ;;  %p7166_p8 = scmp.lt.s32.totalorder %s164_s15, %s164_s15 }
  0x24   : > { %p7159_p9 = scmp.ne.s32.totalorder %s164_s15, %s7158_s14  ;;  %p7167_p3 = scmp.lt.s32.totalorder %s7158_s14, %s7158_s14 }
  0x26   : > { %p7161_p11 = pnand %p7159_p9, %p7147_p2  ;;  %p7168_p12 = por %p7167_p3, %p7166_p8 }
  0x28   : > { %p7162_p13 = pneg %p7161_p11 }
  0x2a   : > { %p7169_p10 = pnand %p7168_p12, %p7162_p13 }
  0x2c   : > { %7172 = shalt.err (!%p7169_p10)
}
  0x2d   : > { %s7276_s17 = smov 128   ;;  %s7277_s27 = smov 8  }
  0x2e   : > { %7065 = dma.hbm_to_vmem [thread:$0]  (!%p7397_p0), %s8600_s2, 18432, %s164_s15, [#allocation6], %s7276_s17, %s7276_s17, %s7277_s27  }
  0x2f   : > { %p8621_p1 = scmp.ne.s32.totalorder %s8618_s11, 0 }
  0x31   : > { %185 = sbr.rel (%p8621_p1) target bundleno = 1223 (0x4c7), region = 36 }
  0x38   : > { %p8622_p4 = scmp.ne.s32.totalorder %s8619_s12, 0 }
  0x3a   : > { %7234 = dma.done.wait (%p8622_p4), [#allocation6], 18432  }
  0x3b   : > { %7236 = vsyncadd (%p8622_p4), [#allocation6], 4294948864  ;;  %s203_s26 = sand.u32 1, %s7249_s19   ;;  %s4348_s30 = smul.u32 192, %s7257_s21 }
  0x3c   : > { %s7427_s16 = sshll.u32 %s203_s26, 7  ;;  %s209_s10 = smul.u32 480, %s7261_s22 }
  0x3d   : > { %s7472_s12 = scalar_lea.vmem [#allocation8], %s7427_s16 }
  0x3e   : > { %s210_s15 = sadd.s32 %s4348_s30, %s209_s10 }
  0x3f   : > { %s7433_s17 = scalar_lea.vmem %s8598_s0, %s210_s15 }
  0x40   : > { %v271_v0 = vld [vmem:[%s7433_s17] sm:$0xff]  ;;  %v273_v1 = vld [vmem:[%s7433_s17 + $0x8] sm:$0xff]  ;;  %v275_v2 = vld [vmem:[%s7433_s17 + $0x18] sm:$0xff] }
  0x41   : > { %272 = vst [vmem:[#allocation2] sm:$0xff] %v271_v0  ;;  %274 = vst [vmem:[#allocation2 + $0x8] sm:$0xff] %v273_v1  ;;  %v277_v3 = vld [vmem:[%s7433_s17 + $0x20] sm:$0xff]  ;;  %v279_v4 = vld [vmem:[%s7433_s17 + $0x30] sm:$0xff] }
  0x42   : > { %276 = vst [vmem:[#allocation2 + $0x18] sm:$0xff] %v275_v2  ;;  %v281_v5 = vld [vmem:[%s7433_s17 + $0x38] sm:$0xff]  ;;  %278 = vst [vmem:[#allocation2 + $0x20] sm:$0xff] %v277_v3  ;;  %v283_v6 = vld [vmem:[%s7433_s17 + $0x48] sm:$0xff] }
  0x43   : > { %280 = vst [vmem:[#allocation2 + $0x30] sm:$0xff] %v279_v4  ;;  %282 = vst [vmem:[#allocation2 + $0x38] sm:$0xff] %v281_v5  ;;  %v285_v7 = vld [vmem:[%s7433_s17 + $0x50] sm:$0xff]  ;;  %v287_v8 = vld [vmem:[%s7433_s17 + $0x60] sm:$0xff] }
  0x44   : > { %284 = vst [vmem:[#allocation2 + $0x48] sm:$0xff] %v283_v6  ;;  %286 = vst [vmem:[#allocation2 + $0x50] sm:$0xff] %v285_v7  ;;  %v289_v9 = vld [vmem:[%s7433_s17 + $0x68] sm:$0xff]  ;;  %v291_v10 = vld [vmem:[%s7433_s17 + $0x78] sm:$0xff] }
  0x45   : > { %288 = vst [vmem:[#allocation2 + $0x60] sm:$0xff] %v287_v8  ;;  %v293_v11 = vld [vmem:[%s7433_s17 + $0x80] sm:$0xff]  ;;  %290 = vst [vmem:[#allocation2 + $0x68] sm:$0xff] %v289_v9  ;;  %v295_v12 = vld [vmem:[%s7433_s17 + $0x90] sm:$0xff] }
  0x46   : > { %292 = vst [vmem:[#allocation2 + $0x78] sm:$0xff] %v291_v10  ;;  %294 = vst [vmem:[#allocation2 + $0x80] sm:$0xff] %v293_v11  ;;  %v297_v13 = vld [vmem:[%s7433_s17 + $0x98] sm:$0xff]  ;;  %v299_v14 = vld [vmem:[%s7433_s17 + $0xa8] sm:$0xff] }
  0x47   : > { %296 = vst [vmem:[#allocation2 + $0x90] sm:$0xff] %v295_v12  ;;  %298 = vst [vmem:[#allocation2 + $0x98] sm:$0xff] %v297_v13  ;;  %v301_v15 = vld [vmem:[%s7433_s17 + $0xb0] sm:$0xff]  ;;  %v303_v16 = vld [vmem:[%s7433_s17 + $0xc0] sm:$0xff] }
  0x48   : > { %300 = vst [vmem:[#allocation2 + $0xa8] sm:$0xff] %v299_v14  ;;  %v305_v17 = vld [vmem:[%s7433_s17 + $0xc8] sm:$0xff]  ;;  %302 = vst [vmem:[#allocation2 + $0xb0] sm:$0xff] %v301_v15  ;;  %v307_v18 = vld [vmem:[%s7433_s17 + $0xd8] sm:$0xff] }
  0x49   : > { %304 = vst [vmem:[#allocation2 + $0xc0] sm:$0xff] %v303_v16  ;;  %306 = vst [vmem:[#allocation2 + $0xc8] sm:$0xff] %v305_v17  ;;  %v309_v19 = vld [vmem:[%s7433_s17 + $0xe0] sm:$0xff]  ;;  %v311_v20 = vld [vmem:[%s7433_s17 + $0xf0] sm:$0xff] }
  0x4a   : > { %308 = vst [vmem:[#allocation2 + $0xd8] sm:$0xff] %v307_v18  ;;  %310 = vst [vmem:[#allocation2 + $0xe0] sm:$0xff] %v309_v19  ;;  %v313_v21 = vld [vmem:[%s7433_s17 + $0xf8] sm:$0xff]  ;;  %v315_v22 = vld [vmem:[%s7433_s17 + $0x108] sm:$0xff] }
  0x4b   : > { %312 = vst [vmem:[#allocation2 + $0xf0] sm:$0xff] %v311_v20  ;;  %v317_v23 = vld [vmem:[%s7433_s17 + $0x110] sm:$0xff]  ;;  %314 = vst [vmem:[#allocation2 + $0xf8] sm:$0xff] %v313_v21  ;;  %v4350_v25 = vld [vmem:[%s7433_s17 + $0x28] sm:$0x3] }
  0x4c   : > { %316 = vst [vmem:[#allocation2 + $0x108] sm:$0xff] %v315_v22  ;;  %318 = vst [vmem:[#allocation2 + $0x110] sm:$0xff] %v317_v23  ;;  %v4349_v24 = vld [vmem:[%s7433_s17 + $0x10] sm:$0x3]  ;;  %v4351_v26 = vld [vmem:[%s7433_s17 + $0x40] sm:$0x3] }
  0x4d   : > { %329 = vst [vmem:[#allocation2 + $0x10] sm:$0x3] %v4349_v24  ;;  %331 = vst [vmem:[#allocation2 + $0x28] sm:$0x3] %v4350_v25  ;;  %v4352_v27 = vld [vmem:[%s7433_s17 + $0x58] sm:$0x3] }
  0x4e   : > { %333 = vst [vmem:[#allocation2 + $0x40] sm:$0x3] %v4351_v26  ;;  %v4353_v28 = vld [vmem:[%s7433_s17 + $0x70] sm:$0x3]  ;;  %v4354_v29 = vld [vmem:[%s7433_s17 + $0x88] sm:$0x3] }
  0x4f   : > { %335 = vst [vmem:[#allocation2 + $0x58] sm:$0x3] %v4352_v27  ;;  %337 = vst [vmem:[#allocation2 + $0x70] sm:$0x3] %v4353_v28  ;;  %v4355_v30 = vld [vmem:[%s7433_s17 + $0xa0] sm:$0x3] }
  0x50   : > { %339 = vst [vmem:[#allocation2 + $0x88] sm:$0x3] %v4354_v29  ;;  %v4356_v31 = vld [vmem:[%s7433_s17 + $0xb8] sm:$0x3]  ;;  %v4357_v32 = vld [vmem:[%s7433_s17 + $0xd0] sm:$0x3] }
  0x51   : > { %341 = vst [vmem:[#allocation2 + $0xa0] sm:$0x3] %v4355_v30  ;;  %343 = vst [vmem:[#allocation2 + $0xb8] sm:$0x3] %v4356_v31  ;;  %v4358_v33 = vld [vmem:[%s7433_s17 + $0xe8] sm:$0x3] }
  0x52   : > { %345 = vst [vmem:[#allocation2 + $0xd0] sm:$0x3] %v4357_v32  ;;  %v4359_v34 = vld [vmem:[%s7433_s17 + $0x100] sm:$0x3]  ;;  %v4360_v35 = vld [vmem:[%s7433_s17 + $0x118] sm:$0x3] }
  0x53   : > { %347 = vst [vmem:[#allocation2 + $0xe8] sm:$0x3] %v4358_v33  ;;  %349 = vst [vmem:[#allocation2 + $0x100] sm:$0x3] %v4359_v34 }
  0x54   : > { %351 = vst [vmem:[#allocation2 + $0x118] sm:$0x3] %v4360_v35 }
  0x55   : > { %355 = vsyncadd [#allocation4], 3456 }
  0x56   : > { %7237 = dma.done.wait [#allocation4], 3456 }
  0x57   : > { %7238 = vsyncadd [#allocation4], 4294963840  ;;  %v7278_v36 = vmov 0.0   ;;  %v4361_v37 = vld [vmem:[%s8599_s1 + $0x80] sm:$0xff]  ;;  %v4362_v38 = vld [vmem:[%s8599_s1 + $0x88] sm:$0xff]  ;;  %p4490_p3 = scmp.ne.s32.totalorder %s7257_s21, 0 }
  0x58   : > { %2386 = vst [vmem:[#allocation3] sm:$0x1] %v7278_v36  ;;  %2387 = vst [vmem:[#allocation3 + $0x18] sm:$0x1] %v7278_v36  ;;  %v4363_v39 = vld [vmem:[%s8599_s1 + $0x90] sm:$0xff]  ;;  %v6176_v40 = vpack.c.bf16 %v4362_v38, %v4361_v37  ;;  %v4364_v41 = vld [vmem:[%s8599_s1 + $0x98] sm:$0xff] }
  0x59   : > { %2388 = vst [vmem:[#allocation3 + $0x30] sm:$0x1] %v7278_v36  ;;  %2389 = vst [vmem:[#allocation3 + $0x48] sm:$0x1] %v7278_v36  ;;  %v6180_v42 = vpack.c.bf16 %v4364_v41, %v4363_v39  ;;  %v4365_v43 = vld [vmem:[%s8599_s1 + $0xa0] sm:$0xff]  ;;  %v4366_v44 = vld [vmem:[%s8599_s1 + $0xa8] sm:$0xff] }
  0x5a   : > { %2390 = vst [vmem:[#allocation3 + $0x60] sm:$0x1] %v7278_v36  ;;  %2391 = vst [vmem:[#allocation3 + $0x78] sm:$0x1] %v7278_v36  ;;  %6177 = vmatprep.subr.bf16.mxu0 %v6176_v40  ;;  %v6184_v45 = vpack.c.bf16 %v4366_v44, %v4365_v43  ;;  %v396_v46 = vld [vmem:[#allocation2 + $0x1] sm:$0xff]  ;;  %v4367_v47 = vld [vmem:[%s8599_s1 + $0xb0] sm:$0xff] }
  0x5b   : > { %2392 = vst [vmem:[#allocation3 + $0x90] sm:$0x1] %v7278_v36  ;;  %2393 = vst [vmem:[#allocation3 + $0xa8] sm:$0x1] %v7278_v36  ;;  %6179 = vmatpush3.bf16.msra.mxu0 %v6176_v40  ;;  %v4368_v48 = vld [vmem:[%s8599_s1 + $0xb8] sm:$0xff]  ;;  %5146 = vmatprep.mubr.f32.mxu0 %v396_v46  ;;  %v4369_v50 = vld [vmem:[%s8599_s1 + $0xc0] sm:$0xff] }
  0x5c   : > { %2394 = vst [vmem:[#allocation3 + $0xc0] sm:$0x1] %v7278_v36  ;;  %2395 = vst [vmem:[#allocation3 + $0xd8] sm:$0x1] %v7278_v36  ;;  %6181 = vmatprep.subr.bf16.mxu0 %v6180_v42  ;;  %v6188_v49 = vpack.c.bf16 %v4368_v48, %v4367_v47  ;;  %v4370_v51 = vld [vmem:[%s8599_s1 + $0xc8] sm:$0xff]  ;;  %v4371_v53 = vld [vmem:[%s8599_s1 + $0xd0] sm:$0xff] }
  0x5d   : > { %2396 = vst [vmem:[#allocation3 + $0x11] sm:$0x1] %v7278_v36  ;;  %2397 = vst [vmem:[#allocation3 + $0x29] sm:$0x1] %v7278_v36  ;;  %v6192_v52 = vpack.c.bf16 %v4370_v51, %v4369_v50  ;;  %v4372_v54 = vld [vmem:[%s8599_s1 + $0xd8] sm:$0xff]  ;;  %v4373_v56 = vld [vmem:[%s8599_s1 + $0xe0] sm:$0xff] }
  0x5e   : > { %2398 = vst [vmem:[#allocation3 + $0x41] sm:$0x1] %v7278_v36  ;;  %2399 = vst [vmem:[#allocation3 + $0x59] sm:$0x1] %v7278_v36  ;;  %v6196_v55 = vpack.c.bf16 %v4372_v54, %v4371_v53  ;;  %v4374_v57 = vld [vmem:[%s8599_s1 + $0xe8] sm:$0xff]  ;;  %v4375_v59 = vld [vmem:[%s8599_s1 + $0xf0] sm:$0xff] }
  0x5f   : > { %2400 = vst [vmem:[#allocation3 + $0x71] sm:$0x1] %v7278_v36  ;;  %2401 = vst [vmem:[#allocation3 + $0x89] sm:$0x1] %v7278_v36  ;;  %6183 = vmatpush3.bf16.msra.mxu0 %v6180_v42  ;;  %v6200_v58 = vpack.c.bf16 %v4374_v57, %v4373_v56  ;;  %v4376_v60 = vld [vmem:[%s8599_s1 + $0xf8] sm:$0xff]  ;;  %v380_v62 = vld [vmem:[%s8599_s1] sm:$0xff] }
  0x60   : > { %2402 = vst [vmem:[#allocation3 + $0xa1] sm:$0x1] %v7278_v36  ;;  %2403 = vst [vmem:[#allocation3 + $0xb9] sm:$0x1] %v7278_v36  ;;  %6185 = vmatprep.subr.bf16.mxu0 %v6184_v45  ;;  %v6204_v61 = vpack.c.bf16 %v4376_v60, %v4375_v59  ;;  %v381_v63 = vld [vmem:[%s8599_s1 + $0x8] sm:$0xff]  ;;  %v382_v1 = vld [vmem:[%s8599_s1 + $0x10] sm:$0xff] }
  0x61   : > { %2404 = vst [vmem:[#allocation3 + $0xd1] sm:$0x1] %v7278_v36  ;;  %2405 = vst [vmem:[#allocation3 + $0xe9] sm:$0x1] %v7278_v36  ;;  %v6208_v0 = vpack.c.bf16 %v381_v63, %v380_v62  ;;  %v383_v2 = vld [vmem:[%s8599_s1 + $0x18] sm:$0xff]  ;;  %v397_v3 = vld [vmem:[#allocation2 + $0x9] sm:$0xff] }
  0x62   : > { %v7534_v4 = vld [vmem:[#allocation2 + $0x19] sm:$0xff]  ;;  %v6212_v5 = vpack.c.bf16 %v383_v2, %v382_v1  ;;  %v7536_v6 = vld [vmem:[#allocation2 + $0x4a] sm:$0xff]  ;;  %v7546_v9 = vld [vmem:[#allocation2 + $0x21] sm:$0xff] }
  0x63   : > { %6187 = vmatpush3.bf16.msra.mxu0 %v6184_v45  ;;  %v384_v7 = vld [vmem:[%s8599_s1 + $0x20] sm:$0xff]  ;;  %v385_v8 = vld [vmem:[%s8599_s1 + $0x28] sm:$0xff]  ;;  %5645 = vmatprep.mubr.f32.mxu1 %v7536_v6  ;;  %v7548_v10 = vld [vmem:[#allocation2 + $0x31] sm:$0xff] }
  0x64   : > { %6189 = vmatprep.subr.bf16.mxu0 %v6188_v49  ;;  %v6216_v11 = vpack.c.bf16 %v385_v8, %v384_v7  ;;  %v386_v12 = vld [vmem:[%s8599_s1 + $0x30] sm:$0xff]  ;;  %v387_v13 = vld [vmem:[%s8599_s1 + $0x38] sm:$0xff]  ;;  %v388_v17 = vld [vmem:[%s8599_s1 + $0x40] sm:$0xff] }
  0x65   : > { %v7558_v14 = vld [vmem:[#allocation2 + $0x39] sm:$0xff]  ;;  %v7560_v15 = vld [vmem:[#allocation2 + $0x49] sm:$0xff]  ;;  %v6220_v16 = vpack.c.bf16 %v387_v13, %v386_v12  ;;  %v7570_v19 = vld [vmem:[#allocation2 + $0x51] sm:$0xff] }
  0x66   : > { %v389_v18 = vld [vmem:[%s8599_s1 + $0x48] sm:$0xff]  ;;  %v390_v22 = vld [vmem:[%s8599_s1 + $0x50] sm:$0xff]  ;;  %v391_v23 = vld [vmem:[%s8599_s1 + $0x58] sm:$0xff] }
  0x67   : > { %6191 = vmatpush3.bf16.msra.mxu0 %v6188_v49  ;;  %v7572_v20 = vld [vmem:[#allocation2 + $0x61] sm:$0xff]  ;;  %v6224_v21 = vpack.c.bf16 %v389_v18, %v388_v17  ;;  %v7582_v24 = vld [vmem:[#allocation2 + $0x69] sm:$0xff]  ;;  %v7584_v25 = vld [vmem:[#allocation2 + $0x79] sm:$0xff]  ;;  %v6228_v26 = vpack.c.bf16 %v391_v23, %v390_v22 }
  0x68   : > { %6193 = vmatprep.subr.bf16.mxu0 %v6192_v52  ;;  %v392_v27 = vld [vmem:[%s8599_s1 + $0x60] sm:$0xff]  ;;  %v393_v28 = vld [vmem:[%s8599_s1 + $0x68] sm:$0xff]  ;;  %v7596_v30 = vld [vmem:[#allocation2 + $0x91] sm:$0xff] }
  0x69   : > { %v7594_v29 = vld [vmem:[#allocation2 + $0x81] sm:$0xff]  ;;  %v6232_v31 = vpack.c.bf16 %v393_v28, %v392_v27  ;;  %v394_v32 = vld [vmem:[%s8599_s1 + $0x70] sm:$0xff]  ;;  %v395_v33 = vld [vmem:[%s8599_s1 + $0x78] sm:$0xff] }
  0x6a   : > { %v7606_v34 = vld [vmem:[#allocation2 + $0x99] sm:$0xff]  ;;  %v7608_v35 = vld [vmem:[#allocation2 + $0xa9] sm:$0xff]  ;;  %v6236_v36 = vpack.c.bf16 %v395_v33, %v394_v32  ;;  %v7618_v39 = vld [vmem:[#allocation2 + $0xb1] sm:$0xff] }
  0x6b   : > { %6195 = vmatpush3.bf16.msra.mxu0 %v6192_v52  ;;  %v4377_v37 = vld [vmem:[%s8599_s1 + $0x100] sm:$0xff]  ;;  %v4378_v38 = vld [vmem:[%s8599_s1 + $0x108] sm:$0xff]  ;;  %v4379_v46 = vld [vmem:[%s8599_s1 + $0x110] sm:$0xff] }
  0x6c   : > { %6197 = vmatprep.subr.bf16.mxu0 %v6196_v55  ;;  %v7620_v40 = vld [vmem:[#allocation2 + $0xc1] sm:$0xff]  ;;  %v6240_v41 = vpack.c.bf16 %v4378_v38, %v4377_v37  ;;  %v7624_v42 = vld [vmem:[#allocation2 + $0xc9] sm:$0xff]  ;;  %v7626_v43 = vld [vmem:[#allocation2 + $0xd9] sm:$0xff] }
  0x6d   : > { %v7630_v44 = vld [vmem:[#allocation2 + $0xe1] sm:$0xff]  ;;  %v4380_v47 = vld [vmem:[%s8599_s1 + $0x118] sm:$0xff]  ;;  %v7650_v54 = vld [vmem:[#allocation2 + $0x30] sm:$0xff] }
  0x6e   : > { %v360_v45 = vld [vmem:[#allocation2] sm:$0xff]  ;;  %v361_v48 = vld [vmem:[#allocation2 + $0x8] sm:$0xff]  ;;  %v7639_v49 = vld [vmem:[#allocation2 + $0x18] sm:$0xff]  ;;  %v6244_v50 = vpack.c.bf16 %v4380_v47, %v4379_v46 }
  0x6f   : > { %6199 = vmatpush3.bf16.msra.mxu0 %v6196_v55  ;;  %v4381_v51 = vld [vmem:[%s8599_s1 + $0x120] sm:$0xff]  ;;  %v4382_v52 = vld [vmem:[%s8599_s1 + $0x128] sm:$0xff]  ;;  %v4383_v56 = vld [vmem:[%s8599_s1 + $0x130] sm:$0xff] }
  0x70   : > { %6201 = vmatprep.subr.bf16.mxu0 %v6200_v58  ;;  %v7648_v53 = vld [vmem:[#allocation2 + $0x20] sm:$0xff]  ;;  %v6248_v55 = vpack.c.bf16 %v4382_v52, %v4381_v51  ;;  %v4384_v57 = vld [vmem:[%s8599_s1 + $0x138] sm:$0xff]  ;;  %v7662_v59 = vld [vmem:[#allocation2 + $0x48] sm:$0xff] }
  0x71   : > { %v6252_v60 = vpack.c.bf16 %v4384_v57, %v4383_v56  ;;  %v4386_v62 = vld [vmem:[%s8599_s1 + $0x148] sm:$0xff]  ;;  %v7672_v63 = vld [vmem:[#allocation2 + $0x50] sm:$0xff]  ;;  %v7686_v7 = vld [vmem:[#allocation2 + $0x78] sm:$0xff] }
  0x72   : > { %v4387_v2 = vld [vmem:[%s8599_s1 + $0x150] sm:$0xff]  ;;  %v4390_v12 = vld [vmem:[%s8599_s1 + $0x168] sm:$0xff]  ;;  %v7696_v13 = vld [vmem:[#allocation2 + $0x80] sm:$0xff] }
  0x73   : > { %6203 = vmatpush3.bf16.msra.mxu0 %v6200_v58  ;;  %v7660_v58 = vld [vmem:[#allocation2 + $0x38] sm:$0xff]  ;;  %v4391_v18 = vld [vmem:[%s8599_s1 + $0x170] sm:$0xff]  ;;  %v7710_v23 = vld [vmem:[#allocation2 + $0xa8] sm:$0xff] }
  0x74   : > { %6205 = vmatprep.subr.bf16.mxu0 %v6204_v61  ;;  %v7708_v22 = vld [vmem:[#allocation2 + $0x98] sm:$0xff]  ;;  %v4393_v27 = vld [vmem:[%s8599_s1 + $0x180] sm:$0xff]  ;;  %v4394_v28 = vld [vmem:[%s8599_s1 + $0x188] sm:$0xff] }
  0x75   : > { %v7722_v32 = vld [vmem:[#allocation2 + $0xc0] sm:$0xff]  ;;  %v6272_v33 = vpack.c.bf16 %v4394_v28, %v4393_v27  ;;  %v7728_v37 = vld [vmem:[#allocation2 + $0xd8] sm:$0xff]  ;;  %v764_v47 = vld [vmem:[#allocation2 + $0xa] sm:$0xff] }
  0x76   : > { %v7732_v38 = vld [vmem:[#allocation2 + $0xe0] sm:$0xff]  ;;  %v4396_v46 = vld [vmem:[%s8599_s1 + $0x198] sm:$0xff]  ;;  %v4398_v52 = vld [vmem:[%s8599_s1 + $0x1a8] sm:$0xff] }
  0x77   : > { %6207 = vmatpush3.bf16.msra.mxu0 %v6204_v61  ;;  %v4385_v61 = vld [vmem:[%s8599_s1 + $0x140] sm:$0xff]  ;;  %v7752_v56 = vld [vmem:[#allocation2 + $0x32] sm:$0xff] }
  0x78   : > { %6209 = vmatprep.subr.bf16.mxu0 %v6208_v0  ;;  %v6256_v1 = vpack.c.bf16 %v4386_v62, %v4385_v61  ;;  %v4397_v51 = vld [vmem:[%s8599_s1 + $0x1a0] sm:$0xff]  ;;  %v4400_v61 = vld [vmem:[%s8599_s1 + $0x1b8] sm:$0xff] }
  0x79   : > { %v6280_v57 = vpack.c.bf16 %v4398_v52, %v4397_v51  ;;  %v7762_v62 = vld [vmem:[#allocation2 + $0x3a] sm:$0xff]  ;;  %v7810_v52 = vld [vmem:[#allocation2 + $0xaa] sm:$0xff] }
  0x7a   : > { %5147 = vmatmul.mubr.f32.vlgmr.msra.gmra.mrb[0].mxu0 %v397_v3  ;;  %v4388_v3 = vld [vmem:[%s8599_s1 + $0x158] sm:$0xff]  ;;  %v4405_v28 = vld [vmem:[%s8599_s1 + $0x1e0] sm:$0xff] }
  0x7b   : > { %6211 = vmatpush3.bf16.msra.mxu0 %v6208_v0  ;;  %5149 = vmatprep.mubr.f32.mxu0 %v7534_v4  ;;  %v7674_v0 = vld [vmem:[#allocation2 + $0x60] sm:$0xff]  ;;  %v6260_v8 = vpack.c.bf16 %v4388_v3, %v4387_v2  ;;  %v4402_v3 = vld [vmem:[%s8599_s1 + $0x1c8] sm:$0xff] }
  0x7c   : > { %6213 = vmatprep.subr.bf16.mxu0 %v6212_v5  ;;  %v4401_v2 = vld [vmem:[%s8599_s1 + $0x1c0] sm:$0xff] }
  0x7d   : > { %v7808_v51 = vld [vmem:[#allocation2 + $0x9a] sm:$0xff] }
  0x7e   : > { %5150 = vmatmul.mubr.f32.gmra.mrb[2].mxu0 %v7546_v9 }
  0x7f   : > { %6215 = vmatpush3.bf16.msra.mxu0 %v6212_v5  ;;  %5152 = vmatprep.mubr.f32.mxu0 %v7548_v10  ;;  %v7684_v5 = vld [vmem:[#allocation2 + $0x68] sm:$0xff] }
  0x80   : > { %6217 = vmatprep.subr.bf16.mxu0 %v6216_v11 }
  0x82   : > { %5153 = vmatmul.mubr.f32.gmra.mrb[4].mxu0 %v7558_v14 }
  0x83   : > { %5155 = vmatprep.mubr.f32.mxu0 %v7560_v15  ;;  %6219 = vmatpush3.bf16.msra.mxu0 %v6216_v11  ;;  %v4389_v11 = vld [vmem:[%s8599_s1 + $0x160] sm:$0xff] }
  0x84   : > { %6221 = vmatprep.subr.bf16.mxu0 %v6220_v16  ;;  %v6264_v17 = vpack.c.bf16 %v4390_v12, %v4389_v11  ;;  %v7774_v11 = vld [vmem:[#allocation2 + $0x62] sm:$0xff]  ;;  %v6288_v12 = vpack.c.bf16 %v4402_v3, %v4401_v2 }
  0x85   : > { %v7822_v2 = vld [vmem:[#allocation2 + $0xc2] sm:$0xff] }
  0x86   : > { %5156 = vmatmul.mubr.f32.gmra.mrb[6].mxu0 %v7570_v19 }
  0x87   : > { %5158 = vmatprep.mubr.f32.mxu0 %v7572_v20  ;;  %6223 = vmatpush3.bf16.msra.mxu0 %v6220_v16  ;;  %v7698_v16 = vld [vmem:[#allocation2 + $0x90] sm:$0xff] }
  0x88   : > { %6225 = vmatprep.subr.bf16.mxu0 %v6224_v21 }
  0x8a   : > { %5159 = vmatmul.mubr.f32.gmra.mrb[8].mxu0 %v7582_v24 }
  0x8b   : > { %5161 = vmatprep.mubr.f32.mxu0 %v7584_v25  ;;  %6227 = vmatpush3.bf16.msra.mxu0 %v6224_v21  ;;  %v4392_v21 = vld [vmem:[%s8599_s1 + $0x178] sm:$0xff] }
  0x8c   : > { %6229 = vmatprep.subr.bf16.mxu0 %v6228_v26 }
  0x8e   : > { %5162 = vmatmul.mubr.f32.gmra.mrb[10].mxu0 %v7594_v29 }
  0x8f   : > { %5164 = vmatprep.mubr.f32.mxu0 %v7596_v30  ;;  %6231 = vmatpush3.bf16.msra.mxu0 %v6228_v26  ;;  %v6268_v26 = vpack.c.bf16 %v4392_v21, %v4391_v18  ;;  %v4404_v18 = vld [vmem:[%s8599_s1 + $0x1d8] sm:$0xff]  ;;  %v7784_v21 = vld [vmem:[#allocation2 + $0x6a] sm:$0xff] }
  0x90   : > { %6233 = vmatprep.subr.bf16.mxu0 %v6232_v31 }
  0x92   : > { %5165 = vmatmul.mubr.f32.gmra.mrb[12].mxu0 %v7606_v34 }
  0x93   : > { %5167 = vmatprep.mubr.f32.mxu0 %v7608_v35  ;;  %6235 = vmatpush3.bf16.msra.mxu0 %v6232_v31  ;;  %v7720_v31 = vld [vmem:[#allocation2 + $0xb0] sm:$0xff] }
  0x94   : > { %6237 = vmatprep.subr.bf16.mxu0 %v6236_v36 }
  0x96   : > { %5168 = vmatmul.mubr.f32.gmra.mrb[14].mxu0 %v7618_v39 }
  0x97   : > { %5170 = vmatprep.mubr.f32.mxu0 %v7620_v40  ;;  %6239 = vmatpush3.bf16.msra.mxu0 %v6236_v36  ;;  %v7726_v36 = vld [vmem:[#allocation2 + $0xc8] sm:$0xff] }
  0x98   : > { %6241 = vmatprep.subr.bf16.mxu0 %v6240_v41 }
  0x9a   : > { %5171 = vmatmul.mubr.f32.gmra.mrb[16].mxu0 %v7624_v42 }
  0x9b   : > { %5173 = vmatprep.mubr.f32.mxu0 %v7626_v43 }
  0x9e   : > { %5174 = vmatmul.mubr.f32.gmra.mrb[18].mxu0 %v7630_v44 }
  0x9f   : > { %5208 = vmatprep.mubr.f32.mxu0 %v360_v45  ;;  %v4395_v45 = vld [vmem:[%s8599_s1 + $0x190] sm:$0xff] }
  0xa2   : > { %5209 = vmatmul.mubr.f32.vlgmr.msra.gmra.mrb[0].mxu0 %v361_v48  ;;  %v7741_v48 = vld [vmem:[#allocation2 + $0x1a] sm:$0xff] }
  0xa3   : > { %6243 = vmatpush3.bf16.msra.mxu0 %v6240_v41  ;;  %5211 = vmatprep.mubr.f32.mxu0 %v7639_v49  ;;  %v763_v41 = vld [vmem:[#allocation2 + $0x2] sm:$0xff] }
  0xa4   : > { %6245 = vmatprep.subr.bf16.mxu0 %v6244_v50 }
  0xa6   : > { %5212 = vmatmul.mubr.f32.gmra.mrb[2].mxu0 %v7648_v53 }
  0xa7   : > { %6247 = vmatpush3.bf16.msra.mxu0 %v6244_v50  ;;  %5214 = vmatprep.mubr.f32.mxu0 %v7650_v54  ;;  %v6276_v50 = vpack.c.bf16 %v4396_v46, %v4395_v45  ;;  %v7798_v45 = vld [vmem:[#allocation2 + $0x92] sm:$0xff] }
  0xa8   : > { %6249 = vmatprep.subr.bf16.mxu0 %v6248_v55 }
  0xaa   : > { %5215 = vmatmul.mubr.f32.gmra.mrb[4].mxu0 %v7660_v58 }
  0xab   : > { %5217 = vmatprep.mubr.f32.mxu0 %v7662_v59  ;;  %6251 = vmatpush3.bf16.msra.mxu0 %v6248_v55  ;;  %v7750_v55 = vld [vmem:[#allocation2 + $0x22] sm:$0xff] }
  0xac   : > { %6253 = vmatprep.subr.bf16.mxu0 %v6252_v60 }
  0xae   : > { %5218 = vmatmul.mubr.f32.gmra.mrb[6].mxu0 %v7672_v63 }
  0xaf   : > { %5220 = vmatprep.mubr.f32.mxu0 %v7674_v0  ;;  %6255 = vmatpush3.bf16.msra.mxu0 %v6252_v60  ;;  %v4399_v60 = vld [vmem:[%s8599_s1 + $0x1b0] sm:$0xff] }
  0xb0   : > { %6257 = vmatprep.subr.bf16.mxu0 %v6256_v1 }
  0xb2   : > { %5221 = vmatmul.mubr.f32.gmra.mrb[8].mxu0 %v7684_v5 }
  0xb3   : > { %5223 = vmatprep.mubr.f32.mxu0 %v7686_v7  ;;  %6259 = vmatpush3.bf16.msra.mxu0 %v6256_v1  ;;  %v6284_v1 = vpack.c.bf16 %v4400_v61, %v4399_v60  ;;  %v4409_v60 = vld [vmem:[%s8599_s1 + $0x200] sm:$0xff]  ;;  %v4410_v61 = vld [vmem:[%s8599_s1 + $0x208] sm:$0xff] }
  0xb4   : > { %6261 = vmatprep.subr.bf16.mxu0 %v6260_v8  ;;  %v6304_v3 = vpack.c.bf16 %v4410_v61, %v4409_v60  ;;  %v4415_v61 = vld [vmem:[%s8599_s1 + $0x230] sm:$0xff] }
  0xb6   : > { %5224 = vmatmul.mubr.f32.gmra.mrb[10].mxu0 %v7696_v13 }
  0xb7   : > { %5226 = vmatprep.mubr.f32.mxu0 %v7698_v16  ;;  %6263 = vmatpush3.bf16.msra.mxu0 %v6260_v8  ;;  %v7772_v8 = vld [vmem:[#allocation2 + $0x52] sm:$0xff] }
  0xb8   : > { %6265 = vmatprep.subr.bf16.mxu0 %v6264_v17 }
  0xba   : > { %5227 = vmatmul.mubr.f32.gmra.mrb[12].mxu0 %v7708_v22 }
  0xbb   : > { %5229 = vmatprep.mubr.f32.mxu0 %v7710_v23  ;;  %6267 = vmatpush3.bf16.msra.mxu0 %v6264_v17  ;;  %v4403_v17 = vld [vmem:[%s8599_s1 + $0x1d0] sm:$0xff] }
  0xbc   : > { %6269 = vmatprep.subr.bf16.mxu0 %v6268_v26  ;;  %v6292_v27 = vpack.c.bf16 %v4404_v18, %v4403_v17  ;;  %v7828_v17 = vld [vmem:[#allocation2 + $0xda] sm:$0xff]  ;;  %v7832_v18 = vld [vmem:[#allocation2 + $0xe2] sm:$0xff] }
  0xbe   : > { %5230 = vmatmul.mubr.f32.gmra.mrb[14].mxu0 %v7720_v31 }
  0xbf   : > { %5232 = vmatprep.mubr.f32.mxu0 %v7722_v32  ;;  %6271 = vmatpush3.bf16.msra.mxu0 %v6268_v26  ;;  %v7786_v26 = vld [vmem:[#allocation2 + $0x7a] sm:$0xff] }
  0xc0   : > { %6273 = vmatprep.subr.bf16.mxu0 %v6272_v33 }
  0xc2   : > { %5233 = vmatmul.mubr.f32.gmra.mrb[16].mxu0 %v7726_v36 }
  0xc3   : > { %5235 = vmatprep.mubr.f32.mxu0 %v7728_v37 }
  0xc6   : > { %5236 = vmatmul.mubr.f32.gmra.mrb[18].mxu0 %v7732_v38 }
  0xc7   : > { %5270 = vmatprep.mubr.f32.mxu0 %v763_v41  ;;  %v7796_v41 = vld [vmem:[#allocation2 + $0x82] sm:$0xff] }
  0xca   : > { %5271 = vmatmul.mubr.f32.vlgmr.msra.gmra.mrb[0].mxu0 %v764_v47  ;;  %v4407_v47 = vld [vmem:[%s8599_s1 + $0x1f0] sm:$0xff] }
  0xcb   : > { %6275 = vmatpush3.bf16.msra.mxu0 %v6272_v33  ;;  %5273 = vmatprep.mubr.f32.mxu0 %v7741_v48  ;;  %v4406_v33 = vld [vmem:[%s8599_s1 + $0x1e8] sm:$0xff] }
  0xcc   : > { %6277 = vmatprep.subr.bf16.mxu0 %v6276_v50  ;;  %v6296_v46 = vpack.c.bf16 %v4406_v33, %v4405_v28  ;;  %v4412_v28 = vld [vmem:[%s8599_s1 + $0x218] sm:$0xff] }
  0xce   : > { %5274 = vmatmul.mubr.f32.gmra.mrb[2].mxu0 %v7750_v55 }
  0xcf   : > { %6279 = vmatpush3.bf16.msra.mxu0 %v6276_v50  ;;  %5276 = vmatprep.mubr.f32.mxu0 %v7752_v56  ;;  %v4408_v50 = vld [vmem:[%s8599_s1 + $0x1f8] sm:$0xff] }
  0xd0   : > { %6281 = vmatprep.subr.bf16.mxu0 %v6280_v57 }
  0xd2   : > { %5277 = vmatmul.mubr.f32.gmra.mrb[4].mxu0 %v7762_v62 }
  0xd3   : > { %5279 = vmatprep.mubr.f32.mxu0 %v7536_v6  ;;  %6283 = vmatpush3.bf16.msra.mxu0 %v6280_v57  ;;  %v6300_v57 = vpack.c.bf16 %v4408_v50, %v4407_v47  ;;  %v4414_v47 = vld [vmem:[%s8599_s1 + $0x228] sm:$0xff]  ;;  %v4473_v50 = vld [vmem:[%s8599_s1 + $0x400] sm:$0xff] }
  0xd4   : > { %6285 = vmatprep.subr.bf16.mxu0 %v6284_v1 }
  0xd6   : > { %5280 = vmatmul.mubr.f32.gmra.mrb[6].mxu0 %v7772_v8 }
  0xd7   : > { %5282 = vmatprep.mubr.f32.mxu0 %v7774_v11  ;;  %6287 = vmatpush3.bf16.msra.mxu0 %v6284_v1  ;;  %v7820_v1 = vld [vmem:[#allocation2 + $0xb2] sm:$0xff] }
  0xd8   : > { %6289 = vmatprep.subr.bf16.mxu0 %v6288_v12 }
  0xda   : > { %5283 = vmatmul.mubr.f32.gmra.mrb[8].mxu0 %v7784_v21 }
  0xdb   : > { %5285 = vmatprep.mubr.f32.mxu0 %v7786_v26  ;;  %6291 = vmatpush3.bf16.msra.mxu0 %v6288_v12  ;;  %v7826_v12 = vld [vmem:[#allocation2 + $0xca] sm:$0xff] }
  0xdc   : > { %6293 = vmatprep.subr.bf16.mxu0 %v6292_v27 }
  0xde   : > { %5286 = vmatmul.mubr.f32.gmra.mrb[10].mxu0 %v7796_v41 }
  0xdf   : > { %5288 = vmatprep.mubr.f32.mxu0 %v7798_v45  ;;  %6295 = vmatpush3.bf16.msra.mxu0 %v6292_v27  ;;  %v4411_v27 = vld [vmem:[%s8599_s1 + $0x210] sm:$0xff] }
  0xe0   : > { %6297 = vmatprep.subr.bf16.mxu0 %v6296_v46  ;;  %v6308_v33 = vpack.c.bf16 %v4412_v28, %v4411_v27  ;;  %v4476_v28 = vld [vmem:[%s8599_s1 + $0x418] sm:$0xff] }
  0xe2   : > { %5289 = vmatmul.mubr.f32.gmra.mrb[12].mxu0 %v7808_v51 }
  0xe3   : > { %5291 = vmatprep.mubr.f32.mxu0 %v7810_v52  ;;  %6299 = vmatpush3.bf16.msra.mxu0 %v6296_v46  ;;  %v4413_v46 = vld [vmem:[%s8599_s1 + $0x220] sm:$0xff] }
  0xe4   : > { %6301 = vmatprep.subr.bf16.mxu0 %v6300_v57 }
  0xe6   : > { %5292 = vmatmul.mubr.f32.gmra.mrb[14].mxu0 %v7820_v1 }
  0xe7   : > { %5294 = vmatprep.mubr.f32.mxu0 %v7822_v2  ;;  %6303 = vmatpush3.bf16.msra.mxu0 %v6300_v57  ;;  %v6312_v57 = vpack.c.bf16 %v4414_v47, %v4413_v46  ;;  %v4417_v46 = vld [vmem:[%s8599_s1 + $0x240] sm:$0xff] }
  0xe8   : > { %6305 = vmatprep.subr.bf16.mxu0 %v6304_v3 }
  0xea   : > { %5295 = vmatmul.mubr.f32.gmra.mrb[16].mxu0 %v7826_v12 }
  0xeb   : > { %5297 = vmatprep.mubr.f32.mxu0 %v7828_v17 }
  0xee   : > { %5298 = vmatmul.mubr.f32.gmra.mrb[18].mxu0 %v7832_v18 }
  0xef   : > { %5332 = vmatprep.mubr.f32.mxu0 %v7639_v49  ;;  %v4474_v49 = vld [vmem:[%s8599_s1 + $0x408] sm:$0xff] }
  0xf0   : > { %v7856_v60 = vpack.c.bf16 %v4474_v49, %v4473_v50  ;;  %v4477_v50 = vld [vmem:[%s8599_s1 + $0x420] sm:$0xff]  ;;  %v4478_v49 = vld [vmem:[%s8599_s1 + $0x428] sm:$0xff] }
  0xf2   : > { %5333 = vmatmul.mubr.f32.vlgmr.msra.gmra.mrb[0].mxu0 %v7648_v53  ;;  %v4416_v53 = vld [vmem:[%s8599_s1 + $0x238] sm:$0xff]  ;;  %6752 = vmatprep.subr.bf16.mxu1 %v7856_v60 }
  0xf3   : > { %6307 = vmatpush3.bf16.msra.mxu0 %v6304_v3  ;;  %5335 = vmatprep.mubr.f32.mxu0 %v7650_v54  ;;  %v4475_v3 = vld [vmem:[%s8599_s1 + $0x410] sm:$0xff]  ;;  %v6316_v27 = vpack.c.bf16 %v4416_v53, %v4415_v61  ;;  %v7891_v53 = vpack.c.bf16 %v4478_v49, %v4477_v50  ;;  %v4421_v49 = vld [vmem:[%s8599_s1 + $0x260] sm:$0xff] }
  0xf4   : > { %6309 = vmatprep.subr.bf16.mxu0 %v6308_v33  ;;  %6760 = vmatpush3.bf16.msra.mxu1 %v7856_v60  ;;  %v7880_v47 = vpack.c.bf16 %v4476_v28, %v4475_v3  ;;  %v4419_v3 = vld [vmem:[%s8599_s1 + $0x250] sm:$0xff] }
  0xf5   : > { %8623 = vst [vmem:[#allocation13_spill] sm:$0xff] %v7891_v53  ;;  %v4479_v28 = vld [vmem:[%s8599_s1 + $0x430] sm:$0xff] }
  0xf6   : > { %5336 = vmatmul.mubr.f32.gmra.mrb[2].mxu0 %v7660_v58  ;;  %6753 = vmatprep.subr.bf16.mxu1 %v7880_v47 }
  0xf7   : > { %6311 = vmatpush3.bf16.msra.mxu0 %v6308_v33  ;;  %5338 = vmatprep.mubr.f32.mxu0 %v7662_v59  ;;  %v4418_v33 = vld [vmem:[%s8599_s1 + $0x248] sm:$0xff] }
  0xf8   : > { %6313 = vmatprep.subr.bf16.mxu0 %v6312_v57  ;;  %v6320_v61 = vpack.c.bf16 %v4418_v33, %v4417_v46  ;;  %6761 = vmatpush3.bf16.msra.mxu1 %v7880_v47  ;;  %v4480_v46 = vld [vmem:[%s8599_s1 + $0x438] sm:$0xff] }
  0xf9   : > { %6754 = vmatprep.subr.bf16.mxu1 %v7891_v53  ;;  %v7909_v50 = vpack.c.bf16 %v4480_v46, %v4479_v28 }
  0xfa   : > { %5339 = vmatmul.mubr.f32.gmra.mrb[4].mxu0 %v7672_v63 }
  0xfb   : > { %5341 = vmatprep.mubr.f32.mxu0 %v7674_v0  ;;  %6315 = vmatpush3.bf16.msra.mxu0 %v6312_v57  ;;  %v4420_v57 = vld [vmem:[%s8599_s1 + $0x258] sm:$0xff]  ;;  %8624 = vst [vmem:[#allocation14_spill] sm:$0xff] %v7909_v50 }
  0xfc   : > { %6317 = vmatprep.subr.bf16.mxu0 %v6316_v27  ;;  %v6324_v33 = vpack.c.bf16 %v4420_v57, %v4419_v3  ;;  %6762 = vmatpush3.bf16.msra.mxu1 %v7891_v53  ;;  %v4481_v3 = vld [vmem:[%s8599_s1 + $0x440] sm:$0xff]  ;;  %v4482_v57 = vld [vmem:[%s8599_s1 + $0x448] sm:$0xff]  ;;  %v4423_v53 = vld [vmem:[%s8599_s1 + $0x270] sm:$0xff] }
  0xfd   : > { %6755 = vmatprep.subr.bf16.mxu1 %v7909_v50  ;;  %v7927_v46 = vpack.c.bf16 %v4482_v57, %v4481_v3 }
  0xfe   : > { %5342 = vmatmul.mubr.f32.gmra.mrb[6].mxu0 %v7684_v5 }
  0xff   : > { %5344 = vmatprep.mubr.f32.mxu0 %v7686_v7  ;;  %6319 = vmatpush3.bf16.msra.mxu0 %v6316_v27  ;;  %v4422_v27 = vld [vmem:[%s8599_s1 + $0x268] sm:$0xff] }
 0x100   : > { %6321 = vmatprep.subr.bf16.mxu0 %v6320_v61  ;;  %v6328_v28 = vpack.c.bf16 %v4422_v27, %v4421_v49  ;;  %6763 = vmatpush3.bf16.msra.mxu1 %v7909_v50  ;;  %v4483_v49 = vld [vmem:[%s8599_s1 + $0x450] sm:$0xff]  ;;  %v4484_v27 = vld [vmem:[%s8599_s1 + $0x458] sm:$0xff]  ;;  %v4425_v50 = vld [vmem:[%s8599_s1 + $0x280] sm:$0xff] }
 0x101   : > { %6756 = vmatprep.subr.bf16.mxu1 %v7927_v46  ;;  %v7945_v57 = vpack.c.bf16 %v4484_v27, %v4483_v49  ;;  %v4486_v49 = vld [vmem:[%s8599_s1 + $0x468] sm:$0xff] }
 0x102   : > { %5345 = vmatmul.mubr.f32.gmra.mrb[8].mxu0 %v7696_v13 }
 0x103   : > { %5347 = vmatprep.mubr.f32.mxu0 %v7698_v16  ;;  %6323 = vmatpush3.bf16.msra.mxu0 %v6320_v61  ;;  %v4424_v61 = vld [vmem:[%s8599_s1 + $0x278] sm:$0xff]  ;;  %8625 = vst [vmem:[#allocation15_spill] sm:$0xff] %v7945_v57 }
 0x104   : > { %6325 = vmatprep.subr.bf16.mxu0 %v6324_v33  ;;  %v6332_v3 = vpack.c.bf16 %v4424_v61, %v4423_v53  ;;  %6764 = vmatpush3.bf16.msra.mxu1 %v7927_v46  ;;  %v4485_v61 = vld [vmem:[%s8599_s1 + $0x460] sm:$0xff] }
 0x105   : > { %6757 = vmatprep.subr.bf16.mxu1 %v7945_v57  ;;  %v7964_v27 = vpack.c.bf16 %v4486_v49, %v4485_v61  ;;  %v4427_v49 = vld [vmem:[%s8599_s1 + $0x290] sm:$0xff] }
 0x106   : > { %5348 = vmatmul.mubr.f32.gmra.mrb[10].mxu0 %v7708_v22 }
 0x107   : > { %5350 = vmatprep.mubr.f32.mxu0 %v7710_v23  ;;  %6327 = vmatpush3.bf16.msra.mxu0 %v6324_v33  ;;  %v4426_v33 = vld [vmem:[%s8599_s1 + $0x288] sm:$0xff]  ;;  %8626 = vst [vmem:[#allocation16_spill] sm:$0xff] %v7964_v27 }
 0x108   : > { %6329 = vmatprep.subr.bf16.mxu0 %v6328_v28  ;;  %v6336_v53 = vpack.c.bf16 %v4426_v33, %v4425_v50  ;;  %6765 = vmatpush3.bf16.msra.mxu1 %v7945_v57  ;;  %v4487_v50 = vld [vmem:[%s8599_s1 + $0x470] sm:$0xff]  ;;  %v4428_v57 = vld [vmem:[%s8599_s1 + $0x298] sm:$0xff] }
 0x109   : > { %v7974_v33 = vld [vmem:[#allocation2 + $0xf0] sm:$0xff]  ;;  %6758 = vmatprep.subr.bf16.mxu1 %v7964_v27 }
 0x10a   : > { %5351 = vmatmul.mubr.f32.gmra.mrb[12].mxu0 %v7720_v31 }
 0x10b   : > { %5353 = vmatprep.mubr.f32.mxu0 %v7722_v32  ;;  %6331 = vmatpush3.bf16.msra.mxu0 %v6328_v28  ;;  %v4488_v28 = vld [vmem:[%s8599_s1 + $0x478] sm:$0xff] }
 0x10c   : > { %6333 = vmatprep.subr.bf16.mxu0 %v6332_v3  ;;  %v7977_v61 = vpack.c.bf16 %v4488_v28, %v4487_v50  ;;  %6766 = vmatpush3.bf16.msra.mxu1 %v7964_v27  ;;  %v6340_v50 = vpack.c.bf16 %v4428_v57, %v4427_v49  ;;  %v4429_v28 = vld [vmem:[%s8599_s1 + $0x2a0] sm:$0xff]  ;;  %v4430_v27 = vld [vmem:[%s8599_s1 + $0x2a8] sm:$0xff]  ;;  %v4431_v57 = vld [vmem:[%s8599_s1 + $0x2b0] sm:$0xff] }
 0x10d   : > { %v4432_v49 = vld [vmem:[%s8599_s1 + $0x2b8] sm:$0xff] }
 0x10e   : > { %5354 = vmatmul.mubr.f32.gmra.mrb[14].mxu0 %v7726_v36  ;;  %6759 = vmatprep.subr.bf16.mxu1 %v7977_v61 }
 0x10f   : > { %5356 = vmatprep.mubr.f32.mxu0 %v7728_v37  ;;  %6335 = vmatpush3.bf16.msra.mxu0 %v6332_v3  ;;  %v7983_v3 = vld [vmem:[#allocation2 + $0xf8] sm:$0xff] }
 0x110   : > { %6337 = vmatprep.subr.bf16.mxu0 %v6336_v53  ;;  %6767 = vmatpush3.bf16.msra.mxu1 %v7977_v61 }
 0x112   : > { %5357 = vmatmul.mubr.f32.gmra.mrb[16].mxu0 %v7732_v38 }
 0x113   : > { %5359 = vmatprep.mubr.f32.mxu0 %v7974_v33  ;;  %5646 = vmatmul.mubr.f32.vlgmr.msra.gmra.mrb[0].mxu1 %v7772_v8 }
 0x114   : > { %5648 = vmatprep.mubr.f32.mxu1 %v7774_v11 }
 0x116   : > { %5360 = vmatmul.mubr.f32.gmra.mrb[18].mxu0 %v7983_v3 }
 0x117   : > { %5394 = vmatprep.mubr.f32.mxu0 %v7534_v4  ;;  %v6344_v4 = vpack.c.bf16 %v4430_v27, %v4429_v28  ;;  %5649 = vmatmul.mubr.f32.gmra.mrb[2].mxu1 %v7784_v21  ;;  %v4436_v27 = vld [vmem:[%s8599_s1 + $0x2d8] sm:$0xff] }
 0x118   : > { %5651 = vmatprep.mubr.f32.mxu1 %v7786_v26  ;;  %v4440_v28 = vld [vmem:[%s8599_s1 + $0x2f8] sm:$0xff] }
 0x11a   : > { %5395 = vmatmul.mubr.f32.vlgmr.msra.gmra.mrb[0].mxu0 %v7546_v9  ;;  %v6348_v9 = vpack.c.bf16 %v4432_v49, %v4431_v57  ;;  %v4442_v57 = vld [vmem:[%s8599_s1 + $0x308] sm:$0xff] }
 0x11b   : > { %6339 = vmatpush3.bf16.msra.mxu0 %v6336_v53  ;;  %5397 = vmatprep.mubr.f32.mxu0 %v7548_v10  ;;  %v4433_v10 = vld [vmem:[%s8599_s1 + $0x2c0] sm:$0xff]  ;;  %v4434_v53 = vld [vmem:[%s8599_s1 + $0x2c8] sm:$0xff] }
 0x11c   : > { %6341 = vmatprep.subr.bf16.mxu0 %v6340_v50  ;;  %5652 = vmatmul.mubr.f32.gmra.mrb[4].mxu1 %v7796_v41 }
 0x11d   : > { %5654 = vmatprep.mubr.f32.mxu1 %v7798_v45 }
 0x11e   : > { %5398 = vmatmul.mubr.f32.gmra.mrb[2].mxu0 %v7558_v14  ;;  %v6352_v14 = vpack.c.bf16 %v4434_v53, %v4433_v10  ;;  %v8071_v10 = vld [vmem:[#allocation2 + $0xf1] sm:$0xff]  ;;  %v4446_v53 = vld [vmem:[%s8599_s1 + $0x328] sm:$0xff] }
 0x11f   : > { %6343 = vmatpush3.bf16.msra.mxu0 %v6340_v50  ;;  %5400 = vmatprep.mubr.f32.mxu0 %v7560_v15  ;;  %v4435_v15 = vld [vmem:[%s8599_s1 + $0x2d0] sm:$0xff]  ;;  %v4438_v50 = vld [vmem:[%s8599_s1 + $0x2e8] sm:$0xff] }
 0x120   : > { %6345 = vmatprep.subr.bf16.mxu0 %v6344_v4  ;;  %5655 = vmatmul.mubr.f32.gmra.mrb[6].mxu1 %v7808_v51 }
 0x121   : > { %5657 = vmatprep.mubr.f32.mxu1 %v7810_v52 }
 0x122   : > { %5401 = vmatmul.mubr.f32.gmra.mrb[4].mxu0 %v7570_v19  ;;  %v6356_v19 = vpack.c.bf16 %v4436_v27, %v4435_v15  ;;  %v4448_v15 = vld [vmem:[%s8599_s1 + $0x338] sm:$0xff]  ;;  %v4450_v27 = vld [vmem:[%s8599_s1 + $0x348] sm:$0xff] }
 0x123   : > { %5403 = vmatprep.mubr.f32.mxu0 %v7572_v20  ;;  %6347 = vmatpush3.bf16.msra.mxu0 %v6344_v4  ;;  %v4437_v20 = vld [vmem:[%s8599_s1 + $0x2e0] sm:$0xff] }
 0x124   : > { %6349 = vmatprep.subr.bf16.mxu0 %v6348_v9  ;;  %5658 = vmatmul.mubr.f32.gmra.mrb[8].mxu1 %v7820_v1  ;;  %v4441_v4 = vld [vmem:[%s8599_s1 + $0x300] sm:$0xff] }
 0x125   : > { %5660 = vmatprep.mubr.f32.mxu1 %v7822_v2  ;;  %v6368_v49 = vpack.c.bf16 %v4442_v57, %v4441_v4  ;;  %v4472_v4 = vld [vmem:[%s8599_s1 + $0x3f8] sm:$0xff]  ;;  %v1877_v57 = vld [vmem:[#allocation2 + $0x49] sm:$0xff] }
 0x126   : > { %5404 = vmatmul.mubr.f32.gmra.mrb[6].mxu0 %v7582_v24  ;;  %v6360_v24 = vpack.c.bf16 %v4438_v50, %v4437_v20  ;;  %v4454_v20 = vld [vmem:[%s8599_s1 + $0x368] sm:$0xff]  ;;  %v4456_v50 = vld [vmem:[%s8599_s1 + $0x378] sm:$0xff] }
 0x127   : > { %5406 = vmatprep.mubr.f32.mxu0 %v7584_v25  ;;  %6351 = vmatpush3.bf16.msra.mxu0 %v6348_v9  ;;  %v4439_v25 = vld [vmem:[%s8599_s1 + $0x2f0] sm:$0xff] }
 0x128   : > { %6353 = vmatprep.subr.bf16.mxu0 %v6352_v14  ;;  %5661 = vmatmul.mubr.f32.gmra.mrb[10].mxu1 %v7826_v12  ;;  %v2116_v9 = vld [vmem:[#allocation2 + $0x112] sm:$0xff] }
 0x129   : > { %5663 = vmatprep.mubr.f32.mxu1 %v7828_v17 }
 0x12a   : > { %5407 = vmatmul.mubr.f32.gmra.mrb[8].mxu0 %v7594_v29  ;;  %v6364_v29 = vpack.c.bf16 %v4440_v28, %v4439_v25  ;;  %v4464_v25 = vld [vmem:[%s8599_s1 + $0x3b8] sm:$0xff]  ;;  %v4466_v28 = vld [vmem:[%s8599_s1 + $0x3c8] sm:$0xff] }
 0x12b   : > { %5409 = vmatprep.mubr.f32.mxu0 %v7596_v30  ;;  %6355 = vmatpush3.bf16.msra.mxu0 %v6352_v14  ;;  %v8054_v30 = vld [vmem:[#allocation2 + $0xf2] sm:$0xff] }
 0x12c   : > { %6357 = vmatprep.subr.bf16.mxu0 %v6356_v19  ;;  %5664 = vmatmul.mubr.f32.gmra.mrb[12].mxu1 %v7832_v18 }
 0x12d   : > { %5666 = vmatprep.mubr.f32.mxu1 %v8054_v30 }
 0x12e   : > { %5410 = vmatmul.mubr.f32.gmra.mrb[10].mxu0 %v7606_v34  ;;  %v8066_v34 = vld [vmem:[#allocation2 + $0xfa] sm:$0xff] }
 0x12f   : > { %5412 = vmatprep.mubr.f32.mxu0 %v7608_v35  ;;  %6359 = vmatpush3.bf16.msra.mxu0 %v6356_v19  ;;  %v2115_v35 = vld [vmem:[#allocation2 + $0x10a] sm:$0xff]  ;;  %v4452_v19 = vld [vmem:[%s8599_s1 + $0x358] sm:$0xff] }
 0x130   : > { %6361 = vmatprep.subr.bf16.mxu0 %v6360_v24  ;;  %5667 = vmatmul.mubr.f32.gmra.mrb[14].mxu1 %v8066_v34 }
 0x131   : > { %5669 = vmatprep.mubr.f32.mxu1 %v2115_v35  ;;  %v1882_v35 = vld [vmem:[#allocation2 + $0x81] sm:$0xff] }
 0x132   : > { %5413 = vmatmul.mubr.f32.gmra.mrb[12].mxu0 %v7618_v39  ;;  %v8075_v39 = vld [vmem:[#allocation2 + $0xf9] sm:$0xff] }
 0x133   : > { %5415 = vmatprep.mubr.f32.mxu0 %v7620_v40  ;;  %6363 = vmatpush3.bf16.msra.mxu0 %v6360_v24  ;;  %v4443_v40 = vld [vmem:[%s8599_s1 + $0x310] sm:$0xff]  ;;  %v4458_v24 = vld [vmem:[%s8599_s1 + $0x388] sm:$0xff] }
 0x134   : > { %6365 = vmatprep.subr.bf16.mxu0 %v6364_v29  ;;  %5670 = vmatmul.mubr.f32.gmra.mrb[16].mxu1 %v2116_v9  ;;  %v1884_v9 = vld [vmem:[#allocation2 + $0x99] sm:$0xff] }
 0x136   : > { %5416 = vmatmul.mubr.f32.gmra.mrb[14].mxu0 %v7624_v42  ;;  %v4444_v42 = vld [vmem:[%s8599_s1 + $0x318] sm:$0xff] }
 0x137   : > { %5418 = vmatprep.mubr.f32.mxu0 %v7626_v43  ;;  %6367 = vmatpush3.bf16.msra.mxu0 %v6364_v29  ;;  %v6372_v43 = vpack.c.bf16 %v4444_v42, %v4443_v40  ;;  %v4468_v29 = vld [vmem:[%s8599_s1 + $0x3d8] sm:$0xff]  ;;  %v1885_v40 = vld [vmem:[#allocation2 + $0xa9] sm:$0xff]  ;;  %v1887_v42 = vld [vmem:[#allocation2 + $0xc1] sm:$0xff] }
 0x138   : > { %6369 = vmatprep.subr.bf16.mxu0 %v6368_v49 }
 0x13a   : > { %5419 = vmatmul.mubr.f32.gmra.mrb[16].mxu0 %v7630_v44  ;;  %v4445_v44 = vld [vmem:[%s8599_s1 + $0x320] sm:$0xff] }
 0x13b   : > { %5421 = vmatprep.mubr.f32.mxu0 %v8071_v10  ;;  %v6376_v14 = vpack.c.bf16 %v4446_v53, %v4445_v44  ;;  %v1888_v44 = vld [vmem:[#allocation2 + $0xc9] sm:$0xff]  ;;  %v1889_v53 = vld [vmem:[#allocation2 + $0xd9] sm:$0xff] }
 0x13e   : > { %5422 = vmatmul.mubr.f32.gmra.mrb[18].mxu0 %v8075_v39 }
 0x13f   : > { %5456 = vmatprep.mubr.f32.mxu0 %v7741_v48  ;;  %v4447_v48 = vld [vmem:[%s8599_s1 + $0x330] sm:$0xff] }
 0x142   : > { %5457 = vmatmul.mubr.f32.vlgmr.msra.gmra.mrb[0].mxu0 %v7750_v55  ;;  %v6380_v55 = vpack.c.bf16 %v4448_v15, %v4447_v48  ;;  %v1890_v48 = vld [vmem:[#allocation2 + $0xe1] sm:$0xff]  ;;  %v1894_v15 = vld [vmem:[#allocation2 + $0x111] sm:$0xff] }
 0x143   : > { %6371 = vmatpush3.bf16.msra.mxu0 %v6368_v49  ;;  %5459 = vmatprep.mubr.f32.mxu0 %v7752_v56  ;;  %v4449_v56 = vld [vmem:[%s8599_s1 + $0x340] sm:$0xff]  ;;  %v1883_v49 = vld [vmem:[#allocation2 + $0x91] sm:$0xff] }
 0x144   : > { %6373 = vmatprep.subr.bf16.mxu0 %v6372_v43 }
 0x146   : > { %5460 = vmatmul.mubr.f32.gmra.mrb[2].mxu0 %v7762_v62  ;;  %v6384_v62 = vpack.c.bf16 %v4450_v27, %v4449_v56  ;;  %v2098_v56 = vld [vmem:[#allocation2 + $0x3a] sm:$0xff] }
 0x147   : > { %6375 = vmatpush3.bf16.msra.mxu0 %v6372_v43  ;;  %5462 = vmatprep.mubr.f32.mxu0 %v7536_v6  ;;  %v4451_v6 = vld [vmem:[%s8599_s1 + $0x350] sm:$0xff]  ;;  %v8629_v43 = vld [vmem:[#allocation15_spill] sm:$0xff] }
 0x148   : > { %6377 = vmatprep.subr.bf16.mxu0 %v6376_v14 }
 0x14a   : > { %5463 = vmatmul.mubr.f32.gmra.mrb[4].mxu0 %v7772_v8  ;;  %v6388_v8 = vpack.c.bf16 %v4452_v19, %v4451_v6 }
 0x14b   : > { %5465 = vmatprep.mubr.f32.mxu0 %v7774_v11  ;;  %6379 = vmatpush3.bf16.msra.mxu0 %v6376_v14  ;;  %v4453_v11 = vld [vmem:[%s8599_s1 + $0x360] sm:$0xff]  ;;  %v8630_v14 = vld [vmem:[#allocation16_spill] sm:$0xff] }
 0x14c   : > { %6381 = vmatprep.subr.bf16.mxu0 %v6380_v55 }
 0x14e   : > { %5466 = vmatmul.mubr.f32.gmra.mrb[6].mxu0 %v7784_v21  ;;  %v6392_v21 = vpack.c.bf16 %v4454_v20, %v4453_v11 }
 0x14f   : > { %5468 = vmatprep.mubr.f32.mxu0 %v7786_v26  ;;  %6383 = vmatpush3.bf16.msra.mxu0 %v6380_v55  ;;  %v4455_v26 = vld [vmem:[%s8599_s1 + $0x370] sm:$0xff] }
 0x150   : > { %6385 = vmatprep.subr.bf16.mxu0 %v6384_v62  ;;  %v2097_v55 = vld [vmem:[#allocation2 + $0x32] sm:$0xff] }
 0x152   : > { %5469 = vmatmul.mubr.f32.gmra.mrb[8].mxu0 %v7796_v41  ;;  %v6396_v41 = vpack.c.bf16 %v4456_v50, %v4455_v26 }
 0x153   : > { %5471 = vmatprep.mubr.f32.mxu0 %v7798_v45  ;;  %6387 = vmatpush3.bf16.msra.mxu0 %v6384_v62  ;;  %v4457_v45 = vld [vmem:[%s8599_s1 + $0x380] sm:$0xff] }
 0x154   : > { %6389 = vmatprep.subr.bf16.mxu0 %v6388_v8 }
 0x156   : > { %5472 = vmatmul.mubr.f32.gmra.mrb[10].mxu0 %v7808_v51  ;;  %v6400_v51 = vpack.c.bf16 %v4458_v24, %v4457_v45 }
 0x157   : > { %5474 = vmatprep.mubr.f32.mxu0 %v7810_v52  ;;  %6391 = vmatpush3.bf16.msra.mxu0 %v6388_v8  ;;  %v4459_v52 = vld [vmem:[%s8599_s1 + $0x390] sm:$0xff] }
 0x158   : > { %6393 = vmatprep.subr.bf16.mxu0 %v6392_v21 }
 0x15a   : > { %5475 = vmatmul.mubr.f32.gmra.mrb[12].mxu0 %v7820_v1  ;;  %v4460_v1 = vld [vmem:[%s8599_s1 + $0x398] sm:$0xff] }
 0x15b   : > { %5477 = vmatprep.mubr.f32.mxu0 %v7822_v2  ;;  %6395 = vmatpush3.bf16.msra.mxu0 %v6392_v21  ;;  %v6404_v2 = vpack.c.bf16 %v4460_v1, %v4459_v52 }
 0x15c   : > { %6397 = vmatprep.subr.bf16.mxu0 %v6396_v41 }
 0x15e   : > { %5478 = vmatmul.mubr.f32.gmra.mrb[14].mxu0 %v7826_v12  ;;  %v4461_v12 = vld [vmem:[%s8599_s1 + $0x3a0] sm:$0xff] }
 0x15f   : > { %5480 = vmatprep.mubr.f32.mxu0 %v7828_v17  ;;  %6399 = vmatpush3.bf16.msra.mxu0 %v6396_v41  ;;  %v4462_v17 = vld [vmem:[%s8599_s1 + $0x3a8] sm:$0xff] }
 0x160   : > { %6401 = vmatprep.subr.bf16.mxu0 %v6400_v51 }
 0x162   : > { %5481 = vmatmul.mubr.f32.gmra.mrb[16].mxu0 %v7832_v18  ;;  %v6408_v18 = vpack.c.bf16 %v4462_v17, %v4461_v12 }
 0x163   : > { %5483 = vmatprep.mubr.f32.mxu0 %v8054_v30  ;;  %v4470_v30 = vld [vmem:[%s8599_s1 + $0x3e8] sm:$0xff] }
 0x166   : > { %5484 = vmatmul.mubr.f32.gmra.mrb[18].mxu0 %v8066_v34  ;;  %v1881_v34 = vld [vmem:[#allocation2 + $0x79] sm:$0xff] }
 0x167   : > { %5518 = vmatprep.mubr.f32.mxu0 %v7650_v54  ;;  %v4463_v54 = vld [vmem:[%s8599_s1 + $0x3b0] sm:$0xff] }
 0x16a   : > { %5519 = vmatmul.mubr.f32.vlgmr.msra.gmra.mrb[0].mxu0 %v7660_v58  ;;  %v6412_v58 = vpack.c.bf16 %v4464_v25, %v4463_v54 }
 0x16b   : > { %6403 = vmatpush3.bf16.msra.mxu0 %v6400_v51  ;;  %5521 = vmatprep.mubr.f32.mxu0 %v7662_v59  ;;  %v4465_v59 = vld [vmem:[%s8599_s1 + $0x3c0] sm:$0xff] }
 0x16c   : > { %6405 = vmatprep.subr.bf16.mxu0 %v6404_v2 }
 0x16e   : > { %5522 = vmatmul.mubr.f32.gmra.mrb[2].mxu0 %v7672_v63  ;;  %v6416_v63 = vpack.c.bf16 %v4466_v28, %v4465_v59 }
 0x16f   : > { %6407 = vmatpush3.bf16.msra.mxu0 %v6404_v2  ;;  %5524 = vmatprep.mubr.f32.mxu0 %v7674_v0  ;;  %v4467_v0 = vld [vmem:[%s8599_s1 + $0x3d0] sm:$0xff]  ;;  %v8239_v2 = vld [vmem:[%s8601_s3] ss:$0 sm:$0xff] }
 0x170   : > { %6409 = vmatprep.subr.bf16.mxu0 %v6408_v18 }
 0x172   : > { %5525 = vmatmul.mubr.f32.gmra.mrb[4].mxu0 %v7684_v5  ;;  %v6420_v5 = vpack.c.bf16 %v4468_v29, %v4467_v0 }
 0x173   : > { %5527 = vmatprep.mubr.f32.mxu0 %v7686_v7  ;;  %6411 = vmatpush3.bf16.msra.mxu0 %v6408_v18  ;;  %v4469_v7 = vld [vmem:[%s8599_s1 + $0x3e0] sm:$0xff] }
 0x174   : > { %6413 = vmatprep.subr.bf16.mxu0 %v6412_v58 }
 0x176   : > { %5528 = vmatmul.mubr.f32.gmra.mrb[6].mxu0 %v7696_v13  ;;  %v6424_v13 = vpack.c.bf16 %v4470_v30, %v4469_v7 }
 0x177   : > { %5530 = vmatprep.mubr.f32.mxu0 %v7698_v16  ;;  %6415 = vmatpush3.bf16.msra.mxu0 %v6412_v58  ;;  %v4471_v16 = vld [vmem:[%s8599_s1 + $0x3f0] sm:$0xff] }
 0x178   : > { %6417 = vmatprep.subr.bf16.mxu0 %v6416_v63 }
 0x17a   : > { %5531 = vmatmul.mubr.f32.gmra.mrb[8].mxu0 %v7708_v22  ;;  %v6428_v22 = vpack.c.bf16 %v4472_v4, %v4471_v16 }
 0x17b   : > { %5533 = vmatprep.mubr.f32.mxu0 %v7710_v23  ;;  %6419 = vmatpush3.bf16.msra.mxu0 %v6416_v63  ;;  %v1671_v23 = vld [vmem:[#allocation2 + $0x108] sm:$0xff] }
 0x17c   : > { %6421 = vmatprep.subr.bf16.mxu0 %v6420_v5 }
 0x17e   : > { %5534 = vmatmul.mubr.f32.gmra.mrb[10].mxu0 %v7720_v31  ;;  %v1672_v31 = vld [vmem:[#allocation2 + $0x110] sm:$0xff] }
 0x17f   : > { %5536 = vmatprep.mubr.f32.mxu0 %v7722_v32  ;;  %6423 = vmatpush3.bf16.msra.mxu0 %v6420_v5  ;;  %v1875_v32 = vld [vmem:[#allocation2 + $0x31] sm:$0xff] }
 0x180   : > { %6425 = vmatprep.subr.bf16.mxu0 %v6424_v13 }
 0x182   : > { %5537 = vmatmul.mubr.f32.gmra.mrb[12].mxu0 %v7726_v36  ;;  %v1876_v36 = vld [vmem:[#allocation2 + $0x39] sm:$0xff] }
 0x183   : > { %5539 = vmatprep.mubr.f32.mxu0 %v7728_v37  ;;  %6427 = vmatpush3.bf16.msra.mxu0 %v6424_v13  ;;  %v1878_v37 = vld [vmem:[#allocation2 + $0x51] sm:$0xff] }
 0x184   : > { %6429 = vmatprep.subr.bf16.mxu0 %v6428_v22 }
 0x186   : > { %5540 = vmatmul.mubr.f32.gmra.mrb[14].mxu0 %v7732_v38  ;;  %v1879_v38 = vld [vmem:[#allocation2 + $0x61] sm:$0xff] }
 0x187   : > { %5542 = vmatprep.mubr.f32.mxu0 %v7974_v33  ;;  %6431 = vmatpush3.bf16.msra.mxu0 %v6428_v22  ;;  %v1880_v33 = vld [vmem:[#allocation2 + $0x69] sm:$0xff] }
 0x188   : > { %6433 = vmatprep.subr.bf16.mxu0 %v7856_v60 }
 0x18a   : > { %5543 = vmatmul.mubr.f32.gmra.mrb[16].mxu0 %v7983_v3  ;;  %v8627_v3 = vld [vmem:[#allocation13_spill] sm:$0xff] }
 0x18b   : > { %5545 = vmatprep.mubr.f32.mxu0 %v1671_v23 }
 0x18e   : > { %5546 = vmatmul.mubr.f32.gmra.mrb[18].mxu0 %v1672_v31 }
 0x18f   : > { %5580 = vmatprep.mubr.f32.mxu0 %v1875_v32 }
 0x192   : > { %5581 = vmatmul.mubr.f32.vlgmr.msra.gmra.mrb[0].mxu0 %v1876_v36 }
 0x193   : > { %6435 = vmatpush3.bf16.msra.mxu0 %v7856_v60  ;;  %5583 = vmatprep.mubr.f32.mxu0 %v1877_v57  ;;  %v8628_v60 = vld [vmem:[#allocation14_spill] sm:$0xff] }
 0x194   : > { %6437 = vmatprep.subr.bf16.mxu0 %v7880_v47 }
 0x196   : > { %5584 = vmatmul.mubr.f32.gmra.mrb[2].mxu0 %v1878_v37 }
 0x197   : > { %6439 = vmatpush3.bf16.msra.mxu0 %v7880_v47  ;;  %5586 = vmatprep.mubr.f32.mxu0 %v1879_v38  ;;  %v1886_v47 = vld [vmem:[#allocation2 + $0xb1] sm:$0xff] }
 0x198   : > { %6441 = vmatprep.subr.bf16.mxu0 %v8627_v3 }
 0x19a   : > { %5587 = vmatmul.mubr.f32.gmra.mrb[4].mxu0 %v1880_v33 }
 0x19b   : > { %5589 = vmatprep.mubr.f32.mxu0 %v1881_v34  ;;  %6443 = vmatpush3.bf16.msra.mxu0 %v8627_v3 }
 0x19c   : > { %6445 = vmatprep.subr.bf16.mxu0 %v8628_v60 }
 0x19e   : > { %5590 = vmatmul.mubr.f32.gmra.mrb[6].mxu0 %v1882_v35 }
 0x19f   : > { %5592 = vmatprep.mubr.f32.mxu0 %v1883_v49  ;;  %6447 = vmatpush3.bf16.msra.mxu0 %v8628_v60 }
 0x1a0   : > { %6449 = vmatprep.subr.bf16.mxu0 %v7927_v46 }
 0x1a2   : > { %5593 = vmatmul.mubr.f32.gmra.mrb[8].mxu0 %v1884_v9 }
 0x1a3   : > { %5595 = vmatprep.mubr.f32.mxu0 %v1885_v40  ;;  %6451 = vmatpush3.bf16.msra.mxu0 %v7927_v46  ;;  %v1893_v46 = vld [vmem:[#allocation2 + $0x109] sm:$0xff] }
 0x1a4   : > { %6453 = vmatprep.subr.bf16.mxu0 %v8629_v43 }
 0x1a6   : > { %5596 = vmatmul.mubr.f32.gmra.mrb[10].mxu0 %v1886_v47 }
 0x1a7   : > { %5598 = vmatprep.mubr.f32.mxu0 %v1887_v42  ;;  %6455 = vmatpush3.bf16.msra.mxu0 %v8629_v43 }
 0x1a8   : > { %6457 = vmatprep.subr.bf16.mxu0 %v8630_v14 }
 0x1aa   : > { %5599 = vmatmul.mubr.f32.gmra.mrb[12].mxu0 %v1888_v44 }
 0x1ab   : > { %5601 = vmatprep.mubr.f32.mxu0 %v1889_v53  ;;  %6459 = vmatpush3.bf16.msra.mxu0 %v8630_v14 }
 0x1ac   : > { %6461 = vmatprep.subr.bf16.mxu0 %v7977_v61 }
 0x1ae   : > { %5602 = vmatmul.mubr.f32.gmra.mrb[14].mxu0 %v1890_v48 }
 0x1af   : > { %5604 = vmatprep.mubr.f32.mxu0 %v8071_v10  ;;  %6463 = vmatpush3.bf16.msra.mxu0 %v7977_v61 }
 0x1b2   : > { %5605 = vmatmul.mubr.f32.gmra.mrb[16].mxu0 %v8075_v39 }
 0x1b3   : > { %5607 = vmatprep.mubr.f32.mxu0 %v1893_v46 }
 0x1b6   : > { %5608 = vmatmul.mubr.f32.gmra.mrb[18].mxu0 %v1894_v15 }
 0x1b7   : > { %5642 = vmatprep.mubr.f32.mxu0 %v2097_v55 }
 0x1ba   : > { %5643 = vmatmul.mubr.f32.vlgmr.msra.gmra.mrb[0].mxu0 %v2098_v56 }
 0x1e6   : > { %v5647_v27 = vpop.f32.mrb[0].mxu1 }
 0x1e7   : > { %v2210_v62 = vpop.f32.mrb[1].mxu1 }
 0x1ea   : > { %v5650_v6 = vpop.f32.mrb[2].mxu1 }
 0x1eb   : > { %v2220_v19 = vpop.f32.mrb[3].mxu1 }
 0x1ef   : > { %v5653_v8 = vpop.f32.mrb[4].mxu1 }
 0x1f0   : > { %v2230_v11 = vpop.f32.mrb[5].mxu1 }
 0x1f3   : > { %v5656_v20 = vpop.f32.mrb[6].mxu1 }
 0x1f4   : > { %v2240_v10 = vpop.f32.mrb[7].mxu1 }
 0x1f7   : > { %v5659_v21 = vpop.f32.mrb[8].mxu1 }
 0x1f8   : > { %v2250_v61 = vpop.f32.mrb[9].mxu1 }
 0x1fb   : > { %v5662_v26 = vpop.f32.mrb[10].mxu1 }
 0x1fc   : > { %v2260_v50 = vpop.f32.mrb[11].mxu1 }
 0x1ff   : > { %v8224_v39 = vpop.f32.mrb[12].mxu1 }
 0x200   : > { %v8226_v41 = vpop.f32.mrb[13].mxu1 }
 0x203   : > { %v8228_v45 = vpop.f32.mrb[14].mxu1 }
 0x204   : > { %v8230_v24 = vpop.f32.mrb[15].mxu1 }
 0x207   : > { %v8232_v51 = vpop.f32.mrb[16].mxu1 }
 0x208   : > { %v8234_v52 = vpop.f32.mrb[17].mxu1 }
 0x269   : > { %v5585_v1 = vpop.f32.mrb[2].mxu0 }
 0x26a   : > { %v6768_v12 = vadd.f32 %v5647_v27, %v5585_v1  ;;  %v1988_v17 = vpop.f32.mrb[3].mxu0 }
 0x26b   : > { %v6769_v18 = vadd.f32 %v2210_v62, %v1988_v17 }
 0x26c   : > { %v2329_v54 = vadd.f32 %v6768_v12, %v8239_v2 }
 0x26d   : > { %v2328_v25 = vadd.f32 %v6769_v18, %v8239_v2  ;;  %v5588_v58 = vpop.f32.mrb[4].mxu0 }
 0x26e   : > { %v2349_v59 = vmax.f32 %v2329_v54, 0.0  ;;  %v6770_v28 = vadd.f32 %v5650_v6, %v5588_v58  ;;  %v1998_v63 = vpop.f32.mrb[5].mxu0 }
 0x26f   : > { %v2348_v0 = vmax.f32 %v2328_v25, 0.0  ;;  %v6771_v29 = vadd.f32 %v2220_v19, %v1998_v63 }
 0x270   : > { %2369 = vst [vmem:[#allocation3 + $0x21] sm:$0xff] %v2349_v59  ;;  %v2331_v5 = vadd.f32 %v6770_v28, %v8239_v2 }
 0x271   : > { %2368 = vst [vmem:[#allocation3 + $0x19] sm:$0xff] %v2348_v0  ;;  %v2330_v7 = vadd.f32 %v6771_v29, %v8239_v2  ;;  %v5591_v30 = vpop.f32.mrb[6].mxu0 }
 0x272   : > { %v2351_v13 = vmax.f32 %v2331_v5, 0.0  ;;  %v6772_v16 = vadd.f32 %v5653_v8, %v5591_v30  ;;  %v2008_v4 = vpop.f32.mrb[7].mxu0 }
 0x273   : > { %v2350_v22 = vmax.f32 %v2330_v7, 0.0  ;;  %v6773_v23 = vadd.f32 %v2230_v11, %v2008_v4 }
 0x274   : > { %2371 = vst [vmem:[#allocation3 + $0x39] sm:$0xff] %v2351_v13  ;;  %v2333_v31 = vadd.f32 %v6772_v16, %v8239_v2 }
 0x275   : > { %2370 = vst [vmem:[#allocation3 + $0x31] sm:$0xff] %v2350_v22  ;;  %v2332_v32 = vadd.f32 %v6773_v23, %v8239_v2  ;;  %v5594_v36 = vpop.f32.mrb[8].mxu0 }
 0x276   : > { %v2353_v57 = vmax.f32 %v2333_v31, 0.0  ;;  %v6774_v37 = vadd.f32 %v5656_v20, %v5594_v36  ;;  %v2018_v38 = vpop.f32.mrb[9].mxu0 }
 0x277   : > { %v2352_v33 = vmax.f32 %v2332_v32, 0.0  ;;  %v6775_v3 = vadd.f32 %v2240_v10, %v2018_v38 }
 0x278   : > { %2373 = vst [vmem:[#allocation3 + $0x51] sm:$0xff] %v2353_v57  ;;  %v2335_v34 = vadd.f32 %v6774_v37, %v8239_v2 }
 0x279   : > { %2372 = vst [vmem:[#allocation3 + $0x49] sm:$0xff] %v2352_v33  ;;  %v2334_v35 = vadd.f32 %v6775_v3, %v8239_v2  ;;  %v5597_v49 = vpop.f32.mrb[10].mxu0 }
 0x27a   : > { %v2355_v60 = vmax.f32 %v2335_v34, 0.0  ;;  %v6776_v9 = vadd.f32 %v5659_v21, %v5597_v49  ;;  %v2028_v40 = vpop.f32.mrb[11].mxu0 }
 0x27b   : > { %v2354_v47 = vmax.f32 %v2334_v35, 0.0  ;;  %v6777_v42 = vadd.f32 %v2250_v61, %v2028_v40 }
 0x27c   : > { %2375 = vst [vmem:[#allocation3 + $0x69] sm:$0xff] %v2355_v60  ;;  %v2337_v43 = vadd.f32 %v6776_v9, %v8239_v2 }
 0x27d   : > { %2374 = vst [vmem:[#allocation3 + $0x61] sm:$0xff] %v2354_v47  ;;  %v2336_v44 = vadd.f32 %v6777_v42, %v8239_v2  ;;  %v5600_v53 = vpop.f32.mrb[12].mxu0 }
 0x27e   : > { %v2357_v14 = vmax.f32 %v2337_v43, 0.0  ;;  %v6778_v48 = vadd.f32 %v5662_v26, %v5600_v53  ;;  %v2038_v46 = vpop.f32.mrb[13].mxu0 }
 0x27f   : > { %v2356_v15 = vmax.f32 %v2336_v44, 0.0  ;;  %v6779_v55 = vadd.f32 %v2260_v50, %v2038_v46 }
 0x280   : > { %2377 = vst [vmem:[#allocation3 + $0x81] sm:$0xff] %v2357_v14  ;;  %v2339_v56 = vadd.f32 %v6778_v48, %v8239_v2 }
 0x281   : > { %2376 = vst [vmem:[#allocation3 + $0x79] sm:$0xff] %v2356_v15  ;;  %v2338_v27 = vadd.f32 %v6779_v55, %v8239_v2  ;;  %v5603_v62 = vpop.f32.mrb[14].mxu0 }
 0x282   : > { %v2359_v6 = vmax.f32 %v2339_v56, 0.0  ;;  %v6780_v19 = vadd.f32 %v8224_v39, %v5603_v62  ;;  %v2048_v8 = vpop.f32.mrb[15].mxu0 }
 0x283   : > { %v2358_v11 = vmax.f32 %v2338_v27, 0.0  ;;  %v6781_v20 = vadd.f32 %v8226_v41, %v2048_v8 }
 0x284   : > { %2379 = vst [vmem:[#allocation3 + $0x99] sm:$0xff] %v2359_v6  ;;  %v2341_v10 = vadd.f32 %v6780_v19, %v8239_v2 }
 0x285   : > { %2378 = vst [vmem:[#allocation3 + $0x91] sm:$0xff] %v2358_v11  ;;  %v2340_v21 = vadd.f32 %v6781_v20, %v8239_v2  ;;  %v5606_v61 = vpop.f32.mrb[16].mxu0 }
 0x286   : > { %v2361_v26 = vmax.f32 %v2341_v10, 0.0  ;;  %v6782_v50 = vadd.f32 %v8228_v45, %v5606_v61  ;;  %v2058_v1 = vpop.f32.mrb[17].mxu0 }
 0x287   : > { %v2360_v12 = vmax.f32 %v2340_v21, 0.0  ;;  %v6783_v17 = vadd.f32 %v8230_v24, %v2058_v1 }
 0x288   : > { %2381 = vst [vmem:[#allocation3 + $0xb1] sm:$0xff] %v2361_v26  ;;  %v2343_v39 = vadd.f32 %v6782_v50, %v8239_v2 }
 0x289   : > { %2380 = vst [vmem:[#allocation3 + $0xa9] sm:$0xff] %v2360_v12  ;;  %v2342_v41 = vadd.f32 %v6783_v17, %v8239_v2  ;;  %v5609_v18 = vpop.f32.mrb[18].mxu0 }
 0x28a   : > { %v2363_v54 = vmax.f32 %v2343_v39, 0.0  ;;  %v6784_v25 = vadd.f32 %v8232_v51, %v5609_v18  ;;  %v2068_v58 = vpop.f32.mrb[19].mxu0 }
 0x28b   : > { %v2362_v59 = vmax.f32 %v2342_v41, 0.0  ;;  %v6785_v28 = vadd.f32 %v8234_v52, %v2068_v58  ;;  %v7279_v52 = vmov (!%p4490_p3), 0.0  }
 0x28c   : > { %2383 = vst [vmem:[#allocation3 + $0xc9] sm:$0xff] %v2363_v54  ;;  %v2345_v45 = vadd.f32 %v6784_v25, %v8239_v2 }
 0x28d   : > { %2382 = vst [vmem:[#allocation3 + $0xc1] sm:$0xff] %v2362_v59  ;;  %v2344_v24 = vadd.f32 %v6785_v28, %v8239_v2  ;;  %v5644_v63 = vpop.f32.mrb[0].mxu0  ;;  %2409 = sbr.rel (%p4490_p3) target bundleno = 661 (0x295), region = 81 }
 0x28e   : > { %v2365_v0 = vmax.f32 %v2345_v45, 0.0  ;;  %v2327_v29 = vadd.f32 %v5644_v63, %v8239_v2  ;;  %v2200_v5 = vpop.f32.mrb[1].mxu0 }
 0x28f   : > { %v2364_v7 = vmax.f32 %v2344_v24, 0.0  ;;  %v2326_v30 = vadd.f32 %v8239_v2, %v2200_v5 }
 0x290   : > { %2385 = vst [vmem:[#allocation3 + $0xe1] sm:$0xff] %v2365_v0  ;;  %v2347_v51 = vmax.f32 %v2327_v29, 0.0 }
 0x291   : > { %2384 = vst [vmem:[#allocation3 + $0xd9] sm:$0xff] %v2364_v7  ;;  %v2346_v13 = vmax.f32 %v2326_v30, 0.0 }
 0x292   : > { %2367 = vst [vmem:[#allocation3 + $0x9] sm:$0xff] %v2347_v51 }
 0x293   : > { %2366 = vst [vmem:[#allocation3 + $0x1] sm:$0xff] %v2346_v13  ;;  %2412 = vst [vmem:[#allocation3 + $0x10] sm:$0xff] (!%p4490_p3), %v7279_v52 }
 0x294   : > { %2410 = vst [vmem:[#allocation3] sm:$0xff] %v7279_v52  ;;  %2411 = vst [vmem:[#allocation3 + $0x8] sm:$0xff] %v7279_v52 }
 0x295 PF: > { %p4491_p8 = scmp.ne.s32.totalorder %s7257_s21, 1 }
 0x296   : > { %v7280_v16 = vmov (!%p4491_p8), 0.0  }
 0x297   : > { %2416 = sbr.rel (%p4491_p8) target bundleno = 670 (0x29e), region = 85  ;;  %2418 = vst [vmem:[#allocation3 + $0xd8] sm:$0xff] (!%p4491_p8), %v7280_v16  ;;  %2419 = vst [vmem:[#allocation3 + $0xe0] sm:$0xff] (!%p4491_p8), %v7280_v16 }
 0x298   : > { %2420 = vst [vmem:[#allocation3 + $0xe8] sm:$0xff] (!%p4491_p8), %v7280_v16 }
 0x29e PF: > { %v2470_v2 = vld [vmem:[#allocation5 + $0x80] sm:$0xff]  ;;  %v2471_v4 = vld [vmem:[#allocation5 + $0x88] sm:$0xff]  ;;  %v2472_v22 = vld [vmem:[#allocation5 + $0x90] sm:$0xff]  ;;  %s4501_s9 = sshll.u32 %s7257_s21, 4  ;;  %s4496_s30 = sshll.u32 %s7261_s22, 5 }
 0x29f   : > { %v6464_v23 = vpack.c.bf16 %v2471_v4, %v2470_v2  ;;  %v2473_v31 = vld [vmem:[#allocation5 + $0x98] sm:$0xff]  ;;  %v2474_v36 = vld [vmem:[#allocation5 + $0xa0] sm:$0xff]  ;;  %v2475_v57 = vld [vmem:[#allocation5 + $0xa8] sm:$0xff]  ;;  %s4237_s16 = sadd.s32 %s4501_s9, %s4496_s30  ;;  %s4240_s22 = sshll.u32 %s7472_s12, 4  ;;  %s8540_s22 = int_to_ptr.vmem [resolvable:$true] %s4240_s22 }
 0x2a0   : > { %v6468_v32 = vpack.c.bf16 %v2473_v31, %v2472_v22  ;;  %v6472_v37 = vpack.c.bf16 %v2475_v57, %v2474_v36  ;;  %v2453_v38 = vld [vmem:[#allocation3 + $0x1] sm:$0xff]  ;;  %v2478_v35 = vld [vmem:[#allocation5 + $0xc0] sm:$0xff]  ;;  %v2479_v49 = vld [vmem:[#allocation5 + $0xc8] sm:$0xff]  ;;  %s4497_s21 = sshll.u32 %s4237_s16, 7  ;;  %s8546_s11 = scalar_lea.sflag [#allocation7], %s203_s26 }
 0x2a1   : > { %6465 = vmatprep.subr.bf16.mxu1 %v6464_v23  ;;  %v2476_v33 = vld [vmem:[#allocation5 + $0xb0] sm:$0xff]  ;;  %v2477_v3 = vld [vmem:[#allocation5 + $0xb8] sm:$0xff]  ;;  %5704 = vmatprep.mubr.f32.mxu1 %v2453_v38  ;;  %v6480_v60 = vpack.c.bf16 %v2479_v49, %v2478_v35  ;;  %v2482_v42 = vld [vmem:[#allocation5 + $0xe0] sm:$0xff]  ;;  %s8538_s14 = scalar_lea.hbm %s8603_s5, %s4497_s21  ;;  %s7173_s17 = scalar_lea.vmem %s8540_s22, 2048 }
 0x2a2   : > { %6467 = vmatpush3.bf16.msra.mxu1 %v6464_v23  ;;  %v6476_v34 = vpack.c.bf16 %v2477_v3, %v2476_v33  ;;  %v2480_v9 = vld [vmem:[#allocation5 + $0xd0] sm:$0xff]  ;;  %v2481_v40 = vld [vmem:[#allocation5 + $0xd8] sm:$0xff]  ;;  %v2483_v43 = vld [vmem:[#allocation5 + $0xe8] sm:$0xff]  ;;  %p7174_p10 = scmp.ne.s32.totalorder %s8540_s22, %s7173_s17  ;;  %p8631_p12 = scmp.ne.s32.totalorder %s8616_s7, 0 }
 0x2a3   : > { %6469 = vmatprep.subr.bf16.mxu1 %v6468_v32  ;;  %v6484_v47 = vpack.c.bf16 %v2481_v40, %v2480_v9  ;;  %v6488_v44 = vpack.c.bf16 %v2483_v43, %v2482_v42  ;;  %v2484_v53 = vld [vmem:[#allocation5 + $0xf0] sm:$0xff]  ;;  %v2485_v14 = vld [vmem:[#allocation5 + $0xf8] sm:$0xff]  ;;  %v2437_v46 = vld [vmem:[#allocation5] sm:$0xff]  ;;  %s7281_s27 = smov [#allocation8]  }
 0x2a4   : > { %v6492_v48 = vpack.c.bf16 %v2485_v14, %v2484_v53  ;;  %v2438_v15 = vld [vmem:[#allocation5 + $0x8] sm:$0xff]  ;;  %v2439_v56 = vld [vmem:[#allocation5 + $0x10] sm:$0xff]  ;;  %v2440_v27 = vld [vmem:[#allocation5 + $0x18] sm:$0xff]  ;;  %p7175_p0 = pnand %p7174_p10, %p8631_p12  ;;  %s7177_s6 = sshll.u32 %s7281_s27, 4  ;;  %s7178_s6 = int_to_ptr.vmem [resolvable:$false] %s7177_s6 }
 0x2a5   : > { %v6496_v55 = vpack.c.bf16 %v2438_v15, %v2437_v46  ;;  %v2454_v62 = vld [vmem:[#allocation3 + $0x9] sm:$0xff]  ;;  %v8269_v6 = vld [vmem:[#allocation3 + $0x19] sm:$0xff]  ;;  %v6500_v19 = vpack.c.bf16 %v2440_v27, %v2439_v56  ;;  %v8272_v20 = vld [vmem:[#allocation3 + $0x21] sm:$0xff]  ;;  %s7179_s9 = scalar_lea.vmem %s7178_s6, 4096  ;;  %p7180_p5 = scmp.lt.s32.totalorder %s8540_s22, %s7178_s6 }
 0x2a6   : > { %6471 = vmatpush3.bf16.msra.mxu1 %v6468_v32  ;;  %v2441_v8 = vld [vmem:[#allocation5 + $0x20] sm:$0xff]  ;;  %v2442_v11 = vld [vmem:[#allocation5 + $0x28] sm:$0xff]  ;;  %v2443_v61 = vld [vmem:[#allocation5 + $0x30] sm:$0xff]  ;;  %p7176_p2 = pneg %p7175_p0  ;;  %p7181_p6 = scmp.lt.s32.totalorder %s7179_s9, %s7173_s17 }
 0x2a7   : > { %6473 = vmatprep.subr.bf16.mxu1 %v6472_v37  ;;  %v8274_v10 = vld [vmem:[#allocation3 + $0x31] sm:$0xff]  ;;  %v6504_v21 = vpack.c.bf16 %v2442_v11, %v2441_v8  ;;  %v2444_v26 = vld [vmem:[#allocation5 + $0x38] sm:$0xff]  ;;  %v8278_v50 = vld [vmem:[#allocation3 + $0x39] sm:$0xff] }
 0x2a8   : > { %v8280_v1 = vld [vmem:[#allocation3 + $0x49] sm:$0xff]  ;;  %v6508_v12 = vpack.c.bf16 %v2444_v26, %v2443_v61  ;;  %v2446_v39 = vld [vmem:[#allocation5 + $0x48] sm:$0xff]  ;;  %v8286_v18 = vld [vmem:[#allocation3 + $0x61] sm:$0xff]  ;;  %p7182_p7 = por %p7181_p6, %p7180_p5 }
 0x2a9   : > { %v2445_v17 = vld [vmem:[#allocation5 + $0x40] sm:$0xff]  ;;  %v2447_v25 = vld [vmem:[#allocation5 + $0x50] sm:$0xff]  ;;  %v2448_v58 = vld [vmem:[#allocation5 + $0x58] sm:$0xff] }
 0x2aa   : > { %6475 = vmatpush3.bf16.msra.mxu1 %v6472_v37  ;;  %v8284_v41 = vld [vmem:[#allocation3 + $0x51] sm:$0xff]  ;;  %v6512_v54 = vpack.c.bf16 %v2446_v39, %v2445_v17  ;;  %v8290_v59 = vld [vmem:[#allocation3 + $0x69] sm:$0xff]  ;;  %v8292_v28 = vld [vmem:[#allocation3 + $0x79] sm:$0xff]  ;;  %v6516_v45 = vpack.c.bf16 %v2448_v58, %v2447_v25  ;;  %p7183_p9 = pnand %p7182_p7, %p7176_p2 }
 0x2ab   : > { %6477 = vmatprep.subr.bf16.mxu1 %v6476_v34  ;;  %v2449_v24 = vld [vmem:[#allocation5 + $0x60] sm:$0xff]  ;;  %v2450_v63 = vld [vmem:[#allocation5 + $0x68] sm:$0xff]  ;;  %v8296_v0 = vld [vmem:[#allocation3 + $0x81] sm:$0xff] }
 0x2ac   : > { %v8298_v29 = vld [vmem:[#allocation3 + $0x91] sm:$0xff]  ;;  %v6520_v5 = vpack.c.bf16 %v2450_v63, %v2449_v24  ;;  %v2451_v7 = vld [vmem:[#allocation5 + $0x70] sm:$0xff]  ;;  %v2452_v30 = vld [vmem:[#allocation5 + $0x78] sm:$0xff] }
 0x2ad   : > { %v8302_v51 = vld [vmem:[#allocation3 + $0x99] sm:$0xff]  ;;  %v8304_v13 = vld [vmem:[#allocation3 + $0xa9] sm:$0xff]  ;;  %v6524_v52 = vpack.c.bf16 %v2452_v30, %v2451_v7  ;;  %v8308_v4 = vld [vmem:[#allocation3 + $0xb1] sm:$0xff] }
 0x2ae   : > { %6479 = vmatpush3.bf16.msra.mxu1 %v6476_v34  ;;  %v2793_v16 = vld [vmem:[#allocation5 + $0x100] sm:$0xff]  ;;  %v2794_v2 = vld [vmem:[#allocation5 + $0x108] sm:$0xff]  ;;  %v2421_v22 = vld [vmem:[#allocation3] sm:$0xff] }
 0x2af   : > { %6481 = vmatprep.subr.bf16.mxu1 %v6480_v60  ;;  %v6528_v23 = vpack.c.bf16 %v2794_v2, %v2793_v16  ;;  %v2795_v31 = vld [vmem:[#allocation5 + $0x110] sm:$0xff]  ;;  %v2796_v32 = vld [vmem:[#allocation5 + $0x118] sm:$0xff]  ;;  %v8311_v57 = vld [vmem:[#allocation3 + $0x18] sm:$0xff] }
 0x2b0   : > { %v2422_v36 = vld [vmem:[#allocation3 + $0x8] sm:$0xff]  ;;  %v6532_v37 = vpack.c.bf16 %v2796_v32, %v2795_v31  ;;  %v2797_v38 = vld [vmem:[#allocation5 + $0x120] sm:$0xff]  ;;  %v2798_v33 = vld [vmem:[#allocation5 + $0x128] sm:$0xff] }
 0x2b1   : > { %v8314_v3 = vld [vmem:[#allocation3 + $0x20] sm:$0xff]  ;;  %v8316_v34 = vld [vmem:[#allocation3 + $0x30] sm:$0xff]  ;;  %v6536_v35 = vpack.c.bf16 %v2798_v33, %v2797_v38  ;;  %v8320_v9 = vld [vmem:[#allocation3 + $0x38] sm:$0xff] }
 0x2b2   : > { %6483 = vmatpush3.bf16.msra.mxu1 %v6480_v60  ;;  %v2799_v49 = vld [vmem:[#allocation5 + $0x130] sm:$0xff]  ;;  %v2800_v60 = vld [vmem:[#allocation5 + $0x138] sm:$0xff]  ;;  %v2801_v42 = vld [vmem:[#allocation5 + $0x140] sm:$0xff] }
 0x2b3   : > { %6485 = vmatprep.subr.bf16.mxu1 %v6484_v47  ;;  %v8322_v40 = vld [vmem:[#allocation3 + $0x48] sm:$0xff]  ;;  %v2802_v43 = vld [vmem:[#allocation5 + $0x148] sm:$0xff]  ;;  %v8328_v53 = vld [vmem:[#allocation3 + $0x60] sm:$0xff] }
 0x2b4   : > { %v6544_v14 = vpack.c.bf16 %v2802_v43, %v2801_v42  ;;  %v2804_v46 = vld [vmem:[#allocation5 + $0x158] sm:$0xff]  ;;  %v2805_v27 = vld [vmem:[#allocation5 + $0x160] sm:$0xff]  ;;  %v8344_v26 = vld [vmem:[#allocation3 + $0x98] sm:$0xff] }
 0x2b5   : > { %v8332_v15 = vld [vmem:[#allocation3 + $0x68] sm:$0xff]  ;;  %v8340_v8 = vld [vmem:[#allocation3 + $0x90] sm:$0xff]  ;;  %v2990_v24 = vld [vmem:[#allocation5 + $0x190] sm:$0xff] }
 0x2b6   : > { %6487 = vmatpush3.bf16.msra.mxu1 %v6484_v47  ;;  %v6540_v47 = vpack.c.bf16 %v2800_v60, %v2799_v49  ;;  %v2808_v61 = vld [vmem:[#allocation5 + $0x178] sm:$0xff]  ;;  %v2988_v39 = vld [vmem:[#allocation5 + $0x180] sm:$0xff]  ;;  %v8353_v7 = vld [vmem:[#allocation3 + $0x1a] sm:$0xff] }
 0x2b7   : > { %6489 = vmatprep.subr.bf16.mxu1 %v6488_v44  ;;  %v8350_v25 = vld [vmem:[#allocation3 + $0xb0] sm:$0xff]  ;;  %v2776_v58 = vld [vmem:[#allocation3 + $0x2] sm:$0xff]  ;;  %v2993_v16 = vld [vmem:[#allocation5 + $0x1a8] sm:$0xff] }
 0x2b8   : > { %v2991_v63 = vld [vmem:[#allocation5 + $0x198] sm:$0xff]  ;;  %v2994_v31 = vld [vmem:[#allocation5 + $0x1b0] sm:$0xff]  ;;  %v2996_v33 = vld [vmem:[#allocation5 + $0x1c0] sm:$0xff] }
 0x2b9   : > { %v6564_v30 = vpack.c.bf16 %v2991_v63, %v2990_v24  ;;  %v8356_v2 = vld [vmem:[#allocation3 + $0x22] sm:$0xff]  ;;  %v8368_v49 = vld [vmem:[#allocation3 + $0x52] sm:$0xff] }
 0x2ba   : > { %6491 = vmatpush3.bf16.msra.mxu1 %v6488_v44  ;;  %v8326_v44 = vld [vmem:[#allocation3 + $0x50] sm:$0xff]  ;;  %v2995_v32 = vld [vmem:[#allocation5 + $0x1b8] sm:$0xff]  ;;  %v2998_v42 = vld [vmem:[#allocation5 + $0x1d0] sm:$0xff] }
 0x2bb   : > { %6493 = vmatprep.subr.bf16.mxu1 %v6492_v48  ;;  %v6572_v38 = vpack.c.bf16 %v2995_v32, %v2994_v31  ;;  %v8370_v60 = vld [vmem:[#allocation3 + $0x62] sm:$0xff]  ;;  %v3183_v24 = vld [vmem:[#allocation5 + $0x208] sm:$0xff] }
 0x2bc   : > { %v2999_v43 = vld [vmem:[#allocation5 + $0x1d8] sm:$0xff]  ;;  %v8392_v63 = vld [vmem:[#allocation3 + $0xb2] sm:$0xff] }
 0x2bd   : > { %v3187_v31 = vld [vmem:[#allocation5 + $0x228] sm:$0xff] }
 0x2be   : > { %6495 = vmatpush3.bf16.msra.mxu1 %v6492_v48  ;;  %v2803_v48 = vld [vmem:[#allocation5 + $0x150] sm:$0xff] }
 0x2bf   : > { %6497 = vmatprep.subr.bf16.mxu1 %v6496_v55  ;;  %v6548_v56 = vpack.c.bf16 %v2804_v46, %v2803_v48  ;;  %v8376_v48 = vld [vmem:[#allocation3 + $0x7a] sm:$0xff]  ;;  %v6580_v46 = vpack.c.bf16 %v2999_v43, %v2998_v42  ;;  %v3193_v43 = vld [vmem:[#allocation5 + $0x258] sm:$0xff] }
 0x2c0   : > { %v3192_v42 = vld [vmem:[#allocation5 + $0x250] sm:$0xff] }
 0x2c1   : > { %5705 = vmatmul.mubr.f32.vlgmr.msra.gmra.mrb[18].mxu1 %v2454_v62  ;;  %v2806_v62 = vld [vmem:[#allocation5 + $0x168] sm:$0xff] }
 0x2c2   : > { %6499 = vmatpush3.bf16.msra.mxu1 %v6496_v55  ;;  %5707 = vmatprep.mubr.f32.mxu1 %v8269_v6  ;;  %v8334_v55 = vld [vmem:[#allocation3 + $0x78] sm:$0xff]  ;;  %v6552_v11 = vpack.c.bf16 %v2806_v62, %v2805_v27  ;;  %v8380_v62 = vld [vmem:[#allocation3 + $0x82] sm:$0xff] }
 0x2c3   : > { %6501 = vmatprep.subr.bf16.mxu1 %v6500_v19  ;;  %v3001_v27 = vld [vmem:[#allocation5 + $0x1e8] sm:$0xff] }
 0x2c5   : > { %5708 = vmatmul.mubr.f32.gmra.mrb[20].mxu1 %v8272_v20 }
 0x2c6   : > { %6503 = vmatpush3.bf16.msra.mxu1 %v6500_v19  ;;  %5710 = vmatprep.mubr.f32.mxu1 %v8274_v10  ;;  %v8338_v19 = vld [vmem:[#allocation3 + $0x80] sm:$0xff] }
 0x2c7   : > { %6505 = vmatprep.subr.bf16.mxu1 %v6504_v21 }
 0x2c9   : > { %5711 = vmatmul.mubr.f32.gmra.mrb[22].mxu1 %v8278_v50 }
 0x2ca   : > { %6507 = vmatpush3.bf16.msra.mxu1 %v6504_v21  ;;  %5713 = vmatprep.mubr.f32.mxu1 %v8280_v1  ;;  %v2807_v21 = vld [vmem:[#allocation5 + $0x170] sm:$0xff] }
 0x2cb   : > { %6509 = vmatprep.subr.bf16.mxu1 %v6508_v12  ;;  %v6556_v17 = vpack.c.bf16 %v2808_v61, %v2807_v21  ;;  %v3002_v61 = vld [vmem:[#allocation5 + $0x1f0] sm:$0xff] }
 0x2cd   : > { %5714 = vmatmul.mubr.f32.gmra.mrb[24].mxu1 %v8284_v41 }
 0x2ce   : > { %6511 = vmatpush3.bf16.msra.mxu1 %v6508_v12  ;;  %5716 = vmatprep.mubr.f32.mxu1 %v8286_v18  ;;  %v8346_v12 = vld [vmem:[#allocation3 + $0xa8] sm:$0xff] }
 0x2cf   : > { %6513 = vmatprep.subr.bf16.mxu1 %v6512_v54 }
 0x2d1   : > { %5717 = vmatmul.mubr.f32.gmra.mrb[26].mxu1 %v8290_v59 }
 0x2d2   : > { %6515 = vmatpush3.bf16.msra.mxu1 %v6512_v54  ;;  %5719 = vmatprep.mubr.f32.mxu1 %v8292_v28  ;;  %v2989_v54 = vld [vmem:[#allocation5 + $0x188] sm:$0xff] }
 0x2d3   : > { %6517 = vmatprep.subr.bf16.mxu1 %v6516_v45 }
 0x2d5   : > { %5720 = vmatmul.mubr.f32.gmra.mrb[28].mxu1 %v8296_v0 }
 0x2d6   : > { %6519 = vmatpush3.bf16.msra.mxu1 %v6516_v45  ;;  %5722 = vmatprep.mubr.f32.mxu1 %v8298_v29  ;;  %v6560_v45 = vpack.c.bf16 %v2989_v54, %v2988_v39  ;;  %v8386_v39 = vld [vmem:[#allocation3 + $0x9a] sm:$0xff]  ;;  %v8388_v54 = vld [vmem:[#allocation3 + $0xaa] sm:$0xff] }
 0x2d7   : > { %6521 = vmatprep.subr.bf16.mxu1 %v6520_v5 }
 0x2d9   : > { %5723 = vmatmul.mubr.f32.gmra.mrb[30].mxu1 %v8302_v51 }
 0x2da   : > { %6523 = vmatpush3.bf16.msra.mxu1 %v6520_v5  ;;  %5725 = vmatprep.mubr.f32.mxu1 %v8304_v13  ;;  %v2777_v5 = vld [vmem:[#allocation3 + $0xa] sm:$0xff] }
 0x2db   : > { %6525 = vmatprep.subr.bf16.mxu1 %v6524_v52 }
 0x2dd   : > { %5726 = vmatmul.mubr.f32.gmra.mrb[32].mxu1 %v8308_v4 }
 0x2de   : > { %6527 = vmatpush3.bf16.msra.mxu1 %v6524_v52  ;;  %5760 = vmatprep.mubr.f32.mxu1 %v2421_v22  ;;  %v2992_v52 = vld [vmem:[#allocation5 + $0x1a0] sm:$0xff] }
 0x2df   : > { %6529 = vmatprep.subr.bf16.mxu1 %v6528_v23  ;;  %v8358_v22 = vld [vmem:[#allocation3 + $0x32] sm:$0xff] }
 0x2e1   : > { %5761 = vmatmul.mubr.f32.vlgmr.msra.gmra.mrb[18].mxu1 %v2422_v36  ;;  %v8362_v36 = vld [vmem:[#allocation3 + $0x3a] sm:$0xff] }
 0x2e2   : > { %6531 = vmatpush3.bf16.msra.mxu1 %v6528_v23  ;;  %5763 = vmatprep.mubr.f32.mxu1 %v8311_v57  ;;  %v6568_v23 = vpack.c.bf16 %v2993_v16, %v2992_v52  ;;  %v3185_v52 = vld [vmem:[#allocation5 + $0x218] sm:$0xff] }
 0x2e3   : > { %6533 = vmatprep.subr.bf16.mxu1 %v6532_v37 }
 0x2e5   : > { %5764 = vmatmul.mubr.f32.gmra.mrb[20].mxu1 %v8314_v3 }
 0x2e6   : > { %6535 = vmatpush3.bf16.msra.mxu1 %v6532_v37  ;;  %5766 = vmatprep.mubr.f32.mxu1 %v8316_v34  ;;  %v8364_v37 = vld [vmem:[#allocation3 + $0x4a] sm:$0xff] }
 0x2e7   : > { %6537 = vmatprep.subr.bf16.mxu1 %v6536_v35 }
 0x2e9   : > { %5767 = vmatmul.mubr.f32.gmra.mrb[22].mxu1 %v8320_v9 }
 0x2ea   : > { %6539 = vmatpush3.bf16.msra.mxu1 %v6536_v35  ;;  %5769 = vmatprep.mubr.f32.mxu1 %v8322_v40  ;;  %v2997_v35 = vld [vmem:[#allocation5 + $0x1c8] sm:$0xff] }
 0x2eb   : > { %6541 = vmatprep.subr.bf16.mxu1 %v6540_v47 }
 0x2ed   : > { %5770 = vmatmul.mubr.f32.gmra.mrb[24].mxu1 %v8326_v44 }
 0x2ee   : > { %6543 = vmatpush3.bf16.msra.mxu1 %v6540_v47  ;;  %5772 = vmatprep.mubr.f32.mxu1 %v8328_v53  ;;  %v6576_v47 = vpack.c.bf16 %v2997_v35, %v2996_v33  ;;  %v3189_v33 = vld [vmem:[#allocation5 + $0x238] sm:$0xff]  ;;  %v3190_v35 = vld [vmem:[#allocation5 + $0x240] sm:$0xff] }
 0x2ef   : > { %6545 = vmatprep.subr.bf16.mxu1 %v6544_v14 }
 0x2f1   : > { %5773 = vmatmul.mubr.f32.gmra.mrb[26].mxu1 %v8332_v15 }
 0x2f2   : > { %6547 = vmatpush3.bf16.msra.mxu1 %v6544_v14  ;;  %5775 = vmatprep.mubr.f32.mxu1 %v8334_v55  ;;  %v8374_v14 = vld [vmem:[#allocation3 + $0x6a] sm:$0xff] }
 0x2f3   : > { %6549 = vmatprep.subr.bf16.mxu1 %v6548_v56 }
 0x2f5   : > { %5776 = vmatmul.mubr.f32.gmra.mrb[28].mxu1 %v8338_v19 }
 0x2f6   : > { %6551 = vmatpush3.bf16.msra.mxu1 %v6548_v56  ;;  %5778 = vmatprep.mubr.f32.mxu1 %v8340_v8  ;;  %v3000_v56 = vld [vmem:[#allocation5 + $0x1e0] sm:$0xff] }
 0x2f7   : > { %6553 = vmatprep.subr.bf16.mxu1 %v6552_v11  ;;  %v6584_v21 = vpack.c.bf16 %v3001_v27, %v3000_v56  ;;  %v3194_v56 = vld [vmem:[#allocation5 + $0x260] sm:$0xff]  ;;  %v3195_v27 = vld [vmem:[#allocation5 + $0x268] sm:$0xff] }
 0x2f9   : > { %5779 = vmatmul.mubr.f32.gmra.mrb[30].mxu1 %v8344_v26 }
 0x2fa   : > { %6555 = vmatpush3.bf16.msra.mxu1 %v6552_v11  ;;  %5781 = vmatprep.mubr.f32.mxu1 %v8346_v12  ;;  %v8382_v11 = vld [vmem:[#allocation3 + $0x92] sm:$0xff] }
 0x2fb   : > { %6557 = vmatprep.subr.bf16.mxu1 %v6556_v17 }
 0x2fd   : > { %5782 = vmatmul.mubr.f32.gmra.mrb[32].mxu1 %v8350_v25 }
 0x2fe   : > { %6559 = vmatpush3.bf16.msra.mxu1 %v6556_v17  ;;  %5816 = vmatprep.mubr.f32.mxu1 %v2776_v58  ;;  %v3003_v17 = vld [vmem:[#allocation5 + $0x1f8] sm:$0xff] }
 0x2ff   : > { %6561 = vmatprep.subr.bf16.mxu1 %v6560_v45  ;;  %v6588_v58 = vpack.c.bf16 %v3003_v17, %v3002_v61  ;;  %v3196_v61 = vld [vmem:[#allocation5 + $0x270] sm:$0xff]  ;;  %v3197_v17 = vld [vmem:[#allocation5 + $0x278] sm:$0xff] }
 0x301   : > { %5817 = vmatmul.mubr.f32.vlgmr.msra.gmra.mrb[18].mxu1 %v2777_v5 }
 0x302   : > { %6563 = vmatpush3.bf16.msra.mxu1 %v6560_v45  ;;  %5819 = vmatprep.mubr.f32.mxu1 %v8353_v7  ;;  %v3182_v45 = vld [vmem:[#allocation5 + $0x200] sm:$0xff] }
 0x303   : > { %6565 = vmatprep.subr.bf16.mxu1 %v6564_v30  ;;  %v6592_v5 = vpack.c.bf16 %v3183_v24, %v3182_v45  ;;  %v6620_v45 = vpack.c.bf16 %v3197_v17, %v3196_v61  ;;  %v3376_v24 = vld [vmem:[#allocation5 + $0x280] sm:$0xff]  ;;  %v3390_v61 = vld [vmem:[#allocation5 + $0x2f0] sm:$0xff]  ;;  %v3391_v17 = vld [vmem:[#allocation5 + $0x2f8] sm:$0xff] }
 0x305   : > { %5820 = vmatmul.mubr.f32.gmra.mrb[20].mxu1 %v8356_v2 }
 0x306   : > { %6567 = vmatpush3.bf16.msra.mxu1 %v6564_v30  ;;  %5822 = vmatprep.mubr.f32.mxu1 %v8358_v22  ;;  %v3184_v30 = vld [vmem:[#allocation5 + $0x210] sm:$0xff] }
 0x307   : > { %6569 = vmatprep.subr.bf16.mxu1 %v6568_v23  ;;  %v6596_v16 = vpack.c.bf16 %v3185_v52, %v3184_v30  ;;  %v8412_v30 = vld [vmem:[#allocation3 + $0xc8] sm:$0xff] }
 0x309   : > { %5823 = vmatmul.mubr.f32.gmra.mrb[22].mxu1 %v8362_v36 }
 0x30a   : > { %6571 = vmatpush3.bf16.msra.mxu1 %v6568_v23  ;;  %5825 = vmatprep.mubr.f32.mxu1 %v8364_v37  ;;  %v3186_v23 = vld [vmem:[#allocation5 + $0x220] sm:$0xff] }
 0x30b   : > { %6573 = vmatprep.subr.bf16.mxu1 %v6572_v38  ;;  %v6600_v32 = vpack.c.bf16 %v3187_v31, %v3186_v23  ;;  %v3379_v23 = vld [vmem:[#allocation5 + $0x298] sm:$0xff] }
 0x30d   : > { %5826 = vmatmul.mubr.f32.gmra.mrb[24].mxu1 %v8368_v49 }
 0x30e   : > { %6575 = vmatpush3.bf16.msra.mxu1 %v6572_v38  ;;  %5828 = vmatprep.mubr.f32.mxu1 %v8370_v60  ;;  %v3188_v38 = vld [vmem:[#allocation5 + $0x230] sm:$0xff] }
 0x30f   : > { %6577 = vmatprep.subr.bf16.mxu1 %v6576_v47 }
 0x311   : > { %5829 = vmatmul.mubr.f32.gmra.mrb[26].mxu1 %v8374_v14 }
 0x312   : > { %6579 = vmatpush3.bf16.msra.mxu1 %v6576_v47  ;;  %5831 = vmatprep.mubr.f32.mxu1 %v8376_v48  ;;  %v3191_v47 = vld [vmem:[#allocation5 + $0x248] sm:$0xff] }
 0x313   : > { %6581 = vmatprep.subr.bf16.mxu1 %v6580_v46 }
 0x315   : > { %5832 = vmatmul.mubr.f32.gmra.mrb[28].mxu1 %v8380_v62 }
 0x316   : > { %6583 = vmatpush3.bf16.msra.mxu1 %v6580_v46  ;;  %5834 = vmatprep.mubr.f32.mxu1 %v8382_v11  ;;  %v6612_v46 = vpack.c.bf16 %v3193_v43, %v3192_v42  ;;  %v3386_v42 = vld [vmem:[#allocation5 + $0x2d0] sm:$0xff]  ;;  %v3387_v43 = vld [vmem:[#allocation5 + $0x2d8] sm:$0xff] }
 0x317   : > { %6585 = vmatprep.subr.bf16.mxu1 %v6584_v21 }
 0x319   : > { %5835 = vmatmul.mubr.f32.gmra.mrb[30].mxu1 %v8386_v39 }
 0x31a   : > { %6587 = vmatpush3.bf16.msra.mxu1 %v6584_v21  ;;  %5837 = vmatprep.mubr.f32.mxu1 %v8388_v54  ;;  %v6616_v21 = vpack.c.bf16 %v3195_v27, %v3194_v56  ;;  %v3388_v56 = vld [vmem:[#allocation5 + $0x2e0] sm:$0xff]  ;;  %v3389_v27 = vld [vmem:[#allocation5 + $0x2e8] sm:$0xff] }
 0x31b   : > { %6589 = vmatprep.subr.bf16.mxu1 %v6588_v58 }
 0x31d   : > { %5838 = vmatmul.mubr.f32.gmra.mrb[32].mxu1 %v8392_v63 }
 0x31e   : > { %6591 = vmatpush3.bf16.msra.mxu1 %v6588_v58  ;;  %5872 = vmatprep.mubr.f32.mxu1 %v8311_v57  ;;  %v6604_v57 = vpack.c.bf16 %v3189_v33, %v3188_v38  ;;  %v8408_v58 = vld [vmem:[#allocation3 + $0xc0] sm:$0xff]  ;;  %v3381_v38 = vld [vmem:[#allocation5 + $0x2a8] sm:$0xff] }
 0x31f   : > { %6593 = vmatprep.subr.bf16.mxu1 %v6592_v5 }
 0x321   : > { %5873 = vmatmul.mubr.f32.vlgmr.msra.gmra.mrb[18].mxu1 %v8314_v3  ;;  %v6608_v3 = vpack.c.bf16 %v3191_v47, %v3190_v35  ;;  %v3383_v35 = vld [vmem:[#allocation5 + $0x2b8] sm:$0xff]  ;;  %v3384_v47 = vld [vmem:[#allocation5 + $0x2c0] sm:$0xff] }
 0x322   : > { %6595 = vmatpush3.bf16.msra.mxu1 %v6592_v5  ;;  %5875 = vmatprep.mubr.f32.mxu1 %v8316_v34  ;;  %v3377_v5 = vld [vmem:[#allocation5 + $0x288] sm:$0xff] }
 0x323   : > { %6597 = vmatprep.subr.bf16.mxu1 %v6596_v16  ;;  %v6624_v52 = vpack.c.bf16 %v3377_v5, %v3376_v24  ;;  %v6652_v24 = vpack.c.bf16 %v3391_v17, %v3390_v61  ;;  %v3571_v5 = vld [vmem:[#allocation5 + $0x300] sm:$0xff]  ;;  %v3585_v61 = vld [vmem:[#allocation5 + $0x370] sm:$0xff]  ;;  %v3586_v17 = vld [vmem:[#allocation5 + $0x378] sm:$0xff] }
 0x325   : > { %5876 = vmatmul.mubr.f32.gmra.mrb[20].mxu1 %v8320_v9 }
 0x326   : > { %6599 = vmatpush3.bf16.msra.mxu1 %v6596_v16  ;;  %5878 = vmatprep.mubr.f32.mxu1 %v8322_v40  ;;  %v3378_v16 = vld [vmem:[#allocation5 + $0x290] sm:$0xff] }
 0x327   : > { %6601 = vmatprep.subr.bf16.mxu1 %v6600_v32  ;;  %v6628_v31 = vpack.c.bf16 %v3379_v23, %v3378_v16  ;;  %v8432_v16 = vld [vmem:[#allocation3 + $0xc9] sm:$0xff] }
 0x329   : > { %5879 = vmatmul.mubr.f32.gmra.mrb[22].mxu1 %v8326_v44 }
 0x32a   : > { %6603 = vmatpush3.bf16.msra.mxu1 %v6600_v32  ;;  %5881 = vmatprep.mubr.f32.mxu1 %v8328_v53  ;;  %v3380_v32 = vld [vmem:[#allocation5 + $0x2a0] sm:$0xff] }
 0x32b   : > { %6605 = vmatprep.subr.bf16.mxu1 %v6604_v57  ;;  %v6632_v33 = vpack.c.bf16 %v3381_v38, %v3380_v32  ;;  %v3574_v32 = vld [vmem:[#allocation5 + $0x318] sm:$0xff] }
 0x32d   : > { %5882 = vmatmul.mubr.f32.gmra.mrb[24].mxu1 %v8332_v15 }
 0x32e   : > { %6607 = vmatpush3.bf16.msra.mxu1 %v6604_v57  ;;  %5884 = vmatprep.mubr.f32.mxu1 %v8334_v55  ;;  %v3382_v57 = vld [vmem:[#allocation5 + $0x2b0] sm:$0xff] }
 0x32f   : > { %6609 = vmatprep.subr.bf16.mxu1 %v6608_v3 }
 0x331   : > { %5885 = vmatmul.mubr.f32.gmra.mrb[26].mxu1 %v8338_v19 }
 0x332   : > { %6611 = vmatpush3.bf16.msra.mxu1 %v6608_v3  ;;  %5887 = vmatprep.mubr.f32.mxu1 %v8340_v8  ;;  %v3385_v3 = vld [vmem:[#allocation5 + $0x2c8] sm:$0xff] }
 0x333   : > { %6613 = vmatprep.subr.bf16.mxu1 %v6612_v46 }
 0x335   : > { %5888 = vmatmul.mubr.f32.gmra.mrb[28].mxu1 %v8344_v26 }
 0x336   : > { %6615 = vmatpush3.bf16.msra.mxu1 %v6612_v46  ;;  %5890 = vmatprep.mubr.f32.mxu1 %v8346_v12  ;;  %v6644_v46 = vpack.c.bf16 %v3387_v43, %v3386_v42  ;;  %v3581_v42 = vld [vmem:[#allocation5 + $0x350] sm:$0xff]  ;;  %v3582_v43 = vld [vmem:[#allocation5 + $0x358] sm:$0xff] }
 0x337   : > { %6617 = vmatprep.subr.bf16.mxu1 %v6616_v21 }
 0x339   : > { %5891 = vmatmul.mubr.f32.gmra.mrb[30].mxu1 %v8350_v25 }
 0x33a   : > { %6619 = vmatpush3.bf16.msra.mxu1 %v6616_v21  ;;  %5893 = vmatprep.mubr.f32.mxu1 %v8408_v58  ;;  %v6648_v21 = vpack.c.bf16 %v3389_v27, %v3388_v56  ;;  %v3583_v56 = vld [vmem:[#allocation5 + $0x360] sm:$0xff]  ;;  %v3584_v27 = vld [vmem:[#allocation5 + $0x368] sm:$0xff] }
 0x33b   : > { %6621 = vmatprep.subr.bf16.mxu1 %v6620_v45 }
 0x33d   : > { %5894 = vmatmul.mubr.f32.gmra.mrb[32].mxu1 %v8412_v30 }
 0x33e   : > { %6623 = vmatpush3.bf16.msra.mxu1 %v6620_v45  ;;  %5928 = vmatprep.mubr.f32.mxu1 %v8269_v6  ;;  %v6636_v6 = vpack.c.bf16 %v3383_v35, %v3382_v57  ;;  %v8428_v45 = vld [vmem:[#allocation3 + $0xc1] sm:$0xff]  ;;  %v3576_v57 = vld [vmem:[#allocation5 + $0x328] sm:$0xff] }
 0x33f   : > { %6625 = vmatprep.subr.bf16.mxu1 %v6624_v52 }
 0x341   : > { %5929 = vmatmul.mubr.f32.vlgmr.msra.gmra.mrb[18].mxu1 %v8272_v20  ;;  %v6640_v20 = vpack.c.bf16 %v3385_v3, %v3384_v47  ;;  %v3578_v47 = vld [vmem:[#allocation5 + $0x338] sm:$0xff]  ;;  %v3579_v3 = vld [vmem:[#allocation5 + $0x340] sm:$0xff] }
 0x342   : > { %6627 = vmatpush3.bf16.msra.mxu1 %v6624_v52  ;;  %5931 = vmatprep.mubr.f32.mxu1 %v8274_v10  ;;  %v3572_v52 = vld [vmem:[#allocation5 + $0x308] sm:$0xff] }
 0x343   : > { %6629 = vmatprep.subr.bf16.mxu1 %v6628_v31  ;;  %v6656_v23 = vpack.c.bf16 %v3572_v52, %v3571_v5  ;;  %v6684_v5 = vpack.c.bf16 %v3586_v17, %v3585_v61  ;;  %v3765_v52 = vld [vmem:[#allocation5 + $0x380] sm:$0xff]  ;;  %v3962_v61 = vld [vmem:[#allocation5 + $0x418] sm:$0xff]  ;;  %v3964_v17 = vld [vmem:[#allocation5 + $0x428] sm:$0xff] }
 0x345   : > { %5932 = vmatmul.mubr.f32.gmra.mrb[20].mxu1 %v8278_v50 }
 0x346   : > { %6631 = vmatpush3.bf16.msra.mxu1 %v6628_v31  ;;  %5934 = vmatprep.mubr.f32.mxu1 %v8280_v1  ;;  %v3573_v31 = vld [vmem:[#allocation5 + $0x310] sm:$0xff] }
 0x347   : > { %6633 = vmatprep.subr.bf16.mxu1 %v6632_v33  ;;  %v6660_v38 = vpack.c.bf16 %v3574_v32, %v3573_v31  ;;  %v8452_v31 = vld [vmem:[#allocation3 + $0xca] sm:$0xff] }
 0x349   : > { %5935 = vmatmul.mubr.f32.gmra.mrb[22].mxu1 %v8284_v41 }
 0x34a   : > { %6635 = vmatpush3.bf16.msra.mxu1 %v6632_v33  ;;  %5937 = vmatprep.mubr.f32.mxu1 %v8286_v18  ;;  %v3575_v33 = vld [vmem:[#allocation5 + $0x320] sm:$0xff] }
 0x34b   : > { %6637 = vmatprep.subr.bf16.mxu1 %v6636_v6  ;;  %v6664_v35 = vpack.c.bf16 %v3576_v57, %v3575_v33  ;;  %v3768_v33 = vld [vmem:[#allocation5 + $0x398] sm:$0xff] }
 0x34d   : > { %5938 = vmatmul.mubr.f32.gmra.mrb[24].mxu1 %v8290_v59 }
 0x34e   : > { %6639 = vmatpush3.bf16.msra.mxu1 %v6636_v6  ;;  %5940 = vmatprep.mubr.f32.mxu1 %v8292_v28  ;;  %v3577_v6 = vld [vmem:[#allocation5 + $0x330] sm:$0xff] }
 0x34f   : > { %6641 = vmatprep.subr.bf16.mxu1 %v6640_v20 }
 0x351   : > { %5941 = vmatmul.mubr.f32.gmra.mrb[26].mxu1 %v8296_v0 }
 0x352   : > { %6643 = vmatpush3.bf16.msra.mxu1 %v6640_v20  ;;  %5943 = vmatprep.mubr.f32.mxu1 %v8298_v29  ;;  %v3580_v20 = vld [vmem:[#allocation5 + $0x348] sm:$0xff] }
 0x353   : > { %6645 = vmatprep.subr.bf16.mxu1 %v6644_v46 }
 0x355   : > { %5944 = vmatmul.mubr.f32.gmra.mrb[28].mxu1 %v8302_v51 }
 0x356   : > { %6647 = vmatpush3.bf16.msra.mxu1 %v6644_v46  ;;  %5946 = vmatprep.mubr.f32.mxu1 %v8304_v13  ;;  %v6676_v46 = vpack.c.bf16 %v3582_v43, %v3581_v42  ;;  %v3776_v42 = vld [vmem:[#allocation5 + $0x3d8] sm:$0xff]  ;;  %v3778_v43 = vld [vmem:[#allocation5 + $0x3e8] sm:$0xff] }
 0x357   : > { %6649 = vmatprep.subr.bf16.mxu1 %v6648_v21 }
 0x359   : > { %5947 = vmatmul.mubr.f32.gmra.mrb[30].mxu1 %v8308_v4 }
 0x35a   : > { %6651 = vmatpush3.bf16.msra.mxu1 %v6648_v21  ;;  %5949 = vmatprep.mubr.f32.mxu1 %v8428_v45  ;;  %v6680_v21 = vpack.c.bf16 %v3584_v27, %v3583_v56  ;;  %v3959_v56 = vld [vmem:[#allocation5 + $0x400] sm:$0xff]  ;;  %v3960_v27 = vld [vmem:[#allocation5 + $0x408] sm:$0xff] }
 0x35b   : > { %6653 = vmatprep.subr.bf16.mxu1 %v6652_v24 }
 0x35d   : > { %5950 = vmatmul.mubr.f32.gmra.mrb[32].mxu1 %v8432_v16 }
 0x35e   : > { %6655 = vmatpush3.bf16.msra.mxu1 %v6652_v24  ;;  %5984 = vmatprep.mubr.f32.mxu1 %v8353_v7  ;;  %v6668_v7 = vpack.c.bf16 %v3578_v47, %v3577_v6  ;;  %v8448_v24 = vld [vmem:[#allocation3 + $0xc2] sm:$0xff]  ;;  %v3770_v6 = vld [vmem:[#allocation5 + $0x3a8] sm:$0xff] }
 0x35f   : > { %6657 = vmatprep.subr.bf16.mxu1 %v6656_v23 }
 0x361   : > { %5985 = vmatmul.mubr.f32.vlgmr.msra.gmra.mrb[18].mxu1 %v8356_v2  ;;  %v6672_v2 = vpack.c.bf16 %v3580_v20, %v3579_v3  ;;  %v3772_v3 = vld [vmem:[#allocation5 + $0x3b8] sm:$0xff]  ;;  %v3773_v20 = vld [vmem:[#allocation5 + $0x3c0] sm:$0xff] }
 0x362   : > { %6659 = vmatpush3.bf16.msra.mxu1 %v6656_v23  ;;  %5987 = vmatprep.mubr.f32.mxu1 %v8358_v22  ;;  %v3766_v23 = vld [vmem:[#allocation5 + $0x388] sm:$0xff] }
 0x363   : > { %6661 = vmatprep.subr.bf16.mxu1 %v6660_v38  ;;  %v6688_v32 = vpack.c.bf16 %v3766_v23, %v3765_v52  ;;  %v3966_v52 = vld [vmem:[#allocation5 + $0x438] sm:$0xff]  ;;  %v3967_v23 = vld [vmem:[#allocation5 + $0x440] sm:$0xff] }
 0x365   : > { %5988 = vmatmul.mubr.f32.gmra.mrb[20].mxu1 %v8362_v36 }
 0x366   : > { %6663 = vmatpush3.bf16.msra.mxu1 %v6660_v38  ;;  %5990 = vmatprep.mubr.f32.mxu1 %v8364_v37  ;;  %v3767_v38 = vld [vmem:[#allocation5 + $0x390] sm:$0xff] }
 0x367   : > { %6665 = vmatprep.subr.bf16.mxu1 %v6664_v35  ;;  %v6692_v57 = vpack.c.bf16 %v3768_v33, %v3767_v38  ;;  %v3970_v38 = vld [vmem:[#allocation5 + $0x458] sm:$0xff]  ;;  %v3972_v33 = vld [vmem:[#allocation5 + $0x468] sm:$0xff] }
 0x369   : > { %5991 = vmatmul.mubr.f32.gmra.mrb[22].mxu1 %v8368_v49 }
 0x36a   : > { %6667 = vmatpush3.bf16.msra.mxu1 %v6664_v35  ;;  %5993 = vmatprep.mubr.f32.mxu1 %v8370_v60  ;;  %v3769_v35 = vld [vmem:[#allocation5 + $0x3a0] sm:$0xff] }
 0x36b   : > { %6669 = vmatprep.subr.bf16.mxu1 %v6668_v7  ;;  %v6696_v47 = vpack.c.bf16 %v3770_v6, %v3769_v35 }
 0x36d   : > { %5994 = vmatmul.mubr.f32.gmra.mrb[24].mxu1 %v8374_v14 }
 0x36e   : > { %6671 = vmatpush3.bf16.msra.mxu1 %v6668_v7  ;;  %5996 = vmatprep.mubr.f32.mxu1 %v8376_v48  ;;  %v3771_v7 = vld [vmem:[#allocation5 + $0x3b0] sm:$0xff] }
 0x36f   : > { %6673 = vmatprep.subr.bf16.mxu1 %v6672_v2 }
 0x371   : > { %5997 = vmatmul.mubr.f32.gmra.mrb[26].mxu1 %v8380_v62 }
 0x372   : > { %6675 = vmatpush3.bf16.msra.mxu1 %v6672_v2  ;;  %5999 = vmatprep.mubr.f32.mxu1 %v8382_v11  ;;  %v3774_v2 = vld [vmem:[#allocation5 + $0x3c8] sm:$0xff] }
 0x373   : > { %6677 = vmatprep.subr.bf16.mxu1 %v6676_v46 }
 0x375   : > { %6000 = vmatmul.mubr.f32.gmra.mrb[28].mxu1 %v8386_v39 }
 0x376   : > { %6679 = vmatpush3.bf16.msra.mxu1 %v6676_v46  ;;  %6002 = vmatprep.mubr.f32.mxu1 %v8388_v54  ;;  %v3780_v46 = vld [vmem:[#allocation5 + $0x3f8] sm:$0xff] }
 0x377   : > { %6681 = vmatprep.subr.bf16.mxu1 %v6680_v21 }
 0x379   : > { %6003 = vmatmul.mubr.f32.gmra.mrb[30].mxu1 %v8392_v63 }
 0x37a   : > { %6683 = vmatpush3.bf16.msra.mxu1 %v6680_v21  ;;  %6005 = vmatprep.mubr.f32.mxu1 %v8448_v24  ;;  %v3961_v21 = vld [vmem:[#allocation5 + $0x410] sm:$0xff] }
 0x37b   : > { %6685 = vmatprep.subr.bf16.mxu1 %v6684_v5 }
 0x37d   : > { %6006 = vmatmul.mubr.f32.gmra.mrb[32].mxu1 %v8452_v31 }
 0x37e   : > { %6687 = vmatpush3.bf16.msra.mxu1 %v6684_v5  ;;  %6040 = vmatprep.mubr.f32.mxu1 %v8316_v34  ;;  %v6700_v34 = vpack.c.bf16 %v3772_v3, %v3771_v7  ;;  %v3965_v5 = vld [vmem:[#allocation5 + $0x430] sm:$0xff]  ;;  %v4164_v3 = vld [vmem:[#allocation2 + $0x69] sm:$0xff] }
 0x37f   : > { %6689 = vmatprep.subr.bf16.mxu1 %v6688_v32 }
 0x381   : > { %6041 = vmatmul.mubr.f32.vlgmr.msra.gmra.mrb[18].mxu1 %v8320_v9  ;;  %v6704_v9 = vpack.c.bf16 %v3774_v2, %v3773_v20 }
 0x382   : > { %6691 = vmatpush3.bf16.msra.mxu1 %v6688_v32  ;;  %6043 = vmatprep.mubr.f32.mxu1 %v8322_v40  ;;  %v3775_v40 = vld [vmem:[#allocation5 + $0x3d0] sm:$0xff]  ;;  %v3968_v32 = vld [vmem:[#allocation5 + $0x448] sm:$0xff] }
 0x383   : > { %6693 = vmatprep.subr.bf16.mxu1 %v6692_v57 }
 0x385   : > { %6044 = vmatmul.mubr.f32.gmra.mrb[20].mxu1 %v8326_v44  ;;  %v6708_v44 = vpack.c.bf16 %v3776_v42, %v3775_v40 }
 0x386   : > { %6695 = vmatpush3.bf16.msra.mxu1 %v6692_v57  ;;  %6046 = vmatprep.mubr.f32.mxu1 %v8328_v53  ;;  %v3777_v53 = vld [vmem:[#allocation5 + $0x3e0] sm:$0xff]  ;;  %v3974_v57 = vld [vmem:[#allocation5 + $0x478] sm:$0xff] }
 0x387   : > { %6697 = vmatprep.subr.bf16.mxu1 %v6696_v47 }
 0x389   : > { %6047 = vmatmul.mubr.f32.gmra.mrb[22].mxu1 %v8332_v15  ;;  %v6712_v15 = vpack.c.bf16 %v3778_v43, %v3777_v53 }
 0x38a   : > { %6699 = vmatpush3.bf16.msra.mxu1 %v6696_v47  ;;  %6049 = vmatprep.mubr.f32.mxu1 %v8334_v55  ;;  %v3779_v55 = vld [vmem:[#allocation5 + $0x3f0] sm:$0xff] }
 0x38b   : > { %6701 = vmatprep.subr.bf16.mxu1 %v6700_v34 }
 0x38d   : > { %6050 = vmatmul.mubr.f32.gmra.mrb[24].mxu1 %v8338_v19  ;;  %v3568_v19 = vld [vmem:[#allocation3 + $0xd8] sm:$0xff] }
 0x38e   : > { %6703 = vmatpush3.bf16.msra.mxu1 %v6700_v34  ;;  %6052 = vmatprep.mubr.f32.mxu1 %v8340_v8  ;;  %v6716_v8 = vpack.c.bf16 %v3780_v46, %v3779_v55 }
 0x38f   : > { %6705 = vmatprep.subr.bf16.mxu1 %v6704_v9 }
 0x391   : > { %6053 = vmatmul.mubr.f32.gmra.mrb[26].mxu1 %v8344_v26  ;;  %v3569_v26 = vld [vmem:[#allocation3 + $0xe0] sm:$0xff] }
 0x392   : > { %6707 = vmatpush3.bf16.msra.mxu1 %v6704_v9  ;;  %6055 = vmatprep.mubr.f32.mxu1 %v8346_v12  ;;  %v6720_v12 = vpack.c.bf16 %v3960_v27, %v3959_v56  ;;  %v4163_v9 = vld [vmem:[#allocation2 + $0x61] sm:$0xff] }
 0x393   : > { %6709 = vmatprep.subr.bf16.mxu1 %v6708_v44 }
 0x395   : > { %6056 = vmatmul.mubr.f32.gmra.mrb[28].mxu1 %v8350_v25  ;;  %v6724_v25 = vpack.c.bf16 %v3962_v61, %v3961_v21  ;;  %v4168_v61 = vld [vmem:[#allocation2 + $0x99] sm:$0xff] }
 0x396   : > { %6711 = vmatpush3.bf16.msra.mxu1 %v6708_v44  ;;  %6058 = vmatprep.mubr.f32.mxu1 %v8408_v58  ;;  %v3963_v58 = vld [vmem:[#allocation5 + $0x420] sm:$0xff] }
 0x397   : > { %6713 = vmatprep.subr.bf16.mxu1 %v6712_v15 }
 0x399   : > { %6059 = vmatmul.mubr.f32.gmra.mrb[30].mxu1 %v8412_v30  ;;  %v6728_v30 = vpack.c.bf16 %v3964_v17, %v3963_v58 }
 0x39a   : > { %6715 = vmatpush3.bf16.msra.mxu1 %v6712_v15  ;;  %6061 = vmatprep.mubr.f32.mxu1 %v3568_v19  ;;  %v4166_v15 = vld [vmem:[#allocation2 + $0x81] sm:$0xff] }
 0x39b   : > { %6717 = vmatprep.subr.bf16.mxu1 %v6716_v8 }
 0x39d   : > { %6062 = vmatmul.mubr.f32.gmra.mrb[32].mxu1 %v3569_v26 }
 0x39e   : > { %6719 = vmatpush3.bf16.msra.mxu1 %v6716_v8  ;;  %6096 = vmatprep.mubr.f32.mxu1 %v8274_v10  ;;  %v6732_v10 = vpack.c.bf16 %v3966_v52, %v3965_v5  ;;  %v4165_v8 = vld [vmem:[#allocation2 + $0x79] sm:$0xff] }
 0x39f   : > { %6721 = vmatprep.subr.bf16.mxu1 %v6720_v12 }
 0x3a1   : > { %6097 = vmatmul.mubr.f32.vlgmr.msra.gmra.mrb[18].mxu1 %v8278_v50  ;;  %v6736_v50 = vpack.c.bf16 %v3968_v32, %v3967_v23 }
 0x3a2   : > { %6723 = vmatpush3.bf16.msra.mxu1 %v6720_v12  ;;  %6099 = vmatprep.mubr.f32.mxu1 %v8280_v1  ;;  %v3969_v1 = vld [vmem:[#allocation5 + $0x450] sm:$0xff] }
 0x3a3   : > { %6725 = vmatprep.subr.bf16.mxu1 %v6724_v25 }
 0x3a5   : > { %6100 = vmatmul.mubr.f32.gmra.mrb[20].mxu1 %v8284_v41  ;;  %v6740_v41 = vpack.c.bf16 %v3970_v38, %v3969_v1 }
 0x3a6   : > { %6727 = vmatpush3.bf16.msra.mxu1 %v6724_v25  ;;  %6102 = vmatprep.mubr.f32.mxu1 %v8286_v18  ;;  %v3971_v18 = vld [vmem:[#allocation5 + $0x460] sm:$0xff] }
 0x3a7   : > { %6729 = vmatprep.subr.bf16.mxu1 %v6728_v30 }
 0x3a9   : > { %6103 = vmatmul.mubr.f32.gmra.mrb[22].mxu1 %v8290_v59  ;;  %v6744_v59 = vpack.c.bf16 %v3972_v33, %v3971_v18  ;;  %v4169_v18 = vld [vmem:[#allocation2 + $0xa9] sm:$0xff] }
 0x3aa   : > { %6731 = vmatpush3.bf16.msra.mxu1 %v6728_v30  ;;  %6105 = vmatprep.mubr.f32.mxu1 %v8292_v28  ;;  %v3973_v28 = vld [vmem:[#allocation5 + $0x470] sm:$0xff]  ;;  %v4167_v30 = vld [vmem:[#allocation2 + $0x91] sm:$0xff] }
 0x3ab   : > { %6733 = vmatprep.subr.bf16.mxu1 %v6732_v10 }
 0x3ad   : > { %6106 = vmatmul.mubr.f32.gmra.mrb[24].mxu1 %v8296_v0  ;;  %v3762_v0 = vld [vmem:[#allocation3 + $0xd9] sm:$0xff] }
 0x3ae   : > { %6735 = vmatpush3.bf16.msra.mxu1 %v6732_v10  ;;  %6108 = vmatprep.mubr.f32.mxu1 %v8298_v29  ;;  %v6748_v29 = vpack.c.bf16 %v3974_v57, %v3973_v28 }
 0x3af   : > { %6737 = vmatprep.subr.bf16.mxu1 %v6736_v50 }
 0x3b1   : > { %6109 = vmatmul.mubr.f32.gmra.mrb[26].mxu1 %v8302_v51  ;;  %v3763_v51 = vld [vmem:[#allocation3 + $0xe1] sm:$0xff] }
 0x3b2   : > { %6739 = vmatpush3.bf16.msra.mxu1 %v6736_v50  ;;  %6111 = vmatprep.mubr.f32.mxu1 %v8304_v13  ;;  %v3956_v13 = vld [vmem:[#allocation3 + $0xda] sm:$0xff]  ;;  %v4170_v50 = vld [vmem:[#allocation2 + $0xb1] sm:$0xff] }
 0x3b3   : > { %6741 = vmatprep.subr.bf16.mxu1 %v6740_v41 }
 0x3b5   : > { %6112 = vmatmul.mubr.f32.gmra.mrb[28].mxu1 %v8308_v4  ;;  %v3957_v4 = vld [vmem:[#allocation3 + $0xe2] sm:$0xff] }
 0x3b6   : > { %6743 = vmatpush3.bf16.msra.mxu1 %v6740_v41  ;;  %6114 = vmatprep.mubr.f32.mxu1 %v8428_v45 }
 0x3b7   : > { %6745 = vmatprep.subr.bf16.mxu1 %v6744_v59 }
 0x3b9   : > { %6115 = vmatmul.mubr.f32.gmra.mrb[30].mxu1 %v8432_v16 }
 0x3ba   : > { %6747 = vmatpush3.bf16.msra.mxu1 %v6744_v59  ;;  %6117 = vmatprep.mubr.f32.mxu1 %v3762_v0 }
 0x3bb   : > { %6749 = vmatprep.subr.bf16.mxu1 %v6748_v29 }
 0x3bd   : > { %6118 = vmatmul.mubr.f32.gmra.mrb[32].mxu1 %v3763_v51 }
 0x3be   : > { %6751 = vmatpush3.bf16.msra.mxu1 %v6748_v29  ;;  %6152 = vmatprep.mubr.f32.mxu1 %v8358_v22  ;;  %v8500_v22 = vld [vmem:[%s8602_s4] ss:$0 sm:$0xff]  ;;  %v4172_v29 = vld [vmem:[#allocation2 + $0xc9] sm:$0xff] }
 0x3c1   : > { %6153 = vmatmul.mubr.f32.vlgmr.msra.gmra.mrb[18].mxu1 %v8362_v36 }
 0x3c2   : > { %6155 = vmatprep.mubr.f32.mxu1 %v8364_v37  ;;  %v4160_v37 = vld [vmem:[#allocation2 + $0x39] sm:$0xff] }
 0x3c5   : > { %6156 = vmatmul.mubr.f32.gmra.mrb[20].mxu1 %v8368_v49 }
 0x3c6   : > { %6158 = vmatprep.mubr.f32.mxu1 %v8370_v60 }
 0x3c9   : > { %6159 = vmatmul.mubr.f32.gmra.mrb[22].mxu1 %v8374_v14  ;;  %v4159_v14 = vld [vmem:[#allocation2 + $0x31] sm:$0xff] }
 0x3ca   : > { %6161 = vmatprep.mubr.f32.mxu1 %v8376_v48 }
 0x3cd   : > { %6162 = vmatmul.mubr.f32.gmra.mrb[24].mxu1 %v8380_v62 }
 0x3ce   : > { %6164 = vmatprep.mubr.f32.mxu1 %v8382_v11 }
 0x3d1   : > { %6165 = vmatmul.mubr.f32.gmra.mrb[26].mxu1 %v8386_v39 }
 0x3d2   : > { %6167 = vmatprep.mubr.f32.mxu1 %v8388_v54  ;;  %v4162_v54 = vld [vmem:[#allocation2 + $0x51] sm:$0xff] }
 0x3d5   : > { %6168 = vmatmul.mubr.f32.gmra.mrb[28].mxu1 %v8392_v63 }
 0x3d6   : > { %6170 = vmatprep.mubr.f32.mxu1 %v8448_v24  ;;  %v4161_v24 = vld [vmem:[#allocation2 + $0x49] sm:$0xff] }
 0x3d9   : > { %6171 = vmatmul.mubr.f32.gmra.mrb[30].mxu1 %v8452_v31 }
 0x3da   : > { %6173 = vmatprep.mubr.f32.mxu1 %v3956_v13 }
 0x3dd   : > { %6174 = vmatmul.mubr.f32.gmra.mrb[32].mxu1 %v3957_v4 }
 0x494   : > { %v6154_v36 = vpop.f32.mrb[18].mxu1 }
 0x495   : > { %v4144_v49 = vadd.f32 %v6154_v36, %v8500_v22  ;;  %v4041_v60 = vpop.f32.mrb[19].mxu1  ;;  %v4171_v36 = vld [vmem:[#allocation2 + $0xc1] sm:$0xff] }
 0x496   : > { %v4143_v48 = vadd.f32 %v8500_v22, %v4041_v60 }
 0x497   : > { %v4176_v62 = vadd.f32 %v4160_v37, %v4144_v49 }
 0x498   : > { %v4175_v11 = vadd.f32 %v4159_v14, %v4143_v48  ;;  %v6157_v39 = vpop.f32.mrb[20].mxu1 }
 0x499   : > { %v4192_v63 = vmax.f32 %v4176_v62, 0.0  ;;  %v4146_v45 = vadd.f32 %v6157_v39, %v8500_v22  ;;  %v4051_v16 = vpop.f32.mrb[21].mxu1  ;;  %v4174_v62 = vld [vmem:[#allocation2 + $0xe1] sm:$0xff] }
 0x49a   : > { %v4191_v31 = vmax.f32 %v4175_v11, 0.0  ;;  %v4145_v35 = vadd.f32 %v8500_v22, %v4051_v16 }
 0x49b   : > { %4208 = vst [vmem:[%s7472_s12 + $0x8] sm:$0xff] %v4192_v63  ;;  %v4178_v6 = vadd.f32 %v4162_v54, %v4146_v45  ;;  %v4173_v63 = vld [vmem:[#allocation2 + $0xd9] sm:$0xff] }
 0x49c   : > { %4207 = vst [vmem:[%s7472_s12] sm:$0xff] %v4191_v31  ;;  %v4177_v47 = vadd.f32 %v4161_v24, %v4145_v35  ;;  %v6160_v7 = vpop.f32.mrb[22].mxu1 }
 0x49d   : > { %v4194_v34 = vmax.f32 %v4178_v6, 0.0  ;;  %v4148_v20 = vadd.f32 %v6160_v7, %v8500_v22  ;;  %v4061_v2 = vpop.f32.mrb[23].mxu1 }
 0x49e   : > { %v4193_v40 = vmax.f32 %v4177_v47, 0.0  ;;  %v4147_v42 = vadd.f32 %v8500_v22, %v4061_v2 }
 0x49f   : > { %4210 = vst [vmem:[%s7472_s12 + $0x18] sm:$0xff] %v4194_v34  ;;  %v4180_v44 = vadd.f32 %v4164_v3, %v4148_v20 }
 0x4a0   : > { %4209 = vst [vmem:[%s7472_s12 + $0x10] sm:$0xff] %v4193_v40  ;;  %v4179_v53 = vadd.f32 %v4163_v9, %v4147_v42  ;;  %v6163_v43 = vpop.f32.mrb[24].mxu1 }
 0x4a1   : > { %v4196_v55 = vmax.f32 %v4180_v44, 0.0  ;;  %v4150_v46 = vadd.f32 %v6163_v43, %v8500_v22  ;;  %v4071_v19 = vpop.f32.mrb[25].mxu1 }
 0x4a2   : > { %v4195_v56 = vmax.f32 %v4179_v53, 0.0  ;;  %v4149_v27 = vadd.f32 %v8500_v22, %v4071_v19 }
 0x4a3   : > { %4212 = vst [vmem:[%s7472_s12 + $0x28] sm:$0xff] %v4196_v55  ;;  %v4182_v26 = vadd.f32 %v4166_v15, %v4150_v46 }
 0x4a4   : > { %4211 = vst [vmem:[%s7472_s12 + $0x20] sm:$0xff] %v4195_v56  ;;  %v4181_v12 = vadd.f32 %v4165_v8, %v4149_v27  ;;  %v6166_v21 = vpop.f32.mrb[26].mxu1 }
 0x4a5   : > { %v4198_v25 = vmax.f32 %v4182_v26, 0.0  ;;  %v4152_v58 = vadd.f32 %v6166_v21, %v8500_v22  ;;  %v4081_v17 = vpop.f32.mrb[27].mxu1 }
 0x4a6   : > { %v4197_v5 = vmax.f32 %v4181_v12, 0.0  ;;  %v4151_v52 = vadd.f32 %v8500_v22, %v4081_v17 }
 0x4a7   : > { %4214 = vst [vmem:[%s7472_s12 + $0x38] sm:$0xff] %v4198_v25  ;;  %v4184_v10 = vadd.f32 %v4168_v61, %v4152_v58 }
 0x4a8   : > { %4213 = vst [vmem:[%s7472_s12 + $0x30] sm:$0xff] %v4197_v5  ;;  %v4183_v23 = vadd.f32 %v4167_v30, %v4151_v52  ;;  %v6169_v32 = vpop.f32.mrb[28].mxu1 }
 0x4a9   : > { %v4200_v1 = vmax.f32 %v4184_v10, 0.0  ;;  %v4154_v38 = vadd.f32 %v6169_v32, %v8500_v22  ;;  %v4091_v41 = vpop.f32.mrb[29].mxu1 }
 0x4aa   : > { %v4199_v33 = vmax.f32 %v4183_v23, 0.0  ;;  %v4153_v59 = vadd.f32 %v8500_v22, %v4091_v41 }
 0x4ab   : > { %4216 = vst [vmem:[%s7472_s12 + $0x48] sm:$0xff] %v4200_v1  ;;  %v4186_v28 = vadd.f32 %v4170_v50, %v4154_v38 }
 0x4ac   : > { %4215 = vst [vmem:[%s7472_s12 + $0x40] sm:$0xff] %v4199_v33  ;;  %v4185_v57 = vadd.f32 %v4169_v18, %v4153_v59  ;;  %v6172_v0 = vpop.f32.mrb[30].mxu1 }
 0x4ad   : > { %v4202_v51 = vmax.f32 %v4186_v28, 0.0  ;;  %v4156_v13 = vadd.f32 %v6172_v0, %v8500_v22  ;;  %v4101_v4 = vpop.f32.mrb[31].mxu1 }
 0x4ae   : > { %v4201_v37 = vmax.f32 %v4185_v57, 0.0  ;;  %v4155_v49 = vadd.f32 %v8500_v22, %v4101_v4 }
 0x4af   : > { %4218 = vst [vmem:[%s7472_s12 + $0x58] sm:$0xff] %v4202_v51  ;;  %v4188_v60 = vadd.f32 %v4172_v29, %v4156_v13 }
 0x4b0   : > { %4217 = vst [vmem:[%s7472_s12 + $0x50] sm:$0xff] %v4201_v37  ;;  %v4187_v14 = vadd.f32 %v4171_v36, %v4155_v49  ;;  %v6175_v48 = vpop.f32.mrb[32].mxu1 }
 0x4b1   : > { %v4204_v11 = vmax.f32 %v4188_v60, 0.0  ;;  %v4158_v39 = vadd.f32 %v6175_v48, %v8500_v22  ;;  %v4111_v54 = vpop.f32.mrb[33].mxu1 }
 0x4b2   : > { %v4203_v45 = vmax.f32 %v4187_v14, 0.0  ;;  %v4157_v16 = vadd.f32 %v8500_v22, %v4111_v54 }
 0x4b3   : > { %4220 = vst [vmem:[%s7472_s12 + $0x68] sm:$0xff] %v4204_v11  ;;  %v4190_v24 = vadd.f32 %v4174_v62, %v4158_v39 }
 0x4b4   : > { %4219 = vst [vmem:[%s7472_s12 + $0x60] sm:$0xff] %v4203_v45  ;;  %v4189_v31 = vadd.f32 %v4173_v63, %v4157_v16 }
 0x4b5   : > { %v4206_v35 = vmax.f32 %v4190_v24, 0.0 }
 0x4b6   : > { %v4205_v6 = vmax.f32 %v4189_v31, 0.0 }
 0x4b7   : > { %4222 = vst [vmem:[%s7472_s12 + $0x78] sm:$0xff] %v4206_v35 }
 0x4b8   : > { %4221 = vst [vmem:[%s7472_s12 + $0x70] sm:$0xff] %v4205_v6 }
 0x4b9   : > { %7186 = shalt.err (!%p7183_p9)
}
 0x4ba   : > { %s7187_s26 = scalar_lea.hbm %s8538_s14, 2048  ;;  %s7191_s16 = scalar_lea.hbm %s8603_s5, 8192 }
 0x4bb   : > { %p7188_p11 = scmp.ne.s32.totalorder %s8538_s14, %s7187_s26  ;;  %p7192_p4 = scmp.lt.u32.totalorder %s8538_s14, %s8603_s5 }
 0x4bc   : > { %p7193_p3 = scmp.lt.u32.totalorder %s7191_s16, %s7187_s26  ;;  %p7195_p10 = scmp.lt.u32.totalorder %s7187_s26, %s8538_s14 }
 0x4bd   : > { %p7189_p13 = pnand %p7188_p11, %p8631_p12 }
 0x4be   : > { %p7194_p8 = por %p7193_p3, %p7192_p4 }
 0x4bf   : > { %p7190_p1 = pneg %p7189_p13 }
 0x4c0   : > { %p7196_p0 = por %p7195_p10, %p7194_p8 }
 0x4c2   : > { %p7197_p2 = pnand %p7196_p0, %p7190_p1 }
 0x4c4   : > { %7200 = shalt.err (!%p7197_p2)
}
 0x4c5   : > { %s7282_s15 = smov 128   ;;  %s7283_s17 = smov 8  }
 0x4c6   : > { %7060 = dma.vmem_to_hbm [thread:$0]  (%p8631_p12), %s8540_s22, 2048, %s8538_s14, %s8546_s11, %s7282_s15, %s7282_s15, %s7283_s17  }
 0x4c7 PF: > { %p7072_p5 = scmp.ge.s32.totalorder %s7273_s25, 2  ;;  %s4255_s27 = sand.u32 1, %s7245_s18  }
 0x4c8   : > { %p8632_p6 = scmp.ne.s32.totalorder %s8617_s8, 0  ;;  %s4256_s6 = scalar_lea.sflag [#allocation7], %s4255_s27 }
 0x4ca   : > { %p7067_p7 = pnand %p7072_p5, %p8632_p6 }
 0x4cc   : > { %7240 = dma.done.wait (!%p7067_p7), %s4256_s6, 2048  }
 0x4cd   : > { %7242 = vsyncadd (!%p7067_p7), %s4256_s6, 4294965248  ;;  %s19_s25 = sadd.s32 1, %s7273_s25   ;;  %s8633_s18 = smov %s7249_s19 }
 0x4ce   : > { %p16_p9 = scmp.ge.s32.totalorder %s19_s25, 6   ;;  %s8634_s19 = smov %s7253_s20 }
 0x4cf   : > { %s8635_s20 = smov %s7393_s13  ;;  %s8636_s21 = smov %s7265_s23 }
 0x4d0   : > { %s8637_s22 = smov %s7269_s24  ;;  %s8638_s23 = smov %s8641_s28 }
 0x4d1   : > { %s8639_s24 = smov %s8645_s29  ;;  %18 = sbr.rel (!%p16_p9) target bundleno = 6 (0x6), region = 154 }
 0x4d8   :  { %4261 = vsyncpa [#allocation6], 1 }
 0x4d9   :  { %4263 = vsyncpa [#allocation6 + $0x1], 1 }
 0x4da   :  { %4264 = vsyncpa [#allocation7], 1 }
 0x4db   :  { %4266 = vsyncpa [#allocation7 + $0x1], 1 }
 0x4dc   :  { %4267 = vsyncmov [#allocation4] }
 0x4df   :  { %s4268_s7 = vpop.sfrf %4267 }
 0x4e0   :  { %p4500_p12 = scmp.ne.s32.totalorder %s4268_s7, 0 }
 0x4e2   :  { %4272 = shalt.err (%p4500_p12)  }

</bundles_post_ra>
